<compile_context>
chip_gen: v5e
topology: v5e:2x2
jax: 0.10.0
libtpu: 0.0.40
codegen_flags: <defaults>
</compile_context>

<pallas_src>
import functools

import jax
import jax.numpy as jnp
from jax.experimental import pallas as pl
from jax.experimental.pallas import tpu as pltpu

# Squeezed-block-dim sentinel (pl.Squeezed() on current JAX; None on older).
try:
    _SQ = pl.Squeezed()
except AttributeError:  # pragma: no cover
    _SQ = None

_LANE = 128
# Fold the kw column taps into the matmul K dimension while the folded K stays
# within one 128-deep K tile: small-K layers (stems, final 7x7, 2x2 phase
# convs) get the full MXU-depth / fewer-taps benefit, while large-K layers
# (which already feed the MXU well) keep single-copy activation HBM reads.
_FOLD_MAX_K = 128


def _round_up(v, m=_LANE):
    return ((v + m - 1) // m) * m


def _vmem_limit_bytes():
    cap = 64 * 1024 * 1024          # conservative default (v7x physical VMEM)
    try:
        info = pltpu.get_tpu_info()
        cap = int(getattr(info, "vmem_capacity_bytes", cap) or cap)
    except Exception:
        pass
    # generation-aware limit: ~102 MiB on 128 MiB parts (v5e/v6e), ~51 MiB on v7x
    return min(int(cap * 0.8), 112 * 1024 * 1024)


_VMEM_LIMIT = _vmem_limit_bytes()
_FUSE_BUDGET = int(_VMEM_LIMIT * 0.85)


def _use_fold(cin, kw):
    return cin * kw <= _FOLD_MAX_K


def _apply_act(z, activation):
    if activation == "relu":
        return jnp.maximum(z, 0.0)
    if activation == "tanh":
        return jnp.tanh(z)
    return z


# ----------------------------------------------------------------------------
# Kernels
# ----------------------------------------------------------------------------
def _make_fused_norm_kernel(offsets, rows, wr, wo, cp, n_phase, activation,
                            has_res, eps=1e-5):
    """Conv (tap-accumulated MXU matmuls) + InstanceNorm + act (+residual),
    fully fused for one image.  n_phase > 1: phase-packed outputs sharing
    per-channel statistics (sub-pixel ConvTranspose)."""
    L = rows * wr
    inv_cnt = 1.0 / float(rows * wo * n_phase)

    def kernel(*refs):
        if has_res:
            x_ref, w_ref, res_ref, o_ref = refs
        else:
            x_ref, w_ref, o_ref = refs
        x = x_ref[...]
        acc = None                               # init from first tap (no zeros+add)
        for ti, off in enumerate(offsets):       # static, sublane-aligned offsets
            d = jnp.dot(x[off:off + L, :], w_ref[ti],
                        preferred_element_type=jnp.float32)
            acc = d if acc is None else acc + d
        # Drop the pad/wrap columns once; stats and output both use the valid
        # [rows, wo] window (no mask multiply, no modulo).
        av = acc.reshape(rows, wr, n_phase * cp)[:, :wo, :]
        # Two-pass InstanceNorm in f32 (mean then centered variance).
        s = None
        for p in range(n_phase):
            blk = av[:, :, p * cp:(p + 1) * cp]
            ps = jnp.sum(jnp.sum(blk, axis=1, keepdims=True), axis=0,
                         keepdims=True)
            s = ps if s is None else s + ps
        mean = s * inv_cnt
        v = None
        for p in range(n_phase):
            cdiff = av[:, :, p * cp:(p + 1) * cp] - mean
            pv = jnp.sum(jnp.sum(cdiff * cdiff, axis=1, keepdims=True), axis=0,
                         keepdims=True)
            v = pv if v is None else v + pv
        scale = jax.lax.rsqrt(v * inv_cnt + eps)
        for p in range(n_phase):
            z = (av[:, :, p * cp:(p + 1) * cp] - mean) * scale
            z = _apply_act(z, activation)
            if has_res:
                z = z + res_ref[...].astype(jnp.float32)
            zq = z.astype(o_ref.dtype)
            if n_phase == 1:
                o_ref[...] = zq
            else:
                o_ref[:, :, p * cp:(p + 1) * cp] = zq

    return kernel


def _make_direct_kernel(offsets, rows, wr, wo, activation):
    """Conv + per-channel bias + activation (final layer, no norm)."""
    L = rows * wr

    def kernel(x_ref, w_ref, b_ref, o_ref):
        x = x_ref[...]
        acc = None
        for ti, off in enumerate(offsets):
            d = jnp.dot(x[off:off + L, :], w_ref[ti],
                        preferred_element_type=jnp.float32)
            acc = d if acc is None else acc + d
        z = acc.reshape(rows, wr, -1)[:, :wo, :] + b_ref[...].reshape(1, 1, -1)
        z = _apply_act(z, activation)
        o_ref[...] = z.astype(o_ref.dtype)

    return kernel


def _make_stats_kernel(offsets, tr, wr, wo):
    """Row-tiled conv emitting the valid-column output tile plus per-tile
    (sum, sum-of-squares) for a later InstanceNorm (fallback path only)."""
    L = tr * wr

    def kernel(x_ref, w_ref, y_ref, s_ref):
        x = x_ref[...]
        acc = None
        for ti, off in enumerate(offsets):
            d = jnp.dot(x[off:off + L, :], w_ref[ti],
                        preferred_element_type=jnp.float32)
            acc = d if acc is None else acc + d
        av = acc.reshape(tr, wr, -1)[:, :wo, :]
        am = jnp.sum(jnp.sum(av, axis=1, keepdims=True), axis=0, keepdims=True)
        aq = jnp.sum(jnp.sum(av * av, axis=1, keepdims=True), axis=0,
                     keepdims=True)
        s_ref[...] = jnp.concatenate([am[0], aq[0]], axis=0)
        # NOTE: bf16 quantisation before normalisation (fused path keeps f32).
        y_ref[...] = av.astype(y_ref.dtype)

    return kernel


def _make_norm_apply_kernel(activation, has_res):
    def kernel(*refs):
        if has_res:
            y_ref, ss_ref, r_ref, o_ref = refs
        else:
            y_ref, ss_ref, o_ref = refs
        y = y_ref[...].astype(jnp.float32)
        ss = ss_ref[...]
        z = y * ss[0:1].reshape(1, 1, -1) + ss[1:2].reshape(1, 1, -1)
        z = _apply_act(z, activation)
        if has_res:
            z = z + r_ref[...].astype(jnp.float32)
        o_ref[...] = z.astype(o_ref.dtype)

    return kernel


# ----------------------------------------------------------------------------
# Input prep (XLA glue) and conv core dispatch
# ----------------------------------------------------------------------------
def _prep_input(x_sp, kh, kw, fold):
    """x_sp: spatially padded NHWC input holding exactly the conv's input
    channels.  Returns (x_flat [N, Lin, Cf] bf16, tap offsets, Ho, Wr, Wo)."""
    x_sp = x_sp.astype(jnp.bfloat16)
    n, hp, wp, cin = x_sp.shape
    ho, wo = hp - kh + 1, wp - kw + 1
    if fold:
        # kw column-shifted copies concatenated along the channel (lane) axis:
        # the kernel runs kh matmuls with K = kw*Cin and all offsets are
        # sublane aligned.
        wr = _round_up(wo, 8)
        xq = jnp.pad(x_sp, ((0, 0), (0, 0), (0, wr + kw - 1 - wp), (0, 0)))
        xf = jnp.concatenate([xq[:, :, j:j + wr, :] for j in range(kw)],
                             axis=-1)
        x_flat = xf.reshape(n, hp * wr, kw * cin)
        offsets = [di * wr for di in range(kh)]
    else:
        wr = _round_up(wp, 8)
        xq = jnp.pad(x_sp, ((0, 0), (0, 0), (0, wr - wp), (0, 0)))
        x_flat = xq.reshape(n, hp * wr, cin)
        if kw > 1:
            x_flat = jnp.pad(x_flat, ((0, 0), (0, kw - 1), (0, 0)))
        offsets = [di * wr + dj for di in range(kh) for dj in range(kw)]
    return x_flat, offsets, ho, wr, wo


def _conv_core(x_flat, w_packed, offsets, ho, wr, wo, *, n_phase=1,
               activation=None, residual=None, bias=None,
               out_dtype=jnp.bfloat16):
    """Stride-1 conv over the row-flattened input, fused with InstanceNorm+act
    (or bias+act).  Returns [N, Ho, Wo, Cpt] (phase packed when n_phase>1)."""
    assert residual is None or (n_phase == 1 and bias is None)
    assert bias is None or n_phase == 1
    n, lin, cf = x_flat.shape
    t, _, cpt = w_packed.shape
    out_isz = jnp.dtype(out_dtype).itemsize
    # Per-image footprint of the fully fused path: pipelined operands are
    # double buffered by Pallas; in-kernel f32 accumulator + temps added.
    fused_bytes = (2 * lin * cf * 2 + 2 * t * cf * cpt * 2
                   + 2 * ho * wo * cpt * out_isz
                   + ho * wr * cpt * 4 + 3 * ho * wo * cpt * 4)
    if residual is not None:
        fused_bytes += 2 * ho * wo * cpt * 2
    if fused_bytes <= _FUSE_BUDGET:
        return _conv_fused(x_flat, w_packed, offsets, ho, wr, wo,
                           n_phase=n_phase, activation=activation,
                           residual=residual, bias=bias, out_dtype=out_dtype)
    return _conv_two_phase(x_flat, w_packed, offsets, ho, wr, wo,
                           n_phase=n_phase, activation=activation,
                           residual=residual, bias=bias, out_dtype=out_dtype)


def _conv_fused(x_flat, w_packed, offsets, ho, wr, wo, *, n_phase, activation,
                residual, bias, out_dtype):
    n, lin, cf = x_flat.shape
    t, _, cpt = w_packed.shape
    in_specs = [pl.BlockSpec((_SQ, lin, cf), lambda i: (i, 0, 0)),
                pl.BlockSpec((t, cf, cpt), lambda i: (0, 0, 0))]
    args = [x_flat, w_packed]
    if bias is not None:
        kernel = _make_direct_kernel(offsets, ho, wr, wo, activation)
        in_specs.append(pl.BlockSpec((1, cpt), lambda i: (0, 0)))
        args.append(bias)
    else:
        has_res = residual is not None
        if has_res:
            in_specs.append(pl.BlockSpec((_SQ, ho, wo, cpt),
                                         lambda i: (i, 0, 0, 0)))
            args.append(residual.astype(jnp.bfloat16))
        kernel = _make_fused_norm_kernel(offsets, ho, wr, wo, cpt // n_phase,
                                         n_phase, activation, has_res)
    return pl.pallas_call(
        kernel,
        out_shape=jax.ShapeDtypeStruct((n, ho, wo, cpt), out_dtype),
        grid_spec=pltpu.PrefetchScalarGridSpec(
            num_scalar_prefetch=0, grid=(n,),
            in_specs=in_specs,
            out_specs=pl.BlockSpec((_SQ, ho, wo, cpt), lambda i: (i, 0, 0, 0))),
        compiler_params=pltpu.CompilerParams(
            dimension_semantics=("parallel",),
            vmem_limit_bytes=_VMEM_LIMIT),
    )(*args)


# ----------------------------------------------------------------------------
# Row-tiled two-phase fallback (only for images that do not fit VMEM)
# ----------------------------------------------------------------------------
def _pick_row_tile(ho, wr, wo, cf, cpt, max_off, t, out_isz):
    """Largest output-row tile whose per-step footprint (double-buffered x /
    weight / output blocks + stats + in-kernel f32 temps) fits the budget."""
    w_bytes = 2 * t * cf * cpt * 2
    best = 1
    for tr in range(1, ho + 1):
        step = (w_bytes + 2 * (tr * wr + max_off) * cf * 2
                + 2 * tr * wo * cpt * out_isz
                + tr * wr * cpt * 4 + 2 * tr * wo * cpt * 4
                + 2 * 2 * cpt * 4)
        if step <= _FUSE_BUDGET:
            best = tr
        else:
            break
    return best


def _pick_norm_tile(h, w, c, n_streams):
    best = 1
    for d in range(1, h + 1):
        if h % d:
            continue
        if 2 * n_streams * d * w * c * 2 + 2 * d * w * c * 4 <= _FUSE_BUDGET:
            best = d
    return best


def _scale_shift(stats, count, n_phase, eps=1e-5):
    tot = stats.sum(axis=1)                       # [N, 2, Cpt]
    if n_phase > 1:
        nb = tot.shape[0]
        tot = tot.reshape(nb, 2, n_phase, -1).sum(axis=2)
    s, sq = tot[:, 0], tot[:, 1]
    mean = s / count
    var = jnp.maximum(sq / count - mean * mean, 0.0)
    scale = jax.lax.rsqrt(var + eps)
    return jnp.stack([scale, -mean * scale], axis=1)   # [N, 2, C]


def _norm_apply(y, ss, activation, residual, out_dtype):
    n, h, w, c = y.shape
    tr = _pick_norm_tile(h, w, c, 3 if residual is not None else 2)
    r = h // tr
    in_specs = [pl.BlockSpec((_SQ, tr, w, c), lambda i, j: (i, j, 0, 0)),
                pl.BlockSpec((_SQ, 2, c), lambda i, j: (i, 0, 0))]
    args = [y, ss]
    has_res = residual is not None
    if has_res:
        in_specs.append(pl.BlockSpec((_SQ, tr, w, c), lambda i, j: (i, j, 0, 0)))
        args.append(residual.astype(jnp.bfloat16))
    return pl.pallas_call(
        _make_norm_apply_kernel(activation, has_res),
        out_shape=jax.ShapeDtypeStruct((n, h, w, c), out_dtype),
        grid_spec=pltpu.PrefetchScalarGridSpec(
            num_scalar_prefetch=0, grid=(n, r),
            in_specs=in_specs,
            out_specs=pl.BlockSpec((_SQ, tr, w, c), lambda i, j: (i, j, 0, 0))),
        compiler_params=pltpu.CompilerParams(
            dimension_semantics=("parallel", "parallel"),
            vmem_limit_bytes=_VMEM_LIMIT),
    )(*args)


def _conv_two_phase(x_flat, w_packed, offsets, ho, wr, wo, *, n_phase,
                    activation, residual, bias, out_dtype):
    n, lin, cf = x_flat.shape
    t, _, cpt = w_packed.shape
    out_isz = jnp.dtype(out_dtype).itemsize
    max_off = max(offsets)
    tr = _pick_row_tile(ho, wr, wo, cf, cpt, max_off, t,
                        out_isz if bias is not None else 2)
    r = -(-ho // tr)                      # remainder tile handled via zero pad
    ho_pad = r * tr
    lt_in = tr * wr + max_off
    extra = ho_pad * wr + max_off - lin
    if extra > 0:
        x_flat = jnp.pad(x_flat, ((0, 0), (0, extra), (0, 0)))
    # Overlapping (halo) row windows.  TODO(synk): duplicates ~(kh-1)/tr of the
    # activation in HBM; a manual-DMA (memory_space=pl.ANY) pipeline would
    # remove it.  With the large tr picked above the factor stays small.
    xw = jnp.stack([x_flat[:, i * tr * wr:i * tr * wr + lt_in, :]
                    for i in range(r)], axis=1)

    x_spec = pl.BlockSpec((_SQ, _SQ, lt_in, cf), lambda i, j: (i, j, 0, 0))
    w_spec = pl.BlockSpec((t, cf, cpt), lambda i, j: (0, 0, 0))
    cparams = pltpu.CompilerParams(dimension_semantics=("parallel", "parallel"),
                                   vmem_limit_bytes=_VMEM_LIMIT)

    if bias is not None:
        y = pl.pallas_call(
            _make_direct_kernel(offsets, tr, wr, wo, activation),
            out_shape=jax.ShapeDtypeStruct((n, ho_pad, wo, cpt), out_dtype),
            grid_spec=pltpu.PrefetchScalarGridSpec(
                num_scalar_prefetch=0, grid=(n, r),
                in_specs=[x_spec, w_spec,
                          pl.BlockSpec((1, cpt), lambda i, j: (0, 0))],
                out_specs=pl.BlockSpec((_SQ, tr, wo, cpt),
                                       lambda i, j: (i, j, 0, 0))),
            compiler_params=cparams,
        )(xw, w_packed, bias)
        return y[:, :ho]

    y, stats = pl.pallas_call(
        _make_stats_kernel(offsets, tr, wr, wo),
        out_shape=(jax.ShapeDtypeStruct((n, ho_pad, wo, cpt), jnp.bfloat16),
                   jax.ShapeDtypeStruct((n, r, 2, cpt), jnp.float32)),
        grid_spec=pltpu.PrefetchScalarGridSpec(
            num_scalar_prefetch=0, grid=(n, r),
            in_specs=[x_spec, w_spec],
            out_specs=(pl.BlockSpec((_SQ, tr, wo, cpt),
                                    lambda i, j: (i, j, 0, 0)),
                       pl.BlockSpec((_SQ, _SQ, 2, cpt),
                                    lambda i, j: (i, j, 0, 0)))),
        compiler_params=cparams,
    )(xw, w_packed)
    y = y[:, :ho]
    ss = _scale_shift(stats, ho * wo * n_phase, n_phase)
    if n_phase > 1:
        ss = jnp.concatenate([ss] * n_phase, axis=-1)
    return _norm_apply(y, ss, activation, residual, out_dtype)


# ----------------------------------------------------------------------------
# Layer wrappers
# ----------------------------------------------------------------------------
def conv_in_act(x, w_packed, *, kh, kw, pad, pad_mode, activation,
                residual=None):
    """Conv2d(stride=1) + InstanceNorm2d(affine=False) + activation (+residual).
    Conv bias skipped: InstanceNorm cancels a per-channel constant exactly."""
    fold = (w_packed.shape[0] == kh)
    cin = w_packed.shape[1] // (kw if fold else 1)
    xs = x[..., :cin]
    if pad:
        mode = "reflect" if pad_mode == "reflect" else "constant"
        xs = jnp.pad(xs, ((0, 0), (pad, pad), (pad, pad), (0, 0)), mode=mode)
    x_flat, offsets, ho, wr, wo = _prep_input(xs, kh, kw, fold)
    return _conv_core(x_flat, w_packed, offsets, ho, wr, wo,
                      activation=activation, residual=residual)


def conv_s2_in_act(x, w_packed, *, activation):
    """Conv2d(k=3, s=2, p=1) + InstanceNorm + act via space-to-depth: a 2x2
    stride-1 conv over the 4 interleaved input phases (no strided reads)."""
    fold = (w_packed.shape[0] == 2)
    cin4 = w_packed.shape[1] // (2 if fold else 1)
    cin = cin4 // 4
    n, h, w, _ = x.shape
    xp = jnp.pad(x[..., :cin], ((0, 0), (1, 1), (1, 1), (0, 0)))
    hp, wp = h + 2, w + 2
    ho, wo = (hp - 3) // 2 + 1, (wp - 3) // 2 + 1
    phases = []
    for r_ in range(2):
        for c_ in range(2):
            ph = xp[:, r_::2, c_::2, :][:, :ho + 1, :wo + 1, :]
            ph = jnp.pad(ph, ((0, 0), (0, ho + 1 - ph.shape[1]),
                              (0, wo + 1 - ph.shape[2]), (0, 0)))
            phases.append(ph)
    xs2d = jnp.concatenate(phases, axis=-1)           # [N, ho+1, wo+1, 4*cin]
    x_flat, offsets, ho2, wr, wo2 = _prep_input(xs2d, 2, 2, fold)
    return _conv_core(x_flat, w_packed, offsets, ho2, wr, wo2,
                      activation=activation)


def convT_s2_in_act(x, w_packed, *, activation):
    """ConvTranspose2d(k=3, s=2, p=1, output_padding=1) + InstanceNorm + act via
    sub-pixel decomposition: a 2x2 stride-1 conv with 4 phase-packed outputs
    (normalised with stats shared across phases), then depth-to-space."""
    fold = (w_packed.shape[0] == 2)
    cin = w_packed.shape[1] // (2 if fold else 1)
    n, h, w, _ = x.shape
    xp = jnp.pad(x[..., :cin], ((0, 0), (0, 1), (0, 1), (0, 0)))
    x_flat, offsets, ho, wr, wo = _prep_input(xp, 2, 2, fold)
    y = _conv_core(x_flat, w_packed, offsets, ho, wr, wo, n_phase=4,
                   activation=activation)             # [N, h, w, 4*Cp]
    cp = y.shape[-1] // 4
    y = y.reshape(n, h, w, 2, 2, cp).transpose(0, 1, 3, 2, 4, 5)
    return y.reshape(n, 2 * h, 2 * w, cp)


def conv_bias_act(x, w_packed, bias, *, kh, kw, pad, pad_mode, activation,
                  cout):
    """Final conv (no norm): per-channel bias + activation fused in-kernel."""
    fold = (w_packed.shape[0] == kh)
    cin = w_packed.shape[1] // (kw if fold else 1)
    mode = "reflect" if pad_mode == "reflect" else "constant"
    xs = jnp.pad(x[..., :cin], ((0, 0), (pad, pad), (pad, pad), (0, 0)),
                 mode=mode)
    x_flat, offsets, ho, wr, wo = _prep_input(xs, kh, kw, fold)
    y = _conv_core(x_flat, w_packed, offsets, ho, wr, wo, activation=activation,
                   bias=bias, out_dtype=jnp.float32)
    return y[..., :cout]


# ----------------------------------------------------------------------------
# One-time weight packing (hoisted out of the forward pass)
# ----------------------------------------------------------------------------
def _finish_pack(w4, kh, kw, cin, fold):
    if fold:
        w = w4.reshape(kh, kw * cin, -1)
    else:
        w = w4.reshape(kh * kw, cin, -1)
    return w.astype(jnp.bfloat16)


def _pack_conv(w_t):                      # Conv2d weight [cout, cin, kh, kw]
    cout, cin, kh, kw = w_t.shape
    cp = _round_up(cout)
    w4 = jnp.transpose(w_t, (2, 3, 1, 0))             # [kh, kw, cin, cout]
    w4 = jnp.pad(w4, ((0, 0), (0, 0), (0, 0), (0, cp - cout)))
    return _finish_pack(w4, kh, kw, cin, _use_fold(cin, kw))


def _pack_conv_s2(w_t):                   # 3x3 s2 conv -> 2x2 conv over phases
    cout, cin = w_t.shape[0], w_t.shape[1]
    cp = _round_up(cout)
    wt = jnp.transpose(w_t, (2, 3, 1, 0))             # [3, 3, cin, cout]
    w4 = jnp.zeros((2, 2, 4 * cin, cp), jnp.float32)
    for u in range(2):
        for v in range(2):
            for r_ in range(2):
                for c_ in range(2):
                    di, dj = 2 * u + r_, 2 * v + c_
                    if di < 3 and dj < 3:
                        blk = (2 * r_ + c_) * cin
                        w4 = w4.at[u, v, blk:blk + cin, :cout].set(wt[di, dj])
    return _finish_pack(w4, 2, 2, 4 * cin, _use_fold(4 * cin, 2))


def _pack_convT_s2(w_t):                  # ConvT s2 [cin, cout, 3, 3] -> 2x2 conv, 4 phase outputs
    cin, cout = w_t.shape[0], w_t.shape[1]
    cp = _round_up(cout)
    w4 = jnp.zeros((2, 2, cin, 4 * cp), jnp.float32)
    for a in range(2):
        for b in range(2):
            p = 2 * a + b
            for u in range(2):
                for v in range(2):
                    di, dj = a + 1 - 2 * u, b + 1 - 2 * v
                    if 0 <= di < 3 and 0 <= dj < 3:
                        w4 = w4.at[u, v, :, p * cp:p * cp + cout].set(
                            w_t[:, :, di, dj])
    return _finish_pack(w4, 2, 2, cin, _use_fold(cin, 2))


def _pack_convT_s1(w_t):                  # ConvT s1 p1 == conv with flipped kernel
    w_conv = jnp.transpose(w_t[:, :, ::-1, ::-1], (1, 0, 2, 3))
    return _pack_conv(w_conv)


def preprocess_params(params):
    """One-time weight re-layout (transpose / channel pad / bf16 / tap packing)."""
    packed = {}
    for key in ("down1", "down2"):
        layers = params[key]
        ent = [_pack_conv(layers[0][0])]
        for (w, _b) in layers[1:]:
            ent.append(_pack_conv_s2(w))
        packed[key] = ent
    packed["mid"] = [(_pack_conv(w1), _pack_conv(w2))
                     for (w1, _b1), (w2, _b2) in params["mid"]]
    packed["up_t"] = [_pack_convT_s2(w) for (w, _b) in params["up_t"]]
    packed["up_t1"] = _pack_convT_s1(params["up_t1"][0])
    wf, bf = params["up_final"]
    cp = _round_up(wf.shape[0])
    packed["up_final_w"] = _pack_conv(wf)
    packed["up_final_b"] = jnp.zeros((1, cp), jnp.float32).at[0, :wf.shape[0]].set(bf)
    return packed


# ----------------------------------------------------------------------------
# Deterministic parameter construction (shapes follow WarpResGenerator.__init__)
# ----------------------------------------------------------------------------
def _init_conv(key, cout, cin, kh, kw, scale=0.05):
    kw_, kb = jax.random.split(key)
    w = jax.random.normal(kw_, (cout, cin, kh, kw), jnp.float32) * scale
    b = jax.random.normal(kb, (cout,), jnp.float32) * 0.01
    return w, b


def _init_convT(key, cin, cout, kh, kw, scale=0.05):
    kw_, kb = jax.random.split(key)
    w = jax.random.normal(kw_, (cin, cout, kh, kw), jnp.float32) * scale
    b = jax.random.normal(kb, (cout,), jnp.float32) * 0.01
    return w, b


def init_params(key, input_nc_1, input_nc_2, output_nc, ngf, n_downsampling,
                n_blocks):
    counter = [0]

    def nk():
        counter[0] += 1
        return jax.random.fold_in(key, counter[0])

    def down(nc_in):
        layers = [_init_conv(nk(), ngf, nc_in, 7, 7)]
        for i in range(n_downsampling):
            mult = 2 ** i
            layers.append(_init_conv(nk(), ngf * mult * 2, ngf * mult, 3, 3))
        return layers

    params = {"down1": down(input_nc_1), "down2": down(input_nc_2)}
    dim = ngf * (2 ** n_downsampling) * 2
    params["mid"] = [(_init_conv(nk(), dim, dim, 3, 3),
                      _init_conv(nk(), dim, dim, 3, 3))
                     for _ in range(n_blocks)]
    params["up_t"] = []
    for i in range(n_downsampling):
        m = 2 ** (n_downsampling - i) * 2
        params["up_t"].append(_init_convT(nk(), ngf * m, ngf * m // 2, 3, 3))
    params["up_t1"] = _init_convT(nk(), ngf * 2, ngf, 3, 3)
    params["up_final"] = _init_conv(nk(), output_nc, ngf, 7, 7)
    return params


# ----------------------------------------------------------------------------
# Forward pass (jittable; the data-dependent policy check is hoisted outside jit)
# ----------------------------------------------------------------------------
def warp_res_generator_forward(packed, x, theta_aff, theta_tps, theta_aff_tps,
                               policy_binary, *, ngf, n_downsampling, n_blocks,
                               output_nc):
    to_nhwc = lambda t: jnp.transpose(t, (0, 2, 3, 1))
    x1 = to_nhwc(x[:, :3]).astype(jnp.bfloat16)
    x2 = to_nhwc(x[:, 3:]).astype(jnp.bfloat16)

    def down(xin, entries):
        y = conv_in_act(xin, entries[0], kh=7, kw=7, pad=3, pad_mode="reflect",
                        activation="relu")
        for ent in entries[1:]:
            y = conv_s2_in_act(y, ent, activation="relu")
        return y

    x1f = down(x1, packed["down1"])
    x2f = down(x2, packed["down2"])
    c_true = ngf * (2 ** n_downsampling)
    bsz, h, w_, _ = x1f.shape

    # --- WarpResBlock (zero-policy identity path) --------------------------
    # Mirrors WarpResBlock.forward: keep the first (C - 64*7) channels of the
    # concat (the module hard-codes ngf=64 for this arithmetic); with an
    # all-zero policy grid_sample_by_policy is the identity, so z = x + x.
    ta = to_nhwc(theta_aff.reshape(bsz, -1, h, w_)).astype(jnp.bfloat16)
    tt = to_nhwc(theta_tps.reshape(bsz, -1, h, w_)).astype(jnp.bfloat16)
    tat = to_nhwc(theta_aff_tps.reshape(bsz, -1, h, w_)).astype(jnp.bfloat16)
    pb = to_nhwc(policy_binary.reshape(bsz, -1, h, w_)).astype(jnp.bfloat16)
    tmp = jnp.concatenate([x1f[..., :c_true], ta, tt, tat, pb], axis=-1)
    x_warp = tmp[..., :tmp.shape[-1] - 64 * 7]
    warp_feat = x_warp + x_warp

    cat = jnp.concatenate([x2f[..., :c_true], warp_feat], axis=-1)
    y = jnp.pad(cat, ((0, 0), (0, 0), (0, 0),
                      (0, _round_up(cat.shape[-1]) - cat.shape[-1])))

    for i in range(n_blocks):
        w1p, w2p = packed["mid"][i]
        h1 = conv_in_act(y, w1p, kh=3, kw=3, pad=1, pad_mode="reflect",
                         activation="relu")
        # second conv + norm, residual add fused into the same kernel
        y = conv_in_act(h1, w2p, kh=3, kw=3, pad=1, pad_mode="reflect",
                        activation=None, residual=y)

    for ent in packed["up_t"]:
        y = convT_s2_in_act(y, ent, activation="relu")
    y = conv_in_act(y, packed["up_t1"], kh=3, kw=3, pad=1, pad_mode="zero",
                    activation="relu")
    out = conv_bias_act(y, packed["up_final_w"], packed["up_final_b"],
                        kh=7, kw=7, pad=3, pad_mode="reflect",
                        activation="tanh", cout=output_nc)
    return jnp.transpose(out, (0, 3, 1, 2))   # back to NCHW


def _check_zero_policy(policy_binary):
    # Mirrors WarpResBlock.grid_sample_by_policy: only elements [:, 0] and
    # [:, 1] of the per-image flattened policy gate the two grid-sample
    # branches.  With both zero the block is the identity (implemented here).
    # TODO(synk): the F.grid_sample / GeometricTnf warp path (nonzero policy,
    # external module) is not implemented; raise instead of computing wrongly.
    pol = jnp.reshape(policy_binary, (policy_binary.shape[0], -1))[:, :2]
    if float(jnp.abs(pol).sum()) != 0.0:
        raise NotImplementedError(
            "WarpResBlock grid-sample path (nonzero policy) not implemented")


# ----------------------------------------------------------------------------
if __name__ == "__main__":
    B, H, W = 2, 16, 16
    input_nc_1, input_nc_2, output_nc = 3, 3, 3
    ngf, n_downsampling, n_blocks = 8, 2, 2   # small config consistent with module

    root = jax.random.PRNGKey(0)
    params = init_params(jax.random.fold_in(root, 1), input_nc_1, input_nc_2,
                         output_nc, ngf, n_downsampling, n_blocks)
    packed = preprocess_params(params)        # one-time weight re-layout

    hf, wf = H // (2 ** n_downsampling), W // (2 ** n_downsampling)
    kx, ka, kt, kat = jax.random.split(jax.random.fold_in(root, 2), 4)
    x = jax.random.normal(kx, (B, input_nc_1 + input_nc_2, H, W), jnp.float32)
    theta_aff = jax.random.normal(ka, (B, 128, hf, wf), jnp.float32)
    theta_tps = jax.random.normal(kt, (B, 128, hf, wf), jnp.float32)
    theta_aff_tps = jax.random.normal(kat, (B, 128, hf, wf), jnp.float32)
    policy_binary = jnp.zeros((B, 64, hf, wf), jnp.float32)   # zero-policy path

    _check_zero_policy(policy_binary)

    fwd = jax.jit(functools.partial(
        warp_res_generator_forward, ngf=ngf, n_downsampling=n_downsampling,
        n_blocks=n_blocks, output_nc=output_nc))
    out = jax.block_until_ready(
        fwd(packed, x, theta_aff, theta_tps, theta_aff_tps, policy_binary))

    assert out.shape == (B, output_nc, H, W), out.shape
    assert bool(jnp.all(jnp.isfinite(out)))
    print("KERNEL_OK")
</pallas_src>

<mosaic_0001>
module attributes {stable_mosaic.version = 11 : i64} {
  func.func @kernel(%arg0: i32, %arg1: memref<1x352x21xbf16, #tpu.memory_space<vmem>>, %arg2: memref<7x21x128xbf16, #tpu.memory_space<vmem>>, %arg3: memref<1x16x16x128xbf16, #tpu.memory_space<vmem>>) attributes {dimension_semantics = [#tpu.dimension_semantics<parallel>], iteration_bounds = array<i64: 2>, scalar_prefetch = 0 : i64, scratch_operands = 0 : i64, tpu.core_type = #tpu.core_type<tc>, window_params = [{transform_indices = @transform_0, window_bounds = array<i64: 1, 352, 21>}, {pipeline_mode = #tpu.pipeline_mode<synchronous>, transform_indices = @transform_1, window_bounds = array<i64: 7, 21, 128>}, {transform_indices = @transform_2, window_bounds = array<i64: 1, 16, 16, 128>}]} {
    %c0 = arith.constant 0 : index
    %c0_0 = arith.constant 0 : index
    %c0_1 = arith.constant 0 : index
    %0 = vector.load %arg1[%c0, %c0_0, %c0_1] : memref<1x352x21xbf16, #tpu.memory_space<vmem>>, vector<1x352x21xbf16>
    %1 = vector.shape_cast %0 : vector<1x352x21xbf16> to vector<352x21xbf16>
    %2 = vector.extract_strided_slice %1 {offsets = [0, 0], sizes = [256, 21], strides = [1, 1]} : vector<352x21xbf16> to vector<256x21xbf16>
    %c0_2 = arith.constant 0 : index
    %c0_3 = arith.constant 0 : index
    %c0_4 = arith.constant 0 : index
    %3 = vector.load %arg2[%c0_2, %c0_3, %c0_4] : memref<7x21x128xbf16, #tpu.memory_space<vmem>>, vector<1x21x128xbf16>
    %4 = vector.shape_cast %3 : vector<1x21x128xbf16> to vector<21x128xbf16>
    %cst = arith.constant dense<0.000000e+00> : vector<256x128xf32>
    %5 = tpu.matmul %2, %4, %cst {dimension_numbers = #tpu.dot_dimension_numbers<[1], [0], [0], [1], [0, 0, 1, 1], [], []>} : vector<256x21xbf16>, vector<21x128xbf16>, vector<256x128xf32> -> vector<256x128xf32>
    %6 = vector.extract_strided_slice %1 {offsets = [16, 0], sizes = [256, 21], strides = [1, 1]} : vector<352x21xbf16> to vector<256x21xbf16>
    %c1 = arith.constant 1 : index
    %c0_5 = arith.constant 0 : index
    %c0_6 = arith.constant 0 : index
    %7 = vector.load %arg2[%c1, %c0_5, %c0_6] : memref<7x21x128xbf16, #tpu.memory_space<vmem>>, vector<1x21x128xbf16>
    %8 = vector.shape_cast %7 : vector<1x21x128xbf16> to vector<21x128xbf16>
    %cst_7 = arith.constant dense<0.000000e+00> : vector<256x128xf32>
    %9 = tpu.matmul %6, %8, %cst_7 {dimension_numbers = #tpu.dot_dimension_numbers<[1], [0], [0], [1], [0, 0, 1, 1], [], []>} : vector<256x21xbf16>, vector<21x128xbf16>, vector<256x128xf32> -> vector<256x128xf32>
    %10 = arith.addf %5, %9 : vector<256x128xf32>
    %11 = vector.extract_strided_slice %1 {offsets = [32, 0], sizes = [256, 21], strides = [1, 1]} : vector<352x21xbf16> to vector<256x21xbf16>
    %c2 = arith.constant 2 : index
    %c0_8 = arith.constant 0 : index
    %c0_9 = arith.constant 0 : index
    %12 = vector.load %arg2[%c2, %c0_8, %c0_9] : memref<7x21x128xbf16, #tpu.memory_space<vmem>>, vector<1x21x128xbf16>
    %13 = vector.shape_cast %12 : vector<1x21x128xbf16> to vector<21x128xbf16>
    %cst_10 = arith.constant dense<0.000000e+00> : vector<256x128xf32>
    %14 = tpu.matmul %11, %13, %cst_10 {dimension_numbers = #tpu.dot_dimension_numbers<[1], [0], [0], [1], [0, 0, 1, 1], [], []>} : vector<256x21xbf16>, vector<21x128xbf16>, vector<256x128xf32> -> vector<256x128xf32>
    %15 = arith.addf %10, %14 : vector<256x128xf32>
    %16 = vector.extract_strided_slice %1 {offsets = [48, 0], sizes = [256, 21], strides = [1, 1]} : vector<352x21xbf16> to vector<256x21xbf16>
    %c3 = arith.constant 3 : index
    %c0_11 = arith.constant 0 : index
    %c0_12 = arith.constant 0 : index
    %17 = vector.load %arg2[%c3, %c0_11, %c0_12] : memref<7x21x128xbf16, #tpu.memory_space<vmem>>, vector<1x21x128xbf16>
    %18 = vector.shape_cast %17 : vector<1x21x128xbf16> to vector<21x128xbf16>
    %cst_13 = arith.constant dense<0.000000e+00> : vector<256x128xf32>
    %19 = tpu.matmul %16, %18, %cst_13 {dimension_numbers = #tpu.dot_dimension_numbers<[1], [0], [0], [1], [0, 0, 1, 1], [], []>} : vector<256x21xbf16>, vector<21x128xbf16>, vector<256x128xf32> -> vector<256x128xf32>
    %20 = arith.addf %15, %19 : vector<256x128xf32>
    %21 = vector.extract_strided_slice %1 {offsets = [64, 0], sizes = [256, 21], strides = [1, 1]} : vector<352x21xbf16> to vector<256x21xbf16>
    %c4 = arith.constant 4 : index
    %c0_14 = arith.constant 0 : index
    %c0_15 = arith.constant 0 : index
    %22 = vector.load %arg2[%c4, %c0_14, %c0_15] : memref<7x21x128xbf16, #tpu.memory_space<vmem>>, vector<1x21x128xbf16>
    %23 = vector.shape_cast %22 : vector<1x21x128xbf16> to vector<21x128xbf16>
    %cst_16 = arith.constant dense<0.000000e+00> : vector<256x128xf32>
    %24 = tpu.matmul %21, %23, %cst_16 {dimension_numbers = #tpu.dot_dimension_numbers<[1], [0], [0], [1], [0, 0, 1, 1], [], []>} : vector<256x21xbf16>, vector<21x128xbf16>, vector<256x128xf32> -> vector<256x128xf32>
    %25 = arith.addf %20, %24 : vector<256x128xf32>
    %26 = vector.extract_strided_slice %1 {offsets = [80, 0], sizes = [256, 21], strides = [1, 1]} : vector<352x21xbf16> to vector<256x21xbf16>
    %c5 = arith.constant 5 : index
    %c0_17 = arith.constant 0 : index
    %c0_18 = arith.constant 0 : index
    %27 = vector.load %arg2[%c5, %c0_17, %c0_18] : memref<7x21x128xbf16, #tpu.memory_space<vmem>>, vector<1x21x128xbf16>
    %28 = vector.shape_cast %27 : vector<1x21x128xbf16> to vector<21x128xbf16>
    %cst_19 = arith.constant dense<0.000000e+00> : vector<256x128xf32>
    %29 = tpu.matmul %26, %28, %cst_19 {dimension_numbers = #tpu.dot_dimension_numbers<[1], [0], [0], [1], [0, 0, 1, 1], [], []>} : vector<256x21xbf16>, vector<21x128xbf16>, vector<256x128xf32> -> vector<256x128xf32>
    %30 = arith.addf %25, %29 : vector<256x128xf32>
    %31 = vector.extract_strided_slice %1 {offsets = [96, 0], sizes = [256, 21], strides = [1, 1]} : vector<352x21xbf16> to vector<256x21xbf16>
    %c6 = arith.constant 6 : index
    %c0_20 = arith.constant 0 : index
    %c0_21 = arith.constant 0 : index
    %32 = vector.load %arg2[%c6, %c0_20, %c0_21] : memref<7x21x128xbf16, #tpu.memory_space<vmem>>, vector<1x21x128xbf16>
    %33 = vector.shape_cast %32 : vector<1x21x128xbf16> to vector<21x128xbf16>
    %cst_22 = arith.constant dense<0.000000e+00> : vector<256x128xf32>
    %34 = tpu.matmul %31, %33, %cst_22 {dimension_numbers = #tpu.dot_dimension_numbers<[1], [0], [0], [1], [0, 0, 1, 1], [], []>} : vector<256x21xbf16>, vector<21x128xbf16>, vector<256x128xf32> -> vector<256x128xf32>
    %35 = arith.addf %30, %34 : vector<256x128xf32>
    %36 = vector.shape_cast %35 : vector<256x128xf32> to vector<16x16x128xf32>
    %cst_23 = arith.constant dense<0.000000e+00> : vector<16x128xf32>
    %37 = vector.multi_reduction <add>, %36, %cst_23 [1] : vector<16x16x128xf32> to vector<16x128xf32>
    %38 = vector.shape_cast %37 : vector<16x128xf32> to vector<16x1x128xf32>
    %cst_24 = arith.constant dense<0.000000e+00> : vector<1x128xf32>
    %39 = vector.multi_reduction <add>, %38, %cst_24 [0] : vector<16x1x128xf32> to vector<1x128xf32>
    %40 = vector.shape_cast %39 : vector<1x128xf32> to vector<1x1x128xf32>
    %cst_25 = arith.constant 3.906250e-03 : f32
    %41 = vector.broadcast %cst_25 : f32 to vector<1x1x128xf32>
    %42 = arith.mulf %40, %41 : vector<1x1x128xf32>
    %43 = vector.broadcast %42 : vector<1x1x128xf32> to vector<16x16x128xf32>
    %44 = arith.subf %36, %43 : vector<16x16x128xf32>
    %45 = arith.mulf %44, %44 : vector<16x16x128xf32>
    %cst_26 = arith.constant dense<0.000000e+00> : vector<16x128xf32>
    %46 = vector.multi_reduction <add>, %45, %cst_26 [1] : vector<16x16x128xf32> to vector<16x128xf32>
    %47 = vector.shape_cast %46 : vector<16x128xf32> to vector<16x1x128xf32>
    %cst_27 = arith.constant dense<0.000000e+00> : vector<1x128xf32>
    %48 = vector.multi_reduction <add>, %47, %cst_27 [0] : vector<16x1x128xf32> to vector<1x128xf32>
    %49 = vector.shape_cast %48 : vector<1x128xf32> to vector<1x1x128xf32>
    %cst_28 = arith.constant 3.906250e-03 : f32
    %50 = vector.broadcast %cst_28 : f32 to vector<1x1x128xf32>
    %51 = arith.mulf %49, %50 : vector<1x1x128xf32>
    %cst_29 = arith.constant 9.99999974E-6 : f32
    %52 = vector.broadcast %cst_29 : f32 to vector<1x1x128xf32>
    %53 = arith.addf %51, %52 : vector<1x1x128xf32>
    %54 = math.rsqrt %53 : vector<1x1x128xf32>
    %55 = vector.broadcast %42 : vector<1x1x128xf32> to vector<16x16x128xf32>
    %56 = arith.subf %36, %55 : vector<16x16x128xf32>
    %57 = vector.broadcast %54 : vector<1x1x128xf32> to vector<16x16x128xf32>
    %58 = arith.mulf %56, %57 : vector<16x16x128xf32>
    %cst_30 = arith.constant 0.000000e+00 : f32
    %59 = vector.broadcast %cst_30 : f32 to vector<16x16x128xf32>
    %60 = arith.maximumf %58, %59 : vector<16x16x128xf32>
    %61 = arith.truncf %60 : vector<16x16x128xf32> to vector<16x16x128xbf16>
    %c0_31 = arith.constant 0 : index
    %c0_32 = arith.constant 0 : index
    %c0_33 = arith.constant 0 : index
    %c0_34 = arith.constant 0 : index
    %62 = vector.load %arg3[%c0_31, %c0_32, %c0_33, %c0_34] : memref<1x16x16x128xbf16, #tpu.memory_space<vmem>>, vector<1x16x16x128xbf16>
    %63 = vector.shape_cast %62 : vector<1x16x16x128xbf16> to vector<16x16x128xbf16>
    %64 = vector.shape_cast %61 : vector<16x16x128xbf16> to vector<1x16x16x128xbf16>
    tpu.vector_store %arg3[%c0_31, %c0_32, %c0_33, %c0_34], %64 {strides = array<i32>} : memref<1x16x16x128xbf16, #tpu.memory_space<vmem>>, vector<1x16x16x128xbf16>,
    return
  }
  func.func @transform_0(%arg0: i32) -> (i32, i32, i32) {
    %c0_i32 = arith.constant 0 : i32
    %c0_i32_0 = arith.constant 0 : i32
    %c0_i32_1 = arith.constant 0 : i32
    return %arg0, %c0_i32, %c0_i32_0 : i32, i32, i32
  }
  func.func @transform_1(%arg0: i32) -> (i32, i32, i32) {
    %c0_i32 = arith.constant 0 : i32
    %c0_i32_0 = arith.constant 0 : i32
    %c0_i32_1 = arith.constant 0 : i32
    %c0_i32_2 = arith.constant 0 : i32
    return %c0_i32, %c0_i32_0, %c0_i32_1 : i32, i32, i32
  }
  func.func @transform_2(%arg0: i32) -> (i32, i32, i32, i32) {
    %c0_i32 = arith.constant 0 : i32
    %c0_i32_0 = arith.constant 0 : i32
    %c0_i32_1 = arith.constant 0 : i32
    %c0_i32_2 = arith.constant 0 : i32
    return %arg0, %c0_i32, %c0_i32_0, %c0_i32_1 : i32, i32, i32, i32
  }
}

module attributes {stable_mosaic.version = 11 : i64} {
  func.func @kernel(%arg0: i32, %arg1: memref<1x72x64xbf16, #tpu.memory_space<vmem>>, %arg2: memref<2x64x128xbf16, #tpu.memory_space<vmem>>, %arg3: memref<1x8x8x128xbf16, #tpu.memory_space<vmem>>) attributes {dimension_semantics = [#tpu.dimension_semantics<parallel>], iteration_bounds = array<i64: 2>, scalar_prefetch = 0 : i64, scratch_operands = 0 : i64, tpu.core_type = #tpu.core_type<tc>, window_params = [{transform_indices = @transform_0, window_bounds = array<i64: 1, 72, 64>}, {pipeline_mode = #tpu.pipeline_mode<synchronous>, transform_indices = @transform_1, window_bounds = array<i64: 2, 64, 128>}, {transform_indices = @transform_2, window_bounds = array<i64: 1, 8, 8, 128>}]} {
    %c0 = arith.constant 0 : index
    %c0_0 = arith.constant 0 : index
    %c0_1 = arith.constant 0 : index
    %0 = vector.load %arg1[%c0, %c0_0, %c0_1] : memref<1x72x64xbf16, #tpu.memory_space<vmem>>, vector<1x72x64xbf16>
    %1 = vector.shape_cast %0 : vector<1x72x64xbf16> to vector<72x64xbf16>
    %2 = vector.extract_strided_slice %1 {offsets = [0, 0], sizes = [64, 64], strides = [1, 1]} : vector<72x64xbf16> to vector<64x64xbf16>
    %c0_2 = arith.constant 0 : index
    %c0_3 = arith.constant 0 : index
    %c0_4 = arith.constant 0 : index
    %3 = vector.load %arg2[%c0_2, %c0_3, %c0_4] : memref<2x64x128xbf16, #tpu.memory_space<vmem>>, vector<1x64x128xbf16>
    %4 = vector.shape_cast %3 : vector<1x64x128xbf16> to vector<64x128xbf16>
    %cst = arith.constant dense<0.000000e+00> : vector<64x128xf32>
    %5 = tpu.matmul %2, %4, %cst {dimension_numbers = #tpu.dot_dimension_numbers<[1], [0], [0], [1], [0, 0, 1, 1], [], []>} : vector<64x64xbf16>, vector<64x128xbf16>, vector<64x128xf32> -> vector<64x128xf32>
    %6 = vector.extract_strided_slice %1 {offsets = [8, 0], sizes = [64, 64], strides = [1, 1]} : vector<72x64xbf16> to vector<64x64xbf16>
    %c1 = arith.constant 1 : index
    %c0_5 = arith.constant 0 : index
    %c0_6 = arith.constant 0 : index
    %7 = vector.load %arg2[%c1, %c0_5, %c0_6] : memref<2x64x128xbf16, #tpu.memory_space<vmem>>, vector<1x64x128xbf16>
    %8 = vector.shape_cast %7 : vector<1x64x128xbf16> to vector<64x128xbf16>
    %cst_7 = arith.constant dense<0.000000e+00> : vector<64x128xf32>
    %9 = tpu.matmul %6, %8, %cst_7 {dimension_numbers = #tpu.dot_dimension_numbers<[1], [0], [0], [1], [0, 0, 1, 1], [], []>} : vector<64x64xbf16>, vector<64x128xbf16>, vector<64x128xf32> -> vector<64x128xf32>
    %10 = arith.addf %5, %9 : vector<64x128xf32>
    %11 = vector.shape_cast %10 : vector<64x128xf32> to vector<8x8x128xf32>
    %cst_8 = arith.constant dense<0.000000e+00> : vector<8x128xf32>
    %12 = vector.multi_reduction <add>, %11, %cst_8 [1] : vector<8x8x128xf32> to vector<8x128xf32>
    %13 = vector.shape_cast %12 : vector<8x128xf32> to vector<8x1x128xf32>
    %cst_9 = arith.constant dense<0.000000e+00> : vector<1x128xf32>
    %14 = vector.multi_reduction <add>, %13, %cst_9 [0] : vector<8x1x128xf32> to vector<1x128xf32>
    %15 = vector.shape_cast %14 : vector<1x128xf32> to vector<1x1x128xf32>
    %cst_10 = arith.constant 1.562500e-02 : f32
    %16 = vector.broadcast %cst_10 : f32 to vector<1x1x128xf32>
    %17 = arith.mulf %15, %16 : vector<1x1x128xf32>
    %18 = vector.broadcast %17 : vector<1x1x128xf32> to vector<8x8x128xf32>
    %19 = arith.subf %11, %18 : vector<8x8x128xf32>
    %20 = arith.mulf %19, %19 : vector<8x8x128xf32>
    %cst_11 = arith.constant dense<0.000000e+00> : vector<8x128xf32>
    %21 = vector.multi_reduction <add>, %20, %cst_11 [1] : vector<8x8x128xf32> to vector<8x128xf32>
    %22 = vector.shape_cast %21 : vector<8x128xf32> to vector<8x1x128xf32>
    %cst_12 = arith.constant dense<0.000000e+00> : vector<1x128xf32>
    %23 = vector.multi_reduction <add>, %22, %cst_12 [0] : vector<8x1x128xf32> to vector<1x128xf32>
    %24 = vector.shape_cast %23 : vector<1x128xf32> to vector<1x1x128xf32>
    %cst_13 = arith.constant 1.562500e-02 : f32
    %25 = vector.broadcast %cst_13 : f32 to vector<1x1x128xf32>
    %26 = arith.mulf %24, %25 : vector<1x1x128xf32>
    %cst_14 = arith.constant 9.99999974E-6 : f32
    %27 = vector.broadcast %cst_14 : f32 to vector<1x1x128xf32>
    %28 = arith.addf %26, %27 : vector<1x1x128xf32>
    %29 = math.rsqrt %28 : vector<1x1x128xf32>
    %30 = vector.broadcast %17 : vector<1x1x128xf32> to vector<8x8x128xf32>
    %31 = arith.subf %11, %30 : vector<8x8x128xf32>
    %32 = vector.broadcast %29 : vector<1x1x128xf32> to vector<8x8x128xf32>
    %33 = arith.mulf %31, %32 : vector<8x8x128xf32>
    %cst_15 = arith.constant 0.000000e+00 : f32
    %34 = vector.broadcast %cst_15 : f32 to vector<8x8x128xf32>
    %35 = arith.maximumf %33, %34 : vector<8x8x128xf32>
    %36 = arith.truncf %35 : vector<8x8x128xf32> to vector<8x8x128xbf16>
    %c0_16 = arith.constant 0 : index
    %c0_17 = arith.constant 0 : index
    %c0_18 = arith.constant 0 : index
    %c0_19 = arith.constant 0 : index
    %37 = vector.load %arg3[%c0_16, %c0_17, %c0_18, %c0_19] : memref<1x8x8x128xbf16, #tpu.memory_space<vmem>>, vector<1x8x8x128xbf16>
    %38 = vector.shape_cast %37 : vector<1x8x8x128xbf16> to vector<8x8x128xbf16>
    %39 = vector.shape_cast %36 : vector<8x8x128xbf16> to vector<1x8x8x128xbf16>
    tpu.vector_store %arg3[%c0_16, %c0_17, %c0_18, %c0_19], %39 {strides = array<i32>} : memref<1x8x8x128xbf16, #tpu.memory_space<vmem>>, vector<1x8x8x128xbf16>,
    return
  }
  func.func @transform_0(%arg0: i32) -> (i32, i32, i32) {
    %c0_i32 = arith.constant 0 : i32
    %c0_i32_0 = arith.constant 0 : i32
    %c0_i32_1 = arith.constant 0 : i32
    return %arg0, %c0_i32, %c0_i32_0 : i32, i32, i32
  }
  func.func @transform_1(%arg0: i32) -> (i32, i32, i32) {
    %c0_i32 = arith.constant 0 : i32
    %c0_i32_0 = arith.constant 0 : i32
    %c0_i32_1 = arith.constant 0 : i32
    %c0_i32_2 = arith.constant 0 : i32
    return %c0_i32, %c0_i32_0, %c0_i32_1 : i32, i32, i32
  }
  func.func @transform_2(%arg0: i32) -> (i32, i32, i32, i32) {
    %c0_i32 = arith.constant 0 : i32
    %c0_i32_0 = arith.constant 0 : i32
    %c0_i32_1 = arith.constant 0 : i32
    %c0_i32_2 = arith.constant 0 : i32
    return %arg0, %c0_i32, %c0_i32_0, %c0_i32_1 : i32, i32, i32, i32
  }
}

module attributes {stable_mosaic.version = 11 : i64} {
  func.func @kernel(%arg0: i32, %arg1: memref<1x40x128xbf16, #tpu.memory_space<vmem>>, %arg2: memref<2x128x128xbf16, #tpu.memory_space<vmem>>, %arg3: memref<1x4x4x128xbf16, #tpu.memory_space<vmem>>) attributes {dimension_semantics = [#tpu.dimension_semantics<parallel>], iteration_bounds = array<i64: 2>, scalar_prefetch = 0 : i64, scratch_operands = 0 : i64, tpu.core_type = #tpu.core_type<tc>, window_params = [{transform_indices = @transform_0, window_bounds = array<i64: 1, 40, 128>}, {pipeline_mode = #tpu.pipeline_mode<synchronous>, transform_indices = @transform_1, window_bounds = array<i64: 2, 128, 128>}, {transform_indices = @transform_2, window_bounds = array<i64: 1, 4, 4, 128>}]} {
    %c0 = arith.constant 0 : index
    %c0_0 = arith.constant 0 : index
    %c0_1 = arith.constant 0 : index
    %0 = vector.load %arg1[%c0, %c0_0, %c0_1] : memref<1x40x128xbf16, #tpu.memory_space<vmem>>, vector<1x40x128xbf16>
    %1 = vector.shape_cast %0 : vector<1x40x128xbf16> to vector<40x128xbf16>
    %2 = vector.extract_strided_slice %1 {offsets = [0, 0], sizes = [32, 128], strides = [1, 1]} : vector<40x128xbf16> to vector<32x128xbf16>
    %c0_2 = arith.constant 0 : index
    %c0_3 = arith.constant 0 : index
    %c0_4 = arith.constant 0 : index
    %3 = vector.load %arg2[%c0_2, %c0_3, %c0_4] : memref<2x128x128xbf16, #tpu.memory_space<vmem>>, vector<1x128x128xbf16>
    %4 = vector.shape_cast %3 : vector<1x128x128xbf16> to vector<128x128xbf16>
    %cst = arith.constant dense<0.000000e+00> : vector<32x128xf32>
    %5 = tpu.matmul %2, %4, %cst {dimension_numbers = #tpu.dot_dimension_numbers<[1], [0], [0], [1], [0, 0, 1, 1], [], []>} : vector<32x128xbf16>, vector<128x128xbf16>, vector<32x128xf32> -> vector<32x128xf32>
    %6 = vector.extract_strided_slice %1 {offsets = [8, 0], sizes = [32, 128], strides = [1, 1]} : vector<40x128xbf16> to vector<32x128xbf16>
    %c1 = arith.constant 1 : index
    %c0_5 = arith.constant 0 : index
    %c0_6 = arith.constant 0 : index
    %7 = vector.load %arg2[%c1, %c0_5, %c0_6] : memref<2x128x128xbf16, #tpu.memory_space<vmem>>, vector<1x128x128xbf16>
    %8 = vector.shape_cast %7 : vector<1x128x128xbf16> to vector<128x128xbf16>
    %cst_7 = arith.constant dense<0.000000e+00> : vector<32x128xf32>
    %9 = tpu.matmul %6, %8, %cst_7 {dimension_numbers = #tpu.dot_dimension_numbers<[1], [0], [0], [1], [0, 0, 1, 1], [], []>} : vector<32x128xbf16>, vector<128x128xbf16>, vector<32x128xf32> -> vector<32x128xf32>
    %10 = arith.addf %5, %9 : vector<32x128xf32>
    %11 = vector.shape_cast %10 : vector<32x128xf32> to vector<4x8x128xf32>
    %12 = vector.extract_strided_slice %11 {offsets = [0, 0, 0], sizes = [4, 4, 128], strides = [1, 1, 1]} : vector<4x8x128xf32> to vector<4x4x128xf32>
    %cst_8 = arith.constant dense<0.000000e+00> : vector<4x128xf32>
    %13 = vector.multi_reduction <add>, %12, %cst_8 [1] : vector<4x4x128xf32> to vector<4x128xf32>
    %14 = vector.shape_cast %13 : vector<4x128xf32> to vector<4x1x128xf32>
    %cst_9 = arith.constant dense<0.000000e+00> : vector<1x128xf32>
    %15 = vector.multi_reduction <add>, %14, %cst_9 [0] : vector<4x1x128xf32> to vector<1x128xf32>
    %16 = vector.shape_cast %15 : vector<1x128xf32> to vector<1x1x128xf32>
    %cst_10 = arith.constant 6.250000e-02 : f32
    %17 = vector.broadcast %cst_10 : f32 to vector<1x1x128xf32>
    %18 = arith.mulf %16, %17 : vector<1x1x128xf32>
    %19 = vector.broadcast %18 : vector<1x1x128xf32> to vector<4x4x128xf32>
    %20 = arith.subf %12, %19 : vector<4x4x128xf32>
    %21 = arith.mulf %20, %20 : vector<4x4x128xf32>
    %cst_11 = arith.constant dense<0.000000e+00> : vector<4x128xf32>
    %22 = vector.multi_reduction <add>, %21, %cst_11 [1] : vector<4x4x128xf32> to vector<4x128xf32>
    %23 = vector.shape_cast %22 : vector<4x128xf32> to vector<4x1x128xf32>
    %cst_12 = arith.constant dense<0.000000e+00> : vector<1x128xf32>
    %24 = vector.multi_reduction <add>, %23, %cst_12 [0] : vector<4x1x128xf32> to vector<1x128xf32>
    %25 = vector.shape_cast %24 : vector<1x128xf32> to vector<1x1x128xf32>
    %cst_13 = arith.constant 6.250000e-02 : f32
    %26 = vector.broadcast %cst_13 : f32 to vector<1x1x128xf32>
    %27 = arith.mulf %25, %26 : vector<1x1x128xf32>
    %cst_14 = arith.constant 9.99999974E-6 : f32
    %28 = vector.broadcast %cst_14 : f32 to vector<1x1x128xf32>
    %29 = arith.addf %27, %28 : vector<1x1x128xf32>
    %30 = math.rsqrt %29 : vector<1x1x128xf32>
    %31 = vector.broadcast %18 : vector<1x1x128xf32> to vector<4x4x128xf32>
    %32 = arith.subf %12, %31 : vector<4x4x128xf32>
    %33 = vector.broadcast %30 : vector<1x1x128xf32> to vector<4x4x128xf32>
    %34 = arith.mulf %32, %33 : vector<4x4x128xf32>
    %cst_15 = arith.constant 0.000000e+00 : f32
    %35 = vector.broadcast %cst_15 : f32 to vector<4x4x128xf32>
    %36 = arith.maximumf %34, %35 : vector<4x4x128xf32>
    %37 = arith.truncf %36 : vector<4x4x128xf32> to vector<4x4x128xbf16>
    %c0_16 = arith.constant 0 : index
    %c0_17 = arith.constant 0 : index
    %c0_18 = arith.constant 0 : index
    %c0_19 = arith.constant 0 : index
    %38 = vector.load %arg3[%c0_16, %c0_17, %c0_18, %c0_19] : memref<1x4x4x128xbf16, #tpu.memory_space<vmem>>, vector<1x4x4x128xbf16>
    %39 = vector.shape_cast %38 : vector<1x4x4x128xbf16> to vector<4x4x128xbf16>
    %40 = vector.shape_cast %37 : vector<4x4x128xbf16> to vector<1x4x4x128xbf16>
    tpu.vector_store %arg3[%c0_16, %c0_17, %c0_18, %c0_19], %40 {strides = array<i32>} : memref<1x4x4x128xbf16, #tpu.memory_space<vmem>>, vector<1x4x4x128xbf16>,
    return
  }
  func.func @transform_0(%arg0: i32) -> (i32, i32, i32) {
    %c0_i32 = arith.constant 0 : i32
    %c0_i32_0 = arith.constant 0 : i32
    %c0_i32_1 = arith.constant 0 : i32
    return %arg0, %c0_i32, %c0_i32_0 : i32, i32, i32
  }
  func.func @transform_1(%arg0: i32) -> (i32, i32, i32) {
    %c0_i32 = arith.constant 0 : i32
    %c0_i32_0 = arith.constant 0 : i32
    %c0_i32_1 = arith.constant 0 : i32
    %c0_i32_2 = arith.constant 0 : i32
    return %c0_i32, %c0_i32_0, %c0_i32_1 : i32, i32, i32
  }
  func.func @transform_2(%arg0: i32) -> (i32, i32, i32, i32) {
    %c0_i32 = arith.constant 0 : i32
    %c0_i32_0 = arith.constant 0 : i32
    %c0_i32_1 = arith.constant 0 : i32
    %c0_i32_2 = arith.constant 0 : i32
    return %arg0, %c0_i32, %c0_i32_0, %c0_i32_1 : i32, i32, i32, i32
  }
}

module attributes {stable_mosaic.version = 11 : i64} {
  func.func @kernel(%arg0: i32, %arg1: memref<1x50x64xbf16, #tpu.memory_space<vmem>>, %arg2: memref<9x64x128xbf16, #tpu.memory_space<vmem>>, %arg3: memref<1x4x4x128xbf16, #tpu.memory_space<vmem>>) attributes {dimension_semantics = [#tpu.dimension_semantics<parallel>], iteration_bounds = array<i64: 2>, scalar_prefetch = 0 : i64, scratch_operands = 0 : i64, tpu.core_type = #tpu.core_type<tc>, window_params = [{transform_indices = @transform_0, window_bounds = array<i64: 1, 50, 64>}, {pipeline_mode = #tpu.pipeline_mode<synchronous>, transform_indices = @transform_1, window_bounds = array<i64: 9, 64, 128>}, {transform_indices = @transform_2, window_bounds = array<i64: 1, 4, 4, 128>}]} {
    %c0 = arith.constant 0 : index
    %c0_0 = arith.constant 0 : index
    %c0_1 = arith.constant 0 : index
    %0 = vector.load %arg1[%c0, %c0_0, %c0_1] : memref<1x50x64xbf16, #tpu.memory_space<vmem>>, vector<1x50x64xbf16>
    %1 = vector.shape_cast %0 : vector<1x50x64xbf16> to vector<50x64xbf16>
    %2 = vector.extract_strided_slice %1 {offsets = [0, 0], sizes = [32, 64], strides = [1, 1]} : vector<50x64xbf16> to vector<32x64xbf16>
    %c0_2 = arith.constant 0 : index
    %c0_3 = arith.constant 0 : index
    %c0_4 = arith.constant 0 : index
    %3 = vector.load %arg2[%c0_2, %c0_3, %c0_4] : memref<9x64x128xbf16, #tpu.memory_space<vmem>>, vector<1x64x128xbf16>
    %4 = vector.shape_cast %3 : vector<1x64x128xbf16> to vector<64x128xbf16>
    %cst = arith.constant dense<0.000000e+00> : vector<32x128xf32>
    %5 = tpu.matmul %2, %4, %cst {dimension_numbers = #tpu.dot_dimension_numbers<[1], [0], [0], [1], [0, 0, 1, 1], [], []>} : vector<32x64xbf16>, vector<64x128xbf16>, vector<32x128xf32> -> vector<32x128xf32>
    %6 = vector.extract_strided_slice %1 {offsets = [1, 0], sizes = [32, 64], strides = [1, 1]} : vector<50x64xbf16> to vector<32x64xbf16>
    %c1 = arith.constant 1 : index
    %c0_5 = arith.constant 0 : index
    %c0_6 = arith.constant 0 : index
    %7 = vector.load %arg2[%c1, %c0_5, %c0_6] : memref<9x64x128xbf16, #tpu.memory_space<vmem>>, vector<1x64x128xbf16>
    %8 = vector.shape_cast %7 : vector<1x64x128xbf16> to vector<64x128xbf16>
    %cst_7 = arith.constant dense<0.000000e+00> : vector<32x128xf32>
    %9 = tpu.matmul %6, %8, %cst_7 {dimension_numbers = #tpu.dot_dimension_numbers<[1], [0], [0], [1], [0, 0, 1, 1], [], []>} : vector<32x64xbf16>, vector<64x128xbf16>, vector<32x128xf32> -> vector<32x128xf32>
    %10 = arith.addf %5, %9 : vector<32x128xf32>
    %11 = vector.extract_strided_slice %1 {offsets = [2, 0], sizes = [32, 64], strides = [1, 1]} : vector<50x64xbf16> to vector<32x64xbf16>
    %c2 = arith.constant 2 : index
    %c0_8 = arith.constant 0 : index
    %c0_9 = arith.constant 0 : index
    %12 = vector.load %arg2[%c2, %c0_8, %c0_9] : memref<9x64x128xbf16, #tpu.memory_space<vmem>>, vector<1x64x128xbf16>
    %13 = vector.shape_cast %12 : vector<1x64x128xbf16> to vector<64x128xbf16>
    %cst_10 = arith.constant dense<0.000000e+00> : vector<32x128xf32>
    %14 = tpu.matmul %11, %13, %cst_10 {dimension_numbers = #tpu.dot_dimension_numbers<[1], [0], [0], [1], [0, 0, 1, 1], [], []>} : vector<32x64xbf16>, vector<64x128xbf16>, vector<32x128xf32> -> vector<32x128xf32>
    %15 = arith.addf %10, %14 : vector<32x128xf32>
    %16 = vector.extract_strided_slice %1 {offsets = [8, 0], sizes = [32, 64], strides = [1, 1]} : vector<50x64xbf16> to vector<32x64xbf16>
    %c3 = arith.constant 3 : index
    %c0_11 = arith.constant 0 : index
    %c0_12 = arith.constant 0 : index
    %17 = vector.load %arg2[%c3, %c0_11, %c0_12] : memref<9x64x128xbf16, #tpu.memory_space<vmem>>, vector<1x64x128xbf16>
    %18 = vector.shape_cast %17 : vector<1x64x128xbf16> to vector<64x128xbf16>
    %cst_13 = arith.constant dense<0.000000e+00> : vector<32x128xf32>
    %19 = tpu.matmul %16, %18, %cst_13 {dimension_numbers = #tpu.dot_dimension_numbers<[1], [0], [0], [1], [0, 0, 1, 1], [], []>} : vector<32x64xbf16>, vector<64x128xbf16>, vector<32x128xf32> -> vector<32x128xf32>
    %20 = arith.addf %15, %19 : vector<32x128xf32>
    %21 = vector.extract_strided_slice %1 {offsets = [9, 0], sizes = [32, 64], strides = [1, 1]} : vector<50x64xbf16> to vector<32x64xbf16>
    %c4 = arith.constant 4 : index
    %c0_14 = arith.constant 0 : index
    %c0_15 = arith.constant 0 : index
    %22 = vector.load %arg2[%c4, %c0_14, %c0_15] : memref<9x64x128xbf16, #tpu.memory_space<vmem>>, vector<1x64x128xbf16>
    %23 = vector.shape_cast %22 : vector<1x64x128xbf16> to vector<64x128xbf16>
    %cst_16 = arith.constant dense<0.000000e+00> : vector<32x128xf32>
    %24 = tpu.matmul %21, %23, %cst_16 {dimension_numbers = #tpu.dot_dimension_numbers<[1], [0], [0], [1], [0, 0, 1, 1], [], []>} : vector<32x64xbf16>, vector<64x128xbf16>, vector<32x128xf32> -> vector<32x128xf32>
    %25 = arith.addf %20, %24 : vector<32x128xf32>
    %26 = vector.extract_strided_slice %1 {offsets = [10, 0], sizes = [32, 64], strides = [1, 1]} : vector<50x64xbf16> to vector<32x64xbf16>
    %c5 = arith.constant 5 : index
    %c0_17 = arith.constant 0 : index
    %c0_18 = arith.constant 0 : index
    %27 = vector.load %arg2[%c5, %c0_17, %c0_18] : memref<9x64x128xbf16, #tpu.memory_space<vmem>>, vector<1x64x128xbf16>
    %28 = vector.shape_cast %27 : vector<1x64x128xbf16> to vector<64x128xbf16>
    %cst_19 = arith.constant dense<0.000000e+00> : vector<32x128xf32>
    %29 = tpu.matmul %26, %28, %cst_19 {dimension_numbers = #tpu.dot_dimension_numbers<[1], [0], [0], [1], [0, 0, 1, 1], [], []>} : vector<32x64xbf16>, vector<64x128xbf16>, vector<32x128xf32> -> vector<32x128xf32>
    %30 = arith.addf %25, %29 : vector<32x128xf32>
    %31 = vector.extract_strided_slice %1 {offsets = [16, 0], sizes = [32, 64], strides = [1, 1]} : vector<50x64xbf16> to vector<32x64xbf16>
    %c6 = arith.constant 6 : index
    %c0_20 = arith.constant 0 : index
    %c0_21 = arith.constant 0 : index
    %32 = vector.load %arg2[%c6, %c0_20, %c0_21] : memref<9x64x128xbf16, #tpu.memory_space<vmem>>, vector<1x64x128xbf16>
    %33 = vector.shape_cast %32 : vector<1x64x128xbf16> to vector<64x128xbf16>
    %cst_22 = arith.constant dense<0.000000e+00> : vector<32x128xf32>
    %34 = tpu.matmul %31, %33, %cst_22 {dimension_numbers = #tpu.dot_dimension_numbers<[1], [0], [0], [1], [0, 0, 1, 1], [], []>} : vector<32x64xbf16>, vector<64x128xbf16>, vector<32x128xf32> -> vector<32x128xf32>
    %35 = arith.addf %30, %34 : vector<32x128xf32>
    %36 = vector.extract_strided_slice %1 {offsets = [17, 0], sizes = [32, 64], strides = [1, 1]} : vector<50x64xbf16> to vector<32x64xbf16>
    %c7 = arith.constant 7 : index
    %c0_23 = arith.constant 0 : index
    %c0_24 = arith.constant 0 : index
    %37 = vector.load %arg2[%c7, %c0_23, %c0_24] : memref<9x64x128xbf16, #tpu.memory_space<vmem>>, vector<1x64x128xbf16>
    %38 = vector.shape_cast %37 : vector<1x64x128xbf16> to vector<64x128xbf16>
    %cst_25 = arith.constant dense<0.000000e+00> : vector<32x128xf32>
    %39 = tpu.matmul %36, %38, %cst_25 {dimension_numbers = #tpu.dot_dimension_numbers<[1], [0], [0], [1], [0, 0, 1, 1], [], []>} : vector<32x64xbf16>, vector<64x128xbf16>, vector<32x128xf32> -> vector<32x128xf32>
    %40 = arith.addf %35, %39 : vector<32x128xf32>
    %41 = vector.extract_strided_slice %1 {offsets = [18, 0], sizes = [32, 64], strides = [1, 1]} : vector<50x64xbf16> to vector<32x64xbf16>
    %c8 = arith.constant 8 : index
    %c0_26 = arith.constant 0 : index
    %c0_27 = arith.constant 0 : index
    %42 = vector.load %arg2[%c8, %c0_26, %c0_27] : memref<9x64x128xbf16, #tpu.memory_space<vmem>>, vector<1x64x128xbf16>
    %43 = vector.shape_cast %42 : vector<1x64x128xbf16> to vector<64x128xbf16>
    %cst_28 = arith.constant dense<0.000000e+00> : vector<32x128xf32>
    %44 = tpu.matmul %41, %43, %cst_28 {dimension_numbers = #tpu.dot_dimension_numbers<[1], [0], [0], [1], [0, 0, 1, 1], [], []>} : vector<32x64xbf16>, vector<64x128xbf16>, vector<32x128xf32> -> vector<32x128xf32>
    %45 = arith.addf %40, %44 : vector<32x128xf32>
    %46 = vector.shape_cast %45 : vector<32x128xf32> to vector<4x8x128xf32>
    %47 = vector.extract_strided_slice %46 {offsets = [0, 0, 0], sizes = [4, 4, 128], strides = [1, 1, 1]} : vector<4x8x128xf32> to vector<4x4x128xf32>
    %cst_29 = arith.constant dense<0.000000e+00> : vector<4x128xf32>
    %48 = vector.multi_reduction <add>, %47, %cst_29 [1] : vector<4x4x128xf32> to vector<4x128xf32>
    %49 = vector.shape_cast %48 : vector<4x128xf32> to vector<4x1x128xf32>
    %cst_30 = arith.constant dense<0.000000e+00> : vector<1x128xf32>
    %50 = vector.multi_reduction <add>, %49, %cst_30 [0] : vector<4x1x128xf32> to vector<1x128xf32>
    %51 = vector.shape_cast %50 : vector<1x128xf32> to vector<1x1x128xf32>
    %cst_31 = arith.constant 6.250000e-02 : f32
    %52 = vector.broadcast %cst_31 : f32 to vector<1x1x128xf32>
    %53 = arith.mulf %51, %52 : vector<1x1x128xf32>
    %54 = vector.broadcast %53 : vector<1x1x128xf32> to vector<4x4x128xf32>
    %55 = arith.subf %47, %54 : vector<4x4x128xf32>
    %56 = arith.mulf %55, %55 : vector<4x4x128xf32>
    %cst_32 = arith.constant dense<0.000000e+00> : vector<4x128xf32>
    %57 = vector.multi_reduction <add>, %56, %cst_32 [1] : vector<4x4x128xf32> to vector<4x128xf32>
    %58 = vector.shape_cast %57 : vector<4x128xf32> to vector<4x1x128xf32>
    %cst_33 = arith.constant dense<0.000000e+00> : vector<1x128xf32>
    %59 = vector.multi_reduction <add>, %58, %cst_33 [0] : vector<4x1x128xf32> to vector<1x128xf32>
    %60 = vector.shape_cast %59 : vector<1x128xf32> to vector<1x1x128xf32>
    %cst_34 = arith.constant 6.250000e-02 : f32
    %61 = vector.broadcast %cst_34 : f32 to vector<1x1x128xf32>
    %62 = arith.mulf %60, %61 : vector<1x1x128xf32>
    %cst_35 = arith.constant 9.99999974E-6 : f32
    %63 = vector.broadcast %cst_35 : f32 to vector<1x1x128xf32>
    %64 = arith.addf %62, %63 : vector<1x1x128xf32>
    %65 = math.rsqrt %64 : vector<1x1x128xf32>
    %66 = vector.broadcast %53 : vector<1x1x128xf32> to vector<4x4x128xf32>
    %67 = arith.subf %47, %66 : vector<4x4x128xf32>
    %68 = vector.broadcast %65 : vector<1x1x128xf32> to vector<4x4x128xf32>
    %69 = arith.mulf %67, %68 : vector<4x4x128xf32>
    %cst_36 = arith.constant 0.000000e+00 : f32
    %70 = vector.broadcast %cst_36 : f32 to vector<4x4x128xf32>
    %71 = arith.maximumf %69, %70 : vector<4x4x128xf32>
    %72 = arith.truncf %71 : vector<4x4x128xf32> to vector<4x4x128xbf16>
    %c0_37 = arith.constant 0 : index
    %c0_38 = arith.constant 0 : index
    %c0_39 = arith.constant 0 : index
    %c0_40 = arith.constant 0 : index
    %73 = vector.load %arg3[%c0_37, %c0_38, %c0_39, %c0_40] : memref<1x4x4x128xbf16, #tpu.memory_space<vmem>>, vector<1x4x4x128xbf16>
    %74 = vector.shape_cast %73 : vector<1x4x4x128xbf16> to vector<4x4x128xbf16>
    %75 = vector.shape_cast %72 : vector<4x4x128xbf16> to vector<1x4x4x128xbf16>
    tpu.vector_store %arg3[%c0_37, %c0_38, %c0_39, %c0_40], %75 {strides = array<i32>} : memref<1x4x4x128xbf16, #tpu.memory_space<vmem>>, vector<1x4x4x128xbf16>,
    return
  }
  func.func @transform_0(%arg0: i32) -> (i32, i32, i32) {
    %c0_i32 = arith.constant 0 : i32
    %c0_i32_0 = arith.constant 0 : i32
    %c0_i32_1 = arith.constant 0 : i32
    return %arg0, %c0_i32, %c0_i32_0 : i32, i32, i32
  }
  func.func @transform_1(%arg0: i32) -> (i32, i32, i32) {
    %c0_i32 = arith.constant 0 : i32
    %c0_i32_0 = arith.constant 0 : i32
    %c0_i32_1 = arith.constant 0 : i32
    %c0_i32_2 = arith.constant 0 : i32
    return %c0_i32, %c0_i32_0, %c0_i32_1 : i32, i32, i32
  }
  func.func @transform_2(%arg0: i32) -> (i32, i32, i32, i32) {
    %c0_i32 = arith.constant 0 : i32
    %c0_i32_0 = arith.constant 0 : i32
    %c0_i32_1 = arith.constant 0 : i32
    %c0_i32_2 = arith.constant 0 : i32
    return %arg0, %c0_i32, %c0_i32_0, %c0_i32_1 : i32, i32, i32, i32
  }
}

module attributes {stable_mosaic.version = 11 : i64} {
  func.func @kernel(%arg0: i32, %arg1: memref<1x50x64xbf16, #tpu.memory_space<vmem>>, %arg2: memref<9x64x128xbf16, #tpu.memory_space<vmem>>, %arg3: memref<1x4x4x128xbf16, #tpu.memory_space<vmem>>, %arg4: memref<1x4x4x128xbf16, #tpu.memory_space<vmem>>) attributes {dimension_semantics = [#tpu.dimension_semantics<parallel>], iteration_bounds = array<i64: 2>, scalar_prefetch = 0 : i64, scratch_operands = 0 : i64, tpu.core_type = #tpu.core_type<tc>, window_params = [{transform_indices = @transform_0, window_bounds = array<i64: 1, 50, 64>}, {pipeline_mode = #tpu.pipeline_mode<synchronous>, transform_indices = @transform_1, window_bounds = array<i64: 9, 64, 128>}, {transform_indices = @transform_2, window_bounds = array<i64: 1, 4, 4, 128>}, {transform_indices = @transform_3, window_bounds = array<i64: 1, 4, 4, 128>}]} {
    %c0 = arith.constant 0 : index
    %c0_0 = arith.constant 0 : index
    %c0_1 = arith.constant 0 : index
    %0 = vector.load %arg1[%c0, %c0_0, %c0_1] : memref<1x50x64xbf16, #tpu.memory_space<vmem>>, vector<1x50x64xbf16>
    %1 = vector.shape_cast %0 : vector<1x50x64xbf16> to vector<50x64xbf16>
    %2 = vector.extract_strided_slice %1 {offsets = [0, 0], sizes = [32, 64], strides = [1, 1]} : vector<50x64xbf16> to vector<32x64xbf16>
    %c0_2 = arith.constant 0 : index
    %c0_3 = arith.constant 0 : index
    %c0_4 = arith.constant 0 : index
    %3 = vector.load %arg2[%c0_2, %c0_3, %c0_4] : memref<9x64x128xbf16, #tpu.memory_space<vmem>>, vector<1x64x128xbf16>
    %4 = vector.shape_cast %3 : vector<1x64x128xbf16> to vector<64x128xbf16>
    %cst = arith.constant dense<0.000000e+00> : vector<32x128xf32>
    %5 = tpu.matmul %2, %4, %cst {dimension_numbers = #tpu.dot_dimension_numbers<[1], [0], [0], [1], [0, 0, 1, 1], [], []>} : vector<32x64xbf16>, vector<64x128xbf16>, vector<32x128xf32> -> vector<32x128xf32>
    %6 = vector.extract_strided_slice %1 {offsets = [1, 0], sizes = [32, 64], strides = [1, 1]} : vector<50x64xbf16> to vector<32x64xbf16>
    %c1 = arith.constant 1 : index
    %c0_5 = arith.constant 0 : index
    %c0_6 = arith.constant 0 : index
    %7 = vector.load %arg2[%c1, %c0_5, %c0_6] : memref<9x64x128xbf16, #tpu.memory_space<vmem>>, vector<1x64x128xbf16>
    %8 = vector.shape_cast %7 : vector<1x64x128xbf16> to vector<64x128xbf16>
    %cst_7 = arith.constant dense<0.000000e+00> : vector<32x128xf32>
    %9 = tpu.matmul %6, %8, %cst_7 {dimension_numbers = #tpu.dot_dimension_numbers<[1], [0], [0], [1], [0, 0, 1, 1], [], []>} : vector<32x64xbf16>, vector<64x128xbf16>, vector<32x128xf32> -> vector<32x128xf32>
    %10 = arith.addf %5, %9 : vector<32x128xf32>
    %11 = vector.extract_strided_slice %1 {offsets = [2, 0], sizes = [32, 64], strides = [1, 1]} : vector<50x64xbf16> to vector<32x64xbf16>
    %c2 = arith.constant 2 : index
    %c0_8 = arith.constant 0 : index
    %c0_9 = arith.constant 0 : index
    %12 = vector.load %arg2[%c2, %c0_8, %c0_9] : memref<9x64x128xbf16, #tpu.memory_space<vmem>>, vector<1x64x128xbf16>
    %13 = vector.shape_cast %12 : vector<1x64x128xbf16> to vector<64x128xbf16>
    %cst_10 = arith.constant dense<0.000000e+00> : vector<32x128xf32>
    %14 = tpu.matmul %11, %13, %cst_10 {dimension_numbers = #tpu.dot_dimension_numbers<[1], [0], [0], [1], [0, 0, 1, 1], [], []>} : vector<32x64xbf16>, vector<64x128xbf16>, vector<32x128xf32> -> vector<32x128xf32>
    %15 = arith.addf %10, %14 : vector<32x128xf32>
    %16 = vector.extract_strided_slice %1 {offsets = [8, 0], sizes = [32, 64], strides = [1, 1]} : vector<50x64xbf16> to vector<32x64xbf16>
    %c3 = arith.constant 3 : index
    %c0_11 = arith.constant 0 : index
    %c0_12 = arith.constant 0 : index
    %17 = vector.load %arg2[%c3, %c0_11, %c0_12] : memref<9x64x128xbf16, #tpu.memory_space<vmem>>, vector<1x64x128xbf16>
    %18 = vector.shape_cast %17 : vector<1x64x128xbf16> to vector<64x128xbf16>
    %cst_13 = arith.constant dense<0.000000e+00> : vector<32x128xf32>
    %19 = tpu.matmul %16, %18, %cst_13 {dimension_numbers = #tpu.dot_dimension_numbers<[1], [0], [0], [1], [0, 0, 1, 1], [], []>} : vector<32x64xbf16>, vector<64x128xbf16>, vector<32x128xf32> -> vector<32x128xf32>
    %20 = arith.addf %15, %19 : vector<32x128xf32>
    %21 = vector.extract_strided_slice %1 {offsets = [9, 0], sizes = [32, 64], strides = [1, 1]} : vector<50x64xbf16> to vector<32x64xbf16>
    %c4 = arith.constant 4 : index
    %c0_14 = arith.constant 0 : index
    %c0_15 = arith.constant 0 : index
    %22 = vector.load %arg2[%c4, %c0_14, %c0_15] : memref<9x64x128xbf16, #tpu.memory_space<vmem>>, vector<1x64x128xbf16>
    %23 = vector.shape_cast %22 : vector<1x64x128xbf16> to vector<64x128xbf16>
    %cst_16 = arith.constant dense<0.000000e+00> : vector<32x128xf32>
    %24 = tpu.matmul %21, %23, %cst_16 {dimension_numbers = #tpu.dot_dimension_numbers<[1], [0], [0], [1], [0, 0, 1, 1], [], []>} : vector<32x64xbf16>, vector<64x128xbf16>, vector<32x128xf32> -> vector<32x128xf32>
    %25 = arith.addf %20, %24 : vector<32x128xf32>
    %26 = vector.extract_strided_slice %1 {offsets = [10, 0], sizes = [32, 64], strides = [1, 1]} : vector<50x64xbf16> to vector<32x64xbf16>
    %c5 = arith.constant 5 : index
    %c0_17 = arith.constant 0 : index
    %c0_18 = arith.constant 0 : index
    %27 = vector.load %arg2[%c5, %c0_17, %c0_18] : memref<9x64x128xbf16, #tpu.memory_space<vmem>>, vector<1x64x128xbf16>
    %28 = vector.shape_cast %27 : vector<1x64x128xbf16> to vector<64x128xbf16>
    %cst_19 = arith.constant dense<0.000000e+00> : vector<32x128xf32>
    %29 = tpu.matmul %26, %28, %cst_19 {dimension_numbers = #tpu.dot_dimension_numbers<[1], [0], [0], [1], [0, 0, 1, 1], [], []>} : vector<32x64xbf16>, vector<64x128xbf16>, vector<32x128xf32> -> vector<32x128xf32>
    %30 = arith.addf %25, %29 : vector<32x128xf32>
    %31 = vector.extract_strided_slice %1 {offsets = [16, 0], sizes = [32, 64], strides = [1, 1]} : vector<50x64xbf16> to vector<32x64xbf16>
    %c6 = arith.constant 6 : index
    %c0_20 = arith.constant 0 : index
    %c0_21 = arith.constant 0 : index
    %32 = vector.load %arg2[%c6, %c0_20, %c0_21] : memref<9x64x128xbf16, #tpu.memory_space<vmem>>, vector<1x64x128xbf16>
    %33 = vector.shape_cast %32 : vector<1x64x128xbf16> to vector<64x128xbf16>
    %cst_22 = arith.constant dense<0.000000e+00> : vector<32x128xf32>
    %34 = tpu.matmul %31, %33, %cst_22 {dimension_numbers = #tpu.dot_dimension_numbers<[1], [0], [0], [1], [0, 0, 1, 1], [], []>} : vector<32x64xbf16>, vector<64x128xbf16>, vector<32x128xf32> -> vector<32x128xf32>
    %35 = arith.addf %30, %34 : vector<32x128xf32>
    %36 = vector.extract_strided_slice %1 {offsets = [17, 0], sizes = [32, 64], strides = [1, 1]} : vector<50x64xbf16> to vector<32x64xbf16>
    %c7 = arith.constant 7 : index
    %c0_23 = arith.constant 0 : index
    %c0_24 = arith.constant 0 : index
    %37 = vector.load %arg2[%c7, %c0_23, %c0_24] : memref<9x64x128xbf16, #tpu.memory_space<vmem>>, vector<1x64x128xbf16>
    %38 = vector.shape_cast %37 : vector<1x64x128xbf16> to vector<64x128xbf16>
    %cst_25 = arith.constant dense<0.000000e+00> : vector<32x128xf32>
    %39 = tpu.matmul %36, %38, %cst_25 {dimension_numbers = #tpu.dot_dimension_numbers<[1], [0], [0], [1], [0, 0, 1, 1], [], []>} : vector<32x64xbf16>, vector<64x128xbf16>, vector<32x128xf32> -> vector<32x128xf32>
    %40 = arith.addf %35, %39 : vector<32x128xf32>
    %41 = vector.extract_strided_slice %1 {offsets = [18, 0], sizes = [32, 64], strides = [1, 1]} : vector<50x64xbf16> to vector<32x64xbf16>
    %c8 = arith.constant 8 : index
    %c0_26 = arith.constant 0 : index
    %c0_27 = arith.constant 0 : index
    %42 = vector.load %arg2[%c8, %c0_26, %c0_27] : memref<9x64x128xbf16, #tpu.memory_space<vmem>>, vector<1x64x128xbf16>
    %43 = vector.shape_cast %42 : vector<1x64x128xbf16> to vector<64x128xbf16>
    %cst_28 = arith.constant dense<0.000000e+00> : vector<32x128xf32>
    %44 = tpu.matmul %41, %43, %cst_28 {dimension_numbers = #tpu.dot_dimension_numbers<[1], [0], [0], [1], [0, 0, 1, 1], [], []>} : vector<32x64xbf16>, vector<64x128xbf16>, vector<32x128xf32> -> vector<32x128xf32>
    %45 = arith.addf %40, %44 : vector<32x128xf32>
    %46 = vector.shape_cast %45 : vector<32x128xf32> to vector<4x8x128xf32>
    %47 = vector.extract_strided_slice %46 {offsets = [0, 0, 0], sizes = [4, 4, 128], strides = [1, 1, 1]} : vector<4x8x128xf32> to vector<4x4x128xf32>
    %cst_29 = arith.constant dense<0.000000e+00> : vector<4x128xf32>
    %48 = vector.multi_reduction <add>, %47, %cst_29 [1] : vector<4x4x128xf32> to vector<4x128xf32>
    %49 = vector.shape_cast %48 : vector<4x128xf32> to vector<4x1x128xf32>
    %cst_30 = arith.constant dense<0.000000e+00> : vector<1x128xf32>
    %50 = vector.multi_reduction <add>, %49, %cst_30 [0] : vector<4x1x128xf32> to vector<1x128xf32>
    %51 = vector.shape_cast %50 : vector<1x128xf32> to vector<1x1x128xf32>
    %cst_31 = arith.constant 6.250000e-02 : f32
    %52 = vector.broadcast %cst_31 : f32 to vector<1x1x128xf32>
    %53 = arith.mulf %51, %52 : vector<1x1x128xf32>
    %54 = vector.broadcast %53 : vector<1x1x128xf32> to vector<4x4x128xf32>
    %55 = arith.subf %47, %54 : vector<4x4x128xf32>
    %56 = arith.mulf %55, %55 : vector<4x4x128xf32>
    %cst_32 = arith.constant dense<0.000000e+00> : vector<4x128xf32>
    %57 = vector.multi_reduction <add>, %56, %cst_32 [1] : vector<4x4x128xf32> to vector<4x128xf32>
    %58 = vector.shape_cast %57 : vector<4x128xf32> to vector<4x1x128xf32>
    %cst_33 = arith.constant dense<0.000000e+00> : vector<1x128xf32>
    %59 = vector.multi_reduction <add>, %58, %cst_33 [0] : vector<4x1x128xf32> to vector<1x128xf32>
    %60 = vector.shape_cast %59 : vector<1x128xf32> to vector<1x1x128xf32>
    %cst_34 = arith.constant 6.250000e-02 : f32
    %61 = vector.broadcast %cst_34 : f32 to vector<1x1x128xf32>
    %62 = arith.mulf %60, %61 : vector<1x1x128xf32>
    %cst_35 = arith.constant 9.99999974E-6 : f32
    %63 = vector.broadcast %cst_35 : f32 to vector<1x1x128xf32>
    %64 = arith.addf %62, %63 : vector<1x1x128xf32>
    %65 = math.rsqrt %64 : vector<1x1x128xf32>
    %66 = vector.broadcast %53 : vector<1x1x128xf32> to vector<4x4x128xf32>
    %67 = arith.subf %47, %66 : vector<4x4x128xf32>
    %68 = vector.broadcast %65 : vector<1x1x128xf32> to vector<4x4x128xf32>
    %69 = arith.mulf %67, %68 : vector<4x4x128xf32>
    %c0_36 = arith.constant 0 : index
    %c0_37 = arith.constant 0 : index
    %c0_38 = arith.constant 0 : index
    %c0_39 = arith.constant 0 : index
    %70 = vector.load %arg3[%c0_36, %c0_37, %c0_38, %c0_39] : memref<1x4x4x128xbf16, #tpu.memory_space<vmem>>, vector<1x4x4x128xbf16>
    %71 = vector.shape_cast %70 : vector<1x4x4x128xbf16> to vector<4x4x128xbf16>
    %72 = arith.extf %71 : vector<4x4x128xbf16> to vector<4x4x128xf32>
    %73 = arith.addf %69, %72 : vector<4x4x128xf32>
    %74 = arith.truncf %73 : vector<4x4x128xf32> to vector<4x4x128xbf16>
    %c0_40 = arith.constant 0 : index
    %c0_41 = arith.constant 0 : index
    %c0_42 = arith.constant 0 : index
    %c0_43 = arith.constant 0 : index
    %75 = vector.load %arg4[%c0_40, %c0_41, %c0_42, %c0_43] : memref<1x4x4x128xbf16, #tpu.memory_space<vmem>>, vector<1x4x4x128xbf16>
    %76 = vector.shape_cast %75 : vector<1x4x4x128xbf16> to vector<4x4x128xbf16>
    %77 = vector.shape_cast %74 : vector<4x4x128xbf16> to vector<1x4x4x128xbf16>
    tpu.vector_store %arg4[%c0_40, %c0_41, %c0_42, %c0_43], %77 {strides = array<i32>} : memref<1x4x4x128xbf16, #tpu.memory_space<vmem>>, vector<1x4x4x128xbf16>,
    return
  }
  func.func @transform_0(%arg0: i32) -> (i32, i32, i32) {
    %c0_i32 = arith.constant 0 : i32
    %c0_i32_0 = arith.constant 0 : i32
    %c0_i32_1 = arith.constant 0 : i32
    return %arg0, %c0_i32, %c0_i32_0 : i32, i32, i32
  }
  func.func @transform_1(%arg0: i32) -> (i32, i32, i32) {
    %c0_i32 = arith.constant 0 : i32
    %c0_i32_0 = arith.constant 0 : i32
    %c0_i32_1 = arith.constant 0 : i32
    %c0_i32_2 = arith.constant 0 : i32
    return %c0_i32, %c0_i32_0, %c0_i32_1 : i32, i32, i32
  }
  func.func @transform_2(%arg0: i32) -> (i32, i32, i32, i32) {
    %c0_i32 = arith.constant 0 : i32
    %c0_i32_0 = arith.constant 0 : i32
    %c0_i32_1 = arith.constant 0 : i32
    %c0_i32_2 = arith.constant 0 : i32
    return %arg0, %c0_i32, %c0_i32_0, %c0_i32_1 : i32, i32, i32, i32
  }
  func.func @transform_3(%arg0: i32) -> (i32, i32, i32, i32) {
    %c0_i32 = arith.constant 0 : i32
    %c0_i32_0 = arith.constant 0 : i32
    %c0_i32_1 = arith.constant 0 : i32
    %c0_i32_2 = arith.constant 0 : i32
    return %arg0, %c0_i32, %c0_i32_0, %c0_i32_1 : i32, i32, i32, i32
  }
}

module attributes {stable_mosaic.version = 11 : i64} {
  func.func @kernel(%arg0: i32, %arg1: memref<1x40x128xbf16, #tpu.memory_space<vmem>>, %arg2: memref<2x128x512xbf16, #tpu.memory_space<vmem>>, %arg3: memref<1x4x4x512xbf16, #tpu.memory_space<vmem>>) attributes {dimension_semantics = [#tpu.dimension_semantics<parallel>], iteration_bounds = array<i64: 2>, scalar_prefetch = 0 : i64, scratch_operands = 0 : i64, tpu.core_type = #tpu.core_type<tc>, window_params = [{transform_indices = @transform_0, window_bounds = array<i64: 1, 40, 128>}, {pipeline_mode = #tpu.pipeline_mode<synchronous>, transform_indices = @transform_1, window_bounds = array<i64: 2, 128, 512>}, {transform_indices = @transform_2, window_bounds = array<i64: 1, 4, 4, 512>}]} {
    %c0 = arith.constant 0 : index
    %c0_0 = arith.constant 0 : index
    %c0_1 = arith.constant 0 : index
    %0 = vector.load %arg1[%c0, %c0_0, %c0_1] : memref<1x40x128xbf16, #tpu.memory_space<vmem>>, vector<1x40x128xbf16>
    %1 = vector.shape_cast %0 : vector<1x40x128xbf16> to vector<40x128xbf16>
    %2 = vector.extract_strided_slice %1 {offsets = [0, 0], sizes = [32, 128], strides = [1, 1]} : vector<40x128xbf16> to vector<32x128xbf16>
    %c0_2 = arith.constant 0 : index
    %c0_3 = arith.constant 0 : index
    %c0_4 = arith.constant 0 : index
    %3 = vector.load %arg2[%c0_2, %c0_3, %c0_4] : memref<2x128x512xbf16, #tpu.memory_space<vmem>>, vector<1x128x512xbf16>
    %4 = vector.shape_cast %3 : vector<1x128x512xbf16> to vector<128x512xbf16>
    %cst = arith.constant dense<0.000000e+00> : vector<32x512xf32>
    %5 = tpu.matmul %2, %4, %cst {dimension_numbers = #tpu.dot_dimension_numbers<[1], [0], [0], [1], [0, 0, 1, 1], [], []>} : vector<32x128xbf16>, vector<128x512xbf16>, vector<32x512xf32> -> vector<32x512xf32>
    %6 = vector.extract_strided_slice %1 {offsets = [8, 0], sizes = [32, 128], strides = [1, 1]} : vector<40x128xbf16> to vector<32x128xbf16>
    %c1 = arith.constant 1 : index
    %c0_5 = arith.constant 0 : index
    %c0_6 = arith.constant 0 : index
    %7 = vector.load %arg2[%c1, %c0_5, %c0_6] : memref<2x128x512xbf16, #tpu.memory_space<vmem>>, vector<1x128x512xbf16>
    %8 = vector.shape_cast %7 : vector<1x128x512xbf16> to vector<128x512xbf16>
    %cst_7 = arith.constant dense<0.000000e+00> : vector<32x512xf32>
    %9 = tpu.matmul %6, %8, %cst_7 {dimension_numbers = #tpu.dot_dimension_numbers<[1], [0], [0], [1], [0, 0, 1, 1], [], []>} : vector<32x128xbf16>, vector<128x512xbf16>, vector<32x512xf32> -> vector<32x512xf32>
    %10 = arith.addf %5, %9 : vector<32x512xf32>
    %11 = vector.shape_cast %10 : vector<32x512xf32> to vector<4x8x512xf32>
    %12 = vector.extract_strided_slice %11 {offsets = [0, 0, 0], sizes = [4, 4, 512], strides = [1, 1, 1]} : vector<4x8x512xf32> to vector<4x4x512xf32>
    %13 = vector.extract_strided_slice %12 {offsets = [0, 0, 0], sizes = [4, 4, 128], strides = [1, 1, 1]} : vector<4x4x512xf32> to vector<4x4x128xf32>
    %cst_8 = arith.constant dense<0.000000e+00> : vector<4x128xf32>
    %14 = vector.multi_reduction <add>, %13, %cst_8 [1] : vector<4x4x128xf32> to vector<4x128xf32>
    %15 = vector.shape_cast %14 : vector<4x128xf32> to vector<4x1x128xf32>
    %cst_9 = arith.constant dense<0.000000e+00> : vector<1x128xf32>
    %16 = vector.multi_reduction <add>, %15, %cst_9 [0] : vector<4x1x128xf32> to vector<1x128xf32>
    %17 = vector.shape_cast %16 : vector<1x128xf32> to vector<1x1x128xf32>
    %18 = vector.extract_strided_slice %12 {offsets = [0, 0, 128], sizes = [4, 4, 128], strides = [1, 1, 1]} : vector<4x4x512xf32> to vector<4x4x128xf32>
    %cst_10 = arith.constant dense<0.000000e+00> : vector<4x128xf32>
    %19 = vector.multi_reduction <add>, %18, %cst_10 [1] : vector<4x4x128xf32> to vector<4x128xf32>
    %20 = vector.shape_cast %19 : vector<4x128xf32> to vector<4x1x128xf32>
    %cst_11 = arith.constant dense<0.000000e+00> : vector<1x128xf32>
    %21 = vector.multi_reduction <add>, %20, %cst_11 [0] : vector<4x1x128xf32> to vector<1x128xf32>
    %22 = vector.shape_cast %21 : vector<1x128xf32> to vector<1x1x128xf32>
    %23 = arith.addf %17, %22 : vector<1x1x128xf32>
    %24 = vector.extract_strided_slice %12 {offsets = [0, 0, 256], sizes = [4, 4, 128], strides = [1, 1, 1]} : vector<4x4x512xf32> to vector<4x4x128xf32>
    %cst_12 = arith.constant dense<0.000000e+00> : vector<4x128xf32>
    %25 = vector.multi_reduction <add>, %24, %cst_12 [1] : vector<4x4x128xf32> to vector<4x128xf32>
    %26 = vector.shape_cast %25 : vector<4x128xf32> to vector<4x1x128xf32>
    %cst_13 = arith.constant dense<0.000000e+00> : vector<1x128xf32>
    %27 = vector.multi_reduction <add>, %26, %cst_13 [0] : vector<4x1x128xf32> to vector<1x128xf32>
    %28 = vector.shape_cast %27 : vector<1x128xf32> to vector<1x1x128xf32>
    %29 = arith.addf %23, %28 : vector<1x1x128xf32>
    %30 = vector.extract_strided_slice %12 {offsets = [0, 0, 384], sizes = [4, 4, 128], strides = [1, 1, 1]} : vector<4x4x512xf32> to vector<4x4x128xf32>
    %cst_14 = arith.constant dense<0.000000e+00> : vector<4x128xf32>
    %31 = vector.multi_reduction <add>, %30, %cst_14 [1] : vector<4x4x128xf32> to vector<4x128xf32>
    %32 = vector.shape_cast %31 : vector<4x128xf32> to vector<4x1x128xf32>
    %cst_15 = arith.constant dense<0.000000e+00> : vector<1x128xf32>
    %33 = vector.multi_reduction <add>, %32, %cst_15 [0] : vector<4x1x128xf32> to vector<1x128xf32>
    %34 = vector.shape_cast %33 : vector<1x128xf32> to vector<1x1x128xf32>
    %35 = arith.addf %29, %34 : vector<1x1x128xf32>
    %cst_16 = arith.constant 1.562500e-02 : f32
    %36 = vector.broadcast %cst_16 : f32 to vector<1x1x128xf32>
    %37 = arith.mulf %35, %36 : vector<1x1x128xf32>
    %38 = vector.extract_strided_slice %12 {offsets = [0, 0, 0], sizes = [4, 4, 128], strides = [1, 1, 1]} : vector<4x4x512xf32> to vector<4x4x128xf32>
    %39 = vector.broadcast %37 : vector<1x1x128xf32> to vector<4x4x128xf32>
    %40 = arith.subf %38, %39 : vector<4x4x128xf32>
    %41 = arith.mulf %40, %40 : vector<4x4x128xf32>
    %cst_17 = arith.constant dense<0.000000e+00> : vector<4x128xf32>
    %42 = vector.multi_reduction <add>, %41, %cst_17 [1] : vector<4x4x128xf32> to vector<4x128xf32>
    %43 = vector.shape_cast %42 : vector<4x128xf32> to vector<4x1x128xf32>
    %cst_18 = arith.constant dense<0.000000e+00> : vector<1x128xf32>
    %44 = vector.multi_reduction <add>, %43, %cst_18 [0] : vector<4x1x128xf32> to vector<1x128xf32>
    %45 = vector.shape_cast %44 : vector<1x128xf32> to vector<1x1x128xf32>
    %46 = vector.extract_strided_slice %12 {offsets = [0, 0, 128], sizes = [4, 4, 128], strides = [1, 1, 1]} : vector<4x4x512xf32> to vector<4x4x128xf32>
    %47 = vector.broadcast %37 : vector<1x1x128xf32> to vector<4x4x128xf32>
    %48 = arith.subf %46, %47 : vector<4x4x128xf32>
    %49 = arith.mulf %48, %48 : vector<4x4x128xf32>
    %cst_19 = arith.constant dense<0.000000e+00> : vector<4x128xf32>
    %50 = vector.multi_reduction <add>, %49, %cst_19 [1] : vector<4x4x128xf32> to vector<4x128xf32>
    %51 = vector.shape_cast %50 : vector<4x128xf32> to vector<4x1x128xf32>
    %cst_20 = arith.constant dense<0.000000e+00> : vector<1x128xf32>
    %52 = vector.multi_reduction <add>, %51, %cst_20 [0] : vector<4x1x128xf32> to vector<1x128xf32>
    %53 = vector.shape_cast %52 : vector<1x128xf32> to vector<1x1x128xf32>
    %54 = arith.addf %45, %53 : vector<1x1x128xf32>
    %55 = vector.extract_strided_slice %12 {offsets = [0, 0, 256], sizes = [4, 4, 128], strides = [1, 1, 1]} : vector<4x4x512xf32> to vector<4x4x128xf32>
    %56 = vector.broadcast %37 : vector<1x1x128xf32> to vector<4x4x128xf32>
    %57 = arith.subf %55, %56 : vector<4x4x128xf32>
    %58 = arith.mulf %57, %57 : vector<4x4x128xf32>
    %cst_21 = arith.constant dense<0.000000e+00> : vector<4x128xf32>
    %59 = vector.multi_reduction <add>, %58, %cst_21 [1] : vector<4x4x128xf32> to vector<4x128xf32>
    %60 = vector.shape_cast %59 : vector<4x128xf32> to vector<4x1x128xf32>
    %cst_22 = arith.constant dense<0.000000e+00> : vector<1x128xf32>
    %61 = vector.multi_reduction <add>, %60, %cst_22 [0] : vector<4x1x128xf32> to vector<1x128xf32>
    %62 = vector.shape_cast %61 : vector<1x128xf32> to vector<1x1x128xf32>
    %63 = arith.addf %54, %62 : vector<1x1x128xf32>
    %64 = vector.extract_strided_slice %12 {offsets = [0, 0, 384], sizes = [4, 4, 128], strides = [1, 1, 1]} : vector<4x4x512xf32> to vector<4x4x128xf32>
    %65 = vector.broadcast %37 : vector<1x1x128xf32> to vector<4x4x128xf32>
    %66 = arith.subf %64, %65 : vector<4x4x128xf32>
    %67 = arith.mulf %66, %66 : vector<4x4x128xf32>
    %cst_23 = arith.constant dense<0.000000e+00> : vector<4x128xf32>
    %68 = vector.multi_reduction <add>, %67, %cst_23 [1] : vector<4x4x128xf32> to vector<4x128xf32>
    %69 = vector.shape_cast %68 : vector<4x128xf32> to vector<4x1x128xf32>
    %cst_24 = arith.constant dense<0.000000e+00> : vector<1x128xf32>
    %70 = vector.multi_reduction <add>, %69, %cst_24 [0] : vector<4x1x128xf32> to vector<1x128xf32>
    %71 = vector.shape_cast %70 : vector<1x128xf32> to vector<1x1x128xf32>
    %72 = arith.addf %63, %71 : vector<1x1x128xf32>
    %cst_25 = arith.constant 1.562500e-02 : f32
    %73 = vector.broadcast %cst_25 : f32 to vector<1x1x128xf32>
    %74 = arith.mulf %72, %73 : vector<1x1x128xf32>
    %cst_26 = arith.constant 9.99999974E-6 : f32
    %75 = vector.broadcast %cst_26 : f32 to vector<1x1x128xf32>
    %76 = arith.addf %74, %75 : vector<1x1x128xf32>
    %77 = math.rsqrt %76 : vector<1x1x128xf32>
    %78 = vector.extract_strided_slice %12 {offsets = [0, 0, 0], sizes = [4, 4, 128], strides = [1, 1, 1]} : vector<4x4x512xf32> to vector<4x4x128xf32>
    %79 = vector.broadcast %37 : vector<1x1x128xf32> to vector<4x4x128xf32>
    %80 = arith.subf %78, %79 : vector<4x4x128xf32>
    %81 = vector.broadcast %77 : vector<1x1x128xf32> to vector<4x4x128xf32>
    %82 = arith.mulf %80, %81 : vector<4x4x128xf32>
    %cst_27 = arith.constant 0.000000e+00 : f32
    %83 = vector.broadcast %cst_27 : f32 to vector<4x4x128xf32>
    %84 = arith.maximumf %82, %83 : vector<4x4x128xf32>
    %85 = arith.truncf %84 : vector<4x4x128xf32> to vector<4x4x128xbf16>
    %c0_28 = arith.constant 0 : index
    %c0_29 = arith.constant 0 : index
    %c0_30 = arith.constant 0 : index
    %c0_31 = arith.constant 0 : index
    %86 = vector.load %arg3[%c0_28, %c0_29, %c0_30, %c0_31] : memref<1x4x4x512xbf16, #tpu.memory_space<vmem>>, vector<1x4x4x128xbf16>
    %87 = vector.shape_cast %86 : vector<1x4x4x128xbf16> to vector<4x4x128xbf16>
    %88 = vector.shape_cast %85 : vector<4x4x128xbf16> to vector<1x4x4x128xbf16>
    tpu.vector_store %arg3[%c0_28, %c0_29, %c0_30, %c0_31], %88 {strides = array<i32>} : memref<1x4x4x512xbf16, #tpu.memory_space<vmem>>, vector<1x4x4x128xbf16>,
    %89 = vector.extract_strided_slice %12 {offsets = [0, 0, 128], sizes = [4, 4, 128], strides = [1, 1, 1]} : vector<4x4x512xf32> to vector<4x4x128xf32>
    %90 = vector.broadcast %37 : vector<1x1x128xf32> to vector<4x4x128xf32>
    %91 = arith.subf %89, %90 : vector<4x4x128xf32>
    %92 = vector.broadcast %77 : vector<1x1x128xf32> to vector<4x4x128xf32>
    %93 = arith.mulf %91, %92 : vector<4x4x128xf32>
    %cst_32 = arith.constant 0.000000e+00 : f32
    %94 = vector.broadcast %cst_32 : f32 to vector<4x4x128xf32>
    %95 = arith.maximumf %93, %94 : vector<4x4x128xf32>
    %96 = arith.truncf %95 : vector<4x4x128xf32> to vector<4x4x128xbf16>
    %c0_33 = arith.constant 0 : index
    %c0_34 = arith.constant 0 : index
    %c0_35 = arith.constant 0 : index
    %c128 = arith.constant 128 : index
    %97 = vector.load %arg3[%c0_33, %c0_34, %c0_35, %c128] : memref<1x4x4x512xbf16, #tpu.memory_space<vmem>>, vector<1x4x4x128xbf16>
    %98 = vector.shape_cast %97 : vector<1x4x4x128xbf16> to vector<4x4x128xbf16>
    %99 = vector.shape_cast %96 : vector<4x4x128xbf16> to vector<1x4x4x128xbf16>
    tpu.vector_store %arg3[%c0_33, %c0_34, %c0_35, %c128], %99 {strides = array<i32>} : memref<1x4x4x512xbf16, #tpu.memory_space<vmem>>, vector<1x4x4x128xbf16>,
    %100 = vector.extract_strided_slice %12 {offsets = [0, 0, 256], sizes = [4, 4, 128], strides = [1, 1, 1]} : vector<4x4x512xf32> to vector<4x4x128xf32>
    %101 = vector.broadcast %37 : vector<1x1x128xf32> to vector<4x4x128xf32>
    %102 = arith.subf %100, %101 : vector<4x4x128xf32>
    %103 = vector.broadcast %77 : vector<1x1x128xf32> to vector<4x4x128xf32>
    %104 = arith.mulf %102, %103 : vector<4x4x128xf32>
    %cst_36 = arith.constant 0.000000e+00 : f32
    %105 = vector.broadcast %cst_36 : f32 to vector<4x4x128xf32>
    %106 = arith.maximumf %104, %105 : vector<4x4x128xf32>
    %107 = arith.truncf %106 : vector<4x4x128xf32> to vector<4x4x128xbf16>
    %c0_37 = arith.constant 0 : index
    %c0_38 = arith.constant 0 : index
    %c0_39 = arith.constant 0 : index
    %c256 = arith.constant 256 : index
    %108 = vector.load %arg3[%c0_37, %c0_38, %c0_39, %c256] : memref<1x4x4x512xbf16, #tpu.memory_space<vmem>>, vector<1x4x4x128xbf16>
    %109 = vector.shape_cast %108 : vector<1x4x4x128xbf16> to vector<4x4x128xbf16>
    %110 = vector.shape_cast %107 : vector<4x4x128xbf16> to vector<1x4x4x128xbf16>
    tpu.vector_store %arg3[%c0_37, %c0_38, %c0_39, %c256], %110 {strides = array<i32>} : memref<1x4x4x512xbf16, #tpu.memory_space<vmem>>, vector<1x4x4x128xbf16>,
    %111 = vector.extract_strided_slice %12 {offsets = [0, 0, 384], sizes = [4, 4, 128], strides = [1, 1, 1]} : vector<4x4x512xf32> to vector<4x4x128xf32>
    %112 = vector.broadcast %37 : vector<1x1x128xf32> to vector<4x4x128xf32>
    %113 = arith.subf %111, %112 : vector<4x4x128xf32>
    %114 = vector.broadcast %77 : vector<1x1x128xf32> to vector<4x4x128xf32>
    %115 = arith.mulf %113, %114 : vector<4x4x128xf32>
    %cst_40 = arith.constant 0.000000e+00 : f32
    %116 = vector.broadcast %cst_40 : f32 to vector<4x4x128xf32>
    %117 = arith.maximumf %115, %116 : vector<4x4x128xf32>
    %118 = arith.truncf %117 : vector<4x4x128xf32> to vector<4x4x128xbf16>
    %c0_41 = arith.constant 0 : index
    %c0_42 = arith.constant 0 : index
    %c0_43 = arith.constant 0 : index
    %c384 = arith.constant 384 : index
    %119 = vector.load %arg3[%c0_41, %c0_42, %c0_43, %c384] : memref<1x4x4x512xbf16, #tpu.memory_space<vmem>>, vector<1x4x4x128xbf16>
    %120 = vector.shape_cast %119 : vector<1x4x4x128xbf16> to vector<4x4x128xbf16>
    %121 = vector.shape_cast %118 : vector<4x4x128xbf16> to vector<1x4x4x128xbf16>
    tpu.vector_store %arg3[%c0_41, %c0_42, %c0_43, %c384], %121 {strides = array<i32>} : memref<1x4x4x512xbf16, #tpu.memory_space<vmem>>, vector<1x4x4x128xbf16>,
    return
  }
  func.func @transform_0(%arg0: i32) -> (i32, i32, i32) {
    %c0_i32 = arith.constant 0 : i32
    %c0_i32_0 = arith.constant 0 : i32
    %c0_i32_1 = arith.constant 0 : i32
    return %arg0, %c0_i32, %c0_i32_0 : i32, i32, i32
  }
  func.func @transform_1(%arg0: i32) -> (i32, i32, i32) {
    %c0_i32 = arith.constant 0 : i32
    %c0_i32_0 = arith.constant 0 : i32
    %c0_i32_1 = arith.constant 0 : i32
    %c0_i32_2 = arith.constant 0 : i32
    return %c0_i32, %c0_i32_0, %c0_i32_1 : i32, i32, i32
  }
  func.func @transform_2(%arg0: i32) -> (i32, i32, i32, i32) {
    %c0_i32 = arith.constant 0 : i32
    %c0_i32_0 = arith.constant 0 : i32
    %c0_i32_1 = arith.constant 0 : i32
    %c0_i32_2 = arith.constant 0 : i32
    return %arg0, %c0_i32, %c0_i32_0, %c0_i32_1 : i32, i32, i32, i32
  }
}

module attributes {stable_mosaic.version = 11 : i64} {
  func.func @kernel(%arg0: i32, %arg1: memref<1x72x64xbf16, #tpu.memory_space<vmem>>, %arg2: memref<2x64x512xbf16, #tpu.memory_space<vmem>>, %arg3: memref<1x8x8x512xbf16, #tpu.memory_space<vmem>>) attributes {dimension_semantics = [#tpu.dimension_semantics<parallel>], iteration_bounds = array<i64: 2>, scalar_prefetch = 0 : i64, scratch_operands = 0 : i64, tpu.core_type = #tpu.core_type<tc>, window_params = [{transform_indices = @transform_0, window_bounds = array<i64: 1, 72, 64>}, {pipeline_mode = #tpu.pipeline_mode<synchronous>, transform_indices = @transform_1, window_bounds = array<i64: 2, 64, 512>}, {transform_indices = @transform_2, window_bounds = array<i64: 1, 8, 8, 512>}]} {
    %c0 = arith.constant 0 : index
    %c0_0 = arith.constant 0 : index
    %c0_1 = arith.constant 0 : index
    %0 = vector.load %arg1[%c0, %c0_0, %c0_1] : memref<1x72x64xbf16, #tpu.memory_space<vmem>>, vector<1x72x64xbf16>
    %1 = vector.shape_cast %0 : vector<1x72x64xbf16> to vector<72x64xbf16>
    %2 = vector.extract_strided_slice %1 {offsets = [0, 0], sizes = [64, 64], strides = [1, 1]} : vector<72x64xbf16> to vector<64x64xbf16>
    %c0_2 = arith.constant 0 : index
    %c0_3 = arith.constant 0 : index
    %c0_4 = arith.constant 0 : index
    %3 = vector.load %arg2[%c0_2, %c0_3, %c0_4] : memref<2x64x512xbf16, #tpu.memory_space<vmem>>, vector<1x64x512xbf16>
    %4 = vector.shape_cast %3 : vector<1x64x512xbf16> to vector<64x512xbf16>
    %cst = arith.constant dense<0.000000e+00> : vector<64x512xf32>
    %5 = tpu.matmul %2, %4, %cst {dimension_numbers = #tpu.dot_dimension_numbers<[1], [0], [0], [1], [0, 0, 1, 1], [], []>} : vector<64x64xbf16>, vector<64x512xbf16>, vector<64x512xf32> -> vector<64x512xf32>
    %6 = vector.extract_strided_slice %1 {offsets = [8, 0], sizes = [64, 64], strides = [1, 1]} : vector<72x64xbf16> to vector<64x64xbf16>
    %c1 = arith.constant 1 : index
    %c0_5 = arith.constant 0 : index
    %c0_6 = arith.constant 0 : index
    %7 = vector.load %arg2[%c1, %c0_5, %c0_6] : memref<2x64x512xbf16, #tpu.memory_space<vmem>>, vector<1x64x512xbf16>
    %8 = vector.shape_cast %7 : vector<1x64x512xbf16> to vector<64x512xbf16>
    %cst_7 = arith.constant dense<0.000000e+00> : vector<64x512xf32>
    %9 = tpu.matmul %6, %8, %cst_7 {dimension_numbers = #tpu.dot_dimension_numbers<[1], [0], [0], [1], [0, 0, 1, 1], [], []>} : vector<64x64xbf16>, vector<64x512xbf16>, vector<64x512xf32> -> vector<64x512xf32>
    %10 = arith.addf %5, %9 : vector<64x512xf32>
    %11 = vector.shape_cast %10 : vector<64x512xf32> to vector<8x8x512xf32>
    %12 = vector.extract_strided_slice %11 {offsets = [0, 0, 0], sizes = [8, 8, 128], strides = [1, 1, 1]} : vector<8x8x512xf32> to vector<8x8x128xf32>
    %cst_8 = arith.constant dense<0.000000e+00> : vector<8x128xf32>
    %13 = vector.multi_reduction <add>, %12, %cst_8 [1] : vector<8x8x128xf32> to vector<8x128xf32>
    %14 = vector.shape_cast %13 : vector<8x128xf32> to vector<8x1x128xf32>
    %cst_9 = arith.constant dense<0.000000e+00> : vector<1x128xf32>
    %15 = vector.multi_reduction <add>, %14, %cst_9 [0] : vector<8x1x128xf32> to vector<1x128xf32>
    %16 = vector.shape_cast %15 : vector<1x128xf32> to vector<1x1x128xf32>
    %17 = vector.extract_strided_slice %11 {offsets = [0, 0, 128], sizes = [8, 8, 128], strides = [1, 1, 1]} : vector<8x8x512xf32> to vector<8x8x128xf32>
    %cst_10 = arith.constant dense<0.000000e+00> : vector<8x128xf32>
    %18 = vector.multi_reduction <add>, %17, %cst_10 [1] : vector<8x8x128xf32> to vector<8x128xf32>
    %19 = vector.shape_cast %18 : vector<8x128xf32> to vector<8x1x128xf32>
    %cst_11 = arith.constant dense<0.000000e+00> : vector<1x128xf32>
    %20 = vector.multi_reduction <add>, %19, %cst_11 [0] : vector<8x1x128xf32> to vector<1x128xf32>
    %21 = vector.shape_cast %20 : vector<1x128xf32> to vector<1x1x128xf32>
    %22 = arith.addf %16, %21 : vector<1x1x128xf32>
    %23 = vector.extract_strided_slice %11 {offsets = [0, 0, 256], sizes = [8, 8, 128], strides = [1, 1, 1]} : vector<8x8x512xf32> to vector<8x8x128xf32>
    %cst_12 = arith.constant dense<0.000000e+00> : vector<8x128xf32>
    %24 = vector.multi_reduction <add>, %23, %cst_12 [1] : vector<8x8x128xf32> to vector<8x128xf32>
    %25 = vector.shape_cast %24 : vector<8x128xf32> to vector<8x1x128xf32>
    %cst_13 = arith.constant dense<0.000000e+00> : vector<1x128xf32>
    %26 = vector.multi_reduction <add>, %25, %cst_13 [0] : vector<8x1x128xf32> to vector<1x128xf32>
    %27 = vector.shape_cast %26 : vector<1x128xf32> to vector<1x1x128xf32>
    %28 = arith.addf %22, %27 : vector<1x1x128xf32>
    %29 = vector.extract_strided_slice %11 {offsets = [0, 0, 384], sizes = [8, 8, 128], strides = [1, 1, 1]} : vector<8x8x512xf32> to vector<8x8x128xf32>
    %cst_14 = arith.constant dense<0.000000e+00> : vector<8x128xf32>
    %30 = vector.multi_reduction <add>, %29, %cst_14 [1] : vector<8x8x128xf32> to vector<8x128xf32>
    %31 = vector.shape_cast %30 : vector<8x128xf32> to vector<8x1x128xf32>
    %cst_15 = arith.constant dense<0.000000e+00> : vector<1x128xf32>
    %32 = vector.multi_reduction <add>, %31, %cst_15 [0] : vector<8x1x128xf32> to vector<1x128xf32>
    %33 = vector.shape_cast %32 : vector<1x128xf32> to vector<1x1x128xf32>
    %34 = arith.addf %28, %33 : vector<1x1x128xf32>
    %cst_16 = arith.constant 3.906250e-03 : f32
    %35 = vector.broadcast %cst_16 : f32 to vector<1x1x128xf32>
    %36 = arith.mulf %34, %35 : vector<1x1x128xf32>
    %37 = vector.extract_strided_slice %11 {offsets = [0, 0, 0], sizes = [8, 8, 128], strides = [1, 1, 1]} : vector<8x8x512xf32> to vector<8x8x128xf32>
    %38 = vector.broadcast %36 : vector<1x1x128xf32> to vector<8x8x128xf32>
    %39 = arith.subf %37, %38 : vector<8x8x128xf32>
    %40 = arith.mulf %39, %39 : vector<8x8x128xf32>
    %cst_17 = arith.constant dense<0.000000e+00> : vector<8x128xf32>
    %41 = vector.multi_reduction <add>, %40, %cst_17 [1] : vector<8x8x128xf32> to vector<8x128xf32>
    %42 = vector.shape_cast %41 : vector<8x128xf32> to vector<8x1x128xf32>
    %cst_18 = arith.constant dense<0.000000e+00> : vector<1x128xf32>
    %43 = vector.multi_reduction <add>, %42, %cst_18 [0] : vector<8x1x128xf32> to vector<1x128xf32>
    %44 = vector.shape_cast %43 : vector<1x128xf32> to vector<1x1x128xf32>
    %45 = vector.extract_strided_slice %11 {offsets = [0, 0, 128], sizes = [8, 8, 128], strides = [1, 1, 1]} : vector<8x8x512xf32> to vector<8x8x128xf32>
    %46 = vector.broadcast %36 : vector<1x1x128xf32> to vector<8x8x128xf32>
    %47 = arith.subf %45, %46 : vector<8x8x128xf32>
    %48 = arith.mulf %47, %47 : vector<8x8x128xf32>
    %cst_19 = arith.constant dense<0.000000e+00> : vector<8x128xf32>
    %49 = vector.multi_reduction <add>, %48, %cst_19 [1] : vector<8x8x128xf32> to vector<8x128xf32>
    %50 = vector.shape_cast %49 : vector<8x128xf32> to vector<8x1x128xf32>
    %cst_20 = arith.constant dense<0.000000e+00> : vector<1x128xf32>
    %51 = vector.multi_reduction <add>, %50, %cst_20 [0] : vector<8x1x128xf32> to vector<1x128xf32>
    %52 = vector.shape_cast %51 : vector<1x128xf32> to vector<1x1x128xf32>
    %53 = arith.addf %44, %52 : vector<1x1x128xf32>
    %54 = vector.extract_strided_slice %11 {offsets = [0, 0, 256], sizes = [8, 8, 128], strides = [1, 1, 1]} : vector<8x8x512xf32> to vector<8x8x128xf32>
    %55 = vector.broadcast %36 : vector<1x1x128xf32> to vector<8x8x128xf32>
    %56 = arith.subf %54, %55 : vector<8x8x128xf32>
    %57 = arith.mulf %56, %56 : vector<8x8x128xf32>
    %cst_21 = arith.constant dense<0.000000e+00> : vector<8x128xf32>
    %58 = vector.multi_reduction <add>, %57, %cst_21 [1] : vector<8x8x128xf32> to vector<8x128xf32>
    %59 = vector.shape_cast %58 : vector<8x128xf32> to vector<8x1x128xf32>
    %cst_22 = arith.constant dense<0.000000e+00> : vector<1x128xf32>
    %60 = vector.multi_reduction <add>, %59, %cst_22 [0] : vector<8x1x128xf32> to vector<1x128xf32>
    %61 = vector.shape_cast %60 : vector<1x128xf32> to vector<1x1x128xf32>
    %62 = arith.addf %53, %61 : vector<1x1x128xf32>
    %63 = vector.extract_strided_slice %11 {offsets = [0, 0, 384], sizes = [8, 8, 128], strides = [1, 1, 1]} : vector<8x8x512xf32> to vector<8x8x128xf32>
    %64 = vector.broadcast %36 : vector<1x1x128xf32> to vector<8x8x128xf32>
    %65 = arith.subf %63, %64 : vector<8x8x128xf32>
    %66 = arith.mulf %65, %65 : vector<8x8x128xf32>
    %cst_23 = arith.constant dense<0.000000e+00> : vector<8x128xf32>
    %67 = vector.multi_reduction <add>, %66, %cst_23 [1] : vector<8x8x128xf32> to vector<8x128xf32>
    %68 = vector.shape_cast %67 : vector<8x128xf32> to vector<8x1x128xf32>
    %cst_24 = arith.constant dense<0.000000e+00> : vector<1x128xf32>
    %69 = vector.multi_reduction <add>, %68, %cst_24 [0] : vector<8x1x128xf32> to vector<1x128xf32>
    %70 = vector.shape_cast %69 : vector<1x128xf32> to vector<1x1x128xf32>
    %71 = arith.addf %62, %70 : vector<1x1x128xf32>
    %cst_25 = arith.constant 3.906250e-03 : f32
    %72 = vector.broadcast %cst_25 : f32 to vector<1x1x128xf32>
    %73 = arith.mulf %71, %72 : vector<1x1x128xf32>
    %cst_26 = arith.constant 9.99999974E-6 : f32
    %74 = vector.broadcast %cst_26 : f32 to vector<1x1x128xf32>
    %75 = arith.addf %73, %74 : vector<1x1x128xf32>
    %76 = math.rsqrt %75 : vector<1x1x128xf32>
    %77 = vector.extract_strided_slice %11 {offsets = [0, 0, 0], sizes = [8, 8, 128], strides = [1, 1, 1]} : vector<8x8x512xf32> to vector<8x8x128xf32>
    %78 = vector.broadcast %36 : vector<1x1x128xf32> to vector<8x8x128xf32>
    %79 = arith.subf %77, %78 : vector<8x8x128xf32>
    %80 = vector.broadcast %76 : vector<1x1x128xf32> to vector<8x8x128xf32>
    %81 = arith.mulf %79, %80 : vector<8x8x128xf32>
    %cst_27 = arith.constant 0.000000e+00 : f32
    %82 = vector.broadcast %cst_27 : f32 to vector<8x8x128xf32>
    %83 = arith.maximumf %81, %82 : vector<8x8x128xf32>
    %84 = arith.truncf %83 : vector<8x8x128xf32> to vector<8x8x128xbf16>
    %c0_28 = arith.constant 0 : index
    %c0_29 = arith.constant 0 : index
    %c0_30 = arith.constant 0 : index
    %c0_31 = arith.constant 0 : index
    %85 = vector.load %arg3[%c0_28, %c0_29, %c0_30, %c0_31] : memref<1x8x8x512xbf16, #tpu.memory_space<vmem>>, vector<1x8x8x128xbf16>
    %86 = vector.shape_cast %85 : vector<1x8x8x128xbf16> to vector<8x8x128xbf16>
    %87 = vector.shape_cast %84 : vector<8x8x128xbf16> to vector<1x8x8x128xbf16>
    tpu.vector_store %arg3[%c0_28, %c0_29, %c0_30, %c0_31], %87 {strides = array<i32>} : memref<1x8x8x512xbf16, #tpu.memory_space<vmem>>, vector<1x8x8x128xbf16>,
    %88 = vector.extract_strided_slice %11 {offsets = [0, 0, 128], sizes = [8, 8, 128], strides = [1, 1, 1]} : vector<8x8x512xf32> to vector<8x8x128xf32>
    %89 = vector.broadcast %36 : vector<1x1x128xf32> to vector<8x8x128xf32>
    %90 = arith.subf %88, %89 : vector<8x8x128xf32>
    %91 = vector.broadcast %76 : vector<1x1x128xf32> to vector<8x8x128xf32>
    %92 = arith.mulf %90, %91 : vector<8x8x128xf32>
    %cst_32 = arith.constant 0.000000e+00 : f32
    %93 = vector.broadcast %cst_32 : f32 to vector<8x8x128xf32>
    %94 = arith.maximumf %92, %93 : vector<8x8x128xf32>
    %95 = arith.truncf %94 : vector<8x8x128xf32> to vector<8x8x128xbf16>
    %c0_33 = arith.constant 0 : index
    %c0_34 = arith.constant 0 : index
    %c0_35 = arith.constant 0 : index
    %c128 = arith.constant 128 : index
    %96 = vector.load %arg3[%c0_33, %c0_34, %c0_35, %c128] : memref<1x8x8x512xbf16, #tpu.memory_space<vmem>>, vector<1x8x8x128xbf16>
    %97 = vector.shape_cast %96 : vector<1x8x8x128xbf16> to vector<8x8x128xbf16>
    %98 = vector.shape_cast %95 : vector<8x8x128xbf16> to vector<1x8x8x128xbf16>
    tpu.vector_store %arg3[%c0_33, %c0_34, %c0_35, %c128], %98 {strides = array<i32>} : memref<1x8x8x512xbf16, #tpu.memory_space<vmem>>, vector<1x8x8x128xbf16>,
    %99 = vector.extract_strided_slice %11 {offsets = [0, 0, 256], sizes = [8, 8, 128], strides = [1, 1, 1]} : vector<8x8x512xf32> to vector<8x8x128xf32>
    %100 = vector.broadcast %36 : vector<1x1x128xf32> to vector<8x8x128xf32>
    %101 = arith.subf %99, %100 : vector<8x8x128xf32>
    %102 = vector.broadcast %76 : vector<1x1x128xf32> to vector<8x8x128xf32>
    %103 = arith.mulf %101, %102 : vector<8x8x128xf32>
    %cst_36 = arith.constant 0.000000e+00 : f32
    %104 = vector.broadcast %cst_36 : f32 to vector<8x8x128xf32>
    %105 = arith.maximumf %103, %104 : vector<8x8x128xf32>
    %106 = arith.truncf %105 : vector<8x8x128xf32> to vector<8x8x128xbf16>
    %c0_37 = arith.constant 0 : index
    %c0_38 = arith.constant 0 : index
    %c0_39 = arith.constant 0 : index
    %c256 = arith.constant 256 : index
    %107 = vector.load %arg3[%c0_37, %c0_38, %c0_39, %c256] : memref<1x8x8x512xbf16, #tpu.memory_space<vmem>>, vector<1x8x8x128xbf16>
    %108 = vector.shape_cast %107 : vector<1x8x8x128xbf16> to vector<8x8x128xbf16>
    %109 = vector.shape_cast %106 : vector<8x8x128xbf16> to vector<1x8x8x128xbf16>
    tpu.vector_store %arg3[%c0_37, %c0_38, %c0_39, %c256], %109 {strides = array<i32>} : memref<1x8x8x512xbf16, #tpu.memory_space<vmem>>, vector<1x8x8x128xbf16>,
    %110 = vector.extract_strided_slice %11 {offsets = [0, 0, 384], sizes = [8, 8, 128], strides = [1, 1, 1]} : vector<8x8x512xf32> to vector<8x8x128xf32>
    %111 = vector.broadcast %36 : vector<1x1x128xf32> to vector<8x8x128xf32>
    %112 = arith.subf %110, %111 : vector<8x8x128xf32>
    %113 = vector.broadcast %76 : vector<1x1x128xf32> to vector<8x8x128xf32>
    %114 = arith.mulf %112, %113 : vector<8x8x128xf32>
    %cst_40 = arith.constant 0.000000e+00 : f32
    %115 = vector.broadcast %cst_40 : f32 to vector<8x8x128xf32>
    %116 = arith.maximumf %114, %115 : vector<8x8x128xf32>
    %117 = arith.truncf %116 : vector<8x8x128xf32> to vector<8x8x128xbf16>
    %c0_41 = arith.constant 0 : index
    %c0_42 = arith.constant 0 : index
    %c0_43 = arith.constant 0 : index
    %c384 = arith.constant 384 : index
    %118 = vector.load %arg3[%c0_41, %c0_42, %c0_43, %c384] : memref<1x8x8x512xbf16, #tpu.memory_space<vmem>>, vector<1x8x8x128xbf16>
    %119 = vector.shape_cast %118 : vector<1x8x8x128xbf16> to vector<8x8x128xbf16>
    %120 = vector.shape_cast %117 : vector<8x8x128xbf16> to vector<1x8x8x128xbf16>
    tpu.vector_store %arg3[%c0_41, %c0_42, %c0_43, %c384], %120 {strides = array<i32>} : memref<1x8x8x512xbf16, #tpu.memory_space<vmem>>, vector<1x8x8x128xbf16>,
    return
  }
  func.func @transform_0(%arg0: i32) -> (i32, i32, i32) {
    %c0_i32 = arith.constant 0 : i32
    %c0_i32_0 = arith.constant 0 : i32
    %c0_i32_1 = arith.constant 0 : i32
    return %arg0, %c0_i32, %c0_i32_0 : i32, i32, i32
  }
  func.func @transform_1(%arg0: i32) -> (i32, i32, i32) {
    %c0_i32 = arith.constant 0 : i32
    %c0_i32_0 = arith.constant 0 : i32
    %c0_i32_1 = arith.constant 0 : i32
    %c0_i32_2 = arith.constant 0 : i32
    return %c0_i32, %c0_i32_0, %c0_i32_1 : i32, i32, i32
  }
  func.func @transform_2(%arg0: i32) -> (i32, i32, i32, i32) {
    %c0_i32 = arith.constant 0 : i32
    %c0_i32_0 = arith.constant 0 : i32
    %c0_i32_1 = arith.constant 0 : i32
    %c0_i32_2 = arith.constant 0 : i32
    return %arg0, %c0_i32, %c0_i32_0, %c0_i32_1 : i32, i32, i32, i32
  }
}

module attributes {stable_mosaic.version = 11 : i64} {
  func.func @kernel(%arg0: i32, %arg1: memref<1x288x48xbf16, #tpu.memory_space<vmem>>, %arg2: memref<3x48x128xbf16, #tpu.memory_space<vmem>>, %arg3: memref<1x16x16x128xbf16, #tpu.memory_space<vmem>>) attributes {dimension_semantics = [#tpu.dimension_semantics<parallel>], iteration_bounds = array<i64: 2>, scalar_prefetch = 0 : i64, scratch_operands = 0 : i64, tpu.core_type = #tpu.core_type<tc>, window_params = [{transform_indices = @transform_0, window_bounds = array<i64: 1, 288, 48>}, {pipeline_mode = #tpu.pipeline_mode<synchronous>, transform_indices = @transform_1, window_bounds = array<i64: 3, 48, 128>}, {transform_indices = @transform_2, window_bounds = array<i64: 1, 16, 16, 128>}]} {
    %c0 = arith.constant 0 : index
    %c0_0 = arith.constant 0 : index
    %c0_1 = arith.constant 0 : index
    %0 = vector.load %arg1[%c0, %c0_0, %c0_1] : memref<1x288x48xbf16, #tpu.memory_space<vmem>>, vector<1x288x48xbf16>
    %1 = vector.shape_cast %0 : vector<1x288x48xbf16> to vector<288x48xbf16>
    %2 = vector.extract_strided_slice %1 {offsets = [0, 0], sizes = [256, 48], strides = [1, 1]} : vector<288x48xbf16> to vector<256x48xbf16>
    %c0_2 = arith.constant 0 : index
    %c0_3 = arith.constant 0 : index
    %c0_4 = arith.constant 0 : index
    %3 = vector.load %arg2[%c0_2, %c0_3, %c0_4] : memref<3x48x128xbf16, #tpu.memory_space<vmem>>, vector<1x48x128xbf16>
    %4 = vector.shape_cast %3 : vector<1x48x128xbf16> to vector<48x128xbf16>
    %cst = arith.constant dense<0.000000e+00> : vector<256x128xf32>
    %5 = tpu.matmul %2, %4, %cst {dimension_numbers = #tpu.dot_dimension_numbers<[1], [0], [0], [1], [0, 0, 1, 1], [], []>} : vector<256x48xbf16>, vector<48x128xbf16>, vector<256x128xf32> -> vector<256x128xf32>
    %6 = vector.extract_strided_slice %1 {offsets = [16, 0], sizes = [256, 48], strides = [1, 1]} : vector<288x48xbf16> to vector<256x48xbf16>
    %c1 = arith.constant 1 : index
    %c0_5 = arith.constant 0 : index
    %c0_6 = arith.constant 0 : index
    %7 = vector.load %arg2[%c1, %c0_5, %c0_6] : memref<3x48x128xbf16, #tpu.memory_space<vmem>>, vector<1x48x128xbf16>
    %8 = vector.shape_cast %7 : vector<1x48x128xbf16> to vector<48x128xbf16>
    %cst_7 = arith.constant dense<0.000000e+00> : vector<256x128xf32>
    %9 = tpu.matmul %6, %8, %cst_7 {dimension_numbers = #tpu.dot_dimension_numbers<[1], [0], [0], [1], [0, 0, 1, 1], [], []>} : vector<256x48xbf16>, vector<48x128xbf16>, vector<256x128xf32> -> vector<256x128xf32>
    %10 = arith.addf %5, %9 : vector<256x128xf32>
    %11 = vector.extract_strided_slice %1 {offsets = [32, 0], sizes = [256, 48], strides = [1, 1]} : vector<288x48xbf16> to vector<256x48xbf16>
    %c2 = arith.constant 2 : index
    %c0_8 = arith.constant 0 : index
    %c0_9 = arith.constant 0 : index
    %12 = vector.load %arg2[%c2, %c0_8, %c0_9] : memref<3x48x128xbf16, #tpu.memory_space<vmem>>, vector<1x48x128xbf16>
    %13 = vector.shape_cast %12 : vector<1x48x128xbf16> to vector<48x128xbf16>
    %cst_10 = arith.constant dense<0.000000e+00> : vector<256x128xf32>
    %14 = tpu.matmul %11, %13, %cst_10 {dimension_numbers = #tpu.dot_dimension_numbers<[1], [0], [0], [1], [0, 0, 1, 1], [], []>} : vector<256x48xbf16>, vector<48x128xbf16>, vector<256x128xf32> -> vector<256x128xf32>
    %15 = arith.addf %10, %14 : vector<256x128xf32>
    %16 = vector.shape_cast %15 : vector<256x128xf32> to vector<16x16x128xf32>
    %cst_11 = arith.constant dense<0.000000e+00> : vector<16x128xf32>
    %17 = vector.multi_reduction <add>, %16, %cst_11 [1] : vector<16x16x128xf32> to vector<16x128xf32>
    %18 = vector.shape_cast %17 : vector<16x128xf32> to vector<16x1x128xf32>
    %cst_12 = arith.constant dense<0.000000e+00> : vector<1x128xf32>
    %19 = vector.multi_reduction <add>, %18, %cst_12 [0] : vector<16x1x128xf32> to vector<1x128xf32>
    %20 = vector.shape_cast %19 : vector<1x128xf32> to vector<1x1x128xf32>
    %cst_13 = arith.constant 3.906250e-03 : f32
    %21 = vector.broadcast %cst_13 : f32 to vector<1x1x128xf32>
    %22 = arith.mulf %20, %21 : vector<1x1x128xf32>
    %23 = vector.broadcast %22 : vector<1x1x128xf32> to vector<16x16x128xf32>
    %24 = arith.subf %16, %23 : vector<16x16x128xf32>
    %25 = arith.mulf %24, %24 : vector<16x16x128xf32>
    %cst_14 = arith.constant dense<0.000000e+00> : vector<16x128xf32>
    %26 = vector.multi_reduction <add>, %25, %cst_14 [1] : vector<16x16x128xf32> to vector<16x128xf32>
    %27 = vector.shape_cast %26 : vector<16x128xf32> to vector<16x1x128xf32>
    %cst_15 = arith.constant dense<0.000000e+00> : vector<1x128xf32>
    %28 = vector.multi_reduction <add>, %27, %cst_15 [0] : vector<16x1x128xf32> to vector<1x128xf32>
    %29 = vector.shape_cast %28 : vector<1x128xf32> to vector<1x1x128xf32>
    %cst_16 = arith.constant 3.906250e-03 : f32
    %30 = vector.broadcast %cst_16 : f32 to vector<1x1x128xf32>
    %31 = arith.mulf %29, %30 : vector<1x1x128xf32>
    %cst_17 = arith.constant 9.99999974E-6 : f32
    %32 = vector.broadcast %cst_17 : f32 to vector<1x1x128xf32>
    %33 = arith.addf %31, %32 : vector<1x1x128xf32>
    %34 = math.rsqrt %33 : vector<1x1x128xf32>
    %35 = vector.broadcast %22 : vector<1x1x128xf32> to vector<16x16x128xf32>
    %36 = arith.subf %16, %35 : vector<16x16x128xf32>
    %37 = vector.broadcast %34 : vector<1x1x128xf32> to vector<16x16x128xf32>
    %38 = arith.mulf %36, %37 : vector<16x16x128xf32>
    %cst_18 = arith.constant 0.000000e+00 : f32
    %39 = vector.broadcast %cst_18 : f32 to vector<16x16x128xf32>
    %40 = arith.maximumf %38, %39 : vector<16x16x128xf32>
    %41 = arith.truncf %40 : vector<16x16x128xf32> to vector<16x16x128xbf16>
    %c0_19 = arith.constant 0 : index
    %c0_20 = arith.constant 0 : index
    %c0_21 = arith.constant 0 : index
    %c0_22 = arith.constant 0 : index
    %42 = vector.load %arg3[%c0_19, %c0_20, %c0_21, %c0_22] : memref<1x16x16x128xbf16, #tpu.memory_space<vmem>>, vector<1x16x16x128xbf16>
    %43 = vector.shape_cast %42 : vector<1x16x16x128xbf16> to vector<16x16x128xbf16>
    %44 = vector.shape_cast %41 : vector<16x16x128xbf16> to vector<1x16x16x128xbf16>
    tpu.vector_store %arg3[%c0_19, %c0_20, %c0_21, %c0_22], %44 {strides = array<i32>} : memref<1x16x16x128xbf16, #tpu.memory_space<vmem>>, vector<1x16x16x128xbf16>,
    return
  }
  func.func @transform_0(%arg0: i32) -> (i32, i32, i32) {
    %c0_i32 = arith.constant 0 : i32
    %c0_i32_0 = arith.constant 0 : i32
    %c0_i32_1 = arith.constant 0 : i32
    return %arg0, %c0_i32, %c0_i32_0 : i32, i32, i32
  }
  func.func @transform_1(%arg0: i32) -> (i32, i32, i32) {
    %c0_i32 = arith.constant 0 : i32
    %c0_i32_0 = arith.constant 0 : i32
    %c0_i32_1 = arith.constant 0 : i32
    %c0_i32_2 = arith.constant 0 : i32
    return %c0_i32, %c0_i32_0, %c0_i32_1 : i32, i32, i32
  }
  func.func @transform_2(%arg0: i32) -> (i32, i32, i32, i32) {
    %c0_i32 = arith.constant 0 : i32
    %c0_i32_0 = arith.constant 0 : i32
    %c0_i32_1 = arith.constant 0 : i32
    %c0_i32_2 = arith.constant 0 : i32
    return %arg0, %c0_i32, %c0_i32_0, %c0_i32_1 : i32, i32, i32, i32
  }
}

module attributes {stable_mosaic.version = 11 : i64} {
  func.func @kernel(%arg0: i32, %arg1: memref<1x352x56xbf16, #tpu.memory_space<vmem>>, %arg2: memref<7x56x128xbf16, #tpu.memory_space<vmem>>, %arg3: memref<1x128xf32, #tpu.memory_space<vmem>>, %arg4: memref<1x16x16x128xf32, #tpu.memory_space<vmem>>) attributes {dimension_semantics = [#tpu.dimension_semantics<parallel>], iteration_bounds = array<i64: 2>, scalar_prefetch = 0 : i64, scratch_operands = 0 : i64, tpu.core_type = #tpu.core_type<tc>, window_params = [{transform_indices = @transform_0, window_bounds = array<i64: 1, 352, 56>}, {pipeline_mode = #tpu.pipeline_mode<synchronous>, transform_indices = @transform_1, window_bounds = array<i64: 7, 56, 128>}, {pipeline_mode = #tpu.pipeline_mode<synchronous>, transform_indices = @transform_2, window_bounds = array<i64: 1, 128>}, {transform_indices = @transform_3, window_bounds = array<i64: 1, 16, 16, 128>}]} {
    %c0 = arith.constant 0 : index
    %c0_0 = arith.constant 0 : index
    %c0_1 = arith.constant 0 : index
    %0 = vector.load %arg1[%c0, %c0_0, %c0_1] : memref<1x352x56xbf16, #tpu.memory_space<vmem>>, vector<1x352x56xbf16>
    %1 = vector.shape_cast %0 : vector<1x352x56xbf16> to vector<352x56xbf16>
    %2 = vector.extract_strided_slice %1 {offsets = [0, 0], sizes = [256, 56], strides = [1, 1]} : vector<352x56xbf16> to vector<256x56xbf16>
    %c0_2 = arith.constant 0 : index
    %c0_3 = arith.constant 0 : index
    %c0_4 = arith.constant 0 : index
    %3 = vector.load %arg2[%c0_2, %c0_3, %c0_4] : memref<7x56x128xbf16, #tpu.memory_space<vmem>>, vector<1x56x128xbf16>
    %4 = vector.shape_cast %3 : vector<1x56x128xbf16> to vector<56x128xbf16>
    %cst = arith.constant dense<0.000000e+00> : vector<256x128xf32>
    %5 = tpu.matmul %2, %4, %cst {dimension_numbers = #tpu.dot_dimension_numbers<[1], [0], [0], [1], [0, 0, 1, 1], [], []>} : vector<256x56xbf16>, vector<56x128xbf16>, vector<256x128xf32> -> vector<256x128xf32>
    %6 = vector.extract_strided_slice %1 {offsets = [16, 0], sizes = [256, 56], strides = [1, 1]} : vector<352x56xbf16> to vector<256x56xbf16>
    %c1 = arith.constant 1 : index
    %c0_5 = arith.constant 0 : index
    %c0_6 = arith.constant 0 : index
    %7 = vector.load %arg2[%c1, %c0_5, %c0_6] : memref<7x56x128xbf16, #tpu.memory_space<vmem>>, vector<1x56x128xbf16>
    %8 = vector.shape_cast %7 : vector<1x56x128xbf16> to vector<56x128xbf16>
    %cst_7 = arith.constant dense<0.000000e+00> : vector<256x128xf32>
    %9 = tpu.matmul %6, %8, %cst_7 {dimension_numbers = #tpu.dot_dimension_numbers<[1], [0], [0], [1], [0, 0, 1, 1], [], []>} : vector<256x56xbf16>, vector<56x128xbf16>, vector<256x128xf32> -> vector<256x128xf32>
    %10 = arith.addf %5, %9 : vector<256x128xf32>
    %11 = vector.extract_strided_slice %1 {offsets = [32, 0], sizes = [256, 56], strides = [1, 1]} : vector<352x56xbf16> to vector<256x56xbf16>
    %c2 = arith.constant 2 : index
    %c0_8 = arith.constant 0 : index
    %c0_9 = arith.constant 0 : index
    %12 = vector.load %arg2[%c2, %c0_8, %c0_9] : memref<7x56x128xbf16, #tpu.memory_space<vmem>>, vector<1x56x128xbf16>
    %13 = vector.shape_cast %12 : vector<1x56x128xbf16> to vector<56x128xbf16>
    %cst_10 = arith.constant dense<0.000000e+00> : vector<256x128xf32>
    %14 = tpu.matmul %11, %13, %cst_10 {dimension_numbers = #tpu.dot_dimension_numbers<[1], [0], [0], [1], [0, 0, 1, 1], [], []>} : vector<256x56xbf16>, vector<56x128xbf16>, vector<256x128xf32> -> vector<256x128xf32>
    %15 = arith.addf %10, %14 : vector<256x128xf32>
    %16 = vector.extract_strided_slice %1 {offsets = [48, 0], sizes = [256, 56], strides = [1, 1]} : vector<352x56xbf16> to vector<256x56xbf16>
    %c3 = arith.constant 3 : index
    %c0_11 = arith.constant 0 : index
    %c0_12 = arith.constant 0 : index
    %17 = vector.load %arg2[%c3, %c0_11, %c0_12] : memref<7x56x128xbf16, #tpu.memory_space<vmem>>, vector<1x56x128xbf16>
    %18 = vector.shape_cast %17 : vector<1x56x128xbf16> to vector<56x128xbf16>
    %cst_13 = arith.constant dense<0.000000e+00> : vector<256x128xf32>
    %19 = tpu.matmul %16, %18, %cst_13 {dimension_numbers = #tpu.dot_dimension_numbers<[1], [0], [0], [1], [0, 0, 1, 1], [], []>} : vector<256x56xbf16>, vector<56x128xbf16>, vector<256x128xf32> -> vector<256x128xf32>
    %20 = arith.addf %15, %19 : vector<256x128xf32>
    %21 = vector.extract_strided_slice %1 {offsets = [64, 0], sizes = [256, 56], strides = [1, 1]} : vector<352x56xbf16> to vector<256x56xbf16>
    %c4 = arith.constant 4 : index
    %c0_14 = arith.constant 0 : index
    %c0_15 = arith.constant 0 : index
    %22 = vector.load %arg2[%c4, %c0_14, %c0_15] : memref<7x56x128xbf16, #tpu.memory_space<vmem>>, vector<1x56x128xbf16>
    %23 = vector.shape_cast %22 : vector<1x56x128xbf16> to vector<56x128xbf16>
    %cst_16 = arith.constant dense<0.000000e+00> : vector<256x128xf32>
    %24 = tpu.matmul %21, %23, %cst_16 {dimension_numbers = #tpu.dot_dimension_numbers<[1], [0], [0], [1], [0, 0, 1, 1], [], []>} : vector<256x56xbf16>, vector<56x128xbf16>, vector<256x128xf32> -> vector<256x128xf32>
    %25 = arith.addf %20, %24 : vector<256x128xf32>
    %26 = vector.extract_strided_slice %1 {offsets = [80, 0], sizes = [256, 56], strides = [1, 1]} : vector<352x56xbf16> to vector<256x56xbf16>
    %c5 = arith.constant 5 : index
    %c0_17 = arith.constant 0 : index
    %c0_18 = arith.constant 0 : index
    %27 = vector.load %arg2[%c5, %c0_17, %c0_18] : memref<7x56x128xbf16, #tpu.memory_space<vmem>>, vector<1x56x128xbf16>
    %28 = vector.shape_cast %27 : vector<1x56x128xbf16> to vector<56x128xbf16>
    %cst_19 = arith.constant dense<0.000000e+00> : vector<256x128xf32>
    %29 = tpu.matmul %26, %28, %cst_19 {dimension_numbers = #tpu.dot_dimension_numbers<[1], [0], [0], [1], [0, 0, 1, 1], [], []>} : vector<256x56xbf16>, vector<56x128xbf16>, vector<256x128xf32> -> vector<256x128xf32>
    %30 = arith.addf %25, %29 : vector<256x128xf32>
    %31 = vector.extract_strided_slice %1 {offsets = [96, 0], sizes = [256, 56], strides = [1, 1]} : vector<352x56xbf16> to vector<256x56xbf16>
    %c6 = arith.constant 6 : index
    %c0_20 = arith.constant 0 : index
    %c0_21 = arith.constant 0 : index
    %32 = vector.load %arg2[%c6, %c0_20, %c0_21] : memref<7x56x128xbf16, #tpu.memory_space<vmem>>, vector<1x56x128xbf16>
    %33 = vector.shape_cast %32 : vector<1x56x128xbf16> to vector<56x128xbf16>
    %cst_22 = arith.constant dense<0.000000e+00> : vector<256x128xf32>
    %34 = tpu.matmul %31, %33, %cst_22 {dimension_numbers = #tpu.dot_dimension_numbers<[1], [0], [0], [1], [0, 0, 1, 1], [], []>} : vector<256x56xbf16>, vector<56x128xbf16>, vector<256x128xf32> -> vector<256x128xf32>
    %35 = arith.addf %30, %34 : vector<256x128xf32>
    %36 = vector.shape_cast %35 : vector<256x128xf32> to vector<16x16x128xf32>
    %c0_23 = arith.constant 0 : index
    %c0_24 = arith.constant 0 : index
    %37 = vector.load %arg3[%c0_23, %c0_24] : memref<1x128xf32, #tpu.memory_space<vmem>>, vector<1x128xf32>
    %38 = vector.shape_cast %37 : vector<1x128xf32> to vector<1x1x128xf32>
    %39 = vector.broadcast %38 : vector<1x1x128xf32> to vector<16x16x128xf32>
    %40 = arith.addf %36, %39 : vector<16x16x128xf32>
    %41 = math.tanh %40 : vector<16x16x128xf32>
    %c0_25 = arith.constant 0 : index
    %c0_26 = arith.constant 0 : index
    %c0_27 = arith.constant 0 : index
    %c0_28 = arith.constant 0 : index
    %42 = vector.load %arg4[%c0_25, %c0_26, %c0_27, %c0_28] : memref<1x16x16x128xf32, #tpu.memory_space<vmem>>, vector<1x16x16x128xf32>
    %43 = vector.shape_cast %42 : vector<1x16x16x128xf32> to vector<16x16x128xf32>
    %44 = vector.shape_cast %41 : vector<16x16x128xf32> to vector<1x16x16x128xf32>
    tpu.vector_store %arg4[%c0_25, %c0_26, %c0_27, %c0_28], %44 {strides = array<i32>} : memref<1x16x16x128xf32, #tpu.memory_space<vmem>>, vector<1x16x16x128xf32>,
    return
  }
  func.func @transform_0(%arg0: i32) -> (i32, i32, i32) {
    %c0_i32 = arith.constant 0 : i32
    %c0_i32_0 = arith.constant 0 : i32
    %c0_i32_1 = arith.constant 0 : i32
    return %arg0, %c0_i32, %c0_i32_0 : i32, i32, i32
  }
  func.func @transform_1(%arg0: i32) -> (i32, i32, i32) {
    %c0_i32 = arith.constant 0 : i32
    %c0_i32_0 = arith.constant 0 : i32
    %c0_i32_1 = arith.constant 0 : i32
    %c0_i32_2 = arith.constant 0 : i32
    return %c0_i32, %c0_i32_0, %c0_i32_1 : i32, i32, i32
  }
  func.func @transform_2(%arg0: i32) -> (i32, i32) {
    %c0_i32 = arith.constant 0 : i32
    %c0_i32_0 = arith.constant 0 : i32
    %c0_i32_1 = arith.constant 0 : i32
    return %c0_i32, %c0_i32_0 : i32, i32
  }
  func.func @transform_3(%arg0: i32) -> (i32, i32, i32, i32) {
    %c0_i32 = arith.constant 0 : i32
    %c0_i32_0 = arith.constant 0 : i32
    %c0_i32_1 = arith.constant 0 : i32
    %c0_i32_2 = arith.constant 0 : i32
    return %arg0, %c0_i32, %c0_i32_0, %c0_i32_1 : i32, i32, i32, i32
  }
}

</mosaic_0001>

<bundles_post_ra>
// kernel: warp_res_generator_forward.17
= control target key start
LH: loop header
LB: loop body
LE: loop exit
PB: predicated region body
PF: predicated region fallthrough
CT: control target
= control target key end

     0   :  { %s2201_s9 = smov 0   ;;  %s3019_s0 = inlined_call_operand.vmem [shape: bf16[2,352,21], index: 0, kind: input, shape index: {}]   ;;  %s3020_s1 = inlined_call_operand.vmem [shape: bf16[7,21,128], index: 1, kind: input, shape index: {}]   ;;  %s3021_s2 = inlined_call_operand.vmem [shape: bf16[2,16,16,128], index: 2, kind: output, shape index: {}]  }
   0x1 LB: > { %s1778_s10 = sadd.s32 4294967295, %s2183_s9   ;;  %p1782_p0 = scmp.ge.s32.totalorder %s2183_s9, 1  ;;  %s2183_s9 = sphi %s2201_s9, %s12_s9  }
   0x2   : > { %p112_p1 = scmp.lt.s32.totalorder %s2183_s9, 3 }
   0x4   : > { %p113_p2 = pnand %p1782_p0, %p112_p1 }
   0x6   : > { %116 = sbr.rel (%p113_p2) target bundleno = 741 (0x2e5), region = 28 }
   0xb   : > { %v1788_v0 = vld [vmem:[%s3020_s1 + $0x14] sm:$0x7]  ;;  %vm334_vm0 = vcmask 1041408   ;;  %vm335_vm1 = vcmask 1042432   ;;  %v2185_v2 = vmov 65535   ;;  %p134_p3 = scmp.lt.s32.totalorder %s1778_s10, 1 }
   0xc   : > { %v281_v1 = vunpack.c.l.b16 %v1788_v0  ;;  %v336_v3 = vsel %vm334_vm0, 4294967295, %v2185_v2  ;;  %v191_v4 = vld [vmem:[%s3020_s1 + $0x8] sm:$0x7]  ;;  %v1899_v5 = vld [vmem:[%s3020_s1 + $0x20] sm:$0x7]  ;;  %v2058_v22 = vld [vmem:[%s3020_s1 + $0xc] sm:$0xff] }
   0xd   : > { %v2218_v6 = vsel %vm335_vm1, %v336_v3, 0  ;;  %v440_v7 = vunpack.c.l.b16 %v191_v4  ;;  %v553_v8 = vunpack.c.l.b16 %v1899_v5  ;;  %v2007_v9 = vld [vmem:[%s3020_s1 + $0x50] sm:$0x7]  ;;  %v1953_v12 = vld [vmem:[%s3020_s1 + $0x38] sm:$0x7]  ;;  %s3074_s10 = smov (!%p134_p3, %s1778_s10), 1 }
   0xe   : > { %v283_v10 = vpack.c.b16 %v281_v1, %v281_v1  ;;  %v1133_v11 = vunpack.c.l.b16 %v2007_v9  ;;  %v1980_v13 = vld [vmem:[%s3020_s1 + $0x44] sm:$0x7]  ;;  %v843_v16 = vunpack.c.l.b16 %v1953_v12  ;;  %s2165_s23 = smul.u32 176, %s3074_s10  ;;  %v2059_v24 = vld [vmem:[%s3020_s1 + $0x18] sm:$0xff]  ;;  %vm285_vm2 = vcmask 171008   ;;  %v2063_v42 = vld [vmem:[%s3020_s1 + $0x48] sm:$0xff] }
   0xf   : > { %v442_v14 = vpack.c.b16 %v440_v7, %v440_v7  ;;  %v555_v15 = vpack.c.b16 %v553_v8, %v553_v8  ;;  %v988_v17 = vunpack.c.l.b16 %v1980_v13  ;;  %v2057_v23 = vld [vmem:[%s3020_s1] sm:$0xff]  ;;  %v2061_v43 = vld [vmem:[%s3020_s1 + $0x30] sm:$0xff]  ;;  %v1926_v47 = vld [vmem:[%s3020_s1 + $0x2c] sm:$0x7]  ;;  %s2034_s17 = sshll.u32 %s3074_s10, 7 }
  0x10   : > { %v339_v18 = vand.u32 %v2218_v6, %v283_v10  ;;  %v1135_v19 = vpack.c.b16 %v1133_v11, %v1133_v11  ;;  %s2247_s4 = scalar_lea.vmem %s3019_s0, %s2165_s23  ;;  %v845_v25 = vpack.c.b16 %v843_v16, %v843_v16  ;;  %v2062_v44 = vld [vmem:[%s3020_s1 + $0x3c] sm:$0xff]  ;;  %v698_v48 = vunpack.c.l.b16 %v1926_v47  ;;  %v2060_v56 = vld [vmem:[%s3020_s1 + $0x24] sm:$0xff]  ;;  %s2998_s20 = scalar_lea.vmem %s3021_s2, %s2034_s17 }
  0x11   : > { %v448_v20 = vand.u32 %v442_v14, %v2218_v6  ;;  %v561_v21 = vand.u32 %v555_v15, %v2218_v6  ;;  %v990_v26 = vpack.c.b16 %v988_v17, %v988_v17  ;;  %v2036_v28 = vld [vmem:[%s2247_s4 + $0x8] sm:$0xff]  ;;  %v2035_v30 = vld [vmem:[%s2247_s4] sm:$0xff]  ;;  %v2037_v31 = vld [vmem:[%s2247_s4 + $0x10] sm:$0xff] }
  0x12   : > { %347 = vmatpush.bf16.msra.mxu0 %v339_v18  ;;  %2159 = vmatpush.bf16.msra.mxu3 %v339_v18  ;;  %v1141_v27 = vand.u32 %v1135_v19, %v2218_v6  ;;  %v2252_v29 = vld [vmem:[%s2247_s4 + $0x68] sm:$0xff]  ;;  %v851_v32 = vand.u32 %v845_v25, %v2218_v6  ;;  %v2264_v34 = vld [vmem:[%s2247_s4 + $0x70] sm:$0xff]  ;;  %v2267_v35 = vld [vmem:[%s2247_s4 + $0x18] sm:$0xff]  ;;  %v700_v49 = vpack.c.b16 %v698_v48, %v698_v48 }
  0x13   : > { %456 = vmatpush.bf16.msra.mxu1 %v448_v20  ;;  %569 = vmatpush.bf16.msra.mxu2 %v561_v21  ;;  %v996_v33 = vand.u32 %v990_v26, %v2218_v6  ;;  %v2276_v36 = vld [vmem:[%s2247_s4 + $0x78] sm:$0xff]  ;;  %v2279_v37 = vld [vmem:[%s2247_s4 + $0x20] sm:$0xff]  ;;  %v2292_v39 = vld [vmem:[%s2247_s4 + $0x28] sm:$0xff] }
  0x14   : > { %v2289_v38 = vld [vmem:[%s2247_s4 + $0x80] sm:$0xff]  ;;  %v2306_v41 = vld [vmem:[%s2247_s4 + $0x30] sm:$0xff]  ;;  %v2326_v45 = vld [vmem:[%s2247_s4 + $0x38] sm:$0xff]  ;;  %v706_v50 = vand.u32 %v700_v49, %v2218_v6 }
  0x15   : > { %v2303_v40 = vld [vmem:[%s2247_s4 + $0x60] sm:$0xff]  ;;  %v2352_v51 = vld [vmem:[%s2247_s4 + $0x48] sm:$0xff]  ;;  %v2363_v53 = vld [vmem:[%s2247_s4 + $0x50] sm:$0xff] }
  0x16   : > { %348 = vmatpush.bf16.msra.mxu0 %v2058_v22  ;;  %2160 = vmatpush.bf16.msra.mxu3 %v2058_v22  ;;  %v2337_v46 = vld [vmem:[%s2247_s4 + $0x40] sm:$0xff]  ;;  %v2385_v3 = vld [vmem:[%s2247_s4 + $0x58] sm:$0xff]  ;;  %v2418_v26 = vld [vmem:[%s2247_s4 + $0x88] sm:$0xff] }
  0x17   : > { %457 = vmatpush.bf16.msra.mxu1 %v2057_v23  ;;  %570 = vmatpush.bf16.msra.mxu2 %v2059_v24 }
  0x19   : > { %1857 = vmatmul.msk.bf16.vlgmr.msra.gmra.mxu0 %vm285_vm2, %v2036_v28  ;;  %1869 = vmatmul.msk.bf16.vlgmr.msra.gmra.mxu3 %vm285_vm2, %v2252_v29 }
  0x1a   : > { %2161 = vmatpush.bf16.msrb.mxu3 %v448_v20  ;;  %1881 = vmatmul.msk.bf16.vlgmr.msra.gmra.mxu1 %vm285_vm2, %v2035_v30 }
  0x1b   : > { %1149 = vmatpush.bf16.msrb.mxu2 %v1141_v27  ;;  %859 = vmatpush.bf16.msrb.mxu0 %v851_v32 }
  0x1c   : > { %1908 = vmatmul.msk.bf16.vlgmr.msra.gmra.mxu2 %vm285_vm2, %v2037_v31  ;;  %1004 = vmatpush.bf16.msrb.mxu1 %v996_v33 }
  0x1e   : > { %2162 = vmatpush.bf16.msrb.mxu3 %v2057_v23 }
  0x1f   : > { %1150 = vmatpush.bf16.msrb.mxu2 %v2063_v42  ;;  %860 = vmatpush.bf16.msrb.mxu0 %v2061_v43 }
  0x20   : > { %1005 = vmatpush.bf16.msrb.mxu1 %v2062_v44 }
  0x22   : > { %2163 = vmatpush.bf16.msra.mxu3 %v561_v21 }
  0x26   : > { %2164 = vmatpush.bf16.msra.mxu3 %v2059_v24 }
  0x29   : > { %1858 = vmatmul.msk.bf16.gmra.mxu0 %vm285_vm2, %v2037_v31  ;;  %1870 = vmatmul.msk.bf16.gmra.mxu3 %vm285_vm2, %v2264_v34 }
  0x2a   : > { %1882 = vmatmul.msk.bf16.gmra.mxu1 %vm285_vm2, %v2036_v28 }
  0x2c   : > { %1909 = vmatmul.msk.bf16.gmra.mxu2 %vm285_vm2, %v2267_v35 }
  0x39   : > { %1859 = vmatmul.msk.bf16.gmra.mxu0 %vm285_vm2, %v2267_v35  ;;  %1871 = vmatmul.msk.bf16.gmra.mxu3 %vm285_vm2, %v2276_v36 }
  0x3a   : > { %1883 = vmatmul.msk.bf16.gmra.mxu1 %vm285_vm2, %v2037_v31 }
  0x3c   : > { %1910 = vmatmul.msk.bf16.gmra.mxu2 %vm285_vm2, %v2279_v37 }
  0x49   : > { %1860 = vmatmul.msk.bf16.gmra.mxu0 %vm285_vm2, %v2279_v37  ;;  %1872 = vmatmul.msk.bf16.gmra.mxu3 %vm285_vm2, %v2289_v38 }
  0x4a   : > { %1884 = vmatmul.msk.bf16.gmra.mxu1 %vm285_vm2, %v2267_v35 }
  0x4c   : > { %1911 = vmatmul.msk.bf16.gmra.mxu2 %vm285_vm2, %v2292_v39 }
  0x59   : > { %1861 = vmatmul.msk.bf16.gmra.mxu0 %vm285_vm2, %v2292_v39  ;;  %1893 = vmatmul.msk.bf16.vlgmr.msrb.gmra.mxu3 %vm285_vm2, %v2303_v40 }
  0x5a   : > { %1885 = vmatmul.msk.bf16.gmra.mxu1 %vm285_vm2, %v2279_v37  ;;  %714 = vmatpush.bf16.msrb.mxu3 %v706_v50 }
  0x5c   : > { %1912 = vmatmul.msk.bf16.gmra.mxu2 %vm285_vm2, %v2306_v41 }
  0x5e   : > { %715 = vmatpush.bf16.msrb.mxu3 %v2060_v56 }
  0x69   : > { %1862 = vmatmul.msk.bf16.gmra.mxu0 %vm285_vm2, %v2306_v41  ;;  %1894 = vmatmul.msk.bf16.gmra.mxu3 %vm285_vm2, %v2252_v29 }
  0x6a   : > { %1886 = vmatmul.msk.bf16.gmra.mxu1 %vm285_vm2, %v2292_v39 }
  0x6c   : > { %1913 = vmatmul.msk.bf16.gmra.mxu2 %vm285_vm2, %v2326_v45 }
  0x79   : > { %1863 = vmatmul.msk.bf16.gmra.mxu0 %vm285_vm2, %v2326_v45  ;;  %1895 = vmatmul.msk.bf16.gmra.mxu3 %vm285_vm2, %v2264_v34 }
  0x7a   : > { %1887 = vmatmul.msk.bf16.gmra.mxu1 %vm285_vm2, %v2306_v41 }
  0x7c   : > { %1914 = vmatmul.msk.bf16.gmra.mxu2 %vm285_vm2, %v2337_v46 }
  0x89   : > { %1864 = vmatmul.msk.bf16.gmra.mxu0 %vm285_vm2, %v2337_v46  ;;  %1896 = vmatmul.msk.bf16.gmra.mxu3 %vm285_vm2, %v2276_v36 }
  0x8a   : > { %1888 = vmatmul.msk.bf16.gmra.mxu1 %vm285_vm2, %v2326_v45 }
  0x8c   : > { %1915 = vmatmul.msk.bf16.gmra.mxu2 %vm285_vm2, %v2352_v51 }
  0x96   : > { %v350_v52 = vpop.f32.mrf.mxu0 }
  0x97   : > { %v459_v54 = vpop.f32.mrf.mxu1 }
  0x98   : > { %v460_v55 = vadd.f32 %v459_v54, %v350_v52 }
  0x99   : > { %1865 = vmatmul.msk.bf16.gmra.mxu0 %vm285_vm2, %v2352_v51  ;;  %1920 = vmatmul.msk.bf16.vlgmr.msra.gmra.mxu3 %vm285_vm2, %v2264_v34 }
  0x9a   : > { %1889 = vmatmul.msk.bf16.gmra.mxu1 %vm285_vm2, %v2337_v46 }
  0x9c   : > { %1916 = vmatmul.msk.bf16.gmra.mxu2 %vm285_vm2, %v2363_v53  ;;  %v2376_v57 = vpop.f32.mrf.mxu3 }
  0x9e   : > { %v352_v60 = vpop.f32.mrf.mxu0 }
  0x9f   : > { %v572_v58 = vpop.f32.mrf.mxu2  ;;  %v461_v61 = vpop.f32.mrf.mxu1 }
  0xa0   : > { %v2378_v59 = vadd.f32 %v572_v58, %v460_v55  ;;  %v462_v62 = vadd.f32 %v461_v61, %v352_v60 }
  0xa4   : > { %v2380_v63 = vpop.f32.mrf.mxu3 }
  0xa6   : > { %v355_v2 = vpop.f32.mrf.mxu0 }
  0xa7   : > { %v574_v0 = vpop.f32.mrf.mxu2  ;;  %v464_v4 = vpop.f32.mrf.mxu1 }
  0xa8   : > { %v2382_v1 = vadd.f32 %v574_v0, %v462_v62  ;;  %v465_v5 = vadd.f32 %v464_v4, %v355_v2 }
  0xa9   : > { %1866 = vmatmul.msk.bf16.gmra.mxu0 %vm285_vm2, %v2363_v53  ;;  %1921 = vmatmul.msk.bf16.gmra.mxu3 %vm285_vm2, %v2276_v36 }
  0xaa   : > { %1890 = vmatmul.msk.bf16.gmra.mxu1 %vm285_vm2, %v2352_v51 }
  0xac   : > { %1917 = vmatmul.msk.bf16.gmra.mxu2 %vm285_vm2, %v2385_v3  ;;  %v2395_v6 = vpop.f32.mrf.mxu3 }
  0xae   : > { %v357_v9 = vpop.f32.mrf.mxu0 }
  0xaf   : > { %v577_v7 = vpop.f32.mrf.mxu2  ;;  %v466_v10 = vpop.f32.mrf.mxu1 }
  0xb0   : > { %v2397_v8 = vadd.f32 %v577_v7, %v465_v5  ;;  %v467_v11 = vadd.f32 %v466_v10, %v357_v9 }
  0xb4   : > { %v2399_v12 = vpop.f32.mrf.mxu3 }
  0xb6   : > { %v360_v15 = vpop.f32.mrf.mxu0 }
  0xb7   : > { %v579_v13 = vpop.f32.mrf.mxu2  ;;  %v469_v16 = vpop.f32.mrf.mxu1 }
  0xb8   : > { %v2401_v14 = vadd.f32 %v579_v13, %v467_v11  ;;  %v470_v17 = vadd.f32 %v469_v16, %v360_v15 }
  0xb9   : > { %1867 = vmatmul.msk.bf16.gmra.mxu0 %vm285_vm2, %v2385_v3  ;;  %1922 = vmatmul.msk.bf16.gmra.mxu3 %vm285_vm2, %v2289_v38 }
  0xba   : > { %1891 = vmatmul.msk.bf16.gmra.mxu1 %vm285_vm2, %v2363_v53 }
  0xbc   : > { %1918 = vmatmul.msk.bf16.gmra.mxu2 %vm285_vm2, %v2303_v40  ;;  %v2411_v18 = vpop.f32.mrf.mxu3 }
  0xbe   : > { %v362_v21 = vpop.f32.mrf.mxu0 }
  0xbf   : > { %v582_v19 = vpop.f32.mrf.mxu2  ;;  %v471_v22 = vpop.f32.mrf.mxu1 }
  0xc0   : > { %v2413_v20 = vadd.f32 %v582_v19, %v470_v17  ;;  %v472_v23 = vadd.f32 %v471_v22, %v362_v21 }
  0xc4   : > { %v2415_v24 = vpop.f32.mrf.mxu3 }
  0xc6   : > { %v365_v28 = vpop.f32.mrf.mxu0 }
  0xc7   : > { %v584_v25 = vpop.f32.mrf.mxu2  ;;  %v474_v30 = vpop.f32.mrf.mxu1 }
  0xc8   : > { %v2420_v27 = vadd.f32 %v584_v25, %v472_v23  ;;  %v475_v31 = vadd.f32 %v474_v30, %v365_v28 }
  0xc9   : > { %1868 = vmatmul.msk.bf16.gmra.mxu0 %vm285_vm2, %v2303_v40  ;;  %1923 = vmatmul.msk.bf16.gmra.mxu3 %vm285_vm2, %v2418_v26 }
  0xca   : > { %1892 = vmatmul.msk.bf16.gmra.mxu1 %vm285_vm2, %v2385_v3 }
  0xcc   : > { %1919 = vmatmul.msk.bf16.gmra.mxu2 %vm285_vm2, %v2252_v29  ;;  %v2430_v32 = vpop.f32.mrf.mxu3 }
  0xce   : > { %v367_v43 = vpop.f32.mrf.mxu0 }
  0xcf   : > { %v587_v33 = vpop.f32.mrf.mxu2  ;;  %v476_v44 = vpop.f32.mrf.mxu1 }
  0xd0   : > { %v2432_v42 = vadd.f32 %v587_v33, %v475_v31  ;;  %v477_v47 = vadd.f32 %v476_v44, %v367_v43 }
  0xd4   : > { %v2434_v48 = vpop.f32.mrf.mxu3 }
  0xd6   : > { %v370_v52 = vpop.f32.mrf.mxu0 }
  0xd7   : > { %v589_v49 = vpop.f32.mrf.mxu2  ;;  %v479_v54 = vpop.f32.mrf.mxu1 }
  0xd8   : > { %v2436_v50 = vadd.f32 %v589_v49, %v477_v47  ;;  %v480_v55 = vadd.f32 %v479_v54, %v370_v52 }
  0xd9   : > { %1935 = vmatmul.msk.bf16.vlgmr.msrb.gmra.mxu3 %vm285_vm2, %v2267_v35  ;;  %1962 = vmatmul.msk.bf16.vlgmr.msrb.gmra.mxu0 %vm285_vm2, %v2279_v37 }
  0xda   : > { %1989 = vmatmul.msk.bf16.vlgmr.msrb.gmra.mxu1 %vm285_vm2, %v2292_v39 }
  0xdc   : > { %2016 = vmatmul.msk.bf16.vlgmr.msrb.gmra.mxu2 %vm285_vm2, %v2306_v41  ;;  %v519_v56 = vpop.f32.mrf.mxu3 }
  0xdd   : > { %v2447_v58 = vadd.f32 %v519_v56, %v2376_v57 }
  0xde   : > { %v372_v62 = vpop.f32.mrf.mxu0 }
  0xdf   : > { %v592_v60 = vpop.f32.mrf.mxu2  ;;  %v481_v0 = vpop.f32.mrf.mxu1 }
  0xe0   : > { %v2449_v61 = vadd.f32 %v592_v60, %v480_v55  ;;  %v482_v2 = vadd.f32 %v481_v0, %v372_v62 }
  0xe4   : > { %v521_v35 = vpop.f32.mrf.mxu3 }
  0xe5   : > { %v2452_v4 = vadd.f32 %v521_v35, %v2380_v63 }
  0xe6   : > { %v375_v9 = vpop.f32.mrf.mxu0 }
  0xe7   : > { %v594_v5 = vpop.f32.mrf.mxu2  ;;  %v484_v10 = vpop.f32.mrf.mxu1 }
  0xe8   : > { %v2454_v7 = vadd.f32 %v594_v5, %v482_v2  ;;  %v485_v11 = vadd.f32 %v484_v10, %v375_v9 }
  0xe9   : > { %1936 = vmatmul.msk.bf16.gmra.mxu3 %vm285_vm2, %v2279_v37  ;;  %1963 = vmatmul.msk.bf16.gmra.mxu0 %vm285_vm2, %v2292_v39 }
  0xea   : > { %1990 = vmatmul.msk.bf16.gmra.mxu1 %vm285_vm2, %v2306_v41 }
  0xec   : > { %2017 = vmatmul.msk.bf16.gmra.mxu2 %vm285_vm2, %v2326_v45  ;;  %v524_v57 = vpop.f32.mrf.mxu3 }
  0xed   : > { %v2465_v63 = vadd.f32 %v524_v57, %v2395_v6 }
  0xee   : > { %v377_v16 = vpop.f32.mrf.mxu0 }
  0xef   : > { %v597_v13 = vpop.f32.mrf.mxu2  ;;  %v486_v17 = vpop.f32.mrf.mxu1 }
  0xf0   : > { %v2467_v15 = vadd.f32 %v597_v13, %v485_v11  ;;  %v487_v19 = vadd.f32 %v486_v17, %v377_v16 }
  0xf4   : > { %v526_v37 = vpop.f32.mrf.mxu3 }
  0xf5   : > { %v2470_v21 = vadd.f32 %v526_v37, %v2399_v12 }
  0xf6   : > { %v380_v25 = vpop.f32.mrf.mxu0 }
  0xf7   : > { %v599_v22 = vpop.f32.mrf.mxu2  ;;  %v489_v28 = vpop.f32.mrf.mxu1 }
  0xf8   : > { %v2472_v23 = vadd.f32 %v599_v22, %v487_v19  ;;  %v490_v30 = vadd.f32 %v489_v28, %v380_v25 }
  0xf9   : > { %1937 = vmatmul.msk.bf16.gmra.mxu3 %vm285_vm2, %v2292_v39  ;;  %1964 = vmatmul.msk.bf16.gmra.mxu0 %vm285_vm2, %v2306_v41 }
  0xfa   : > { %1991 = vmatmul.msk.bf16.gmra.mxu1 %vm285_vm2, %v2326_v45 }
  0xfc   : > { %2018 = vmatmul.msk.bf16.gmra.mxu2 %vm285_vm2, %v2337_v46  ;;  %v529_v6 = vpop.f32.mrf.mxu3 }
  0xfd   : > { %v2483_v12 = vadd.f32 %v529_v6, %v2411_v18 }
  0xfe   : > { %v382_v43 = vpop.f32.mrf.mxu0 }
  0xff   : > { %v602_v31 = vpop.f32.mrf.mxu2  ;;  %v491_v44 = vpop.f32.mrf.mxu1 }
 0x100   : > { %v2485_v33 = vadd.f32 %v602_v31, %v490_v30  ;;  %v492_v47 = vadd.f32 %v491_v44, %v382_v43 }
 0x104   : > { %v531_v39 = vpop.f32.mrf.mxu3 }
 0x105   : > { %v2488_v49 = vadd.f32 %v531_v39, %v2415_v24 }
 0x106   : > { %v385_v55 = vpop.f32.mrf.mxu0 }
 0x107   : > { %v604_v52 = vpop.f32.mrf.mxu2  ;;  %v494_v56 = vpop.f32.mrf.mxu1 }
 0x108   : > { %v2490_v54 = vadd.f32 %v604_v52, %v492_v47  ;;  %v495_v60 = vadd.f32 %v494_v56, %v385_v55 }
 0x109   : > { %1938 = vmatmul.msk.bf16.gmra.mxu3 %vm285_vm2, %v2306_v41  ;;  %1965 = vmatmul.msk.bf16.gmra.mxu0 %vm285_vm2, %v2326_v45 }
 0x10a   : > { %1992 = vmatmul.msk.bf16.gmra.mxu1 %vm285_vm2, %v2337_v46 }
 0x10c   : > { %2019 = vmatmul.msk.bf16.gmra.mxu2 %vm285_vm2, %v2352_v51  ;;  %v534_v18 = vpop.f32.mrf.mxu3 }
 0x10d   : > { %v2501_v24 = vadd.f32 %v534_v18, %v2430_v32 }
 0x10e   : > { %v387_v2 = vpop.f32.mrf.mxu0 }
 0x10f   : > { %v607_v62 = vpop.f32.mrf.mxu2  ;;  %v496_v35 = vpop.f32.mrf.mxu1 }
 0x110   : > { %v2503_v0 = vadd.f32 %v607_v62, %v495_v60  ;;  %v497_v5 = vadd.f32 %v496_v35, %v387_v2 }
 0x114   : > { %v536_v41 = vpop.f32.mrf.mxu3 }
 0x115   : > { %v2506_v9 = vadd.f32 %v536_v41, %v2434_v48 }
 0x116   : > { %v390_v57 = vpop.f32.mrf.mxu0 }
 0x117   : > { %v609_v10 = vpop.f32.mrf.mxu2  ;;  %v499_v13 = vpop.f32.mrf.mxu1 }
 0x118   : > { %v2508_v11 = vadd.f32 %v609_v10, %v497_v5  ;;  %v500_v16 = vadd.f32 %v499_v13, %v390_v57 }
 0x119   : > { %1939 = vmatmul.msk.bf16.gmra.mxu3 %vm285_vm2, %v2326_v45  ;;  %1966 = vmatmul.msk.bf16.gmra.mxu0 %vm285_vm2, %v2337_v46 }
 0x11a   : > { %1993 = vmatmul.msk.bf16.gmra.mxu1 %vm285_vm2, %v2352_v51 }
 0x11c   : > { %2020 = vmatmul.msk.bf16.gmra.mxu2 %vm285_vm2, %v2363_v53  ;;  %v632_v32 = vpop.f32.mrf.mxu3 }
 0x11d   : > { %v2519_v17 = vadd.f32 %v632_v32, %v2447_v58 }
 0x11e   : > { %v392_v37 = vpop.f32.mrf.mxu0 }
 0x11f   : > { %v612_v48 = vpop.f32.mrf.mxu2  ;;  %v501_v22 = vpop.f32.mrf.mxu1 }
 0x120   : > { %v2521_v19 = vadd.f32 %v612_v48, %v500_v16  ;;  %v502_v25 = vadd.f32 %v501_v22, %v392_v37 }
 0x124   : > { %v634_v45 = vpop.f32.mrf.mxu3 }
 0x125   : > { %v2524_v30 = vadd.f32 %v634_v45, %v2452_v4 }
 0x126   : > { %v395_v31 = vpop.f32.mrf.mxu0 }
 0x127   : > { %v614_v28 = vpop.f32.mrf.mxu2  ;;  %v504_v43 = vpop.f32.mrf.mxu1 }
 0x128   : > { %v2526_v6 = vadd.f32 %v614_v28, %v502_v25  ;;  %v505_v44 = vadd.f32 %v504_v43, %v395_v31 }
 0x129   : > { %1940 = vmatmul.msk.bf16.gmra.mxu3 %vm285_vm2, %v2337_v46  ;;  %1967 = vmatmul.msk.bf16.gmra.mxu0 %vm285_vm2, %v2352_v51 }
 0x12a   : > { %1994 = vmatmul.msk.bf16.gmra.mxu1 %vm285_vm2, %v2363_v53 }
 0x12c   : > { %2021 = vmatmul.msk.bf16.gmra.mxu2 %vm285_vm2, %v2385_v3  ;;  %v637_v58 = vpop.f32.mrf.mxu3 }
 0x12d   : > { %v2537_v47 = vadd.f32 %v637_v58, %v2465_v63 }
 0x12e   : > { %v397_v52 = vpop.f32.mrf.mxu0 }
 0x12f   : > { %v617_v4 = vpop.f32.mrf.mxu2  ;;  %v506_v55 = vpop.f32.mrf.mxu1 }
 0x130   : > { %v2539_v39 = vadd.f32 %v617_v4, %v505_v44  ;;  %v507_v56 = vadd.f32 %v506_v55, %v397_v52 }
 0x134   : > { %v639_v46 = vpop.f32.mrf.mxu3 }
 0x135   : > { %v2542_v18 = vadd.f32 %v639_v46, %v2470_v21 }
 0x136   : > { %v400_v2 = vpop.f32.mrf.mxu0 }
 0x137   : > { %v619_v60 = vpop.f32.mrf.mxu2  ;;  %v509_v35 = vpop.f32.mrf.mxu1 }
 0x138   : > { %v2544_v62 = vadd.f32 %v619_v60, %v507_v56  ;;  %v510_v5 = vadd.f32 %v509_v35, %v400_v2 }
 0x139   : > { %1941 = vmatmul.msk.bf16.gmra.mxu3 %vm285_vm2, %v2352_v51  ;;  %1968 = vmatmul.msk.bf16.gmra.mxu0 %vm285_vm2, %v2363_v53 }
 0x13a   : > { %1995 = vmatmul.msk.bf16.gmra.mxu1 %vm285_vm2, %v2385_v3 }
 0x13c   : > { %2022 = vmatmul.msk.bf16.gmra.mxu2 %vm285_vm2, %v2303_v40  ;;  %v642_v63 = vpop.f32.mrf.mxu3 }
 0x13d   : > { %v2555_v41 = vadd.f32 %v642_v63, %v2483_v12 }
 0x13e   : > { %v402_v57 = vpop.f32.mrf.mxu0 }
 0x13f   : > { %v622_v21 = vpop.f32.mrf.mxu2  ;;  %v511_v13 = vpop.f32.mrf.mxu1 }
 0x140   : > { %v2557_v10 = vadd.f32 %v622_v21, %v510_v5  ;;  %v512_v16 = vadd.f32 %v511_v13, %v402_v57 }
 0x144   : > { %v644_v51 = vpop.f32.mrf.mxu3 }
 0x145   : > { %v2560_v48 = vadd.f32 %v644_v51, %v2488_v49 }
 0x146   : > { %v405_v22 = vpop.f32.mrf.mxu0 }
 0x147   : > { %v624_v32 = vpop.f32.mrf.mxu2  ;;  %v514_v25 = vpop.f32.mrf.mxu1 }
 0x148   : > { %v2562_v37 = vadd.f32 %v624_v32, %v512_v16  ;;  %v515_v45 = vadd.f32 %v514_v25, %v405_v22 }
 0x149   : > { %1942 = vmatmul.msk.bf16.gmra.mxu3 %vm285_vm2, %v2363_v53  ;;  %1969 = vmatmul.msk.bf16.gmra.mxu0 %vm285_vm2, %v2385_v3 }
 0x14a   : > { %1996 = vmatmul.msk.bf16.gmra.mxu1 %vm285_vm2, %v2303_v40 }
 0x14c   : > { %2023 = vmatmul.msk.bf16.gmra.mxu2 %vm285_vm2, %v2252_v29  ;;  %v647_v12 = vpop.f32.mrf.mxu3 }
 0x14d   : > { %v2573_v28 = vadd.f32 %v647_v12, %v2501_v24 }
 0x14e   : > { %v407_v43 = vpop.f32.mrf.mxu0 }
 0x14f   : > { %v627_v49 = vpop.f32.mrf.mxu2  ;;  %v516_v44 = vpop.f32.mrf.mxu1 }
 0x150   : > { %v2575_v31 = vadd.f32 %v627_v49, %v515_v45  ;;  %v517_v58 = vadd.f32 %v516_v44, %v407_v43 }
 0x154   : > { %v649_v53 = vpop.f32.mrf.mxu3 }
 0x155   : > { %v2578_v52 = vadd.f32 %v649_v53, %v2506_v9 }
 0x156   : > { %v862_v56 = vpop.f32.mrf.mxu0 }
 0x157   : > { %v629_v4 = vpop.f32.mrf.mxu2  ;;  %v1007_v46 = vpop.f32.mrf.mxu1 }
 0x158   : > { %v2580_v55 = vadd.f32 %v629_v4, %v517_v58 }
 0x159   : > { %1943 = vmatmul.msk.bf16.gmra.mxu3 %vm285_vm2, %v2385_v3  ;;  %1970 = vmatmul.msk.bf16.gmra.mxu0 %vm285_vm2, %v2303_v40 }
 0x15a   : > { %1997 = vmatmul.msk.bf16.gmra.mxu1 %vm285_vm2, %v2252_v29 }
 0x15c   : > { %2024 = vmatmul.msk.bf16.gmra.mxu2 %vm285_vm2, %v2264_v34  ;;  %v717_v24 = vpop.f32.mrf.mxu3 }
 0x15d   : > { %v797_v9 = vadd.f32 %v717_v24, %v2378_v59 }
 0x15e   : > { %v864_v2 = vpop.f32.mrf.mxu0 }
 0x15f   : > { %v1152_v60 = vpop.f32.mrf.mxu2  ;;  %v942_v35 = vadd.f32 %v862_v56, %v797_v9  ;;  %v1009_v5 = vpop.f32.mrf.mxu1 }
 0x161   : > { %v1087_v63 = vadd.f32 %v1007_v46, %v942_v35 }
 0x163   : > { %v2591_v21 = vadd.f32 %v1152_v60, %v1087_v63 }
 0x164   : > { %v719_v3 = vpop.f32.mrf.mxu3 }
 0x165   : > { %v798_v57 = vadd.f32 %v719_v3, %v2382_v1 }
 0x166   : > { %v867_v16 = vpop.f32.mrf.mxu0 }
 0x167   : > { %v1154_v13 = vpop.f32.mrf.mxu2  ;;  %v943_v51 = vadd.f32 %v864_v2, %v798_v57  ;;  %v1012_v32 = vpop.f32.mrf.mxu1 }
 0x169   : > { %v1088_v22 = vadd.f32 %v1009_v5, %v943_v51  ;;  %1944 = vmatmul.msk.bf16.gmra.mxu3 %vm285_vm2, %v2303_v40  ;;  %1971 = vmatmul.msk.bf16.gmra.mxu0 %vm285_vm2, %v2252_v29 }
 0x16a   : > { %1998 = vmatmul.msk.bf16.gmra.mxu1 %vm285_vm2, %v2264_v34 }
 0x16b   : > { %v2602_v59 = vadd.f32 %v1154_v13, %v1088_v22 }
 0x16c   : > { %2025 = vmatmul.msk.bf16.gmra.mxu2 %vm285_vm2, %v2276_v36  ;;  %v722_v1 = vpop.f32.mrf.mxu3 }
 0x16d   : > { %v1264_v25 = vadd.f32 %v2602_v59, %v2591_v21  ;;  %v799_v45 = vadd.f32 %v722_v1, %v2397_v8 }
 0x16e   : > { %v869_v49 = vpop.f32.mrf.mxu0 }
 0x16f   : > { %v1157_v12 = vpop.f32.mrf.mxu2  ;;  %v944_v40 = vadd.f32 %v867_v16, %v799_v45  ;;  %v1014_v43 = vpop.f32.mrf.mxu1  ;;  %v1265_v4 = vrot.slane %v1264_v25, 4 }
 0x171   : > { %v1089_v44 = vadd.f32 %v1012_v32, %v944_v40  ;;  %v1266_v2 = vadd.f32 %v1265_v4, %v1264_v25 }
 0x173   : > { %v2607_v58 = vadd.f32 %v1157_v12, %v1089_v44  ;;  %v1267_v5 = vrot.slane %v1266_v2, 2 }
 0x174   : > { %v724_v53 = vpop.f32.mrf.mxu3 }
 0x175   : > { %v800_v56 = vadd.f32 %v724_v53, %v2401_v14  ;;  %v1268_v32 = vadd.f32 %v1267_v5, %v1266_v2 }
 0x176   : > { %v872_v24 = vpop.f32.mrf.mxu0 }
 0x177   : > { %v1159_v46 = vpop.f32.mrf.mxu2  ;;  %v945_v9 = vadd.f32 %v869_v49, %v800_v56  ;;  %v1017_v60 = vpop.f32.mrf.mxu1  ;;  %v1269_v49 = vrot.slane %v1268_v32, 1 }
 0x179   : > { %v1090_v35 = vadd.f32 %v1014_v43, %v945_v9  ;;  %1945 = vmatmul.msk.bf16.gmra.mxu3 %vm285_vm2, %v2252_v29  ;;  %1972 = vmatmul.msk.bf16.gmra.mxu0 %vm285_vm2, %v2264_v34 }
 0x17a   : > { %1999 = vmatmul.msk.bf16.gmra.mxu1 %vm285_vm2, %v2276_v36 }
 0x17b   : > { %v2618_v8 = vadd.f32 %v1159_v46, %v1090_v35  ;;  %v1270_v46 = vadd.f32 %v1269_v49, %v1268_v32  ;;  %v2643_v49 = vld [vmem:[%s2247_s4 + $0x90] sm:$0xff] }
 0x17c   : > { %2026 = vmatmul.msk.bf16.gmra.mxu2 %vm285_vm2, %v2289_v38  ;;  %v727_v14 = vpop.f32.mrf.mxu3 }
 0x17d   : > { %v1271_v63 = vadd.f32 %v2618_v8, %v2607_v58  ;;  %v801_v3 = vadd.f32 %v727_v14, %v2413_v20 }
 0x17e   : > { %v874_v29 = vpop.f32.mrf.mxu0 }
 0x17f   : > { %v1162_v57 = vpop.f32.mrf.mxu2  ;;  %v1272_v13 = vrot.slane %v1271_v63, 4  ;;  %v946_v16 = vadd.f32 %v872_v24, %v801_v3  ;;  %v1019_v51 = vpop.f32.mrf.mxu1 }
 0x181   : > { %v1273_v22 = vadd.f32 %v1272_v13, %v1271_v63  ;;  %v1091_v1 = vadd.f32 %v1017_v60, %v946_v16 }
 0x183   : > { %v1274_v25 = vrot.slane %v1273_v22, 2  ;;  %v2623_v45 = vadd.f32 %v1162_v57, %v1091_v1 }
 0x184   : > { %v729_v12 = vpop.f32.mrf.mxu3 }
 0x185   : > { %v1275_v40 = vadd.f32 %v1274_v25, %v1273_v22  ;;  %v802_v43 = vadd.f32 %v729_v12, %v2420_v27 }
 0x186   : > { %v877_v53 = vpop.f32.mrf.mxu0 }
 0x187   : > { %v1164_v44 = vpop.f32.mrf.mxu2  ;;  %v1276_v4 = vrot.slane %v1275_v40, 1  ;;  %v947_v20 = vadd.f32 %v874_v29, %v802_v43  ;;  %v1022_v56 = vpop.f32.mrf.mxu1 }
 0x189   : > { %v1277_v9 = vadd.f32 %v1276_v4, %v1275_v40  ;;  %v1092_v24 = vadd.f32 %v1019_v51, %v947_v20  ;;  %1946 = vmatmul.msk.bf16.gmra.mxu3 %vm285_vm2, %v2264_v34  ;;  %1973 = vmatmul.msk.bf16.gmra.mxu0 %vm285_vm2, %v2276_v36 }
 0x18a   : > { %2000 = vmatmul.msk.bf16.gmra.mxu1 %vm285_vm2, %v2289_v38 }
 0x18b   : > { %v1376_v27 = vadd.f32 %v1277_v9, %v1270_v46  ;;  %v2634_v60 = vadd.f32 %v1164_v44, %v1092_v24 }
 0x18c   : > { %2027 = vmatmul.msk.bf16.gmra.mxu2 %vm285_vm2, %v2418_v26  ;;  %v732_v2 = vpop.f32.mrf.mxu3 }
 0x18d   : > { %v1278_v35 = vadd.f32 %v2634_v60, %v2623_v45  ;;  %v803_v14 = vadd.f32 %v732_v2, %v2432_v42 }
 0x18e   : > { %v879_v5 = vpop.f32.mrf.mxu0 }
 0x18f   : > { %v1167_v34 = vpop.f32.mrf.mxu2  ;;  %v1279_v63 = vrot.slane %v1278_v35, 4  ;;  %v948_v3 = vadd.f32 %v877_v53, %v803_v14  ;;  %v1024_v57 = vpop.f32.mrf.mxu1 }
 0x191   : > { %v1280_v29 = vadd.f32 %v1279_v63, %v1278_v35  ;;  %v1093_v13 = vadd.f32 %v1022_v56, %v948_v3 }
 0x193   : > { %v1281_v16 = vrot.slane %v1280_v29, 2  ;;  %v2639_v51 = vadd.f32 %v1167_v34, %v1093_v13 }
 0x194   : > { %v734_v32 = vpop.f32.mrf.mxu3 }
 0x195   : > { %v1282_v22 = vadd.f32 %v1281_v16, %v1280_v29  ;;  %v804_v1 = vadd.f32 %v734_v32, %v2436_v50  ;;  %v2662_v16 = vld [vmem:[%s2247_s4 + $0x98] sm:$0xff] }
 0x196   : > { %v882_v12 = vpop.f32.mrf.mxu0 }
 0x197   : > { %v1169_v25 = vpop.f32.mrf.mxu2  ;;  %v1283_v40 = vrot.slane %v1282_v22, 1  ;;  %v949_v42 = vadd.f32 %v879_v5, %v804_v1  ;;  %v1027_v43 = vpop.f32.mrf.mxu1 }
 0x199   : > { %v1284_v44 = vadd.f32 %v1283_v40, %v1282_v22  ;;  %v1094_v4 = vadd.f32 %v1024_v57, %v949_v42  ;;  %1947 = vmatmul.msk.bf16.gmra.mxu3 %vm285_vm2, %v2276_v36  ;;  %1974 = vmatmul.msk.bf16.gmra.mxu0 %vm285_vm2, %v2289_v38 }
 0x19a   : > { %2001 = vmatmul.msk.bf16.gmra.mxu1 %vm285_vm2, %v2418_v26 }
 0x19b   : > { %v1377_v50 = vadd.f32 %v1376_v27, %v1284_v44  ;;  %v2653_v53 = vadd.f32 %v1169_v25, %v1094_v4 }
 0x19c   : > { %2028 = vmatmul.msk.bf16.gmra.mxu2 %vm285_vm2, %v2643_v49  ;;  %v737_v20 = vpop.f32.mrf.mxu3 }
 0x19d   : > { %v1285_v56 = vadd.f32 %v2653_v53, %v2639_v51  ;;  %v805_v46 = vadd.f32 %v737_v20, %v2449_v61 }
 0x19e   : > { %v884_v9 = vpop.f32.mrf.mxu0 }
 0x19f   : > { %v1172_v36 = vpop.f32.mrf.mxu2  ;;  %v1286_v24 = vrot.slane %v1285_v56, 4  ;;  %v950_v2 = vadd.f32 %v882_v12, %v805_v46  ;;  %v1029_v35 = vpop.f32.mrf.mxu1 }
 0x1a1   : > { %v1287_v14 = vadd.f32 %v1286_v24, %v1285_v56  ;;  %v1095_v34 = vadd.f32 %v1027_v43, %v950_v2 }
 0x1a3   : > { %v1288_v5 = vrot.slane %v1287_v14, 2  ;;  %v2658_v63 = vadd.f32 %v1172_v36, %v1095_v34 }
 0x1a4   : > { %v739_v27 = vpop.f32.mrf.mxu3 }
 0x1a5   : > { %v1289_v3 = vadd.f32 %v1288_v5, %v1287_v14  ;;  %v806_v57 = vadd.f32 %v739_v27, %v2454_v7  ;;  %v2055_v5 = vld [vmem:[%s2247_s4 + $0xa0] sm:$0xff] }
 0x1a6   : > { %v887_v13 = vpop.f32.mrf.mxu0 }
 0x1a7   : > { %v1174_v29 = vpop.f32.mrf.mxu2  ;;  %v1290_v32 = vrot.slane %v1289_v3, 1  ;;  %v951_v61 = vadd.f32 %v884_v9, %v806_v57  ;;  %v1032_v22 = vpop.f32.mrf.mxu1 }
 0x1a9   : > { %v1291_v1 = vadd.f32 %v1290_v32, %v1289_v3  ;;  %v1096_v25 = vadd.f32 %v1029_v35, %v951_v61  ;;  %1948 = vmatmul.msk.bf16.gmra.mxu3 %vm285_vm2, %v2289_v38  ;;  %1975 = vmatmul.msk.bf16.gmra.mxu0 %vm285_vm2, %v2418_v26 }
 0x1aa   : > { %2002 = vmatmul.msk.bf16.gmra.mxu1 %vm285_vm2, %v2643_v49 }
 0x1ab   : > { %v1378_v7 = vadd.f32 %v1377_v50, %v1291_v1  ;;  %v2672_v12 = vadd.f32 %v1174_v29, %v1096_v25 }
 0x1ac   : > { %2029 = vmatmul.msk.bf16.gmra.mxu2 %vm285_vm2, %v2662_v16  ;;  %v742_v40 = vpop.f32.mrf.mxu3 }
 0x1ad   : > { %v1292_v42 = vadd.f32 %v2672_v12, %v2658_v63  ;;  %v807_v43 = vadd.f32 %v742_v40, %v2467_v15 }
 0x1ae   : > { %v889_v44 = vpop.f32.mrf.mxu0 }
 0x1af   : > { %v1177_v38 = vpop.f32.mrf.mxu2  ;;  %v1293_v4 = vrot.slane %v1292_v42, 4  ;;  %v952_v20 = vadd.f32 %v887_v13, %v807_v43  ;;  %v1034_v56 = vpop.f32.mrf.mxu1 }
 0x1b1   : > { %v1294_v46 = vadd.f32 %v1293_v4, %v1292_v42  ;;  %v1097_v36 = vadd.f32 %v1032_v22, %v952_v20 }
 0x1b3   : > { %v1295_v9 = vrot.slane %v1294_v46, 2  ;;  %v2677_v24 = vadd.f32 %v1177_v38, %v1097_v36 }
 0x1b4   : > { %v744_v50 = vpop.f32.mrf.mxu3 }
 0x1b5   : > { %v1296_v2 = vadd.f32 %v1295_v9, %v1294_v46  ;;  %v808_v35 = vadd.f32 %v744_v50, %v2472_v23  ;;  %v2056_v9 = vld [vmem:[%s2247_s4 + $0xa8] sm:$0xff] }
 0x1b6   : > { %v892_v34 = vpop.f32.mrf.mxu0 }
 0x1b7   : > { %v1179_v14 = vpop.f32.mrf.mxu2  ;;  %v1297_v27 = vrot.slane %v1296_v2, 1  ;;  %v953_v3 = vadd.f32 %v889_v44, %v808_v35  ;;  %v1037_v15 = vpop.f32.mrf.mxu1 }
 0x1b9   : > { %v1298_v57 = vadd.f32 %v1297_v27, %v1296_v2  ;;  %v1098_v29 = vadd.f32 %v1034_v56, %v953_v3  ;;  %1949 = vmatmul.msk.bf16.gmra.mxu3 %vm285_vm2, %v2418_v26  ;;  %1976 = vmatmul.msk.bf16.gmra.mxu0 %vm285_vm2, %v2643_v49 }
 0x1ba   : > { %2003 = vmatmul.msk.bf16.gmra.mxu1 %vm285_vm2, %v2662_v16 }
 0x1bb   : > { %v1379_v23 = vadd.f32 %v1378_v7, %v1298_v57  ;;  %v2688_v13 = vadd.f32 %v1179_v14, %v1098_v29 }
 0x1bc   : > { %2030 = vmatmul.msk.bf16.gmra.mxu2 %vm285_vm2, %v2055_v5  ;;  %v747_v32 = vpop.f32.mrf.mxu3 }
 0x1bd   : > { %v1299_v61 = vadd.f32 %v2688_v13, %v2677_v24  ;;  %v809_v22 = vadd.f32 %v747_v32, %v2485_v33 }
 0x1be   : > { %v894_v26 = vpop.f32.mrf.mxu0 }
 0x1bf   : > { %v1182_v1 = vpop.f32.mrf.mxu2  ;;  %v1300_v25 = vrot.slane %v1299_v61, 4  ;;  %v954_v40 = vadd.f32 %v892_v34, %v809_v22  ;;  %v1039_v42 = vpop.f32.mrf.mxu1 }
 0x1c1   : > { %v1301_v43 = vadd.f32 %v1300_v25, %v1299_v61  ;;  %v1099_v38 = vadd.f32 %v1037_v15, %v954_v40 }
 0x1c3   : > { %v1302_v44 = vrot.slane %v1301_v43, 2  ;;  %v2693_v4 = vadd.f32 %v1182_v1, %v1099_v38 }
 0x1c4   : > { %v749_v7 = vpop.f32.mrf.mxu3 }
 0x1c5   : > { %v1303_v20 = vadd.f32 %v1302_v44, %v1301_v43  ;;  %v810_v56 = vadd.f32 %v749_v7, %v2490_v54 }
 0x1c6   : > { %v897_v36 = vpop.f32.mrf.mxu0 }
 0x1c7   : > { %v1184_v46 = vpop.f32.mrf.mxu2  ;;  %v1304_v50 = vrot.slane %v1303_v20, 1  ;;  %v955_v2 = vadd.f32 %v894_v26, %v810_v56  ;;  %v1042_v33 = vpop.f32.mrf.mxu1 }
 0x1c9   : > { %v1305_v35 = vadd.f32 %v1304_v50, %v1303_v20  ;;  %v1100_v14 = vadd.f32 %v1039_v42, %v955_v2  ;;  %1950 = vmatmul.msk.bf16.gmra.mxu3 %vm285_vm2, %v2643_v49  ;;  %1977 = vmatmul.msk.bf16.gmra.mxu0 %vm285_vm2, %v2662_v16 }
 0x1ca   : > { %2004 = vmatmul.msk.bf16.gmra.mxu1 %vm285_vm2, %v2055_v5 }
 0x1cb   : > { %v1380_v34 = vadd.f32 %v1379_v23, %v1305_v35  ;;  %v2703_v54 = vadd.f32 %v1184_v46, %v1100_v14 }
 0x1cc   : > { %2031 = vmatmul.msk.bf16.gmra.mxu2 %vm285_vm2, %v2056_v9  ;;  %v752_v27 = vpop.f32.mrf.mxu3 }
 0x1cd   : > { %v1306_v3 = vadd.f32 %v2703_v54, %v2693_v4  ;;  %v811_v15 = vadd.f32 %v752_v27, %v2503_v0 }
 0x1ce   : > { %v899_v29 = vpop.f32.mrf.mxu0 }
 0x1cf   : > { %v1187_v57 = vpop.f32.mrf.mxu2  ;;  %v1307_v32 = vrot.slane %v1306_v3, 4  ;;  %v956_v49 = vadd.f32 %v897_v36, %v811_v15  ;;  %v1044_v61 = vpop.f32.mrf.mxu1 }
 0x1d1   : > { %v1308_v22 = vadd.f32 %v1307_v32, %v1306_v3  ;;  %v1101_v16 = vadd.f32 %v1042_v33, %v956_v49 }
 0x1d3   : > { %v1309_v1 = vrot.slane %v1308_v22, 2  ;;  %v2708_v26 = vadd.f32 %v1187_v57, %v1101_v16 }
 0x1d4   : > { %v754_v5 = vpop.f32.mrf.mxu3 }
 0x1d5   : > { %v1310_v23 = vadd.f32 %v1309_v1, %v1308_v22  ;;  %v812_v25 = vadd.f32 %v754_v5, %v2508_v11 }
 0x1d6   : > { %v902_v42 = vpop.f32.mrf.mxu0 }
 0x1d7   : > { %v1189_v40 = vpop.f32.mrf.mxu2  ;;  %v1311_v43 = vrot.slane %v1310_v23, 1  ;;  %v957_v38 = vadd.f32 %v899_v29, %v812_v25  ;;  %v1047_v44 = vpop.f32.mrf.mxu1 }
 0x1d9   : > { %v1312_v0 = vadd.f32 %v1311_v43, %v1310_v23  ;;  %v1102_v7 = vadd.f32 %v1044_v61, %v957_v38 }
 0x1db   : > { %v1381_v20 = vadd.f32 %v1380_v34, %v1312_v0  ;;  %v2711_v56 = vadd.f32 %v1189_v40, %v1102_v7 }
 0x1dc   : > { %v757_v46 = vpop.f32.mrf.mxu3 }
 0x1dd   : > { %v1313_v36 = vadd.f32 %v2711_v56, %v2708_v26  ;;  %v813_v9 = vadd.f32 %v757_v46, %v2521_v19 }
 0x1de   : > { %v904_v2 = vpop.f32.mrf.mxu0 }
 0x1df   : > { %v1192_v50 = vpop.f32.mrf.mxu2  ;;  %v1314_v33 = vrot.slane %v1313_v36, 4  ;;  %v958_v11 = vadd.f32 %v902_v42, %v813_v9  ;;  %v1049_v35 = vpop.f32.mrf.mxu1 }
 0x1e1   : > { %v1315_v14 = vadd.f32 %v1314_v33, %v1313_v36  ;;  %v1103_v27 = vadd.f32 %v1047_v44, %v958_v11 }
 0x1e3   : > { %v1316_v3 = vrot.slane %v1315_v14, 2  ;;  %v2716_v15 = vadd.f32 %v1192_v50, %v1103_v27 }
 0x1e4   : > { %v759_v57 = vpop.f32.mrf.mxu3 }
 0x1e5   : > { %v1317_v34 = vadd.f32 %v1316_v3, %v1315_v14  ;;  %v814_v29 = vadd.f32 %v759_v57, %v2526_v6 }
 0x1e6   : > { %v907_v49 = vpop.f32.mrf.mxu0 }
 0x1e7   : > { %v1194_v32 = vpop.f32.mrf.mxu2  ;;  %v1318_v61 = vrot.slane %v1317_v34, 1  ;;  %v959_v22 = vadd.f32 %v904_v2, %v814_v29  ;;  %v1052_v16 = vpop.f32.mrf.mxu1 }
 0x1e9   : > { %v1319_v19 = vadd.f32 %v1318_v61, %v1317_v34  ;;  %v1104_v1 = vadd.f32 %v1049_v35, %v959_v22 }
 0x1eb   : > { %v1382_v5 = vadd.f32 %v1381_v20, %v1319_v19  ;;  %v2719_v23 = vadd.f32 %v1194_v32, %v1104_v1 }
 0x1ec   : > { %v762_v25 = vpop.f32.mrf.mxu3 }
 0x1ed   : > { %v1320_v40 = vadd.f32 %v2719_v23, %v2716_v15  ;;  %v815_v42 = vadd.f32 %v762_v25, %v2539_v39 }
 0x1ee   : > { %v909_v38 = vpop.f32.mrf.mxu0 }
 0x1ef   : > { %v1197_v43 = vpop.f32.mrf.mxu2  ;;  %v1321_v44 = vrot.slane %v1320_v40, 4  ;;  %v960_v6 = vadd.f32 %v907_v49, %v815_v42  ;;  %v1054_v0 = vpop.f32.mrf.mxu1 }
 0x1f1   : > { %v1322_v7 = vadd.f32 %v1321_v44, %v1320_v40  ;;  %v1105_v46 = vadd.f32 %v1052_v16, %v960_v6 }
 0x1f3   : > { %v1323_v36 = vrot.slane %v1322_v7, 2  ;;  %v2724_v9 = vadd.f32 %v1197_v43, %v1105_v46 }
 0x1f4   : > { %v764_v50 = vpop.f32.mrf.mxu3 }
 0x1f5   : > { %v1324_v20 = vadd.f32 %v1323_v36, %v1322_v7  ;;  %v816_v2 = vadd.f32 %v764_v50, %v2544_v62 }
 0x1f6   : > { %v912_v11 = vpop.f32.mrf.mxu0 }
 0x1f7   : > { %v1199_v33 = vpop.f32.mrf.mxu2  ;;  %v1325_v35 = vrot.slane %v1324_v20, 1  ;;  %v961_v14 = vadd.f32 %v909_v38, %v816_v2  ;;  %v1057_v27 = vpop.f32.mrf.mxu1 }
 0x1f9   : > { %v1326_v39 = vadd.f32 %v1325_v35, %v1324_v20  ;;  %v1106_v3 = vadd.f32 %v1054_v0, %v961_v14 }
 0x1fb   : > { %v1383_v57 = vadd.f32 %v1382_v5, %v1326_v39  ;;  %v2727_v34 = vadd.f32 %v1199_v33, %v1106_v3 }
 0x1fc   : > { %v767_v29 = vpop.f32.mrf.mxu3 }
 0x1fd   : > { %v1327_v32 = vadd.f32 %v2727_v34, %v2724_v9  ;;  %v817_v49 = vadd.f32 %v767_v29, %v2557_v10 }
 0x1fe   : > { %v914_v22 = vpop.f32.mrf.mxu0 }
 0x1ff   : > { %v1202_v61 = vpop.f32.mrf.mxu2  ;;  %v1328_v16 = vrot.slane %v1327_v32, 4  ;;  %v962_v62 = vadd.f32 %v912_v11, %v817_v49  ;;  %v1059_v19 = vpop.f32.mrf.mxu1 }
 0x201   : > { %v1329_v1 = vadd.f32 %v1328_v16, %v1327_v32  ;;  %v1107_v25 = vadd.f32 %v1057_v27, %v962_v62 }
 0x203   : > { %v1330_v40 = vrot.slane %v1329_v1, 2  ;;  %v2732_v42 = vadd.f32 %v1202_v61, %v1107_v25 }
 0x204   : > { %v769_v43 = vpop.f32.mrf.mxu3 }
 0x205   : > { %v1331_v5 = vadd.f32 %v1330_v40, %v1329_v1  ;;  %v818_v38 = vadd.f32 %v769_v43, %v2562_v37 }
 0x206   : > { %v917_v6 = vpop.f32.mrf.mxu0 }
 0x207   : > { %v1204_v44 = vpop.f32.mrf.mxu2  ;;  %v1332_v0 = vrot.slane %v1331_v5, 1  ;;  %v963_v7 = vadd.f32 %v914_v22, %v818_v38  ;;  %v1062_v46 = vpop.f32.mrf.mxu1 }
 0x209   : > { %v1333_v10 = vadd.f32 %v1332_v0, %v1331_v5  ;;  %v1108_v36 = vadd.f32 %v1059_v19, %v963_v7 }
 0x20b   : > { %v1384_v50 = vadd.f32 %v1383_v57, %v1333_v10  ;;  %v2735_v20 = vadd.f32 %v1204_v44, %v1108_v36 }
 0x20c   : > { %v772_v2 = vpop.f32.mrf.mxu3 }
 0x20d   : > { %v1334_v33 = vadd.f32 %v2735_v20, %v2732_v42  ;;  %v819_v11 = vadd.f32 %v772_v2, %v2575_v31 }
 0x20e   : > { %v919_v14 = vpop.f32.mrf.mxu0 }
 0x20f   : > { %v1207_v35 = vpop.f32.mrf.mxu2  ;;  %v1335_v27 = vrot.slane %v1334_v33, 4  ;;  %v964_v37 = vadd.f32 %v917_v6, %v819_v11  ;;  %v1064_v39 = vpop.f32.mrf.mxu1 }
 0x211   : > { %v1336_v3 = vadd.f32 %v1335_v27, %v1334_v33  ;;  %v1109_v29 = vadd.f32 %v1062_v46, %v964_v37 }
 0x213   : > { %v1337_v32 = vrot.slane %v1336_v3, 2  ;;  %v2740_v49 = vadd.f32 %v1207_v35, %v1109_v29 }
 0x214   : > { %v774_v61 = vpop.f32.mrf.mxu3 }
 0x215   : > { %v1338_v57 = vadd.f32 %v1337_v32, %v1336_v3  ;;  %v820_v22 = vadd.f32 %v774_v61, %v2580_v55 }
 0x216   : > { %v922_v62 = vpop.f32.mrf.mxu0 }
 0x217   : > { %v1209_v16 = vpop.f32.mrf.mxu2  ;;  %v1339_v19 = vrot.slane %v1338_v57, 1  ;;  %v965_v1 = vadd.f32 %v919_v14, %v820_v22  ;;  %v1067_v25 = vpop.f32.mrf.mxu1 }
 0x219   : > { %v1340_v31 = vadd.f32 %v1339_v19, %v1338_v57  ;;  %v1110_v40 = vadd.f32 %v1064_v39, %v965_v1 }
 0x21b   : > { %v1385_v43 = vadd.f32 %v1384_v50, %v1340_v31  ;;  %v2743_v5 = vadd.f32 %v1209_v16, %v1110_v40 }
 0x21c   : > { %v777_v38 = vpop.f32.mrf.mxu3 }
 0x21d   : > { %v1341_v44 = vadd.f32 %v2743_v5, %v2740_v49  ;;  %v821_v46 = vadd.f32 %v777_v38, %v2519_v17 }
 0x21e   : > { %v924_v0 = vpop.f32.mrf.mxu0 }
 0x21f   : > { %v1212_v6 = vpop.f32.mrf.mxu2  ;;  %v1342_v7 = vrot.slane %v1341_v44, 4  ;;  %v1069_v55 = vpop.f32.mrf.mxu1  ;;  %v966_v2 = vadd.f32 %v922_v62, %v821_v46 }
 0x221   : > { %v1343_v10 = vadd.f32 %v1342_v7, %v1341_v44  ;;  %v1111_v37 = vadd.f32 %v1067_v25, %v966_v2 }
 0x223   : > { %v1344_v36 = vrot.slane %v1343_v10, 2  ;;  %v2749_v57 = vadd.f32 %v1212_v6, %v1111_v37 }
 0x224   : > { %v779_v33 = vpop.f32.mrf.mxu3 }
 0x225   : > { %v1345_v11 = vadd.f32 %v1344_v36, %v1343_v10  ;;  %v822_v35 = vadd.f32 %v779_v33, %v2524_v30 }
 0x226   : > { %v927_v14 = vpop.f32.mrf.mxu0 }
 0x227   : > { %v1214_v50 = vpop.f32.mrf.mxu2  ;;  %v1346_v27 = vrot.slane %v1345_v11, 1  ;;  %v967_v39 = vadd.f32 %v924_v0, %v822_v35  ;;  %v1072_v3 = vpop.f32.mrf.mxu1 }
 0x229   : > { %v1347_v29 = vadd.f32 %v1346_v27, %v1345_v11  ;;  %v1112_v32 = vadd.f32 %v1069_v55, %v967_v39 }
 0x22b   : > { %v1386_v61 = vadd.f32 %v1385_v43, %v1347_v29  ;;  %v2751_v17 = vadd.f32 %v1214_v50, %v1112_v32 }
 0x22c   : > { %v782_v22 = vpop.f32.mrf.mxu3 }
 0x22d   : > { %v1348_v16 = vadd.f32 %v2751_v17, %v2749_v57  ;;  %v823_v1 = vadd.f32 %v782_v22, %v2537_v47 }
 0x22e   : > { %v929_v19 = vpop.f32.mrf.mxu0 }
 0x22f   : > { %v1217_v62 = vpop.f32.mrf.mxu2  ;;  %v1349_v30 = vrot.slane %v1348_v16, 4  ;;  %v1074_v31 = vpop.f32.mrf.mxu1  ;;  %v968_v38 = vadd.f32 %v927_v14, %v823_v1 }
 0x231   : > { %v1350_v25 = vadd.f32 %v1349_v30, %v1348_v16  ;;  %v1113_v46 = vadd.f32 %v1072_v3, %v968_v38 }
 0x233   : > { %v1351_v40 = vrot.slane %v1350_v25, 2  ;;  %v2757_v35 = vadd.f32 %v1217_v62, %v1113_v46 }
 0x234   : > { %v784_v44 = vpop.f32.mrf.mxu3 }
 0x235   : > { %v1352_v0 = vadd.f32 %v1351_v40, %v1350_v25  ;;  %v824_v43 = vadd.f32 %v784_v44, %v2542_v18 }
 0x236   : > { %v932_v10 = vpop.f32.mrf.mxu0 }
 0x237   : > { %v1219_v6 = vpop.f32.mrf.mxu2  ;;  %v1353_v7 = vrot.slane %v1352_v0, 1  ;;  %v969_v55 = vadd.f32 %v929_v19, %v824_v43  ;;  %v1077_v33 = vpop.f32.mrf.mxu1 }
 0x239   : > { %v1354_v36 = vadd.f32 %v1353_v7, %v1352_v0  ;;  %v1114_v2 = vadd.f32 %v1074_v31, %v969_v55 }
 0x23b   : > { %v1387_v11 = vadd.f32 %v1386_v61, %v1354_v36  ;;  %v2759_v47 = vadd.f32 %v1219_v6, %v1114_v2 }
 0x23c   : > { %v787_v50 = vpop.f32.mrf.mxu3 }
 0x23d   : > { %v1355_v14 = vadd.f32 %v2759_v47, %v2757_v35  ;;  %v825_v18 = vadd.f32 %v787_v50, %v2555_v41 }
 0x23e   : > { %v934_v3 = vpop.f32.mrf.mxu0 }
 0x23f   : > { %v1222_v27 = vpop.f32.mrf.mxu2  ;;  %v1356_v37 = vrot.slane %v1355_v14, 4  ;;  %v970_v32 = vadd.f32 %v932_v10, %v825_v18  ;;  %v1079_v22 = vpop.f32.mrf.mxu1 }
 0x241   : > { %v1357_v39 = vadd.f32 %v1356_v37, %v1355_v14  ;;  %v1115_v1 = vadd.f32 %v1077_v33, %v970_v32 }
 0x243   : > { %v1358_v29 = vrot.slane %v1357_v39, 2  ;;  %v2765_v44 = vadd.f32 %v1222_v27, %v1115_v1 }
 0x244   : > { %v789_v16 = vpop.f32.mrf.mxu3 }
 0x245   : > { %v1359_v19 = vadd.f32 %v1358_v29, %v1357_v39  ;;  %v826_v61 = vadd.f32 %v789_v16, %v2560_v48 }
 0x246   : > { %v937_v41 = vpop.f32.mrf.mxu0 }
 0x247   : > { %v1224_v62 = vpop.f32.mrf.mxu2  ;;  %v1360_v30 = vrot.slane %v1359_v19, 1  ;;  %v971_v31 = vadd.f32 %v934_v3, %v826_v61  ;;  %v1082_v7 = vpop.f32.mrf.mxu1 }
 0x249   : > { %v1361_v25 = vadd.f32 %v1360_v30, %v1359_v19  ;;  %v1116_v40 = vadd.f32 %v1079_v22, %v971_v31 }
 0x24b   : > { %v1388_v38 = vadd.f32 %v1387_v11, %v1361_v25  ;;  %v2767_v0 = vadd.f32 %v1224_v62, %v1116_v40 }
 0x24c   : > { %v792_v43 = vpop.f32.mrf.mxu3 }
 0x24d   : > { %v1362_v6 = vadd.f32 %v2767_v0, %v2765_v44  ;;  %v827_v48 = vadd.f32 %v792_v43, %v2573_v28 }
 0x24e   : > { %v939_v14 = vpop.f32.mrf.mxu0 }
 0x24f   : > { %v1363_v46 = vrot.slane %v1362_v6, 4  ;;  %v1227_v55 = vpop.f32.mrf.mxu2  ;;  %v972_v2 = vadd.f32 %v937_v41, %v827_v48  ;;  %v1084_v39 = vpop.f32.mrf.mxu1 }
 0x251   : > { %v1364_v10 = vadd.f32 %v1363_v46, %v1362_v6  ;;  %v1117_v37 = vadd.f32 %v1082_v7, %v972_v2 }
 0x253   : > { %v1365_v36 = vrot.slane %v1364_v10, 2  ;;  %v1262_v16 = vadd.f32 %v1227_v55, %v1117_v37 }
 0x254   : > { %v794_v33 = vpop.f32.mrf.mxu3 }
 0x255   : > { %v1366_v50 = vadd.f32 %v1365_v36, %v1364_v10  ;;  %v828_v11 = vadd.f32 %v794_v33, %v2578_v52 }
 0x257   : > { %v1367_v27 = vrot.slane %v1366_v50, 1  ;;  %v973_v18 = vadd.f32 %v939_v14, %v828_v11  ;;  %v1229_v32 = vpop.f32.mrf.mxu2 }
 0x259   : > { %v1368_v3 = vadd.f32 %v1367_v27, %v1366_v50  ;;  %v1118_v29 = vadd.f32 %v1084_v39, %v973_v18 }
 0x25b   : > { %v1389_v22 = vadd.f32 %v1388_v38, %v1368_v3  ;;  %v1263_v19 = vadd.f32 %v1229_v32, %v1118_v29 }
 0x25d   : > { %v1369_v28 = vadd.f32 %v1263_v19, %v1262_v16 }
 0x25f   : > { %v1370_v61 = vrot.slane %v1369_v28, 4 }
 0x261   : > { %v1371_v62 = vadd.f32 %v1370_v61, %v1369_v28 }
 0x263   : > { %v1372_v30 = vrot.slane %v1371_v62, 2 }
 0x265   : > { %v1373_v1 = vadd.f32 %v1372_v30, %v1371_v62 }
 0x267   : > { %v1374_v31 = vrot.slane %v1373_v1, 1 }
 0x269   : > { %v1375_v25 = vadd.f32 %v1374_v31, %v1373_v1 }
 0x26b   : > { %v1390_v40 = vadd.f32 %v1389_v22, %v1375_v25 }
 0x26d   : > { %v1391_v52 = vmul.f32 0.00390625, %v1390_v40 }
 0x26f   : > { %v2774_v41 = vsub.f32 %v2591_v21, %v1391_v52  ;;  %v2777_v43 = vsub.f32 %v2602_v59, %v1391_v52  ;;  %v2780_v6 = vsub.f32 %v2607_v58, %v1391_v52  ;;  %v2783_v38 = vsub.f32 %v2618_v8, %v1391_v52 }
 0x270   : > { %v2786_v7 = vsub.f32 %v2623_v45, %v1391_v52  ;;  %v2789_v46 = vsub.f32 %v2634_v60, %v1391_v52  ;;  %v2792_v48 = vsub.f32 %v2639_v51, %v1391_v52  ;;  %v2795_v21 = vsub.f32 %v2653_v53, %v1391_v52 }
 0x271   : > { %v2798_v59 = vsub.f32 %v2658_v63, %v1391_v52  ;;  %v2801_v58 = vsub.f32 %v2672_v12, %v1391_v52  ;;  %v2804_v8 = vsub.f32 %v2677_v24, %v1391_v52  ;;  %v2807_v45 = vsub.f32 %v2688_v13, %v1391_v52 }
 0x272   : > { %v2810_v60 = vsub.f32 %v2693_v4, %v1391_v52  ;;  %v2813_v51 = vsub.f32 %v2703_v54, %v1391_v52  ;;  %v2816_v53 = vsub.f32 %v2708_v26, %v1391_v52  ;;  %v2819_v63 = vsub.f32 %v2711_v56, %v1391_v52 }
 0x273   : > { %v2822_v12 = vsub.f32 %v2716_v15, %v1391_v52  ;;  %v2825_v24 = vsub.f32 %v2719_v23, %v1391_v52  ;;  %v2828_v13 = vsub.f32 %v2724_v9, %v1391_v52  ;;  %v2831_v4 = vsub.f32 %v2727_v34, %v1391_v52 }
 0x274   : > { %3039 = vst [vmem:[#allocation2_spill] sm:$0xff] %v2819_v63  ;;  %v2834_v54 = vsub.f32 %v2732_v42, %v1391_v52  ;;  %v2837_v26 = vsub.f32 %v2735_v20, %v1391_v52  ;;  %v2840_v56 = vsub.f32 %v2740_v49, %v1391_v52  ;;  %v2843_v15 = vsub.f32 %v2743_v5, %v1391_v52 }
 0x275   : > { %3040 = vst [vmem:[#allocation3_spill] sm:$0xff] %v2822_v12  ;;  %v2846_v23 = vsub.f32 %v2749_v57, %v1391_v52  ;;  %v2849_v9 = vsub.f32 %v2751_v17, %v1391_v52  ;;  %v2852_v34 = vsub.f32 %v2757_v35, %v1391_v52  ;;  %v2855_v42 = vsub.f32 %v2759_v47, %v1391_v52 }
 0x276   : > { %3041 = vst [vmem:[#allocation4_spill] sm:$0xff] %v2825_v24  ;;  %v2858_v20 = vsub.f32 %v2765_v44, %v1391_v52  ;;  %v2861_v49 = vsub.f32 %v2767_v0, %v1391_v52  ;;  %v2863_v5 = vsub.f32 %v1262_v16, %v1391_v52  ;;  %v2865_v55 = vsub.f32 %v1263_v19, %v1391_v52 }
 0x277   : > { %3042 = vst [vmem:[#allocation5_spill] sm:$0xff] %v2828_v13  ;;  %v1424_v57 = vmul.f32 %v2774_v41, %v2774_v41  ;;  %v1425_v17 = vmul.f32 %v2777_v43, %v2777_v43  ;;  %v1426_v35 = vmul.f32 %v2780_v6, %v2780_v6  ;;  %v1427_v47 = vmul.f32 %v2783_v38, %v2783_v38 }
 0x278   : > { %3043 = vst [vmem:[#allocation6_spill] sm:$0xff] %v2831_v4  ;;  %v1428_v44 = vmul.f32 %v2786_v7, %v2786_v7  ;;  %v1429_v0 = vmul.f32 %v2789_v46, %v2789_v46  ;;  %v1436_v10 = vmul.f32 %v2810_v60, %v2810_v60  ;;  %v1437_v36 = vmul.f32 %v2813_v51, %v2813_v51 }
 0x279   : > { %3044 = vst [vmem:[#allocation7_spill] sm:$0xff] %v2834_v54  ;;  %v1438_v2 = vmul.f32 %v2816_v53, %v2816_v53  ;;  %v1439_v33 = vmul.f32 %v2819_v63, %v2819_v63  ;;  %v1430_v50 = vmul.f32 %v2792_v48, %v2792_v48  ;;  %v1431_v11 = vmul.f32 %v2795_v21, %v2795_v21 }
 0x27a   : > { %3045 = vst [vmem:[#allocation8_spill] sm:$0xff] %v2837_v26  ;;  %v1432_v14 = vmul.f32 %v2798_v59, %v2798_v59  ;;  %v1456_v27 = vadd.f32 %v1425_v17, %v1424_v57  ;;  %v1463_v37 = vadd.f32 %v1427_v47, %v1426_v35  ;;  %v1433_v18 = vmul.f32 %v2801_v58, %v2801_v58 }
 0x27b   : > { %3046 = vst [vmem:[#allocation9_spill] sm:$0xff] %v2840_v56  ;;  %v1470_v39 = vadd.f32 %v1429_v0, %v1428_v44  ;;  %v1498_v3 = vadd.f32 %v1437_v36, %v1436_v10  ;;  %v1505_v29 = vadd.f32 %v1439_v33, %v1438_v2  ;;  %v1434_v32 = vmul.f32 %v2804_v8, %v2804_v8 }
 0x27c   : > { %3047 = vst [vmem:[#allocation10_spill] sm:$0xff] %v2843_v15  ;;  %v1435_v22 = vmul.f32 %v2807_v45, %v2807_v45  ;;  %v1457_v16 = vrot.slane %v1456_v27, 4  ;;  %v1464_v19 = vrot.slane %v1463_v37, 4  ;;  %v1477_v61 = vadd.f32 %v1431_v11, %v1430_v50 }
 0x27d   : > { %3048 = vst [vmem:[#allocation11_spill] sm:$0xff] %v2846_v23  ;;  %v1471_v28 = vrot.slane %v1470_v39, 4  ;;  %v1484_v62 = vadd.f32 %v1433_v18, %v1432_v14  ;;  %v1440_v30 = vmul.f32 %v2822_v12, %v2822_v12  ;;  %v1441_v1 = vmul.f32 %v2825_v24, %v2825_v24 }
 0x27e   : > { %3049 = vst [vmem:[#allocation12_spill] sm:$0xff] %v2849_v9  ;;  %v1442_v31 = vmul.f32 %v2828_v13, %v2828_v13  ;;  %v1443_v25 = vmul.f32 %v2831_v4, %v2831_v4  ;;  %v1444_v40 = vmul.f32 %v2834_v54, %v2834_v54  ;;  %v1445_v52 = vmul.f32 %v2837_v26, %v2837_v26 }
 0x27f   : > { %3050 = vst [vmem:[#allocation13_spill] sm:$0xff] %v2852_v34  ;;  %v1446_v57 = vmul.f32 %v2840_v56, %v2840_v56  ;;  %v1458_v17 = vadd.f32 %v1457_v16, %v1456_v27  ;;  %v1465_v35 = vadd.f32 %v1464_v19, %v1463_v37  ;;  %v1491_v47 = vadd.f32 %v1435_v22, %v1434_v32 }
 0x280   : > { %3051 = vst [vmem:[#allocation14_spill] sm:$0xff] %v2855_v42  ;;  %v1447_v44 = vmul.f32 %v2843_v15, %v2843_v15  ;;  %v1472_v0 = vadd.f32 %v1471_v28, %v1470_v39  ;;  %v1478_v10 = vrot.slane %v1477_v61, 4  ;;  %v1485_v36 = vrot.slane %v1484_v62, 4 }
 0x281   : > { %3052 = vst [vmem:[#allocation15_spill] sm:$0xff] %v2858_v20  ;;  %v1448_v2 = vmul.f32 %v2846_v23, %v2846_v23  ;;  %v1449_v33 = vmul.f32 %v2849_v9, %v2849_v9  ;;  %v1450_v50 = vmul.f32 %v2852_v34, %v2852_v34  ;;  %v1451_v11 = vmul.f32 %v2855_v42, %v2855_v42 }
 0x282   : > { %3053 = vst [vmem:[#allocation16_spill] sm:$0xff] %v2861_v49  ;;  %v1452_v14 = vmul.f32 %v2858_v20, %v2858_v20  ;;  %v1453_v27 = vmul.f32 %v2861_v49, %v2861_v49  ;;  %v1454_v37 = vmul.f32 %v2863_v5, %v2863_v5  ;;  %v1455_v18 = vmul.f32 %v2865_v55, %v2865_v55 }
 0x283   : > { %3054 = vst [vmem:[#allocation17_spill] sm:$0xff] %v2863_v5  ;;  %v1459_v39 = vrot.slane %v1458_v17, 2  ;;  %v1466_v32 = vrot.slane %v1465_v35, 2  ;;  %v1492_v22 = vrot.slane %v1491_v47, 4  ;;  %v1473_v16 = vrot.slane %v1472_v0, 2 }
 0x284   : > { %3055 = vst [vmem:[#allocation18_spill] sm:$0xff] %v2865_v55  ;;  %v1479_v19 = vadd.f32 %v1478_v10, %v1477_v61  ;;  %v1486_v28 = vadd.f32 %v1485_v36, %v1484_v62  ;;  %v1499_v34 = vrot.slane %v1498_v3, 4  ;;  %v1512_v42 = vadd.f32 %v1441_v1, %v1440_v30 }
 0x285   : > { %v1519_v9 = vadd.f32 %v1443_v25, %v1442_v31  ;;  %v1526_v23 = vadd.f32 %v1445_v52, %v1444_v40  ;;  %v1533_v20 = vadd.f32 %v1447_v44, %v1446_v57  ;;  %v1540_v15 = vadd.f32 %v1449_v33, %v1448_v2 }
 0x286   : > { %v1547_v56 = vadd.f32 %v1451_v11, %v1450_v50  ;;  %v1554_v49 = vadd.f32 %v1453_v27, %v1452_v14  ;;  %v2931_v26 = vadd.f32 %v1455_v18, %v1454_v37  ;;  %v1460_v5 = vadd.f32 %v1459_v39, %v1458_v17 }
 0x287   : > { %v1467_v54 = vadd.f32 %v1466_v32, %v1465_v35  ;;  %v1480_v4 = vrot.slane %v1479_v19, 2  ;;  %v1493_v55 = vadd.f32 %v1492_v22, %v1491_v47  ;;  %v1506_v13 = vrot.slane %v1505_v29, 4 }
 0x288   : > { %v1474_v24 = vadd.f32 %v1473_v16, %v1472_v0  ;;  %v1487_v12 = vrot.slane %v1486_v28, 2  ;;  %v1500_v63 = vadd.f32 %v1499_v34, %v1498_v3  ;;  %v1461_v61 = vrot.slane %v1460_v5, 1 }
 0x289   : > { %v1468_v62 = vrot.slane %v1467_v54, 1  ;;  %v1513_v10 = vrot.slane %v1512_v42, 4  ;;  %v1481_v30 = vadd.f32 %v1480_v4, %v1479_v19  ;;  %v1494_v1 = vrot.slane %v1493_v55, 2 }
 0x28a   : > { %v1507_v31 = vadd.f32 %v1506_v13, %v1505_v29  ;;  %v1520_v25 = vrot.slane %v1519_v9, 4  ;;  %v1475_v40 = vrot.slane %v1474_v24, 1  ;;  %v1488_v52 = vadd.f32 %v1487_v12, %v1486_v28 }
 0x28b   : > { %v1501_v57 = vrot.slane %v1500_v63, 2  ;;  %v1462_v44 = vadd.f32 %v1461_v61, %v1460_v5  ;;  %v1469_v36 = vadd.f32 %v1468_v62, %v1467_v54  ;;  %v1514_v17 = vadd.f32 %v1513_v10, %v1512_v42 }
 0x28c   : > { %v1527_v35 = vrot.slane %v1526_v23, 4  ;;  %v1482_v2 = vrot.slane %v1481_v30, 1  ;;  %v1495_v47 = vadd.f32 %v1494_v1, %v1493_v55  ;;  %v1508_v33 = vrot.slane %v1507_v31, 2 }
 0x28d   : > { %v1521_v0 = vadd.f32 %v1520_v25, %v1519_v9  ;;  %v1534_v50 = vrot.slane %v1533_v20, 4  ;;  %v1476_v34 = vadd.f32 %v1475_v40, %v1474_v24  ;;  %v1489_v3 = vrot.slane %v1488_v52, 1 }
 0x28e   : > { %v1502_v11 = vadd.f32 %v1501_v57, %v1500_v63  ;;  %v1515_v14 = vrot.slane %v1514_v17, 2  ;;  %v1528_v4 = vadd.f32 %v1527_v35, %v1526_v23  ;;  %v1541_v27 = vrot.slane %v1540_v15, 4 }
 0x28f   : > { %v1568_v13 = vadd.f32 %v1469_v36, %v1462_v44  ;;  %v1483_v29 = vadd.f32 %v1482_v2, %v1481_v30  ;;  %v1496_v37 = vrot.slane %v1495_v47, 1  ;;  %v1509_v12 = vadd.f32 %v1508_v33, %v1507_v31 }
 0x290   : > { %v1522_v18 = vrot.slane %v1521_v0, 2  ;;  %v1535_v5 = vadd.f32 %v1534_v50, %v1533_v20  ;;  %v1548_v54 = vrot.slane %v1547_v56, 4  ;;  %v1490_v39 = vadd.f32 %v1489_v3, %v1488_v52 }
 0x291   : > { %v1569_v42 = vadd.f32 %v1568_v13, %v1476_v34  ;;  %v1503_v32 = vrot.slane %v1502_v11, 1  ;;  %v1555_v55 = vrot.slane %v1554_v49, 4  ;;  %v1516_v22 = vadd.f32 %v1515_v14, %v1514_v17 }
 0x292   : > { %v1529_v9 = vrot.slane %v1528_v4, 2  ;;  %v1542_v16 = vadd.f32 %v1541_v27, %v1540_v15  ;;  %v1497_v19 = vadd.f32 %v1496_v37, %v1495_v47  ;;  %v1510_v63 = vrot.slane %v1509_v12, 1 }
 0x293   : > { %v1570_v24 = vadd.f32 %v1569_v42, %v1483_v29  ;;  %v1562_v23 = vrot.slane %v2931_v26, 4  ;;  %v1523_v28 = vadd.f32 %v1522_v18, %v1521_v0  ;;  %v1536_v61 = vrot.slane %v1535_v5, 2 }
 0x294   : > { %v1549_v62 = vadd.f32 %v1548_v54, %v1547_v56  ;;  %v1504_v30 = vadd.f32 %v1503_v32, %v1502_v11  ;;  %v1556_v1 = vadd.f32 %v1555_v55, %v1554_v49  ;;  %v1517_v20 = vrot.slane %v1516_v22, 1 }
 0x295   : > { %v1571_v10 = vadd.f32 %v1570_v24, %v1490_v39  ;;  %v1530_v31 = vadd.f32 %v1529_v9, %v1528_v4  ;;  %v1543_v25 = vrot.slane %v1542_v16, 2  ;;  %v1511_v52 = vadd.f32 %v1510_v63, %v1509_v12 }
 0x296   : > { %v1563_v57 = vadd.f32 %v1562_v23, %v2931_v26  ;;  %v1524_v44 = vrot.slane %v1523_v28, 1  ;;  %v1537_v15 = vadd.f32 %v1536_v61, %v1535_v5  ;;  %v1550_v36 = vrot.slane %v1549_v62, 2 }
 0x297   : > { %v1572_v40 = vadd.f32 %v1571_v10, %v1497_v19  ;;  %v1557_v35 = vrot.slane %v1556_v1, 2  ;;  %v1518_v2 = vadd.f32 %v1517_v20, %v1516_v22  ;;  %v1531_v47 = vrot.slane %v1530_v31, 1 }
 0x298   : > { %v1544_v33 = vadd.f32 %v1543_v25, %v1542_v16  ;;  %v1564_v56 = vrot.slane %v1563_v57, 2  ;;  %v1525_v50 = vadd.f32 %v1524_v44, %v1523_v28  ;;  %v1538_v34 = vrot.slane %v1537_v15, 1 }
 0x299   : > { %v1573_v17 = vadd.f32 %v1572_v40, %v1504_v30  ;;  %v1551_v49 = vadd.f32 %v1550_v36, %v1549_v62  ;;  %v1532_v11 = vadd.f32 %v1531_v47, %v1530_v31  ;;  %v1558_v4 = vadd.f32 %v1557_v35, %v1556_v1  ;;  %v3058_v35 = vld [vmem:[#allocation4_spill] sm:$0xff] }
 0x29a   : > { %v1545_v14 = vrot.slane %v1544_v33, 1  ;;  %v1539_v13 = vadd.f32 %v1538_v34, %v1537_v15  ;;  %v1565_v29 = vadd.f32 %v1564_v56, %v1563_v57  ;;  %v3062_v56 = vld [vmem:[#allocation8_spill] sm:$0xff]  ;;  %v3064_v34 = vld [vmem:[#allocation10_spill] sm:$0xff] }
 0x29b   : > { %v1574_v0 = vadd.f32 %v1573_v17, %v1511_v52  ;;  %v1552_v26 = vrot.slane %v1551_v49, 1  ;;  %v1559_v18 = vrot.slane %v1558_v4, 1  ;;  %v3057_v17 = vld [vmem:[#allocation3_spill] sm:$0xff] }
 0x29c   : > { %v1546_v12 = vadd.f32 %v1545_v14, %v1544_v33  ;;  %v1566_v42 = vrot.slane %v1565_v29, 1  ;;  %v3060_v33 = vld [vmem:[#allocation6_spill] sm:$0xff]  ;;  %v3067_v14 = vld [vmem:[#allocation13_spill] sm:$0xff] }
 0x29d   : > { %v1575_v3 = vadd.f32 %v1574_v0, %v1518_v2  ;;  %v1553_v54 = vadd.f32 %v1552_v26, %v1551_v49  ;;  %v1560_v32 = vadd.f32 %v1559_v18, %v1558_v4  ;;  %v3061_v0 = vld [vmem:[#allocation7_spill] sm:$0xff]  ;;  %v3071_v18 = vld [vmem:[#allocation17_spill] sm:$0xff] }
 0x29e   : > { %v1567_v22 = vadd.f32 %v1566_v42, %v1565_v29  ;;  %v3065_v49 = vld [vmem:[#allocation11_spill] sm:$0xff] }
 0x29f   : > { %v1576_v27 = vadd.f32 %v1575_v3, %v1525_v50  ;;  %v3063_v50 = vld [vmem:[#allocation9_spill] sm:$0xff]  ;;  %v3066_v3 = vld [vmem:[#allocation12_spill] sm:$0xff]  ;;  %v3069_v26 = vld [vmem:[#allocation15_spill] sm:$0xff] }
 0x2a1   : > { %v1577_v37 = vadd.f32 %v1576_v27, %v1532_v11  ;;  %v3068_v27 = vld [vmem:[#allocation14_spill] sm:$0xff] }
 0x2a3   : > { %v1578_v5 = vadd.f32 %v1577_v37, %v1539_v13  ;;  %v3070_v37 = vld [vmem:[#allocation16_spill] sm:$0xff] }
 0x2a5   : > { %v1579_v39 = vadd.f32 %v1578_v5, %v1546_v12 }
 0x2a7   : > { %v1580_v55 = vadd.f32 %v1579_v39, %v1553_v54  ;;  %v3072_v54 = vld [vmem:[#allocation18_spill] sm:$0xff] }
 0x2a9   : > { %v1581_v9 = vadd.f32 %v1580_v55, %v1560_v32 }
 0x2ab   : > { %v1582_v16 = vadd.f32 %v1581_v9, %v1567_v22 }
 0x2ad   : > { %v1583_v24 = vmul.f32 0.00390625, %v1582_v16 }
 0x2af   : > { %v1584_v19 = vadd.f32 1e-05, %v1583_v24 }
 0x2b1   : > { %2175 = vrsqrt.f32 %v1584_v19  ;;  %vm1591_vm4 = vweird.f32 %v1584_v19 }
 0x2b7   : > { %v2176_v63 = vpop.eup %2175 }
 0x2b8   : > { %v1586_v23 = vmul.f32 %v2176_v63, %v1584_v19  ;;  %vm1592_vm3 = vweird.f32 %v2176_v63 }
 0x2b9   : > { %vm1593_vm5 = vmor %vm1591_vm4, %vm1592_vm3 }
 0x2ba   : > { %v1587_v28 = vmul.f32 %v2176_v63, %v1586_v23 }
 0x2bc   : > { %v1588_v61 = vmul.f32 0.5, %v1587_v28 }
 0x2be   : > { %v1589_v62 = vsub.f32 1.5, %v1588_v61 }
 0x2c0   : > { %v1590_v10 = vmul.f32 %v2176_v63, %v1589_v62 }
 0x2c2   : > { %v1594_v30 = vsel %vm1593_vm5, %v2176_v63, %v1590_v10 }
 0x2c3   : > { %v2936_v1 = vmul.f32 %v1594_v30, %v2774_v41  ;;  %v2939_v20 = vmul.f32 %v1594_v30, %v2777_v43  ;;  %v2942_v31 = vmul.f32 %v1594_v30, %v2780_v6  ;;  %v2945_v25 = vmul.f32 %v1594_v30, %v2783_v38 }
 0x2c4   : > { %v2948_v40 = vmul.f32 %v1594_v30, %v2786_v7  ;;  %v2951_v52 = vmul.f32 %v1594_v30, %v2789_v46  ;;  %v2954_v57 = vmul.f32 %v1594_v30, %v2792_v48  ;;  %v2957_v41 = vmul.f32 %v1594_v30, %v2795_v21  ;;  %v3056_v48 = vld [vmem:[#allocation2_spill] sm:$0xff] }
 0x2c5   : > { %v2960_v43 = vmul.f32 %v1594_v30, %v2798_v59  ;;  %v1604_v6 = vmul.f32 %v1594_v30, %v2801_v58  ;;  %v1605_v38 = vmul.f32 %v1594_v30, %v2804_v8  ;;  %v1606_v44 = vmul.f32 %v1594_v30, %v2807_v45  ;;  %v3059_v59 = vld [vmem:[#allocation5_spill] sm:$0xff] }
 0x2c6   : > { %v1607_v7 = vmul.f32 %v1594_v30, %v2810_v60  ;;  %v1608_v46 = vmul.f32 %v1594_v30, %v2813_v51  ;;  %v1609_v15 = vmul.f32 %v1594_v30, %v2816_v53  ;;  %v1610_v36 = vmul.f32 %v1594_v30, %v3056_v48 }
 0x2c7   : > { %v1611_v21 = vmul.f32 %v1594_v30, %v3057_v17  ;;  %v1612_v2 = vmul.f32 %v1594_v30, %v3058_v35  ;;  %v1613_v47 = vmul.f32 %v1594_v30, %v3059_v59  ;;  %v1614_v58 = vmul.f32 %v1594_v30, %v3060_v33 }
 0x2c8   : > { %v1615_v8 = vmul.f32 %v1594_v30, %v3061_v0  ;;  %v1616_v45 = vmul.f32 %v1594_v30, %v3062_v56  ;;  %v1617_v60 = vmul.f32 %v1594_v30, %v3063_v50  ;;  %v1618_v51 = vmul.f32 %v1594_v30, %v3064_v34 }
 0x2c9   : > { %v1619_v53 = vmul.f32 %v1594_v30, %v3065_v49  ;;  %v1620_v11 = vmul.f32 %v1594_v30, %v3066_v3  ;;  %v1621_v4 = vmul.f32 %v1594_v30, %v3067_v14  ;;  %v1622_v13 = vmul.f32 %v1594_v30, %v3068_v27 }
 0x2ca   : > { %v1623_v29 = vmul.f32 %v1594_v30, %v3069_v26  ;;  %v1624_v12 = vmul.f32 %v1594_v30, %v3070_v37  ;;  %v1625_v5 = vmul.f32 %v1594_v30, %v3071_v18  ;;  %v1626_v42 = vmul.f32 %v1594_v30, %v3072_v54 }
 0x2cb   : > { %v1627_v39 = vmax.f32 %v2936_v1, 0.0  ;;  %v1628_v32 = vmax.f32 %v2939_v20, 0.0  ;;  %v1629_v55 = vmax.f32 %v2942_v31, 0.0  ;;  %v1630_v22 = vmax.f32 %v2945_v25, 0.0 }
 0x2cc   : > { %v1631_v9 = vmax.f32 %v2948_v40, 0.0  ;;  %v1632_v16 = vmax.f32 %v2951_v52, 0.0  ;;  %v1633_v24 = vmax.f32 %v2954_v57, 0.0  ;;  %v1634_v19 = vmax.f32 %v2957_v41, 0.0 }
 0x2cd   : > { %v1635_v63 = vmax.f32 %v2960_v43, 0.0  ;;  %v1636_v23 = vmax.f32 %v1604_v6, 0.0  ;;  %v1637_v28 = vmax.f32 %v1605_v38, 0.0  ;;  %v1638_v61 = vmax.f32 %v1606_v44, 0.0 }
 0x2ce   : > { %v1639_v62 = vmax.f32 %v1607_v7, 0.0  ;;  %v1640_v10 = vmax.f32 %v1608_v46, 0.0  ;;  %v1641_v30 = vmax.f32 %v1609_v15, 0.0  ;;  %v1642_v1 = vmax.f32 %v1610_v36, 0.0 }
 0x2cf   : > { %v1643_v20 = vmax.f32 %v1611_v21, 0.0  ;;  %v1644_v31 = vmax.f32 %v1612_v2, 0.0  ;;  %v1645_v25 = vmax.f32 %v1613_v47, 0.0  ;;  %v1646_v40 = vmax.f32 %v1614_v58, 0.0 }
 0x2d0   : > { %v1647_v48 = vmax.f32 %v1615_v8, 0.0  ;;  %v1648_v52 = vmax.f32 %v1616_v45, 0.0  ;;  %v1649_v17 = vmax.f32 %v1617_v60, 0.0  ;;  %v1650_v57 = vmax.f32 %v1618_v51, 0.0 }
 0x2d1   : > { %v1651_v35 = vmax.f32 %v1619_v53, 0.0  ;;  %v1652_v41 = vmax.f32 %v1620_v11, 0.0  ;;  %v1653_v59 = vmax.f32 %v1621_v4, 0.0  ;;  %v1654_v43 = vmax.f32 %v1622_v13, 0.0 }
 0x2d2   : > { %v1655_v6 = vmax.f32 %v1623_v29, 0.0  ;;  %v1656_v38 = vmax.f32 %v1624_v12, 0.0  ;;  %v1657_v44 = vmax.f32 %v1625_v5, 0.0  ;;  %v1658_v7 = vmax.f32 %v1626_v42, 0.0 }
 0x2d3   : > { %v2067_v46 = vpack.c.bf16 %v1628_v32, %v1627_v39  ;;  %v2072_v15 = vpack.c.bf16 %v1630_v22, %v1629_v55  ;;  %v2077_v36 = vpack.c.bf16 %v1632_v16, %v1631_v9  ;;  %v2082_v21 = vpack.c.bf16 %v1634_v19, %v1633_v24 }
 0x2d4   : > { %v2087_v2 = vpack.c.bf16 %v1636_v23, %v1635_v63  ;;  %v2092_v47 = vpack.c.bf16 %v1638_v61, %v1637_v28  ;;  %v2097_v33 = vpack.c.bf16 %v1640_v10, %v1639_v62  ;;  %v2102_v58 = vpack.c.bf16 %v1642_v1, %v1641_v30 }
 0x2d5   : > { %2068 = vst [vmem:[%s2998_s20] sm:$0xff] %v2067_v46   ;;  %v2107_v0 = vpack.c.bf16 %v1644_v31, %v1643_v20  ;;  %v2112_v8 = vpack.c.bf16 %v1646_v40, %v1645_v25  ;;  %v2117_v56 = vpack.c.bf16 %v1648_v52, %v1647_v48  ;;  %v2122_v45 = vpack.c.bf16 %v1650_v57, %v1649_v17 }
 0x2d6   : > { %2144 = vst [vmem:[%s2998_s20 + $0x8] sm:$0xff] %v2072_v15   ;;  %v2127_v50 = vpack.c.bf16 %v1652_v41, %v1651_v35  ;;  %v2132_v60 = vpack.c.bf16 %v1654_v43, %v1653_v59  ;;  %v2137_v34 = vpack.c.bf16 %v1656_v38, %v1655_v6  ;;  %v2142_v51 = vpack.c.bf16 %v1658_v7, %v1657_v44 }
 0x2d7   : > { %2145 = vst [vmem:[%s2998_s20 + $0x10] sm:$0xff] %v2077_v36  }
 0x2d8   : > { %2146 = vst [vmem:[%s2998_s20 + $0x18] sm:$0xff] %v2082_v21  }
 0x2d9   : > { %2147 = vst [vmem:[%s2998_s20 + $0x20] sm:$0xff] %v2087_v2  }
 0x2da   : > { %2148 = vst [vmem:[%s2998_s20 + $0x28] sm:$0xff] %v2092_v47  }
 0x2db   : > { %2149 = vst [vmem:[%s2998_s20 + $0x30] sm:$0xff] %v2097_v33  }
 0x2dc   : > { %2150 = vst [vmem:[%s2998_s20 + $0x38] sm:$0xff] %v2102_v58  }
 0x2dd   : > { %2151 = vst [vmem:[%s2998_s20 + $0x40] sm:$0xff] %v2107_v0  }
 0x2de   : > { %2152 = vst [vmem:[%s2998_s20 + $0x48] sm:$0xff] %v2112_v8  }
 0x2df   : > { %2153 = vst [vmem:[%s2998_s20 + $0x50] sm:$0xff] %v2117_v56  }
 0x2e0   : > { %2154 = vst [vmem:[%s2998_s20 + $0x58] sm:$0xff] %v2122_v45  }
 0x2e1   : > { %2155 = vst [vmem:[%s2998_s20 + $0x60] sm:$0xff] %v2127_v50  }
 0x2e2   : > { %2156 = vst [vmem:[%s2998_s20 + $0x68] sm:$0xff] %v2132_v60  }
 0x2e3   : > { %2157 = vst [vmem:[%s2998_s20 + $0x70] sm:$0xff] %v2137_v34  }
 0x2e4   : > { %2158 = vst [vmem:[%s2998_s20 + $0x78] sm:$0xff] %v2142_v51  }
 0x2e5 PF: > { %s12_s9 = sadd.s32 1, %s2183_s9  }
 0x2e6   : > { %p9_p4 = scmp.ge.s32.totalorder %s12_s9, 4  }
 0x2e8   :  { %11 = sbr.rel (!%p9_p4) target bundleno = 1 (0x1), region = 64 }

// kernel: warp_res_generator_forward.18
= control target key start
LH: loop header
LB: loop body
LE: loop exit
PB: predicated region body
PF: predicated region fallthrough
CT: control target
= control target key end

     0   :  { %s733_s9 = smov 0   ;;  %s851_s0 = inlined_call_operand.vmem [shape: bf16[2,72,64], index: 0, kind: input, shape index: {}]   ;;  %s852_s1 = inlined_call_operand.vmem [shape: bf16[2,64,128], index: 1, kind: input, shape index: {}]   ;;  %s853_s2 = inlined_call_operand.vmem [shape: bf16[2,8,8,128], index: 2, kind: output, shape index: {}]  }
   0x1 LB: > { %s554_s10 = sadd.s32 4294967295, %s716_s9   ;;  %p558_p0 = scmp.ge.s32.totalorder %s716_s9, 1  ;;  %s716_s9 = sphi %s733_s9, %s12_s9  }
   0x2   : > { %p112_p1 = scmp.lt.s32.totalorder %s716_s9, 3 }
   0x4   : > { %p113_p2 = pnand %p558_p0, %p112_p1 }
   0x5   : > { %p134_p3 = scmp.lt.s32.totalorder (!%p113_p2), %s554_s10, 1 }
   0x6   : > { %116 = sbr.rel (%p113_p2) target bundleno = 266 (0x10a), region = 28 }
   0xb   : > { %v620_v0 = vld [vmem:[%s852_s1 + $0x38] sm:$0xff]  ;;  %v619_v2 = vld [vmem:[%s852_s1 + $0x30] sm:$0xff]  ;;  %s855_s10 = smov (!%p134_p3, %s554_s10), 1  ;;  %v618_v4 = vld [vmem:[%s852_s1 + $0x28] sm:$0xff]  ;;  %vm215_vm0 = vcmask 523264  }
   0xc   : > { %v616_v1 = vld [vmem:[%s852_s1 + $0x18] sm:$0xff]  ;;  %232 = vmatpush.bf16.msra.mxu0 %v620_v0  ;;  %683 = vmatpush.bf16.msra.mxu2 %v620_v0  ;;  %v615_v3 = vld [vmem:[%s852_s1 + $0x10] sm:$0xff]  ;;  %s699_s21 = smul.u32 36, %s855_s10  ;;  %v614_v5 = vld [vmem:[%s852_s1 + $0x8] sm:$0xff]  ;;  %s612_s3 = sshll.u32 %s855_s10, 5 }
   0xd   : > { %303 = vmatpush.bf16.msra.mxu1 %v616_v1  ;;  %687 = vmatpush.bf16.msra.mxu3 %v616_v1  ;;  %v617_v6 = vld [vmem:[%s852_s1 + $0x20] sm:$0xff]  ;;  %s143_s6 = scalar_lea.vmem %s853_s2, %s612_s3 }
   0xe   : > { %s138_s28 = scalar_lea.vmem %s851_s0, %s699_s21  ;;  %v613_v7 = vld [vmem:[%s852_s1] sm:$0xff] }
   0xf   : > { %v693_v8 = vld [vmem:[%s138_s28 + $0x4] sm:$0xff]   ;;  %v697_v9 = vld [vmem:[%s138_s28 + $0x14] sm:$0xff]   ;;  %v695_v12 = vld [vmem:[%s138_s28 + $0xc] sm:$0xff]  }
  0x10   : > { %233 = vmatpush.bf16.msra.mxu0 %v619_v2  ;;  %684 = vmatpush.bf16.msra.mxu2 %v619_v2  ;;  %v622_v10 = vld [vmem:[%s138_s28] sm:$0xff]   ;;  %v658_v11 = vld [vmem:[%s138_s28 + $0x10] sm:$0xff]   ;;  %v657_v14 = vld [vmem:[%s138_s28 + $0x8] sm:$0xff]  }
  0x11   : > { %304 = vmatpush.bf16.msra.mxu1 %v615_v3  ;;  %688 = vmatpush.bf16.msra.mxu3 %v615_v3  ;;  %v698_v13 = vld [vmem:[%s138_s28 + $0x1c] sm:$0xff] }
  0x12   : > { %v659_v15 = vld [vmem:[%s138_s28 + $0x18] sm:$0xff]  }
  0x14   : > { %234 = vmatpush.bf16.msra.mxu0 %v618_v4  ;;  %685 = vmatpush.bf16.msra.mxu2 %v618_v4 }
  0x15   : > { %305 = vmatpush.bf16.msra.mxu1 %v614_v5  ;;  %689 = vmatpush.bf16.msra.mxu3 %v614_v5 }
  0x18   : > { %235 = vmatpush.bf16.msra.mxu0 %v617_v6  ;;  %686 = vmatpush.bf16.msra.mxu2 %v617_v6 }
  0x19   : > { %306 = vmatpush.bf16.msra.mxu1 %v613_v7  ;;  %690 = vmatpush.bf16.msra.mxu3 %v613_v7 }
  0x1b   : > { %586 = vmatmul.msk.bf16.vlgmr.msra.gmra.mxu0 %vm215_vm0, %v693_v8  ;;  %588 = vmatmul.msk.bf16.vlgmr.msra.gmra.mxu2 %vm215_vm0, %v697_v9 }
  0x1c   : > { %606 = vmatmul.msk.bf16.vlgmr.msra.gmra.mxu1 %vm215_vm0, %v622_v10  ;;  %608 = vmatmul.msk.bf16.vlgmr.msra.gmra.mxu3 %vm215_vm0, %v658_v11 }
  0x2b   : > { %587 = vmatmul.msk.bf16.gmra.mxu0 %vm215_vm0, %v695_v12  ;;  %589 = vmatmul.msk.bf16.gmra.mxu2 %vm215_vm0, %v698_v13 }
  0x2c   : > { %607 = vmatmul.msk.bf16.gmra.mxu1 %vm215_vm0, %v657_v14  ;;  %609 = vmatmul.msk.bf16.gmra.mxu3 %vm215_vm0, %v659_v15 }
  0x98   : > { %v237_v16 = vpop.f32.mrf.mxu0 }
  0x99   : > { %v308_v17 = vpop.f32.mrf.mxu1 }
  0x9a   : > { %v779_v21 = vadd.f32 %v308_v17, %v237_v16 }
  0x9c   : > { %v328_v25 = vrot.slane %v779_v21, 4 }
  0x9e   : > { %v247_v18 = vpop.f32.mrf.mxu2  ;;  %v329_v31 = vadd.f32 %v328_v25, %v779_v21 }
  0x9f   : > { %v318_v19 = vpop.f32.mrf.mxu3 }
  0xa0   : > { %v239_v20 = vpop.f32.mrf.mxu0  ;;  %v785_v27 = vadd.f32 %v318_v19, %v247_v18  ;;  %v330_v38 = vrot.slane %v329_v31, 2 }
  0xa1   : > { %v310_v22 = vpop.f32.mrf.mxu1 }
  0xa2   : > { %v781_v23 = vadd.f32 %v310_v22, %v239_v20  ;;  %v352_v35 = vrot.slane %v785_v27, 4  ;;  %v331_v48 = vadd.f32 %v330_v38, %v329_v31 }
  0xa4   : > { %v334_v24 = vrot.slane %v781_v23, 4  ;;  %v353_v42 = vadd.f32 %v352_v35, %v785_v27  ;;  %v332_v58 = vrot.slane %v331_v48, 1 }
  0xa6   : > { %v249_v26 = vpop.f32.mrf.mxu2  ;;  %v335_v29 = vadd.f32 %v334_v24, %v781_v23  ;;  %v354_v54 = vrot.slane %v353_v42, 2  ;;  %v333_v5 = vadd.f32 %v332_v58, %v331_v48 }
  0xa7   : > { %v320_v28 = vpop.f32.mrf.mxu3 }
  0xa8   : > { %v242_v30 = vpop.f32.mrf.mxu0  ;;  %v789_v33 = vadd.f32 %v320_v28, %v249_v26  ;;  %v336_v36 = vrot.slane %v335_v29, 2  ;;  %v355_v63 = vadd.f32 %v354_v54, %v353_v42 }
  0xa9   : > { %v313_v32 = vpop.f32.mrf.mxu1 }
  0xaa   : > { %v791_v34 = vadd.f32 %v313_v32, %v242_v30  ;;  %v358_v39 = vrot.slane %v789_v33, 4  ;;  %v337_v44 = vadd.f32 %v336_v36, %v335_v29  ;;  %v356_v10 = vrot.slane %v355_v63, 1 }
  0xac   : > { %v340_v37 = vrot.slane %v791_v34, 4  ;;  %v359_v50 = vadd.f32 %v358_v39, %v789_v33  ;;  %v338_v55 = vrot.slane %v337_v44, 1  ;;  %v357_v19 = vadd.f32 %v356_v10, %v355_v63 }
  0xae   : > { %v341_v40 = vadd.f32 %v340_v37, %v791_v34  ;;  %v252_v41 = vpop.f32.mrf.mxu2  ;;  %v360_v59 = vrot.slane %v359_v50, 2  ;;  %v339_v1 = vadd.f32 %v338_v55, %v337_v44 }
  0xaf   : > { %v323_v43 = vpop.f32.mrf.mxu3 }
  0xb0   : > { %v342_v45 = vrot.slane %v341_v40, 2  ;;  %v324_v46 = vadd.f32 %v323_v43, %v252_v41  ;;  %v244_v47 = vpop.f32.mrf.mxu0  ;;  %v361_v6 = vadd.f32 %v360_v59, %v359_v50  ;;  %v376_v11 = vadd.f32 %v339_v1, %v333_v5 }
  0xb1   : > { %v315_v49 = vpop.f32.mrf.mxu1 }
  0xb2   : > { %v343_v51 = vadd.f32 %v342_v45, %v341_v40  ;;  %v364_v52 = vrot.slane %v324_v46, 4  ;;  %v316_v53 = vadd.f32 %v315_v49, %v244_v47  ;;  %v362_v15 = vrot.slane %v361_v6, 1 }
  0xb4   : > { %v365_v56 = vadd.f32 %v364_v52, %v324_v46  ;;  %v346_v57 = vrot.slane %v316_v53, 4  ;;  %v344_v60 = vrot.slane %v343_v51, 1  ;;  %v363_v25 = vadd.f32 %v362_v15, %v361_v6 }
  0xb6   : > { %v347_v61 = vadd.f32 %v346_v57, %v316_v53  ;;  %v254_v62 = vpop.f32.mrf.mxu2  ;;  %v366_v2 = vrot.slane %v365_v56, 2  ;;  %v345_v7 = vadd.f32 %v344_v60, %v343_v51 }
  0xb7   : > { %v325_v0 = vpop.f32.mrf.mxu3 }
  0xb8   : > { %v348_v3 = vrot.slane %v347_v61, 2  ;;  %v326_v4 = vadd.f32 %v325_v0, %v254_v62  ;;  %v367_v12 = vadd.f32 %v366_v2, %v365_v56  ;;  %v377_v16 = vadd.f32 %v376_v11, %v345_v7 }
  0xba   : > { %v349_v8 = vadd.f32 %v348_v3, %v347_v61  ;;  %v370_v9 = vrot.slane %v326_v4, 4  ;;  %v368_v20 = vrot.slane %v367_v12, 1 }
  0xbc   : > { %v350_v13 = vrot.slane %v349_v8, 1  ;;  %v371_v14 = vadd.f32 %v370_v9, %v326_v4  ;;  %v369_v29 = vadd.f32 %v368_v20, %v367_v12 }
  0xbe   : > { %v351_v17 = vadd.f32 %v350_v13, %v349_v8  ;;  %v372_v18 = vrot.slane %v371_v14, 2 }
  0xc0   : > { %v378_v22 = vadd.f32 %v377_v16, %v351_v17  ;;  %v373_v24 = vadd.f32 %v372_v18, %v371_v14 }
  0xc2   : > { %v379_v26 = vadd.f32 %v378_v22, %v357_v19  ;;  %v374_v28 = vrot.slane %v373_v24, 1 }
  0xc4   : > { %v380_v30 = vadd.f32 %v379_v26, %v363_v25  ;;  %v375_v31 = vadd.f32 %v374_v28, %v373_v24 }
  0xc6   : > { %v381_v32 = vadd.f32 %v380_v30, %v369_v29 }
  0xc8   : > { %v382_v35 = vadd.f32 %v381_v32, %v375_v31 }
  0xca   : > { %v383_v36 = vmul.f32 0.015625, %v382_v35 }
  0xcc   : > { %v800_v37 = vsub.f32 %v779_v21, %v383_v36  ;;  %v803_v38 = vsub.f32 %v781_v23, %v383_v36  ;;  %v806_v39 = vsub.f32 %v791_v34, %v383_v36  ;;  %v808_v40 = vsub.f32 %v316_v53, %v383_v36 }
  0xcd   : > { %v811_v41 = vsub.f32 %v785_v27, %v383_v36  ;;  %v814_v42 = vsub.f32 %v789_v33, %v383_v36  ;;  %v816_v43 = vsub.f32 %v324_v46, %v383_v36  ;;  %v818_v44 = vsub.f32 %v326_v4, %v383_v36 }
  0xce   : > { %v392_v21 = vmul.f32 %v800_v37, %v800_v37  ;;  %v393_v23 = vmul.f32 %v803_v38, %v803_v38  ;;  %v394_v34 = vmul.f32 %v806_v39, %v806_v39  ;;  %v395_v27 = vmul.f32 %v808_v40, %v808_v40 }
  0xcf   : > { %v396_v33 = vmul.f32 %v811_v41, %v811_v41  ;;  %v397_v45 = vmul.f32 %v814_v42, %v814_v42  ;;  %v398_v46 = vmul.f32 %v816_v43, %v816_v43  ;;  %v399_v47 = vmul.f32 %v818_v44, %v818_v44 }
  0xd0   : > { %v400_v48 = vrot.slane %v392_v21, 4  ;;  %v406_v49 = vrot.slane %v393_v23, 4  ;;  %v412_v50 = vrot.slane %v394_v34, 4  ;;  %v418_v51 = vrot.slane %v395_v27, 4 }
  0xd1   : > { %v424_v52 = vrot.slane %v396_v33, 4  ;;  %v430_v53 = vrot.slane %v397_v45, 4  ;;  %v436_v54 = vrot.slane %v398_v46, 4  ;;  %v442_v55 = vrot.slane %v399_v47, 4 }
  0xd2   : > { %v401_v56 = vadd.f32 %v400_v48, %v392_v21  ;;  %v407_v57 = vadd.f32 %v406_v49, %v393_v23  ;;  %v413_v58 = vadd.f32 %v412_v50, %v394_v34  ;;  %v419_v59 = vadd.f32 %v418_v51, %v395_v27 }
  0xd3   : > { %v425_v60 = vadd.f32 %v424_v52, %v396_v33  ;;  %v431_v61 = vadd.f32 %v430_v53, %v397_v45  ;;  %v437_v62 = vadd.f32 %v436_v54, %v398_v46  ;;  %v443_v5 = vadd.f32 %v442_v55, %v399_v47 }
  0xd4   : > { %v402_v63 = vrot.slane %v401_v56, 2  ;;  %v408_v0 = vrot.slane %v407_v57, 2  ;;  %v414_v1 = vrot.slane %v413_v58, 2  ;;  %v420_v2 = vrot.slane %v419_v59, 2 }
  0xd5   : > { %v426_v3 = vrot.slane %v425_v60, 2  ;;  %v432_v4 = vrot.slane %v431_v61, 2  ;;  %v438_v10 = vrot.slane %v437_v62, 2  ;;  %v444_v15 = vrot.slane %v443_v5, 2 }
  0xd6   : > { %v403_v6 = vadd.f32 %v402_v63, %v401_v56  ;;  %v409_v7 = vadd.f32 %v408_v0, %v407_v57  ;;  %v415_v8 = vadd.f32 %v414_v1, %v413_v58  ;;  %v421_v9 = vadd.f32 %v420_v2, %v419_v59 }
  0xd7   : > { %v427_v14 = vadd.f32 %v426_v3, %v425_v60  ;;  %v433_v19 = vadd.f32 %v432_v4, %v431_v61  ;;  %v439_v24 = vadd.f32 %v438_v10, %v437_v62  ;;  %v445_v29 = vadd.f32 %v444_v15, %v443_v5 }
  0xd8   : > { %v404_v11 = vrot.slane %v403_v6, 1  ;;  %v410_v12 = vrot.slane %v409_v7, 1  ;;  %v416_v13 = vrot.slane %v415_v8, 1  ;;  %v422_v18 = vrot.slane %v421_v9, 1 }
  0xd9   : > { %v428_v22 = vrot.slane %v427_v14, 1  ;;  %v434_v28 = vrot.slane %v433_v19, 1  ;;  %v440_v32 = vrot.slane %v439_v24, 1  ;;  %v446_v21 = vrot.slane %v445_v29, 1 }
  0xda   : > { %v405_v16 = vadd.f32 %v404_v11, %v403_v6  ;;  %v411_v17 = vadd.f32 %v410_v12, %v409_v7  ;;  %v417_v20 = vadd.f32 %v416_v13, %v415_v8  ;;  %v423_v26 = vadd.f32 %v422_v18, %v421_v9 }
  0xdb   : > { %v429_v31 = vadd.f32 %v428_v22, %v427_v14  ;;  %v435_v36 = vadd.f32 %v434_v28, %v433_v19  ;;  %v441_v34 = vadd.f32 %v440_v32, %v439_v24  ;;  %v447_v33 = vadd.f32 %v446_v21, %v445_v29 }
  0xdc   : > { %v448_v25 = vadd.f32 %v411_v17, %v405_v16 }
  0xde   : > { %v449_v30 = vadd.f32 %v448_v25, %v417_v20 }
  0xe0   : > { %v450_v35 = vadd.f32 %v449_v30, %v423_v26 }
  0xe2   : > { %v451_v23 = vadd.f32 %v450_v35, %v429_v31 }
  0xe4   : > { %v452_v27 = vadd.f32 %v451_v23, %v435_v36 }
  0xe6   : > { %v453_v45 = vadd.f32 %v452_v27, %v441_v34 }
  0xe8   : > { %v454_v46 = vadd.f32 %v453_v45, %v447_v33 }
  0xea   : > { %v455_v47 = vmul.f32 0.015625, %v454_v46 }
  0xec   : > { %v456_v48 = vadd.f32 1e-05, %v455_v47 }
  0xee   : > { %708 = vrsqrt.f32 %v456_v48  ;;  %vm463_vm2 = vweird.f32 %v456_v48 }
  0xf4   : > { %v709_v49 = vpop.eup %708 }
  0xf5   : > { %v458_v50 = vmul.f32 %v709_v49, %v456_v48  ;;  %vm464_vm1 = vweird.f32 %v709_v49 }
  0xf6   : > { %vm465_vm3 = vmor %vm463_vm2, %vm464_vm1 }
  0xf7   : > { %v459_v51 = vmul.f32 %v709_v49, %v458_v50 }
  0xf9   : > { %v460_v52 = vmul.f32 0.5, %v459_v51 }
  0xfb   : > { %v461_v53 = vsub.f32 1.5, %v460_v52 }
  0xfd   : > { %v462_v54 = vmul.f32 %v709_v49, %v461_v53 }
  0xff   : > { %v466_v55 = vsel %vm465_vm3, %v709_v49, %v462_v54 }
 0x100   : > { %v467_v56 = vmul.f32 %v466_v55, %v800_v37  ;;  %v468_v57 = vmul.f32 %v466_v55, %v803_v38  ;;  %v469_v58 = vmul.f32 %v466_v55, %v806_v39  ;;  %v470_v59 = vmul.f32 %v466_v55, %v808_v40 }
 0x101   : > { %v471_v60 = vmul.f32 %v466_v55, %v811_v41  ;;  %v472_v61 = vmul.f32 %v466_v55, %v814_v42  ;;  %v473_v62 = vmul.f32 %v466_v55, %v816_v43  ;;  %v474_v63 = vmul.f32 %v466_v55, %v818_v44 }
 0x102   : > { %v475_v0 = vmax.f32 %v467_v56, 0.0  ;;  %v476_v1 = vmax.f32 %v468_v57, 0.0  ;;  %v477_v2 = vmax.f32 %v469_v58, 0.0  ;;  %v478_v3 = vmax.f32 %v470_v59, 0.0 }
 0x103   : > { %v479_v37 = vmax.f32 %v471_v60, 0.0  ;;  %v480_v38 = vmax.f32 %v472_v61, 0.0  ;;  %v481_v39 = vmax.f32 %v473_v62, 0.0  ;;  %v482_v40 = vmax.f32 %v474_v63, 0.0 }
 0x104   : > { %v640_v4 = vpack.c.bf16 %v476_v1, %v475_v0  ;;  %v645_v41 = vpack.c.bf16 %v478_v3, %v477_v2 }
 0x105   : > { %v650_v5 = vpack.c.bf16 %v480_v38, %v479_v37  ;;  %v655_v42 = vpack.c.bf16 %v482_v40, %v481_v39 }
 0x106   : > { %641 = vst [vmem:[%s143_s6] sm:$0xff] %v640_v4  }
 0x107   : > { %660 = vst [vmem:[%s143_s6 + $0x8] sm:$0xff] %v645_v41  }
 0x108   : > { %661 = vst [vmem:[%s143_s6 + $0x10] sm:$0xff] %v650_v5  }
 0x109   : > { %662 = vst [vmem:[%s143_s6 + $0x18] sm:$0xff] %v655_v42  }
 0x10a PF: > { %s12_s9 = sadd.s32 1, %s716_s9  }
 0x10b   : > { %p9_p4 = scmp.ge.s32.totalorder %s12_s9, 4  }
 0x10d   :  { %11 = sbr.rel (!%p9_p4) target bundleno = 1 (0x1), region = 59 }

// kernel: warp_res_generator_forward.19
= control target key start
LH: loop header
LB: loop body
LE: loop exit
PB: predicated region body
PF: predicated region fallthrough
CT: control target
= control target key end

     0   :  { %s669_s9 = smov 0   ;;  %s750_s0 = inlined_call_operand.vmem [shape: bf16[2,40,128], index: 0, kind: input, shape index: {}]   ;;  %s751_s1 = inlined_call_operand.vmem [shape: bf16[2,128,128], index: 1, kind: input, shape index: {}]   ;;  %s752_s2 = inlined_call_operand.vmem [shape: bf16[2,4,4,128], index: 2, kind: output, shape index: {}]  }
   0x1 LB: > { %s489_s10 = sadd.s32 4294967295, %s652_s9   ;;  %p493_p0 = scmp.ge.s32.totalorder %s652_s9, 1  ;;  %s652_s9 = sphi %s669_s9, %s12_s9  }
   0x2   : > { %p112_p1 = scmp.lt.s32.totalorder %s652_s9, 3 }
   0x4   : > { %p113_p2 = pnand %p493_p0, %p112_p1 }
   0x5   : > { %p134_p3 = scmp.lt.s32.totalorder (!%p113_p2), %s489_s10, 1 }
   0x6   : > { %116 = sbr.rel (%p113_p2) target bundleno = 258 (0x102), region = 28 }
   0xb   : > { %v595_v0 = vld [vmem:[%s751_s1 + $0x78] sm:$0xff]  ;;  %v594_v2 = vld [vmem:[%s751_s1 + $0x70] sm:$0xff]  ;;  %v593_v4 = vld [vmem:[%s751_s1 + $0x68] sm:$0xff]  ;;  %s754_s10 = smov (!%p134_p3, %s489_s10), 1  ;;  %vm334_vm0 = vcmask 1043456  }
   0xc   : > { %v587_v1 = vld [vmem:[%s751_s1 + $0x38] sm:$0xff]  ;;  %242 = vmatpush.bf16.msra.mxu0 %v595_v0  ;;  %615 = vmatpush.bf16.msra.mxu2 %v595_v0  ;;  %v586_v3 = vld [vmem:[%s751_s1 + $0x30] sm:$0xff]  ;;  %v585_v5 = vld [vmem:[%s751_s1 + $0x28] sm:$0xff]  ;;  %s635_s11 = smul.u32 20, %s754_s10  ;;  %s579_s21 = sshll.u32 %s754_s10, 3 }
   0xd   : > { %315 = vmatpush.bf16.msra.mxu1 %v587_v1  ;;  %623 = vmatpush.bf16.msra.mxu3 %v587_v1  ;;  %v592_v6 = vld [vmem:[%s751_s1 + $0x60] sm:$0xff]  ;;  %v591_v8 = vld [vmem:[%s751_s1 + $0x58] sm:$0xff]  ;;  %v590_v10 = vld [vmem:[%s751_s1 + $0x50] sm:$0xff]  ;;  %s143_s24 = scalar_lea.vmem %s752_s2, %s579_s21 }
   0xe   : > { %v584_v7 = vld [vmem:[%s751_s1 + $0x20] sm:$0xff]  ;;  %v583_v9 = vld [vmem:[%s751_s1 + $0x18] sm:$0xff]  ;;  %v582_v11 = vld [vmem:[%s751_s1 + $0x10] sm:$0xff]  ;;  %s138_s18 = scalar_lea.vmem %s750_s0, %s635_s11 }
   0xf   : > { %v589_v12 = vld [vmem:[%s751_s1 + $0x48] sm:$0xff]  ;;  %v588_v14 = vld [vmem:[%s751_s1 + $0x40] sm:$0xff] }
  0x10   : > { %243 = vmatpush.bf16.msra.mxu0 %v594_v2  ;;  %616 = vmatpush.bf16.msra.mxu2 %v594_v2  ;;  %v581_v13 = vld [vmem:[%s751_s1 + $0x8] sm:$0xff]  ;;  %v580_v15 = vld [vmem:[%s751_s1] sm:$0xff] }
  0x11   : > { %316 = vmatpush.bf16.msra.mxu1 %v586_v3  ;;  %624 = vmatpush.bf16.msra.mxu3 %v586_v3  ;;  %v633_v16 = vld [vmem:[%s138_s18 + $0x4] sm:$0xff]   ;;  %v634_v17 = vld [vmem:[%s138_s18 + $0xc] sm:$0xff] }
  0x12   : > { %v597_v18 = vld [vmem:[%s138_s18] sm:$0xff]   ;;  %v604_v19 = vld [vmem:[%s138_s18 + $0x8] sm:$0xff]  }
  0x14   : > { %244 = vmatpush.bf16.msra.mxu0 %v593_v4  ;;  %617 = vmatpush.bf16.msra.mxu2 %v593_v4 }
  0x15   : > { %317 = vmatpush.bf16.msra.mxu1 %v585_v5  ;;  %625 = vmatpush.bf16.msra.mxu3 %v585_v5 }
  0x18   : > { %245 = vmatpush.bf16.msra.mxu0 %v592_v6  ;;  %618 = vmatpush.bf16.msra.mxu2 %v592_v6 }
  0x19   : > { %318 = vmatpush.bf16.msra.mxu1 %v584_v7  ;;  %626 = vmatpush.bf16.msra.mxu3 %v584_v7 }
  0x1c   : > { %246 = vmatpush.bf16.msra.mxu0 %v591_v8  ;;  %619 = vmatpush.bf16.msra.mxu2 %v591_v8 }
  0x1d   : > { %319 = vmatpush.bf16.msra.mxu1 %v583_v9  ;;  %627 = vmatpush.bf16.msra.mxu3 %v583_v9 }
  0x20   : > { %247 = vmatpush.bf16.msra.mxu0 %v590_v10  ;;  %620 = vmatpush.bf16.msra.mxu2 %v590_v10 }
  0x21   : > { %320 = vmatpush.bf16.msra.mxu1 %v582_v11  ;;  %628 = vmatpush.bf16.msra.mxu3 %v582_v11 }
  0x24   : > { %248 = vmatpush.bf16.msra.mxu0 %v589_v12  ;;  %621 = vmatpush.bf16.msra.mxu2 %v589_v12 }
  0x25   : > { %321 = vmatpush.bf16.msra.mxu1 %v581_v13  ;;  %629 = vmatpush.bf16.msra.mxu3 %v581_v13 }
  0x28   : > { %249 = vmatpush.bf16.msra.mxu0 %v588_v14  ;;  %622 = vmatpush.bf16.msra.mxu2 %v588_v14 }
  0x29   : > { %322 = vmatpush.bf16.msra.mxu1 %v580_v15  ;;  %630 = vmatpush.bf16.msra.mxu3 %v580_v15 }
  0x2b   : > { %250 = vmatmul.bf16.vlgmr.msra.gmra.mxu0 %v633_v16  ;;  %255 = vmatmul.bf16.vlgmr.msra.gmra.mxu2 %v634_v17 }
  0x2c   : > { %323 = vmatmul.bf16.vlgmr.msra.gmra.mxu1 %v597_v18  ;;  %328 = vmatmul.bf16.vlgmr.msra.gmra.mxu3 %v604_v19 }
  0xa8   : > { %v251_v20 = vpop.f32.mrf.mxu0 }
  0xa9   : > { %v324_v21 = vpop.f32.mrf.mxu1 }
  0xaa   : > { %v325_v22 = vadd.f32 %v324_v21, %v251_v20 }
  0xac   : > { %v335_v23 = vsel %vm334_vm0, %v325_v22, 0.0 }
  0xad   : > { %v336_v24 = vrot.slane %v335_v23, 4 }
  0xae   : > { %v256_v25 = vpop.f32.mrf.mxu2 }
  0xaf   : > { %v337_v26 = vadd.f32 %v336_v24, %v335_v23  ;;  %v329_v27 = vpop.f32.mrf.mxu3 }
  0xb0   : > { %v330_v28 = vadd.f32 %v329_v27, %v256_v25  ;;  %v253_v29 = vpop.f32.mrf.mxu0 }
  0xb1   : > { %v326_v30 = vpop.f32.mrf.mxu1  ;;  %v338_v33 = vrot.slane %v337_v26, 2 }
  0xb2   : > { %v349_v31 = vsel %vm334_vm0, %v330_v28, 0.0  ;;  %v327_v32 = vadd.f32 %v326_v30, %v253_v29 }
  0xb3   : > { %v350_v34 = vrot.slane %v349_v31, 4  ;;  %v339_v39 = vadd.f32 %v338_v33, %v337_v26 }
  0xb4   : > { %v342_v35 = vsel %vm334_vm0, %v327_v32, 0.0 }
  0xb5   : > { %v351_v36 = vadd.f32 %v350_v34, %v349_v31  ;;  %v343_v37 = vrot.slane %v342_v35, 4  ;;  %v340_v46 = vrot.slane %v339_v39, 1 }
  0xb6   : > { %v258_v38 = vpop.f32.mrf.mxu2 }
  0xb7   : > { %v352_v40 = vrot.slane %v351_v36, 2  ;;  %v344_v41 = vadd.f32 %v343_v37, %v342_v35  ;;  %v331_v42 = vpop.f32.mrf.mxu3  ;;  %v341_v52 = vadd.f32 %v340_v46, %v339_v39 }
  0xb8   : > { %v332_v43 = vadd.f32 %v331_v42, %v258_v38 }
  0xb9   : > { %v345_v44 = vrot.slane %v344_v41, 2  ;;  %v353_v47 = vadd.f32 %v352_v40, %v351_v36 }
  0xba   : > { %v356_v45 = vsel %vm334_vm0, %v332_v43, 0.0 }
  0xbb   : > { %v346_v48 = vadd.f32 %v345_v44, %v344_v41  ;;  %v357_v49 = vrot.slane %v356_v45, 4  ;;  %v354_v53 = vrot.slane %v353_v47, 1 }
  0xbd   : > { %v347_v50 = vrot.slane %v346_v48, 1  ;;  %v358_v51 = vadd.f32 %v357_v49, %v356_v45  ;;  %v355_v58 = vadd.f32 %v354_v53, %v353_v47 }
  0xbf   : > { %v348_v54 = vadd.f32 %v347_v50, %v346_v48  ;;  %v359_v55 = vrot.slane %v358_v51, 2 }
  0xc1   : > { %v363_v56 = vadd.f32 %v348_v54, %v341_v52  ;;  %v360_v57 = vadd.f32 %v359_v55, %v358_v51 }
  0xc3   : > { %v361_v59 = vrot.slane %v360_v57, 1  ;;  %v364_v61 = vadd.f32 %v363_v56, %v355_v58 }
  0xc5   : > { %v362_v60 = vadd.f32 %v361_v59, %v360_v57 }
  0xc7   : > { %v365_v62 = vadd.f32 %v364_v61, %v362_v60 }
  0xc9   : > { %v366_v63 = vmul.f32 0.0625, %v365_v62 }
  0xcb   : > { %v367_v0 = vsub.f32 %v325_v22, %v366_v63  ;;  %v368_v1 = vsub.f32 %v327_v32, %v366_v63  ;;  %v369_v2 = vsub.f32 %v330_v28, %v366_v63  ;;  %v370_v3 = vsub.f32 %v332_v43, %v366_v63 }
  0xcd   : > { %v371_v4 = vmul.f32 %v367_v0, %v367_v0  ;;  %v372_v5 = vmul.f32 %v368_v1, %v368_v1  ;;  %v373_v6 = vmul.f32 %v369_v2, %v369_v2  ;;  %v374_v7 = vmul.f32 %v370_v3, %v370_v3 }
  0xcf   : > { %v375_v8 = vsel %vm334_vm0, %v371_v4, 0.0  ;;  %v382_v9 = vsel %vm334_vm0, %v372_v5, 0.0  ;;  %v389_v10 = vsel %vm334_vm0, %v373_v6, 0.0  ;;  %v396_v11 = vsel %vm334_vm0, %v374_v7, 0.0 }
  0xd0   : > { %v376_v12 = vrot.slane %v375_v8, 4  ;;  %v383_v13 = vrot.slane %v382_v9, 4  ;;  %v390_v14 = vrot.slane %v389_v10, 4  ;;  %v397_v15 = vrot.slane %v396_v11, 4 }
  0xd2   : > { %v377_v16 = vadd.f32 %v376_v12, %v375_v8  ;;  %v384_v17 = vadd.f32 %v383_v13, %v382_v9  ;;  %v391_v18 = vadd.f32 %v390_v14, %v389_v10  ;;  %v398_v19 = vadd.f32 %v397_v15, %v396_v11 }
  0xd4   : > { %v378_v20 = vrot.slane %v377_v16, 2  ;;  %v385_v21 = vrot.slane %v384_v17, 2  ;;  %v392_v22 = vrot.slane %v391_v18, 2  ;;  %v399_v23 = vrot.slane %v398_v19, 2 }
  0xd6   : > { %v379_v24 = vadd.f32 %v378_v20, %v377_v16  ;;  %v386_v25 = vadd.f32 %v385_v21, %v384_v17  ;;  %v393_v26 = vadd.f32 %v392_v22, %v391_v18  ;;  %v400_v27 = vadd.f32 %v399_v23, %v398_v19 }
  0xd8   : > { %v380_v28 = vrot.slane %v379_v24, 1  ;;  %v387_v29 = vrot.slane %v386_v25, 1  ;;  %v394_v30 = vrot.slane %v393_v26, 1  ;;  %v401_v33 = vrot.slane %v400_v27, 1 }
  0xda   : > { %v381_v31 = vadd.f32 %v380_v28, %v379_v24  ;;  %v388_v32 = vadd.f32 %v387_v29, %v386_v25  ;;  %v395_v34 = vadd.f32 %v394_v30, %v393_v26  ;;  %v402_v36 = vadd.f32 %v401_v33, %v400_v27 }
  0xdc   : > { %v403_v35 = vadd.f32 %v388_v32, %v381_v31 }
  0xde   : > { %v404_v37 = vadd.f32 %v403_v35, %v395_v34 }
  0xe0   : > { %v405_v38 = vadd.f32 %v404_v37, %v402_v36 }
  0xe2   : > { %v406_v39 = vmul.f32 0.0625, %v405_v38 }
  0xe4   : > { %v407_v40 = vadd.f32 1e-05, %v406_v39 }
  0xe6   : > { %644 = vrsqrt.f32 %v407_v40  ;;  %vm414_vm2 = vweird.f32 %v407_v40 }
  0xec   : > { %v645_v41 = vpop.eup %644 }
  0xed   : > { %v409_v42 = vmul.f32 %v645_v41, %v407_v40  ;;  %vm415_vm1 = vweird.f32 %v645_v41 }
  0xee   : > { %vm416_vm3 = vmor %vm414_vm2, %vm415_vm1 }
  0xef   : > { %v410_v43 = vmul.f32 %v645_v41, %v409_v42 }
  0xf1   : > { %v411_v44 = vmul.f32 0.5, %v410_v43 }
  0xf3   : > { %v412_v45 = vsub.f32 1.5, %v411_v44 }
  0xf5   : > { %v413_v46 = vmul.f32 %v645_v41, %v412_v45 }
  0xf7   : > { %v417_v47 = vsel %vm416_vm3, %v645_v41, %v413_v46 }
  0xf8   : > { %v418_v48 = vmul.f32 %v417_v47, %v367_v0  ;;  %v419_v49 = vmul.f32 %v417_v47, %v368_v1  ;;  %v420_v50 = vmul.f32 %v417_v47, %v369_v2  ;;  %v421_v51 = vmul.f32 %v417_v47, %v370_v3 }
  0xfa   : > { %v422_v52 = vmax.f32 %v418_v48, 0.0  ;;  %v423_v53 = vmax.f32 %v419_v49, 0.0  ;;  %v424_v54 = vmax.f32 %v420_v50, 0.0  ;;  %v425_v55 = vmax.f32 %v421_v51, 0.0 }
  0xfc   : > { %v426_v56 = vpack.c.bf16 %v422_v52, %v422_v52  ;;  %v427_v57 = vpack.c.bf16 %v423_v53, %v423_v53  ;;  %v428_v58 = vpack.c.bf16 %v424_v54, %v424_v54  ;;  %v429_v59 = vpack.c.bf16 %v425_v55, %v425_v55 }
  0xfe   : > { %430 = vst [vmem:[%s143_s24] sm:$0x3] %v426_v56 }
  0xff   : > { %431 = vst [vmem:[%s143_s24 + $0x2] sm:$0x3] %v427_v57 }
 0x100   : > { %432 = vst [vmem:[%s143_s24 + $0x4] sm:$0x3] %v428_v58 }
 0x101   : > { %433 = vst [vmem:[%s143_s24 + $0x6] sm:$0x3] %v429_v59 }
 0x102 PF: > { %s12_s9 = sadd.s32 1, %s652_s9  }
 0x103   : > { %p9_p4 = scmp.ge.s32.totalorder %s12_s9, 4  }
 0x105   :  { %11 = sbr.rel (!%p9_p4) target bundleno = 1 (0x1), region = 59 }

// kernel: warp_res_generator_forward.20
= control target key start
LH: loop header
LB: loop body
LE: loop exit
PB: predicated region body
PF: predicated region fallthrough
CT: control target
= control target key end

     0   :  { %s1272_s9 = smov 0   ;;  %s1493_s0 = inlined_call_operand.vmem [shape: bf16[2,50,64], index: 0, kind: input, shape index: {}]   ;;  %s1494_s1 = inlined_call_operand.vmem [shape: bf16[9,64,128], index: 1, kind: input, shape index: {}]   ;;  %s1495_s2 = inlined_call_operand.vmem [shape: bf16[2,4,4,128], index: 2, kind: output, shape index: {}]  }
   0x1 LB: > { %s940_s10 = sadd.s32 4294967295, %s1255_s9   ;;  %p944_p0 = scmp.ge.s32.totalorder %s1255_s9, 1  ;;  %s1255_s9 = sphi %s1272_s9, %s12_s9  }
   0x2   : > { %p112_p1 = scmp.lt.s32.totalorder %s1255_s9, 3 }
   0x4   : > { %p113_p2 = pnand %p944_p0, %p112_p1 }
   0x5   : > { %p134_p3 = scmp.lt.s32.totalorder (!%p113_p2), %s940_s10, 1 }
   0x6   : > { %116 = sbr.rel (%p113_p2) target bundleno = 306 (0x132), region = 28 }
   0xb   : > { %v1184_v0 = vld [vmem:[%s1494_s1 + $0x38] sm:$0xff]  ;;  %v1183_v3 = vld [vmem:[%s1494_s1 + $0x30] sm:$0xff]  ;;  %s1497_s10 = smov (!%p134_p3, %s940_s10), 1  ;;  %v1182_v6 = vld [vmem:[%s1494_s1 + $0x28] sm:$0xff]  ;;  %vm182_vm0 = vsmask.f32 7424 }
   0xc   : > { %v1188_v1 = vld [vmem:[%s1494_s1 + $0x58] sm:$0xff]  ;;  %238 = vmatpush.bf16.msra.mxu0 %v1184_v0  ;;  %1234 = vmatpush.bf16.msra.mxu1 %v1184_v0  ;;  %v1187_v4 = vld [vmem:[%s1494_s1 + $0x50] sm:$0xff]  ;;  %s1238_s23 = smul.u32 28, %s1497_s10  ;;  %v1186_v7 = vld [vmem:[%s1494_s1 + $0x48] sm:$0xff]  ;;  %vm309_vm1 = vcmask 1046528   ;;  %vm227_vm2 = vcmask 523264  }
   0xd   : > { %v1192_v2 = vld [vmem:[%s1494_s1 + $0x78] sm:$0xff]  ;;  %349 = vmatpush.bf16.msra.mxu2 %v1188_v1  ;;  %v1191_v5 = vld [vmem:[%s1494_s1 + $0x70] sm:$0xff]  ;;  %v1190_v8 = vld [vmem:[%s1494_s1 + $0x68] sm:$0xff]  ;;  %vm785_vm3 = vcmask 1043456  }
   0xe   : > { %413 = vmatpush.bf16.msra.mxu3 %v1192_v2  ;;  %s1313_s4 = scalar_lea.vmem %s1493_s0, %s1238_s23  ;;  %v1181_v17 = vld [vmem:[%s1494_s1 + $0x20] sm:$0xff]  ;;  %v1180_v21 = vld [vmem:[%s1494_s1 + $0x18] sm:$0xff]  ;;  %v1179_v34 = vld [vmem:[%s1494_s1 + $0x10] sm:$0xff] }
   0xf   : > { %v1316_v9 = vld [vmem:[%s1313_s4] sm:$0xff]   ;;  %v1319_v10 = vld [vmem:[%s1313_s4 + $0x8] sm:$0xff]   ;;  %v1322_v11 = vld [vmem:[%s1313_s4 + $0x10] sm:$0xff]  }
  0x10   : > { %239 = vmatpush.bf16.msra.mxu0 %v1183_v3  ;;  %1235 = vmatpush.bf16.msra.mxu1 %v1183_v3  ;;  %v184_v12 = vshrl.u32 %v1316_v9, 16  ;;  %v186_v13 = vshll.u32 %v1316_v9, 16  ;;  %v191_v14 = vshll.u32 %v1319_v10, 16  ;;  %v1223_v15 = vunpack.c.l.b16 %v1322_v11  ;;  %v1185_v22 = vld [vmem:[%s1494_s1 + $0x40] sm:$0xff]  ;;  %v1196_v26 = vld [vmem:[%s1494_s1 + $0x98] sm:$0xff]  ;;  %v1195_v37 = vld [vmem:[%s1494_s1 + $0x90] sm:$0xff] }
  0x11   : > { %350 = vmatpush.bf16.msra.mxu2 %v1187_v4  ;;  %v195_v16 = vshrl.u32 %v1319_v10, 16  ;;  %v310_v23 = vrot.slane %v1316_v9, 1  ;;  %v1342_v24 = vrot.slane %v1319_v10, 1  ;;  %v1189_v27 = vld [vmem:[%s1494_s1 + $0x60] sm:$0xff]  ;;  %v1204_v30 = vld [vmem:[%s1494_s1 + $0xd8] sm:$0xff]  ;;  %v1220_v32 = vunpack.c.h.b16 %v1319_v10  ;;  %v1203_v40 = vld [vmem:[%s1494_s1 + $0xd0] sm:$0xff] }
  0x12   : > { %414 = vmatpush.bf16.msra.mxu3 %v1191_v5  ;;  %v188_v18 = vrot.slane %v186_v13, 1  ;;  %v193_v19 = vrot.slane %v191_v14, 1  ;;  %v1332_v20 = vpack.c.b16 %v1223_v15, %v1223_v15  ;;  %v1364_v36 = vld [vmem:[%s1313_s4 + $0x4] sm:$0xff]   ;;  %v1208_v38 = vld [vmem:[%s1494_s1 + $0xf8] sm:$0xff]  ;;  %v1207_v45 = vld [vmem:[%s1494_s1 + $0xf0] sm:$0xff]  ;;  %v1224_v62 = vunpack.c.h.b16 %v1322_v11 }
  0x13   : > { %v312_v35 = vsel %vm309_vm1, %v310_v23, %v1342_v24  ;;  %v1379_v41 = vpack.c.b16 %v1223_v15, %v1220_v32  ;;  %v446_v42 = vshll.u32 %v1364_v36, 16  ;;  %v1178_v43 = vld [vmem:[%s1494_s1 + $0x8] sm:$0xff]  ;;  %v444_v47 = vshrl.u32 %v1364_v36, 16  ;;  %v1177_v50 = vld [vmem:[%s1494_s1] sm:$0xff]  ;;  %v1200_v52 = vld [vmem:[%s1494_s1 + $0xb8] sm:$0xff] }
  0x14   : > { %240 = vmatpush.bf16.msra.mxu0 %v1182_v6  ;;  %1236 = vmatpush.bf16.msra.mxu1 %v1182_v6  ;;  %v189_v25 = vor.u32 %v188_v18, %v184_v12  ;;  %v1350_v28 = vor.u32 %v195_v16, %v193_v19  ;;  %v199_v29 = vshll.u32 %v1332_v20, 16  ;;  %v1194_v44 = vld [vmem:[%s1494_s1 + $0x88] sm:$0xff]  ;;  %v1193_v51 = vld [vmem:[%s1494_s1 + $0x80] sm:$0xff]  ;;  %v1212_v53 = vld [vmem:[%s1494_s1 + $0x118] sm:$0xff]  ;;  %v313_v58 = vrot.slane %v1332_v20, 1 }
  0x15   : > { %351 = vmatpush.bf16.msra.mxu2 %v1186_v7  ;;  %v1202_v46 = vld [vmem:[%s1494_s1 + $0xc8] sm:$0xff]  ;;  %v448_v48 = vrot.slane %v446_v42, 1  ;;  %v450_v49 = vshll.u32 %v1379_v41, 16  ;;  %v1201_v57 = vld [vmem:[%s1494_s1 + $0xc0] sm:$0xff]  ;;  %v1199_v59 = vld [vmem:[%s1494_s1 + $0xb0] sm:$0xff]  ;;  %v443_v2 = vpack.c.b16 %v1224_v62, %v1224_v62  ;;  %v454_v5 = vshrl.u32 %v1379_v41, 16 }
  0x16   : > { %415 = vmatpush.bf16.msra.mxu3 %v1190_v8  ;;  %v194_v31 = vsel %vm182_vm0, %v189_v25, %v193_v19  ;;  %v201_v33 = vrot.slane %v199_v29, 1  ;;  %v1206_v54 = vld [vmem:[%s1494_s1 + $0xe8] sm:$0xff]  ;;  %v1205_v60 = vld [vmem:[%s1494_s1 + $0xe0] sm:$0xff]  ;;  %v314_v63 = vsel %vm309_vm1, %v1342_v24, %v313_v58  ;;  %v1211_v0 = vld [vmem:[%s1494_s1 + $0x110] sm:$0xff]  ;;  %v654_v8 = vshll.u32 %v1322_v11, 16 }
  0x17   : > { %v449_v55 = vor.u32 %v448_v48, %v444_v47  ;;  %v452_v56 = vrot.slane %v450_v49, 1  ;;  %v1198_v1 = vld [vmem:[%s1494_s1 + $0xa8] sm:$0xff]  ;;  %v1197_v4 = vld [vmem:[%s1494_s1 + $0xa0] sm:$0xff]  ;;  %v458_v6 = vshll.u32 %v443_v2, 16  ;;  %v151_v14 = vld [vmem:[%s1313_s4 + $0x18] sm:$0x1] }
  0x18   : > { %241 = vmatpush.bf16.msra.mxu0 %v1181_v17  ;;  %1237 = vmatpush.bf16.msra.mxu1 %v1181_v17  ;;  %v202_v39 = vsel %vm182_vm0, %v1350_v28, %v201_v33  ;;  %v1210_v3 = vld [vmem:[%s1494_s1 + $0x108] sm:$0xff]  ;;  %v1209_v7 = vld [vmem:[%s1494_s1 + $0x100] sm:$0xff]  ;;  %v656_v13 = vrot.slane %v654_v8, 1  ;;  %v652_v17 = vunpack.c.l.b16 %v151_v14  ;;  %v658_v19 = vshrl.u32 %v1322_v11, 16  ;;  %s1176_s4 = sshll.u32 %s1497_s10, 3 }
  0x19   : > { %352 = vmatpush.bf16.msra.mxu2 %v1185_v22  ;;  %v453_v61 = vsel %vm182_vm0, %v449_v55, %v452_v56  ;;  %v460_v12 = vrot.slane %v458_v6, 1  ;;  %v524_v22 = vrot.slane %v1364_v36, 1  ;;  %v525_v23 = vrot.slane %v1379_v41, 1  ;;  %s143_s13 = scalar_lea.vmem %s1495_s2, %s1176_s4 }
  0x1a   : > { %416 = vmatpush.bf16.msra.mxu3 %v1189_v27  ;;  %v657_v16 = vsel %vm182_vm0, %v1350_v28, %v656_v13  ;;  %v653_v18 = vpack.c.b16 %v652_v17, %v652_v17  ;;  %v660_v25 = vor.u32 %v658_v19, %v656_v13 }
  0x1b   : > { %972 = vmatmul.msk.bf16.vlgmr.msra.gmra.mxu0 %vm227_vm2, %v194_v31  ;;  %973 = vmatmul.msk.bf16.vlgmr.msra.gmra.mxu1 %vm227_vm2, %v202_v39  ;;  %v526_v28 = vsel %vm309_vm1, %v524_v22, %v525_v23 }
  0x1c   : > { %285 = vmatpush.bf16.msrb.mxu1 %v1180_v21  ;;  %496 = vmatpush.bf16.msrb.mxu0 %v1196_v26  ;;  %v662_v20 = vshll.u32 %v653_v18, 16  ;;  %v728_v21 = vrot.slane %v1322_v11, 1  ;;  %v730_v29 = vrot.slane %v653_v18, 1 }
  0x1d   : > { %623 = vmatpush.bf16.msrb.mxu2 %v1204_v30  ;;  %1042 = vmatmul.msk.bf16.vlgmr.msra.gmra.mxu3 %vm227_vm2, %v1364_v36  ;;  %v527_v30 = vrot.slane %v443_v2, 1 }
  0x1e   : > { %1016 = vmatmul.msk.bf16.vlgmr.msra.gmra.mxu2 %vm227_vm2, %v312_v35  ;;  %700 = vmatpush.bf16.msrb.mxu3 %v1208_v38  ;;  %v664_v26 = vrot.slane %v662_v20, 1  ;;  %v729_v27 = vsel %vm309_vm1, %v1342_v24, %v728_v21  ;;  %v731_v31 = vsel %vm309_vm1, %v728_v21, %v730_v29 }
  0x1f   : > { %v528_v32 = vsel %vm309_vm1, %v525_v23, %v527_v30 }
  0x20   : > { %286 = vmatpush.bf16.msrb.mxu1 %v1179_v34  ;;  %497 = vmatpush.bf16.msrb.mxu0 %v1195_v37 }
  0x21   : > { %624 = vmatpush.bf16.msrb.mxu2 %v1203_v40 }
  0x22   : > { %701 = vmatpush.bf16.msrb.mxu3 %v1207_v45 }
  0x24   : > { %287 = vmatpush.bf16.msrb.mxu1 %v1178_v43  ;;  %498 = vmatpush.bf16.msrb.mxu0 %v1194_v44 }
  0x25   : > { %625 = vmatpush.bf16.msrb.mxu2 %v1202_v46 }
  0x26   : > { %702 = vmatpush.bf16.msrb.mxu3 %v1206_v54 }
  0x28   : > { %288 = vmatpush.bf16.msrb.mxu1 %v1177_v50  ;;  %499 = vmatpush.bf16.msrb.mxu0 %v1193_v51 }
  0x29   : > { %626 = vmatpush.bf16.msrb.mxu2 %v1201_v57 }
  0x2a   : > { %703 = vmatpush.bf16.msrb.mxu3 %v1205_v60 }
  0x2b   : > { %1068 = vmatmul.msk.bf16.vlgmr.msrb.gmra.mxu0 %vm227_vm2, %v453_v61  ;;  %990 = vmatmul.msk.bf16.vlgmr.msrb.gmra.mxu1 %vm227_vm2, %v1316_v9  ;;  %v456_v9 = vor.u32 %v454_v5, %v452_v56 }
  0x2c   : > { %563 = vmatpush.bf16.msra.mxu1 %v1200_v52  ;;  %766 = vmatpush.bf16.msra.mxu0 %v1212_v53 }
  0x2d   : > { %1043 = vmatmul.msk.bf16.gmra.mxu3 %vm227_vm2, %v1379_v41  ;;  %v461_v15 = vsel %vm182_vm0, %v456_v9, %v460_v12 }
  0x2e   : > { %1017 = vmatmul.msk.bf16.gmra.mxu2 %vm227_vm2, %v314_v63 }
  0x30   : > { %564 = vmatpush.bf16.msra.mxu1 %v1199_v59  ;;  %767 = vmatpush.bf16.msra.mxu0 %v1211_v0 }
  0x34   : > { %565 = vmatpush.bf16.msra.mxu1 %v1198_v1  ;;  %768 = vmatpush.bf16.msra.mxu0 %v1210_v3 }
  0x38   : > { %566 = vmatpush.bf16.msra.mxu1 %v1197_v4  ;;  %769 = vmatpush.bf16.msra.mxu0 %v1209_v7 }
  0x3b   : > { %1069 = vmatmul.msk.bf16.gmra.mxu0 %vm227_vm2, %v461_v15  ;;  %991 = vmatmul.msk.bf16.gmra.mxu1 %vm227_vm2, %v1319_v10 }
  0x3d   : > { %1146 = vmatmul.msk.bf16.vlgmr.msrb.gmra.mxu3 %vm227_vm2, %v657_v16 }
  0x3e   : > { %1120 = vmatmul.msk.bf16.vlgmr.msrb.gmra.mxu2 %vm227_vm2, %v1319_v10  ;;  %v665_v10 = vsel %vm182_vm0, %v660_v25, %v664_v26 }
  0x4b   : > { %1172 = vmatmul.msk.bf16.vlgmr.msra.gmra.mxu0 %vm227_vm2, %v729_v27  ;;  %1094 = vmatmul.msk.bf16.vlgmr.msra.gmra.mxu1 %vm227_vm2, %v526_v28 }
  0x4d   : > { %1147 = vmatmul.msk.bf16.gmra.mxu3 %vm227_vm2, %v665_v10 }
  0x4e   : > { %1121 = vmatmul.msk.bf16.gmra.mxu2 %vm227_vm2, %v1322_v11 }
  0x5b   : > { %1173 = vmatmul.msk.bf16.gmra.mxu0 %vm227_vm2, %v731_v31  ;;  %1095 = vmatmul.msk.bf16.gmra.mxu1 %vm227_vm2, %v528_v32 }
  0x98   : > { %v243_v24 = vpop.f32.mrf.mxu0  ;;  %v248_v33 = vpop.f32.mrf.mxu1 }
  0xa0   : > { %v245_v35 = vpop.f32.mrf.mxu0  ;;  %v418_v36 = vpop.f32.mrf.mxu3 }
  0xa1   : > { %v354_v34 = vpop.f32.mrf.mxu2  ;;  %v250_v37 = vpop.f32.mrf.mxu1 }
  0xa8   : > { %v501_v11 = vpop.f32.mrf.mxu0  ;;  %v420_v40 = vpop.f32.mrf.mxu3 }
  0xa9   : > { %v356_v38 = vpop.f32.mrf.mxu2  ;;  %v290_v39 = vpop.f32.mrf.mxu1 }
  0xaa   : > { %v291_v48 = vadd.f32 %v290_v39, %v243_v24 }
  0xac   : > { %v364_v50 = vadd.f32 %v354_v34, %v291_v48 }
  0xae   : > { %v428_v53 = vadd.f32 %v418_v36, %v364_v50 }
  0xb0   : > { %v503_v41 = vpop.f32.mrf.mxu0  ;;  %v423_v44 = vpop.f32.mrf.mxu3  ;;  %v511_v57 = vadd.f32 %v501_v11, %v428_v53 }
  0xb1   : > { %v292_v42 = vpop.f32.mrf.mxu1  ;;  %v359_v43 = vpop.f32.mrf.mxu2 }
  0xb2   : > { %v293_v54 = vadd.f32 %v292_v42, %v245_v35 }
  0xb4   : > { %v365_v58 = vadd.f32 %v356_v38, %v293_v54 }
  0xb6   : > { %v429_v62 = vadd.f32 %v420_v40, %v365_v58 }
  0xb8   : > { %v506_v45 = vpop.f32.mrf.mxu0  ;;  %v425_v49 = vpop.f32.mrf.mxu3  ;;  %v512_v2 = vadd.f32 %v503_v41, %v429_v62 }
  0xb9   : > { %v295_v46 = vpop.f32.mrf.mxu1  ;;  %v361_v47 = vpop.f32.mrf.mxu2 }
  0xba   : > { %v296_v63 = vadd.f32 %v295_v46, %v248_v33 }
  0xbc   : > { %v366_v3 = vadd.f32 %v359_v43, %v296_v63 }
  0xbe   : > { %v430_v9 = vadd.f32 %v423_v44, %v366_v3 }
  0xc0   : > { %v508_v51 = vpop.f32.mrf.mxu0  ;;  %v705_v56 = vpop.f32.mrf.mxu3  ;;  %v513_v16 = vadd.f32 %v506_v45, %v430_v9 }
  0xc1   : > { %v297_v52 = vpop.f32.mrf.mxu1  ;;  %v628_v55 = vpop.f32.mrf.mxu2 }
  0xc2   : > { %v298_v12 = vadd.f32 %v297_v52, %v250_v37 }
  0xc4   : > { %v367_v17 = vadd.f32 %v361_v47, %v298_v12 }
  0xc6   : > { %v431_v27 = vadd.f32 %v425_v49, %v367_v17 }
  0xc8   : > { %v771_v60 = vpop.f32.mrf.mxu0  ;;  %v707_v4 = vpop.f32.mrf.mxu3  ;;  %v514_v32 = vadd.f32 %v508_v51, %v431_v27 }
  0xc9   : > { %v568_v59 = vpop.f32.mrf.mxu1  ;;  %v630_v1 = vpop.f32.mrf.mxu2 }
  0xca   : > { %v578_v61 = vadd.f32 %v568_v59, %v511_v57 }
  0xcc   : > { %v638_v0 = vadd.f32 %v628_v55, %v578_v61 }
  0xce   : > { %v715_v6 = vadd.f32 %v705_v56, %v638_v0 }
  0xd0   : > { %v773_v8 = vpop.f32.mrf.mxu0  ;;  %v781_v14 = vadd.f32 %v771_v60, %v715_v6  ;;  %v710_v26 = vpop.f32.mrf.mxu3 }
  0xd1   : > { %v570_v5 = vpop.f32.mrf.mxu1  ;;  %v633_v19 = vpop.f32.mrf.mxu2 }
  0xd2   : > { %v579_v7 = vadd.f32 %v570_v5, %v512_v2  ;;  %v786_v21 = vsel %vm785_vm3, %v781_v14, 0.0 }
  0xd3   : > { %v787_v10 = vrot.slane %v786_v21, 4 }
  0xd4   : > { %v639_v13 = vadd.f32 %v630_v1, %v579_v7 }
  0xd5   : > { %v788_v33 = vadd.f32 %v787_v10, %v786_v21 }
  0xd6   : > { %v716_v15 = vadd.f32 %v707_v4, %v639_v13 }
  0xd7   : > { %v789_v40 = vrot.slane %v788_v33, 2 }
  0xd8   : > { %v782_v18 = vadd.f32 %v773_v8, %v716_v15  ;;  %v776_v29 = vpop.f32.mrf.mxu0  ;;  %v712_v42 = vpop.f32.mrf.mxu3 }
  0xd9   : > { %v573_v20 = vpop.f32.mrf.mxu1  ;;  %v635_v11 = vpop.f32.mrf.mxu2  ;;  %v790_v48 = vadd.f32 %v789_v40, %v788_v33 }
  0xda   : > { %v793_v22 = vsel %vm785_vm3, %v782_v18, 0.0  ;;  %v580_v23 = vadd.f32 %v573_v20, %v513_v16 }
  0xdb   : > { %v794_v25 = vrot.slane %v793_v22, 4  ;;  %v791_v53 = vrot.slane %v790_v48, 1 }
  0xdc   : > { %v640_v28 = vadd.f32 %v633_v19, %v580_v23 }
  0xdd   : > { %v795_v31 = vadd.f32 %v794_v25, %v793_v22  ;;  %v792_v58 = vadd.f32 %v791_v53, %v790_v48 }
  0xde   : > { %v717_v30 = vadd.f32 %v710_v26, %v640_v28 }
  0xdf   : > { %v796_v37 = vrot.slane %v795_v31, 2 }
  0xe0   : > { %v783_v24 = vadd.f32 %v776_v29, %v717_v30  ;;  %v778_v46 = vpop.f32.mrf.mxu0 }
  0xe1   : > { %v575_v34 = vpop.f32.mrf.mxu1  ;;  %v797_v44 = vadd.f32 %v796_v37, %v795_v31 }
  0xe2   : > { %v800_v35 = vsel %vm785_vm3, %v783_v24, 0.0  ;;  %v581_v36 = vadd.f32 %v575_v34, %v514_v32 }
  0xe3   : > { %v801_v38 = vrot.slane %v800_v35, 4  ;;  %v798_v51 = vrot.slane %v797_v44, 1 }
  0xe4   : > { %v641_v39 = vadd.f32 %v635_v11, %v581_v36 }
  0xe5   : > { %v802_v41 = vadd.f32 %v801_v38, %v800_v35  ;;  %v799_v56 = vadd.f32 %v798_v51, %v797_v44 }
  0xe6   : > { %v718_v43 = vadd.f32 %v712_v42, %v641_v39 }
  0xe7   : > { %v803_v45 = vrot.slane %v802_v41, 2  ;;  %v814_v61 = vadd.f32 %v799_v56, %v792_v58 }
  0xe8   : > { %v784_v47 = vadd.f32 %v778_v46, %v718_v43 }
  0xe9   : > { %v804_v49 = vadd.f32 %v803_v45, %v802_v41 }
  0xea   : > { %v807_v50 = vsel %vm785_vm3, %v784_v47, 0.0 }
  0xeb   : > { %v808_v52 = vrot.slane %v807_v50, 4  ;;  %v805_v54 = vrot.slane %v804_v49, 1 }
  0xed   : > { %v809_v55 = vadd.f32 %v808_v52, %v807_v50  ;;  %v806_v59 = vadd.f32 %v805_v54, %v804_v49 }
  0xef   : > { %v810_v57 = vrot.slane %v809_v55, 2  ;;  %v815_v63 = vadd.f32 %v814_v61, %v806_v59 }
  0xf1   : > { %v811_v60 = vadd.f32 %v810_v57, %v809_v55 }
  0xf3   : > { %v812_v62 = vrot.slane %v811_v60, 1 }
  0xf5   : > { %v813_v0 = vadd.f32 %v812_v62, %v811_v60 }
  0xf7   : > { %v816_v1 = vadd.f32 %v815_v63, %v813_v0 }
  0xf9   : > { %v817_v2 = vmul.f32 0.0625, %v816_v1 }
  0xfb   : > { %v818_v3 = vsub.f32 %v781_v14, %v817_v2  ;;  %v819_v4 = vsub.f32 %v782_v18, %v817_v2  ;;  %v820_v5 = vsub.f32 %v783_v24, %v817_v2  ;;  %v821_v6 = vsub.f32 %v784_v47, %v817_v2 }
  0xfd   : > { %v822_v7 = vmul.f32 %v818_v3, %v818_v3  ;;  %v823_v8 = vmul.f32 %v819_v4, %v819_v4  ;;  %v824_v9 = vmul.f32 %v820_v5, %v820_v5  ;;  %v825_v12 = vmul.f32 %v821_v6, %v821_v6 }
  0xff   : > { %v826_v13 = vsel %vm785_vm3, %v822_v7, 0.0  ;;  %v833_v15 = vsel %vm785_vm3, %v823_v8, 0.0  ;;  %v840_v16 = vsel %vm785_vm3, %v824_v9, 0.0  ;;  %v847_v17 = vsel %vm785_vm3, %v825_v12, 0.0 }
 0x100   : > { %v827_v19 = vrot.slane %v826_v13, 4  ;;  %v834_v20 = vrot.slane %v833_v15, 4  ;;  %v841_v21 = vrot.slane %v840_v16, 4  ;;  %v848_v22 = vrot.slane %v847_v17, 4 }
 0x102   : > { %v828_v14 = vadd.f32 %v827_v19, %v826_v13  ;;  %v835_v18 = vadd.f32 %v834_v20, %v833_v15  ;;  %v842_v23 = vadd.f32 %v841_v21, %v840_v16  ;;  %v849_v25 = vadd.f32 %v848_v22, %v847_v17 }
 0x104   : > { %v829_v26 = vrot.slane %v828_v14, 2  ;;  %v836_v27 = vrot.slane %v835_v18, 2  ;;  %v843_v28 = vrot.slane %v842_v23, 2  ;;  %v850_v10 = vrot.slane %v849_v25, 2 }
 0x106   : > { %v830_v29 = vadd.f32 %v829_v26, %v828_v14  ;;  %v837_v30 = vadd.f32 %v836_v27, %v835_v18  ;;  %v844_v31 = vadd.f32 %v843_v28, %v842_v23  ;;  %v851_v32 = vadd.f32 %v850_v10, %v849_v25 }
 0x108   : > { %v831_v24 = vrot.slane %v830_v29, 1  ;;  %v838_v33 = vrot.slane %v837_v30, 1  ;;  %v845_v34 = vrot.slane %v844_v31, 1  ;;  %v852_v37 = vrot.slane %v851_v32, 1 }
 0x10a   : > { %v832_v35 = vadd.f32 %v831_v24, %v830_v29  ;;  %v839_v36 = vadd.f32 %v838_v33, %v837_v30  ;;  %v846_v38 = vadd.f32 %v845_v34, %v844_v31  ;;  %v853_v39 = vadd.f32 %v852_v37, %v851_v32 }
 0x10c   : > { %v854_v11 = vadd.f32 %v839_v36, %v832_v35 }
 0x10e   : > { %v855_v40 = vadd.f32 %v854_v11, %v846_v38 }
 0x110   : > { %v856_v41 = vadd.f32 %v855_v40, %v853_v39 }
 0x112   : > { %v857_v42 = vmul.f32 0.0625, %v856_v41 }
 0x114   : > { %v858_v43 = vadd.f32 1e-05, %v857_v42 }
 0x116   : > { %1247 = vrsqrt.f32 %v858_v43  ;;  %vm865_vm5 = vweird.f32 %v858_v43 }
 0x11c   : > { %v1248_v44 = vpop.eup %1247 }
 0x11d   : > { %v860_v45 = vmul.f32 %v1248_v44, %v858_v43  ;;  %vm866_vm4 = vweird.f32 %v1248_v44 }
 0x11e   : > { %vm867_vm6 = vmor %vm865_vm5, %vm866_vm4 }
 0x11f   : > { %v861_v46 = vmul.f32 %v1248_v44, %v860_v45 }
 0x121   : > { %v862_v47 = vmul.f32 0.5, %v861_v46 }
 0x123   : > { %v863_v48 = vsub.f32 1.5, %v862_v47 }
 0x125   : > { %v864_v49 = vmul.f32 %v1248_v44, %v863_v48 }
 0x127   : > { %v868_v50 = vsel %vm867_vm6, %v1248_v44, %v864_v49 }
 0x128   : > { %v869_v51 = vmul.f32 %v868_v50, %v818_v3  ;;  %v870_v52 = vmul.f32 %v868_v50, %v819_v4  ;;  %v871_v53 = vmul.f32 %v868_v50, %v820_v5  ;;  %v872_v54 = vmul.f32 %v868_v50, %v821_v6 }
 0x12a   : > { %v873_v55 = vmax.f32 %v869_v51, 0.0  ;;  %v874_v56 = vmax.f32 %v870_v52, 0.0  ;;  %v875_v57 = vmax.f32 %v871_v53, 0.0  ;;  %v876_v58 = vmax.f32 %v872_v54, 0.0 }
 0x12c   : > { %v877_v59 = vpack.c.bf16 %v873_v55, %v873_v55  ;;  %v878_v60 = vpack.c.bf16 %v874_v56, %v874_v56  ;;  %v879_v61 = vpack.c.bf16 %v875_v57, %v875_v57  ;;  %v880_v62 = vpack.c.bf16 %v876_v58, %v876_v58 }
 0x12e   : > { %881 = vst [vmem:[%s143_s13] sm:$0x3] %v877_v59 }
 0x12f   : > { %882 = vst [vmem:[%s143_s13 + $0x2] sm:$0x3] %v878_v60 }
 0x130   : > { %883 = vst [vmem:[%s143_s13 + $0x4] sm:$0x3] %v879_v61 }
 0x131   : > { %884 = vst [vmem:[%s143_s13 + $0x6] sm:$0x3] %v880_v62 }
 0x132 PF: > { %s12_s9 = sadd.s32 1, %s1255_s9  }
 0x133   : > { %p9_p4 = scmp.ge.s32.totalorder %s12_s9, 4  }
 0x135   :  { %11 = sbr.rel (!%p9_p4) target bundleno = 1 (0x1), region = 66 }

// kernel: warp_res_generator_forward.21
= control target key start
LH: loop header
LB: loop body
LE: loop exit
PB: predicated region body
PF: predicated region fallthrough
CT: control target
= control target key end

     0   :  { %s1347_s12 = smov 0   ;;  %s1576_s0 = inlined_call_operand.vmem [shape: bf16[2,50,64], index: 0, kind: input, shape index: {}]   ;;  %s1577_s1 = inlined_call_operand.vmem [shape: bf16[9,64,128], index: 1, kind: input, shape index: {}]   ;;  %s1578_s2 = inlined_call_operand.vmem [shape: bf16[2,4,4,128], index: 2, kind: input, shape index: {}]   ;;  %s1579_s3 = inlined_call_operand.vmem [shape: bf16[2,4,4,128], index: 3, kind: output, shape index: {}]  }
   0x1 LB: > { %s1007_s13 = sadd.s32 4294967295, %s1325_s12   ;;  %p1011_p0 = scmp.ge.s32.totalorder %s1325_s12, 1  ;;  %s1325_s12 = sphi %s1347_s12, %s13_s12  }
   0x2   : > { %p147_p1 = scmp.lt.s32.totalorder %s1325_s12, 3 }
   0x4   : > { %p148_p2 = pnand %p1011_p0, %p147_p1 }
   0x5   : > { %p176_p3 = scmp.lt.s32.totalorder (!%p148_p2), %s1007_s13, 1 }
   0x6   : > { %151 = sbr.rel (%p148_p2) target bundleno = 306 (0x132), region = 32 }
   0xb   : > { %v1254_v0 = vld [vmem:[%s1577_s1 + $0x38] sm:$0xff]  ;;  %v1253_v3 = vld [vmem:[%s1577_s1 + $0x30] sm:$0xff]  ;;  %s1581_s13 = smov (!%p176_p3, %s1007_s13), 1  ;;  %v1252_v6 = vld [vmem:[%s1577_s1 + $0x28] sm:$0xff]  ;;  %vm229_vm0 = vsmask.f32 7424 }
   0xc   : > { %v1258_v1 = vld [vmem:[%s1577_s1 + $0x58] sm:$0xff]  ;;  %285 = vmatpush.bf16.msra.mxu0 %v1254_v0  ;;  %1304 = vmatpush.bf16.msra.mxu1 %v1254_v0  ;;  %v1257_v4 = vld [vmem:[%s1577_s1 + $0x50] sm:$0xff]  ;;  %s1308_s26 = smul.u32 28, %s1581_s13  ;;  %v1256_v7 = vld [vmem:[%s1577_s1 + $0x48] sm:$0xff]  ;;  %vm356_vm1 = vcmask 1046528   ;;  %vm274_vm2 = vcmask 523264  }
   0xd   : > { %v1262_v2 = vld [vmem:[%s1577_s1 + $0x78] sm:$0xff]  ;;  %396 = vmatpush.bf16.msra.mxu2 %v1258_v1  ;;  %v1261_v5 = vld [vmem:[%s1577_s1 + $0x70] sm:$0xff]  ;;  %v1260_v8 = vld [vmem:[%s1577_s1 + $0x68] sm:$0xff]  ;;  %vm832_vm3 = vcmask 1043456  }
   0xe   : > { %460 = vmatpush.bf16.msra.mxu3 %v1262_v2  ;;  %s1388_s8 = scalar_lea.vmem %s1576_s0, %s1308_s26  ;;  %v1251_v17 = vld [vmem:[%s1577_s1 + $0x20] sm:$0xff]  ;;  %v1250_v21 = vld [vmem:[%s1577_s1 + $0x18] sm:$0xff]  ;;  %v1249_v34 = vld [vmem:[%s1577_s1 + $0x10] sm:$0xff] }
   0xf   : > { %v1391_v9 = vld [vmem:[%s1388_s8] sm:$0xff]   ;;  %v1394_v10 = vld [vmem:[%s1388_s8 + $0x8] sm:$0xff]   ;;  %v1397_v11 = vld [vmem:[%s1388_s8 + $0x10] sm:$0xff]  }
  0x10   : > { %286 = vmatpush.bf16.msra.mxu0 %v1253_v3  ;;  %1305 = vmatpush.bf16.msra.mxu1 %v1253_v3  ;;  %v231_v12 = vshrl.u32 %v1391_v9, 16  ;;  %v233_v13 = vshll.u32 %v1391_v9, 16  ;;  %v238_v14 = vshll.u32 %v1394_v10, 16  ;;  %v1293_v15 = vunpack.c.l.b16 %v1397_v11  ;;  %v1255_v22 = vld [vmem:[%s1577_s1 + $0x40] sm:$0xff]  ;;  %v1266_v26 = vld [vmem:[%s1577_s1 + $0x98] sm:$0xff]  ;;  %v1265_v37 = vld [vmem:[%s1577_s1 + $0x90] sm:$0xff] }
  0x11   : > { %397 = vmatpush.bf16.msra.mxu2 %v1257_v4  ;;  %v242_v16 = vshrl.u32 %v1394_v10, 16  ;;  %v357_v23 = vrot.slane %v1391_v9, 1  ;;  %v1417_v24 = vrot.slane %v1394_v10, 1  ;;  %v1259_v27 = vld [vmem:[%s1577_s1 + $0x60] sm:$0xff]  ;;  %v1274_v30 = vld [vmem:[%s1577_s1 + $0xd8] sm:$0xff]  ;;  %v1290_v32 = vunpack.c.h.b16 %v1394_v10  ;;  %v1273_v40 = vld [vmem:[%s1577_s1 + $0xd0] sm:$0xff] }
  0x12   : > { %461 = vmatpush.bf16.msra.mxu3 %v1261_v5  ;;  %v235_v18 = vrot.slane %v233_v13, 1  ;;  %v240_v19 = vrot.slane %v238_v14, 1  ;;  %v1407_v20 = vpack.c.b16 %v1293_v15, %v1293_v15  ;;  %v1439_v36 = vld [vmem:[%s1388_s8 + $0x4] sm:$0xff]   ;;  %v1278_v38 = vld [vmem:[%s1577_s1 + $0xf8] sm:$0xff]  ;;  %v1277_v45 = vld [vmem:[%s1577_s1 + $0xf0] sm:$0xff]  ;;  %v1294_v62 = vunpack.c.h.b16 %v1397_v11 }
  0x13   : > { %v359_v35 = vsel %vm356_vm1, %v357_v23, %v1417_v24  ;;  %v1454_v41 = vpack.c.b16 %v1293_v15, %v1290_v32  ;;  %v493_v42 = vshll.u32 %v1439_v36, 16  ;;  %v1248_v43 = vld [vmem:[%s1577_s1 + $0x8] sm:$0xff]  ;;  %v491_v47 = vshrl.u32 %v1439_v36, 16  ;;  %v1247_v50 = vld [vmem:[%s1577_s1] sm:$0xff]  ;;  %v1270_v52 = vld [vmem:[%s1577_s1 + $0xb8] sm:$0xff] }
  0x14   : > { %287 = vmatpush.bf16.msra.mxu0 %v1252_v6  ;;  %1306 = vmatpush.bf16.msra.mxu1 %v1252_v6  ;;  %v236_v25 = vor.u32 %v235_v18, %v231_v12  ;;  %v1425_v28 = vor.u32 %v242_v16, %v240_v19  ;;  %v246_v29 = vshll.u32 %v1407_v20, 16  ;;  %v1264_v44 = vld [vmem:[%s1577_s1 + $0x88] sm:$0xff]  ;;  %v1263_v51 = vld [vmem:[%s1577_s1 + $0x80] sm:$0xff]  ;;  %v1282_v53 = vld [vmem:[%s1577_s1 + $0x118] sm:$0xff]  ;;  %v360_v58 = vrot.slane %v1407_v20, 1 }
  0x15   : > { %398 = vmatpush.bf16.msra.mxu2 %v1256_v7  ;;  %v1272_v46 = vld [vmem:[%s1577_s1 + $0xc8] sm:$0xff]  ;;  %v495_v48 = vrot.slane %v493_v42, 1  ;;  %v497_v49 = vshll.u32 %v1454_v41, 16  ;;  %v1271_v57 = vld [vmem:[%s1577_s1 + $0xc0] sm:$0xff]  ;;  %v1269_v59 = vld [vmem:[%s1577_s1 + $0xb0] sm:$0xff]  ;;  %v490_v2 = vpack.c.b16 %v1294_v62, %v1294_v62  ;;  %v501_v5 = vshrl.u32 %v1454_v41, 16 }
  0x16   : > { %462 = vmatpush.bf16.msra.mxu3 %v1260_v8  ;;  %v241_v31 = vsel %vm229_vm0, %v236_v25, %v240_v19  ;;  %v248_v33 = vrot.slane %v246_v29, 1  ;;  %v1276_v54 = vld [vmem:[%s1577_s1 + $0xe8] sm:$0xff]  ;;  %v1275_v60 = vld [vmem:[%s1577_s1 + $0xe0] sm:$0xff]  ;;  %v361_v63 = vsel %vm356_vm1, %v1417_v24, %v360_v58  ;;  %v1281_v0 = vld [vmem:[%s1577_s1 + $0x110] sm:$0xff]  ;;  %v701_v8 = vshll.u32 %v1397_v11, 16 }
  0x17   : > { %v496_v55 = vor.u32 %v495_v48, %v491_v47  ;;  %v499_v56 = vrot.slane %v497_v49, 1  ;;  %v1268_v1 = vld [vmem:[%s1577_s1 + $0xa8] sm:$0xff]  ;;  %v1267_v4 = vld [vmem:[%s1577_s1 + $0xa0] sm:$0xff]  ;;  %v505_v6 = vshll.u32 %v490_v2, 16  ;;  %v198_v14 = vld [vmem:[%s1388_s8 + $0x18] sm:$0x1] }
  0x18   : > { %288 = vmatpush.bf16.msra.mxu0 %v1251_v17  ;;  %1307 = vmatpush.bf16.msra.mxu1 %v1251_v17  ;;  %v249_v39 = vsel %vm229_vm0, %v1425_v28, %v248_v33  ;;  %v1280_v3 = vld [vmem:[%s1577_s1 + $0x108] sm:$0xff]  ;;  %v1279_v7 = vld [vmem:[%s1577_s1 + $0x100] sm:$0xff]  ;;  %v703_v13 = vrot.slane %v701_v8, 1  ;;  %v699_v17 = vunpack.c.l.b16 %v198_v14  ;;  %v705_v19 = vshrl.u32 %v1397_v11, 16  ;;  %s1245_s8 = sshll.u32 %s1581_s13, 3 }
  0x19   : > { %399 = vmatpush.bf16.msra.mxu2 %v1255_v22  ;;  %v500_v61 = vsel %vm229_vm0, %v496_v55, %v499_v56  ;;  %v507_v12 = vrot.slane %v505_v6, 1  ;;  %v571_v22 = vrot.slane %v1439_v36, 1  ;;  %v572_v23 = vrot.slane %v1454_v41, 1  ;;  %s185_s19 = scalar_lea.vmem %s1578_s2, %s1245_s8  ;;  %s190_s21 = scalar_lea.vmem %s1579_s3, %s1245_s8 }
  0x1a   : > { %463 = vmatpush.bf16.msra.mxu3 %v1259_v27  ;;  %v704_v16 = vsel %vm229_vm0, %v1425_v28, %v703_v13  ;;  %v700_v18 = vpack.c.b16 %v699_v17, %v699_v17  ;;  %v707_v25 = vor.u32 %v705_v19, %v703_v13 }
  0x1b   : > { %1041 = vmatmul.msk.bf16.vlgmr.msra.gmra.mxu0 %vm274_vm2, %v241_v31  ;;  %1042 = vmatmul.msk.bf16.vlgmr.msra.gmra.mxu1 %vm274_vm2, %v249_v39  ;;  %v573_v28 = vsel %vm356_vm1, %v571_v22, %v572_v23 }
  0x1c   : > { %332 = vmatpush.bf16.msrb.mxu1 %v1250_v21  ;;  %543 = vmatpush.bf16.msrb.mxu0 %v1266_v26  ;;  %v709_v20 = vshll.u32 %v700_v18, 16  ;;  %v775_v21 = vrot.slane %v1397_v11, 1  ;;  %v777_v29 = vrot.slane %v700_v18, 1 }
  0x1d   : > { %670 = vmatpush.bf16.msrb.mxu2 %v1274_v30  ;;  %1111 = vmatmul.msk.bf16.vlgmr.msra.gmra.mxu3 %vm274_vm2, %v1439_v36  ;;  %v574_v30 = vrot.slane %v490_v2, 1 }
  0x1e   : > { %1085 = vmatmul.msk.bf16.vlgmr.msra.gmra.mxu2 %vm274_vm2, %v359_v35  ;;  %747 = vmatpush.bf16.msrb.mxu3 %v1278_v38  ;;  %v711_v26 = vrot.slane %v709_v20, 1  ;;  %v776_v27 = vsel %vm356_vm1, %v1417_v24, %v775_v21  ;;  %v778_v31 = vsel %vm356_vm1, %v775_v21, %v777_v29 }
  0x1f   : > { %v575_v32 = vsel %vm356_vm1, %v572_v23, %v574_v30 }
  0x20   : > { %333 = vmatpush.bf16.msrb.mxu1 %v1249_v34  ;;  %544 = vmatpush.bf16.msrb.mxu0 %v1265_v37 }
  0x21   : > { %671 = vmatpush.bf16.msrb.mxu2 %v1273_v40 }
  0x22   : > { %748 = vmatpush.bf16.msrb.mxu3 %v1277_v45 }
  0x24   : > { %334 = vmatpush.bf16.msrb.mxu1 %v1248_v43  ;;  %545 = vmatpush.bf16.msrb.mxu0 %v1264_v44 }
  0x25   : > { %672 = vmatpush.bf16.msrb.mxu2 %v1272_v46 }
  0x26   : > { %749 = vmatpush.bf16.msrb.mxu3 %v1276_v54 }
  0x28   : > { %335 = vmatpush.bf16.msrb.mxu1 %v1247_v50  ;;  %546 = vmatpush.bf16.msrb.mxu0 %v1263_v51 }
  0x29   : > { %673 = vmatpush.bf16.msrb.mxu2 %v1271_v57 }
  0x2a   : > { %750 = vmatpush.bf16.msrb.mxu3 %v1275_v60 }
  0x2b   : > { %1137 = vmatmul.msk.bf16.vlgmr.msrb.gmra.mxu0 %vm274_vm2, %v500_v61  ;;  %1059 = vmatmul.msk.bf16.vlgmr.msrb.gmra.mxu1 %vm274_vm2, %v1391_v9  ;;  %v503_v9 = vor.u32 %v501_v5, %v499_v56 }
  0x2c   : > { %610 = vmatpush.bf16.msra.mxu1 %v1270_v52  ;;  %813 = vmatpush.bf16.msra.mxu0 %v1282_v53 }
  0x2d   : > { %1112 = vmatmul.msk.bf16.gmra.mxu3 %vm274_vm2, %v1454_v41  ;;  %v508_v15 = vsel %vm229_vm0, %v503_v9, %v507_v12 }
  0x2e   : > { %1086 = vmatmul.msk.bf16.gmra.mxu2 %vm274_vm2, %v361_v63 }
  0x30   : > { %611 = vmatpush.bf16.msra.mxu1 %v1269_v59  ;;  %814 = vmatpush.bf16.msra.mxu0 %v1281_v0 }
  0x34   : > { %612 = vmatpush.bf16.msra.mxu1 %v1268_v1  ;;  %815 = vmatpush.bf16.msra.mxu0 %v1280_v3 }
  0x38   : > { %613 = vmatpush.bf16.msra.mxu1 %v1267_v4  ;;  %816 = vmatpush.bf16.msra.mxu0 %v1279_v7 }
  0x3b   : > { %1138 = vmatmul.msk.bf16.gmra.mxu0 %vm274_vm2, %v508_v15  ;;  %1060 = vmatmul.msk.bf16.gmra.mxu1 %vm274_vm2, %v1394_v10 }
  0x3d   : > { %1215 = vmatmul.msk.bf16.vlgmr.msrb.gmra.mxu3 %vm274_vm2, %v704_v16 }
  0x3e   : > { %1189 = vmatmul.msk.bf16.vlgmr.msrb.gmra.mxu2 %vm274_vm2, %v1394_v10  ;;  %v712_v10 = vsel %vm229_vm0, %v707_v25, %v711_v26 }
  0x4b   : > { %1241 = vmatmul.msk.bf16.vlgmr.msra.gmra.mxu0 %vm274_vm2, %v776_v27  ;;  %1163 = vmatmul.msk.bf16.vlgmr.msra.gmra.mxu1 %vm274_vm2, %v573_v28 }
  0x4d   : > { %1216 = vmatmul.msk.bf16.gmra.mxu3 %vm274_vm2, %v712_v10 }
  0x4e   : > { %1190 = vmatmul.msk.bf16.gmra.mxu2 %vm274_vm2, %v1397_v11 }
  0x5b   : > { %1242 = vmatmul.msk.bf16.gmra.mxu0 %vm274_vm2, %v778_v31  ;;  %1164 = vmatmul.msk.bf16.gmra.mxu1 %vm274_vm2, %v575_v32 }
  0x98   : > { %v290_v24 = vpop.f32.mrf.mxu0  ;;  %v295_v33 = vpop.f32.mrf.mxu1 }
  0xa0   : > { %v292_v35 = vpop.f32.mrf.mxu0  ;;  %v465_v36 = vpop.f32.mrf.mxu3 }
  0xa1   : > { %v401_v34 = vpop.f32.mrf.mxu2  ;;  %v297_v37 = vpop.f32.mrf.mxu1 }
  0xa8   : > { %v548_v11 = vpop.f32.mrf.mxu0  ;;  %v467_v40 = vpop.f32.mrf.mxu3 }
  0xa9   : > { %v403_v38 = vpop.f32.mrf.mxu2  ;;  %v337_v39 = vpop.f32.mrf.mxu1 }
  0xaa   : > { %v338_v48 = vadd.f32 %v337_v39, %v290_v24 }
  0xac   : > { %v411_v50 = vadd.f32 %v401_v34, %v338_v48 }
  0xae   : > { %v475_v53 = vadd.f32 %v465_v36, %v411_v50 }
  0xb0   : > { %v550_v41 = vpop.f32.mrf.mxu0  ;;  %v470_v44 = vpop.f32.mrf.mxu3  ;;  %v558_v57 = vadd.f32 %v548_v11, %v475_v53 }
  0xb1   : > { %v339_v42 = vpop.f32.mrf.mxu1  ;;  %v406_v43 = vpop.f32.mrf.mxu2 }
  0xb2   : > { %v340_v54 = vadd.f32 %v339_v42, %v292_v35 }
  0xb4   : > { %v412_v58 = vadd.f32 %v403_v38, %v340_v54 }
  0xb6   : > { %v476_v62 = vadd.f32 %v467_v40, %v412_v58 }
  0xb8   : > { %v553_v45 = vpop.f32.mrf.mxu0  ;;  %v472_v49 = vpop.f32.mrf.mxu3  ;;  %v559_v2 = vadd.f32 %v550_v41, %v476_v62 }
  0xb9   : > { %v342_v46 = vpop.f32.mrf.mxu1  ;;  %v408_v47 = vpop.f32.mrf.mxu2 }
  0xba   : > { %v343_v63 = vadd.f32 %v342_v46, %v295_v33 }
  0xbc   : > { %v413_v3 = vadd.f32 %v406_v43, %v343_v63 }
  0xbe   : > { %v477_v9 = vadd.f32 %v470_v44, %v413_v3 }
  0xc0   : > { %v555_v51 = vpop.f32.mrf.mxu0  ;;  %v752_v56 = vpop.f32.mrf.mxu3  ;;  %v560_v16 = vadd.f32 %v553_v45, %v477_v9 }
  0xc1   : > { %v344_v52 = vpop.f32.mrf.mxu1  ;;  %v675_v55 = vpop.f32.mrf.mxu2 }
  0xc2   : > { %v345_v12 = vadd.f32 %v344_v52, %v297_v37 }
  0xc4   : > { %v414_v17 = vadd.f32 %v408_v47, %v345_v12 }
  0xc6   : > { %v478_v27 = vadd.f32 %v472_v49, %v414_v17 }
  0xc8   : > { %v818_v60 = vpop.f32.mrf.mxu0  ;;  %v754_v4 = vpop.f32.mrf.mxu3  ;;  %v561_v32 = vadd.f32 %v555_v51, %v478_v27 }
  0xc9   : > { %v615_v59 = vpop.f32.mrf.mxu1  ;;  %v677_v1 = vpop.f32.mrf.mxu2 }
  0xca   : > { %v625_v61 = vadd.f32 %v615_v59, %v558_v57 }
  0xcc   : > { %v685_v0 = vadd.f32 %v675_v55, %v625_v61 }
  0xce   : > { %v762_v6 = vadd.f32 %v752_v56, %v685_v0 }
  0xd0   : > { %v820_v8 = vpop.f32.mrf.mxu0  ;;  %v828_v14 = vadd.f32 %v818_v60, %v762_v6  ;;  %v757_v26 = vpop.f32.mrf.mxu3 }
  0xd1   : > { %v617_v5 = vpop.f32.mrf.mxu1  ;;  %v680_v19 = vpop.f32.mrf.mxu2 }
  0xd2   : > { %v626_v7 = vadd.f32 %v617_v5, %v559_v2  ;;  %v833_v21 = vsel %vm832_vm3, %v828_v14, 0.0 }
  0xd3   : > { %v834_v10 = vrot.slane %v833_v21, 4 }
  0xd4   : > { %v686_v13 = vadd.f32 %v677_v1, %v626_v7 }
  0xd5   : > { %v835_v33 = vadd.f32 %v834_v10, %v833_v21 }
  0xd6   : > { %v763_v15 = vadd.f32 %v754_v4, %v686_v13 }
  0xd7   : > { %v836_v40 = vrot.slane %v835_v33, 2 }
  0xd8   : > { %v829_v18 = vadd.f32 %v820_v8, %v763_v15  ;;  %v823_v29 = vpop.f32.mrf.mxu0  ;;  %v759_v42 = vpop.f32.mrf.mxu3 }
  0xd9   : > { %v620_v20 = vpop.f32.mrf.mxu1  ;;  %v682_v11 = vpop.f32.mrf.mxu2  ;;  %v837_v48 = vadd.f32 %v836_v40, %v835_v33 }
  0xda   : > { %v840_v22 = vsel %vm832_vm3, %v829_v18, 0.0  ;;  %v627_v23 = vadd.f32 %v620_v20, %v560_v16 }
  0xdb   : > { %v841_v25 = vrot.slane %v840_v22, 4  ;;  %v838_v53 = vrot.slane %v837_v48, 1 }
  0xdc   : > { %v687_v28 = vadd.f32 %v680_v19, %v627_v23 }
  0xdd   : > { %v842_v31 = vadd.f32 %v841_v25, %v840_v22  ;;  %v839_v58 = vadd.f32 %v838_v53, %v837_v48  ;;  %v920_v48 = vld [vmem:[%s185_s19] sm:$0x3] }
  0xde   : > { %v764_v30 = vadd.f32 %v757_v26, %v687_v28 }
  0xdf   : > { %v843_v37 = vrot.slane %v842_v31, 2 }
  0xe0   : > { %v830_v24 = vadd.f32 %v823_v29, %v764_v30  ;;  %v825_v46 = vpop.f32.mrf.mxu0 }
  0xe1   : > { %v622_v34 = vpop.f32.mrf.mxu1  ;;  %v844_v44 = vadd.f32 %v843_v37, %v842_v31 }
  0xe2   : > { %v847_v35 = vsel %vm832_vm3, %v830_v24, 0.0  ;;  %v628_v36 = vadd.f32 %v622_v34, %v561_v32 }
  0xe3   : > { %v848_v38 = vrot.slane %v847_v35, 4  ;;  %v845_v51 = vrot.slane %v844_v44, 1 }
  0xe4   : > { %v688_v39 = vadd.f32 %v682_v11, %v628_v36 }
  0xe5   : > { %v849_v41 = vadd.f32 %v848_v38, %v847_v35  ;;  %v846_v56 = vadd.f32 %v845_v51, %v844_v44  ;;  %v922_v51 = vld [vmem:[%s185_s19 + $0x4] sm:$0x3] }
  0xe6   : > { %v765_v43 = vadd.f32 %v759_v42, %v688_v39 }
  0xe7   : > { %v850_v45 = vrot.slane %v849_v41, 2  ;;  %v861_v61 = vadd.f32 %v846_v56, %v839_v58  ;;  %v926_v56 = vunpack.c.l.bf16 %v922_v51 }
  0xe8   : > { %v831_v47 = vadd.f32 %v825_v46, %v765_v43 }
  0xe9   : > { %v851_v49 = vadd.f32 %v850_v45, %v849_v41 }
  0xea   : > { %v854_v50 = vsel %vm832_vm3, %v831_v47, 0.0 }
  0xeb   : > { %v855_v52 = vrot.slane %v854_v50, 4  ;;  %v852_v54 = vrot.slane %v851_v49, 1 }
  0xed   : > { %v856_v55 = vadd.f32 %v855_v52, %v854_v50  ;;  %v853_v59 = vadd.f32 %v852_v54, %v851_v49  ;;  %v921_v49 = vld [vmem:[%s185_s19 + $0x2] sm:$0x3]  ;;  %v923_v52 = vld [vmem:[%s185_s19 + $0x6] sm:$0x3]  ;;  %v924_v54 = vunpack.c.l.bf16 %v920_v48 }
  0xef   : > { %v857_v57 = vrot.slane %v856_v55, 2  ;;  %v862_v63 = vadd.f32 %v861_v61, %v853_v59 }
  0xf1   : > { %v858_v60 = vadd.f32 %v857_v57, %v856_v55  ;;  %v925_v55 = vunpack.c.l.bf16 %v921_v49  ;;  %v927_v57 = vunpack.c.l.bf16 %v923_v52 }
  0xf3   : > { %v859_v62 = vrot.slane %v858_v60, 1 }
  0xf5   : > { %v860_v0 = vadd.f32 %v859_v62, %v858_v60 }
  0xf7   : > { %v863_v1 = vadd.f32 %v862_v63, %v860_v0 }
  0xf9   : > { %v864_v2 = vmul.f32 0.0625, %v863_v1 }
  0xfb   : > { %v1557_v3 = vsub.f32 %v828_v14, %v864_v2  ;;  %v866_v4 = vsub.f32 %v829_v18, %v864_v2  ;;  %v867_v5 = vsub.f32 %v830_v24, %v864_v2  ;;  %v868_v6 = vsub.f32 %v831_v47, %v864_v2 }
  0xfd   : > { %v869_v7 = vmul.f32 %v1557_v3, %v1557_v3  ;;  %v870_v8 = vmul.f32 %v866_v4, %v866_v4  ;;  %v871_v9 = vmul.f32 %v867_v5, %v867_v5  ;;  %v872_v12 = vmul.f32 %v868_v6, %v868_v6 }
  0xff   : > { %v873_v13 = vsel %vm832_vm3, %v869_v7, 0.0  ;;  %v880_v15 = vsel %vm832_vm3, %v870_v8, 0.0  ;;  %v887_v16 = vsel %vm832_vm3, %v871_v9, 0.0  ;;  %v894_v17 = vsel %vm832_vm3, %v872_v12, 0.0 }
 0x100   : > { %v874_v19 = vrot.slane %v873_v13, 4  ;;  %v881_v14 = vrot.slane %v880_v15, 4  ;;  %v888_v20 = vrot.slane %v887_v16, 4  ;;  %v895_v18 = vrot.slane %v894_v17, 4 }
 0x102   : > { %v875_v21 = vadd.f32 %v874_v19, %v873_v13  ;;  %v882_v22 = vadd.f32 %v881_v14, %v880_v15  ;;  %v889_v23 = vadd.f32 %v888_v20, %v887_v16  ;;  %v896_v25 = vadd.f32 %v895_v18, %v894_v17 }
 0x104   : > { %v876_v26 = vrot.slane %v875_v21, 2  ;;  %v883_v27 = vrot.slane %v882_v22, 2  ;;  %v890_v28 = vrot.slane %v889_v23, 2  ;;  %v897_v10 = vrot.slane %v896_v25, 2 }
 0x106   : > { %v877_v29 = vadd.f32 %v876_v26, %v875_v21  ;;  %v884_v30 = vadd.f32 %v883_v27, %v882_v22  ;;  %v891_v31 = vadd.f32 %v890_v28, %v889_v23  ;;  %v898_v32 = vadd.f32 %v897_v10, %v896_v25 }
 0x108   : > { %v878_v24 = vrot.slane %v877_v29, 1  ;;  %v885_v33 = vrot.slane %v884_v30, 1  ;;  %v892_v34 = vrot.slane %v891_v31, 1  ;;  %v899_v37 = vrot.slane %v898_v32, 1 }
 0x10a   : > { %v879_v35 = vadd.f32 %v878_v24, %v877_v29  ;;  %v886_v36 = vadd.f32 %v885_v33, %v884_v30  ;;  %v893_v38 = vadd.f32 %v892_v34, %v891_v31  ;;  %v900_v39 = vadd.f32 %v899_v37, %v898_v32 }
 0x10c   : > { %v901_v11 = vadd.f32 %v886_v36, %v879_v35 }
 0x10e   : > { %v902_v40 = vadd.f32 %v901_v11, %v893_v38 }
 0x110   : > { %v903_v41 = vadd.f32 %v902_v40, %v900_v39 }
 0x112   : > { %v904_v42 = vmul.f32 0.0625, %v903_v41 }
 0x114   : > { %v905_v43 = vadd.f32 1e-05, %v904_v42 }
 0x116   : > { %1317 = vrsqrt.f32 %v905_v43  ;;  %vm912_vm5 = vweird.f32 %v905_v43 }
 0x11c   : > { %v1318_v44 = vpop.eup %1317 }
 0x11d   : > { %v907_v45 = vmul.f32 %v1318_v44, %v905_v43  ;;  %vm913_vm4 = vweird.f32 %v1318_v44 }
 0x11e   : > { %vm914_vm6 = vmor %vm912_vm5, %vm913_vm4 }
 0x11f   : > { %v908_v46 = vmul.f32 %v1318_v44, %v907_v45 }
 0x121   : > { %v909_v47 = vmul.f32 0.5, %v908_v46 }
 0x123   : > { %v910_v50 = vsub.f32 1.5, %v909_v47 }
 0x125   : > { %v911_v53 = vmul.f32 %v1318_v44, %v910_v50 }
 0x127   : > { %v915_v58 = vsel %vm914_vm6, %v1318_v44, %v911_v53 }
 0x128   : > { %v916_v59 = vmul.f32 %v915_v58, %v1557_v3  ;;  %v917_v60 = vmul.f32 %v915_v58, %v866_v4  ;;  %v918_v61 = vmul.f32 %v915_v58, %v867_v5  ;;  %v919_v62 = vmul.f32 %v915_v58, %v868_v6 }
 0x12a   : > { %v928_v63 = vadd.f32 %v924_v54, %v916_v59  ;;  %v929_v0 = vadd.f32 %v925_v55, %v917_v60  ;;  %v930_v1 = vadd.f32 %v926_v56, %v918_v61  ;;  %v931_v2 = vadd.f32 %v927_v57, %v919_v62 }
 0x12c   : > { %v932_v7 = vpack.c.bf16 %v928_v63, %v928_v63  ;;  %v933_v8 = vpack.c.bf16 %v929_v0, %v929_v0  ;;  %v934_v9 = vpack.c.bf16 %v930_v1, %v930_v1  ;;  %v935_v12 = vpack.c.bf16 %v931_v2, %v931_v2 }
 0x12e   : > { %936 = vst [vmem:[%s190_s21] sm:$0x3] %v932_v7 }
 0x12f   : > { %937 = vst [vmem:[%s190_s21 + $0x2] sm:$0x3] %v933_v8 }
 0x130   : > { %938 = vst [vmem:[%s190_s21 + $0x4] sm:$0x3] %v934_v9 }
 0x131   : > { %939 = vst [vmem:[%s190_s21 + $0x6] sm:$0x3] %v935_v12 }
 0x132 PF: > { %s13_s12 = sadd.s32 1, %s1325_s12  }
 0x133   : > { %p10_p4 = scmp.ge.s32.totalorder %s13_s12, 4  }
 0x135   :  { %12 = sbr.rel (!%p10_p4) target bundleno = 1 (0x1), region = 73 }

// kernel: warp_res_generator_forward.24
= control target key start
LH: loop header
LB: loop body
LE: loop exit
PB: predicated region body
PF: predicated region fallthrough
CT: control target
= control target key end

     0   :  { %s1543_s9 = smov 0   ;;  %s2203_s0 = inlined_call_operand.vmem [shape: bf16[2,40,128], index: 0, kind: input, shape index: {}]   ;;  %s2204_s1 = inlined_call_operand.vmem [shape: bf16[2,128,512], index: 1, kind: input, shape index: {}]   ;;  %s2205_s2 = inlined_call_operand.vmem [shape: bf16[2,4,4,512], index: 2, kind: output, shape index: {}]  }
   0x1 LB: > { %s1123_s10 = sadd.s32 4294967295, %s1526_s9   ;;  %p1127_p0 = scmp.ge.s32.totalorder %s1526_s9, 1  ;;  %s1526_s9 = sphi %s1543_s9, %s12_s9  }
   0x2   : > { %p112_p1 = scmp.lt.s32.totalorder %s1526_s9, 3 }
   0x4   : > { %p113_p2 = pnand %p1127_p0, %p112_p1 }
   0x5   : > { %p134_p3 = scmp.lt.s32.totalorder (!%p113_p2), %s1123_s10, 1 }
   0x6   : > { %116 = sbr.rel (%p113_p2) target bundleno = 349 (0x15d), region = 28 }
   0xb   : > { %v1277_v0 = vld [vmem:[%s2204_s1 + $0x1e0] sm:$0xf]  ;;  %v1484_v1 = vld [vmem:[%s2204_s1 + $0x1ec] sm:$0xf0]  ;;  %v1482_v2 = vld [vmem:[%s2204_s1 + $0x1e4] sm:$0xf] }
   0xc   : > { %v1278_v3 = vor.u32 %v1484_v1, %v1277_v0  ;;  %v1279_v4 = vld [vmem:[%s2204_s1 + $0x1f0] sm:$0xf0]  ;;  %v1285_v5 = vld [vmem:[%s2204_s1 + $0x1e8] sm:$0xf]  ;;  %v1485_v6 = vld [vmem:[%s2204_s1 + $0x1f4] sm:$0xf0] }
   0xd   : > { %v1282_v7 = vor.u32 %v1482_v2, %v1279_v4  ;;  %v1286_v8 = vor.u32 %v1485_v6, %v1285_v5  ;;  %v1483_v9 = vld [vmem:[%s2204_s1 + $0x1ec] sm:$0xf]  ;;  %v1287_v10 = vld [vmem:[%s2204_s1 + $0x1f8] sm:$0xf0]  ;;  %v1261_v11 = vld [vmem:[%s2204_s1 + $0x1c0] sm:$0xf] }
   0xe   : > { %386 = vmatpush.bf16.msra.mxu0 %v1278_v3  ;;  %v1290_v12 = vor.u32 %v1483_v9, %v1287_v10  ;;  %v1480_v13 = vld [vmem:[%s2204_s1 + $0x1cc] sm:$0xf0]  ;;  %v1478_v14 = vld [vmem:[%s2204_s1 + $0x1c4] sm:$0xf]  ;;  %v1263_v15 = vld [vmem:[%s2204_s1 + $0x1d0] sm:$0xf0] }
   0xf   : > { %405 = vmatpush.bf16.msra.mxu1 %v1282_v7  ;;  %424 = vmatpush.bf16.msra.mxu2 %v1286_v8  ;;  %v1262_v16 = vor.u32 %v1480_v13, %v1261_v11  ;;  %v1266_v17 = vor.u32 %v1478_v14, %v1263_v15  ;;  %v1269_v18 = vld [vmem:[%s2204_s1 + $0x1c8] sm:$0xf]  ;;  %v1481_v19 = vld [vmem:[%s2204_s1 + $0x1d4] sm:$0xf0]  ;;  %v1479_v20 = vld [vmem:[%s2204_s1 + $0x1cc] sm:$0xf] }
  0x10   : > { %443 = vmatpush.bf16.msra.mxu3 %v1290_v12  ;;  %v1270_v21 = vor.u32 %v1481_v19, %v1269_v18  ;;  %v1271_v22 = vld [vmem:[%s2204_s1 + $0x1d8] sm:$0xf0]  ;;  %v1245_v23 = vld [vmem:[%s2204_s1 + $0x1a0] sm:$0xf]  ;;  %v1476_v24 = vld [vmem:[%s2204_s1 + $0x1ac] sm:$0xf0] }
  0x11   : > { %v1274_v25 = vor.u32 %v1479_v20, %v1271_v22  ;;  %v1474_v26 = vld [vmem:[%s2204_s1 + $0x1a4] sm:$0xf]  ;;  %v1247_v27 = vld [vmem:[%s2204_s1 + $0x1b0] sm:$0xf0]  ;;  %v1253_v28 = vld [vmem:[%s2204_s1 + $0x1a8] sm:$0xf]  ;;  %v1246_v29 = vor.u32 %v1476_v24, %v1245_v23 }
  0x12   : > { %387 = vmatpush.bf16.msra.mxu0 %v1262_v16  ;;  %v1477_v30 = vld [vmem:[%s2204_s1 + $0x1b4] sm:$0xf0]  ;;  %v1475_v31 = vld [vmem:[%s2204_s1 + $0x1ac] sm:$0xf]  ;;  %v1255_v32 = vld [vmem:[%s2204_s1 + $0x1b8] sm:$0xf0]  ;;  %v1250_v33 = vor.u32 %v1474_v26, %v1247_v27 }
  0x13   : > { %406 = vmatpush.bf16.msra.mxu1 %v1266_v17  ;;  %425 = vmatpush.bf16.msra.mxu2 %v1270_v21  ;;  %v1254_v34 = vor.u32 %v1477_v30, %v1253_v28  ;;  %v1229_v35 = vld [vmem:[%s2204_s1 + $0x180] sm:$0xf]  ;;  %v1472_v36 = vld [vmem:[%s2204_s1 + $0x18c] sm:$0xf0]  ;;  %v1470_v37 = vld [vmem:[%s2204_s1 + $0x184] sm:$0xf]  ;;  %v1258_v38 = vor.u32 %v1475_v31, %v1255_v32 }
  0x14   : > { %444 = vmatpush.bf16.msra.mxu3 %v1274_v25  ;;  %v1231_v39 = vld [vmem:[%s2204_s1 + $0x190] sm:$0xf0]  ;;  %v1237_v40 = vld [vmem:[%s2204_s1 + $0x188] sm:$0xf]  ;;  %v1473_v41 = vld [vmem:[%s2204_s1 + $0x194] sm:$0xf0]  ;;  %v1230_v44 = vor.u32 %v1472_v36, %v1229_v35 }
  0x15   : > { %v1471_v42 = vld [vmem:[%s2204_s1 + $0x18c] sm:$0xf]  ;;  %v1239_v43 = vld [vmem:[%s2204_s1 + $0x198] sm:$0xf0]  ;;  %v1234_v45 = vor.u32 %v1470_v37, %v1231_v39  ;;  %v1238_v46 = vor.u32 %v1473_v41, %v1237_v40  ;;  %v1213_v47 = vld [vmem:[%s2204_s1 + $0x160] sm:$0xf] }
  0x16   : > { %388 = vmatpush.bf16.msra.mxu0 %v1246_v29  ;;  %v1468_v48 = vld [vmem:[%s2204_s1 + $0x16c] sm:$0xf0]  ;;  %v1466_v49 = vld [vmem:[%s2204_s1 + $0x164] sm:$0xf]  ;;  %v1242_v50 = vor.u32 %v1471_v42, %v1239_v43  ;;  %v1215_v51 = vld [vmem:[%s2204_s1 + $0x170] sm:$0xf0] }
  0x17   : > { %407 = vmatpush.bf16.msra.mxu1 %v1250_v33  ;;  %426 = vmatpush.bf16.msra.mxu2 %v1254_v34  ;;  %v1221_v52 = vld [vmem:[%s2204_s1 + $0x168] sm:$0xf]  ;;  %v1469_v53 = vld [vmem:[%s2204_s1 + $0x174] sm:$0xf0]  ;;  %v1467_v54 = vld [vmem:[%s2204_s1 + $0x16c] sm:$0xf]  ;;  %v1214_v56 = vor.u32 %v1468_v48, %v1213_v47  ;;  %v1218_v57 = vor.u32 %v1466_v49, %v1215_v51 }
  0x18   : > { %445 = vmatpush.bf16.msra.mxu3 %v1258_v38  ;;  %v1223_v55 = vld [vmem:[%s2204_s1 + $0x178] sm:$0xf0]  ;;  %v1222_v58 = vor.u32 %v1469_v53, %v1221_v52  ;;  %v1197_v59 = vld [vmem:[%s2204_s1 + $0x140] sm:$0xf]  ;;  %v1464_v60 = vld [vmem:[%s2204_s1 + $0x14c] sm:$0xf0] }
  0x19   : > { %v1462_v61 = vld [vmem:[%s2204_s1 + $0x144] sm:$0xf]  ;;  %v1226_v62 = vor.u32 %v1467_v54, %v1223_v55  ;;  %v1199_v63 = vld [vmem:[%s2204_s1 + $0x150] sm:$0xf0]  ;;  %v1205_v0 = vld [vmem:[%s2204_s1 + $0x148] sm:$0xf]  ;;  %v1198_v4 = vor.u32 %v1464_v60, %v1197_v59 }
  0x1a   : > { %389 = vmatpush.bf16.msra.mxu0 %v1230_v44  ;;  %v1465_v1 = vld [vmem:[%s2204_s1 + $0x154] sm:$0xf0]  ;;  %v1463_v2 = vld [vmem:[%s2204_s1 + $0x14c] sm:$0xf]  ;;  %v1207_v3 = vld [vmem:[%s2204_s1 + $0x158] sm:$0xf0]  ;;  %v1202_v6 = vor.u32 %v1462_v61, %v1199_v63 }
  0x1b   : > { %408 = vmatpush.bf16.msra.mxu1 %v1234_v45  ;;  %427 = vmatpush.bf16.msra.mxu2 %v1238_v46  ;;  %v1181_v5 = vld [vmem:[%s2204_s1 + $0x120] sm:$0xf]  ;;  %v1206_v7 = vor.u32 %v1465_v1, %v1205_v0  ;;  %v1460_v8 = vld [vmem:[%s2204_s1 + $0x12c] sm:$0xf0]  ;;  %v1458_v9 = vld [vmem:[%s2204_s1 + $0x124] sm:$0xf]  ;;  %v1210_v11 = vor.u32 %v1463_v2, %v1207_v3 }
  0x1c   : > { %446 = vmatpush.bf16.msra.mxu3 %v1242_v50  ;;  %v1183_v10 = vld [vmem:[%s2204_s1 + $0x130] sm:$0xf0]  ;;  %v1189_v12 = vld [vmem:[%s2204_s1 + $0x128] sm:$0xf]  ;;  %v1461_v13 = vld [vmem:[%s2204_s1 + $0x134] sm:$0xf0]  ;;  %v1182_v16 = vor.u32 %v1460_v8, %v1181_v5 }
  0x1d   : > { %v1459_v14 = vld [vmem:[%s2204_s1 + $0x12c] sm:$0xf]  ;;  %v1191_v15 = vld [vmem:[%s2204_s1 + $0x138] sm:$0xf0]  ;;  %v1165_v17 = vld [vmem:[%s2204_s1 + $0x100] sm:$0xf]  ;;  %v1186_v19 = vor.u32 %v1458_v9, %v1183_v10  ;;  %v1190_v20 = vor.u32 %v1461_v13, %v1189_v12 }
  0x1e   : > { %390 = vmatpush.bf16.msra.mxu0 %v1214_v56  ;;  %v1456_v18 = vld [vmem:[%s2204_s1 + $0x10c] sm:$0xf0]  ;;  %s2207_s10 = smov (!%p134_p3, %s1123_s10), 1  ;;  %v1454_v21 = vld [vmem:[%s2204_s1 + $0x104] sm:$0xf]  ;;  %v1194_v24 = vor.u32 %v1459_v14, %v1191_v15  ;;  %vm704_vm0 = vcmask 1043456  }
  0x1f   : > { %409 = vmatpush.bf16.msra.mxu1 %v1218_v57  ;;  %428 = vmatpush.bf16.msra.mxu2 %v1222_v58  ;;  %v1167_v22 = vld [vmem:[%s2204_s1 + $0x110] sm:$0xf0]  ;;  %v1173_v23 = vld [vmem:[%s2204_s1 + $0x108] sm:$0xf]  ;;  %v1457_v25 = vld [vmem:[%s2204_s1 + $0x114] sm:$0xf0]  ;;  %v1166_v30 = vor.u32 %v1456_v18, %v1165_v17 }
  0x20   : > { %447 = vmatpush.bf16.msra.mxu3 %v1226_v62  ;;  %v1455_v26 = vld [vmem:[%s2204_s1 + $0x10c] sm:$0xf]  ;;  %s1509_s5 = smul.u32 20, %s2207_s10  ;;  %v1175_v27 = vld [vmem:[%s2204_s1 + $0x118] sm:$0xf0]  ;;  %v1170_v33 = vor.u32 %v1454_v21, %v1167_v22  ;;  %v1174_v34 = vor.u32 %v1457_v25, %v1173_v23 }
  0x21   : > { %v1413_v28 = vld [vmem:[%s2204_s1 + $0xe8] sm:$0xf]  ;;  %v1453_v29 = vld [vmem:[%s2204_s1 + $0xf4] sm:$0xf0]  ;;  %v1450_v31 = vld [vmem:[%s2204_s1 + $0xe4] sm:$0xf]  ;;  %v1178_v36 = vor.u32 %v1455_v26, %v1175_v27 }
  0x22   : > { %391 = vmatpush.bf16.msra.mxu0 %v1198_v4  ;;  %s1759_s16 = scalar_lea.vmem %s2203_s0, %s1509_s5  ;;  %v1407_v32 = vld [vmem:[%s2204_s1 + $0xf0] sm:$0xf0]  ;;  %v1405_v35 = vld [vmem:[%s2204_s1 + $0xe0] sm:$0xf]  ;;  %v1414_v37 = vor.u32 %v1453_v29, %v1413_v28  ;;  %v1452_v38 = vld [vmem:[%s2204_s1 + $0xec] sm:$0xf0] }
  0x23   : > { %410 = vmatpush.bf16.msra.mxu1 %v1202_v6  ;;  %429 = vmatpush.bf16.msra.mxu2 %v1206_v7  ;;  %v1451_v39 = vld [vmem:[%s2204_s1 + $0xec] sm:$0xf]  ;;  %v1415_v40 = vld [vmem:[%s2204_s1 + $0xf8] sm:$0xf0]  ;;  %v1507_v41 = vld [vmem:[%s1759_s16 + $0x4] sm:$0xff]   ;;  %v1410_v42 = vor.u32 %v1450_v31, %v1407_v32  ;;  %v1406_v47 = vor.u32 %v1452_v38, %v1405_v35 }
  0x24   : > { %448 = vmatpush.bf16.msra.mxu3 %v1210_v11  ;;  %v1397_v43 = vld [vmem:[%s2204_s1 + $0xc8] sm:$0xf]  ;;  %v1449_v44 = vld [vmem:[%s2204_s1 + $0xd4] sm:$0xf0]  ;;  %v1446_v45 = vld [vmem:[%s2204_s1 + $0xc4] sm:$0xf]  ;;  %v1418_v48 = vor.u32 %v1451_v39, %v1415_v40 }
  0x25   : > { %v1391_v46 = vld [vmem:[%s2204_s1 + $0xd0] sm:$0xf0]  ;;  %v1398_v49 = vor.u32 %v1449_v44, %v1397_v43  ;;  %v1389_v50 = vld [vmem:[%s2204_s1 + $0xc0] sm:$0xf]  ;;  %v1448_v51 = vld [vmem:[%s2204_s1 + $0xcc] sm:$0xf0] }
  0x26   : > { %392 = vmatpush.bf16.msra.mxu0 %v1182_v16  ;;  %v1447_v52 = vld [vmem:[%s2204_s1 + $0xcc] sm:$0xf]  ;;  %v1394_v53 = vor.u32 %v1446_v45, %v1391_v46  ;;  %v1399_v54 = vld [vmem:[%s2204_s1 + $0xd8] sm:$0xf0]  ;;  %v1381_v55 = vld [vmem:[%s2204_s1 + $0xa8] sm:$0xf]  ;;  %v1390_v59 = vor.u32 %v1448_v51, %v1389_v50 }
  0x27   : > { %411 = vmatpush.bf16.msra.mxu1 %v1186_v19  ;;  %430 = vmatpush.bf16.msra.mxu2 %v1190_v20  ;;  %v1445_v56 = vld [vmem:[%s2204_s1 + $0xb4] sm:$0xf0]  ;;  %v1442_v57 = vld [vmem:[%s2204_s1 + $0xa4] sm:$0xf]  ;;  %v1375_v58 = vld [vmem:[%s2204_s1 + $0xb0] sm:$0xf0]  ;;  %v1402_v60 = vor.u32 %v1447_v52, %v1399_v54 }
  0x28   : > { %449 = vmatpush.bf16.msra.mxu3 %v1194_v24  ;;  %v1382_v61 = vor.u32 %v1445_v56, %v1381_v55  ;;  %v1373_v62 = vld [vmem:[%s2204_s1 + $0xa0] sm:$0xf]  ;;  %v1444_v63 = vld [vmem:[%s2204_s1 + $0xac] sm:$0xf0]  ;;  %v1443_v0 = vld [vmem:[%s2204_s1 + $0xac] sm:$0xf]  ;;  %v1378_v1 = vor.u32 %v1442_v57, %v1375_v58 }
  0x29   : > { %v1383_v2 = vld [vmem:[%s2204_s1 + $0xb8] sm:$0xf0]  ;;  %v1365_v3 = vld [vmem:[%s2204_s1 + $0x88] sm:$0xf]  ;;  %v1441_v4 = vld [vmem:[%s2204_s1 + $0x94] sm:$0xf0]  ;;  %v1374_v7 = vor.u32 %v1444_v63, %v1373_v62 }
  0x2a   : > { %393 = vmatpush.bf16.msra.mxu0 %v1166_v30  ;;  %v1438_v5 = vld [vmem:[%s2204_s1 + $0x84] sm:$0xf]  ;;  %v1359_v6 = vld [vmem:[%s2204_s1 + $0x90] sm:$0xf0]  ;;  %v1386_v8 = vor.u32 %v1443_v0, %v1383_v2  ;;  %v1366_v9 = vor.u32 %v1441_v4, %v1365_v3  ;;  %v1357_v10 = vld [vmem:[%s2204_s1 + $0x80] sm:$0xf] }
  0x2b   : > { %412 = vmatpush.bf16.msra.mxu1 %v1170_v33  ;;  %431 = vmatpush.bf16.msra.mxu2 %v1174_v34  ;;  %v1440_v11 = vld [vmem:[%s2204_s1 + $0x8c] sm:$0xf0]  ;;  %v1439_v12 = vld [vmem:[%s2204_s1 + $0x8c] sm:$0xf]  ;;  %v1362_v13 = vor.u32 %v1438_v5, %v1359_v6  ;;  %v1367_v14 = vld [vmem:[%s2204_s1 + $0x98] sm:$0xf0] }
  0x2c   : > { %450 = vmatpush.bf16.msra.mxu3 %v1178_v36  ;;  %v1349_v15 = vld [vmem:[%s2204_s1 + $0x68] sm:$0xf]  ;;  %v1437_v16 = vld [vmem:[%s2204_s1 + $0x74] sm:$0xf0]  ;;  %v1434_v17 = vld [vmem:[%s2204_s1 + $0x64] sm:$0xf]  ;;  %v1358_v19 = vor.u32 %v1440_v11, %v1357_v10  ;;  %v1370_v21 = vor.u32 %v1439_v12, %v1367_v14 }
  0x2d   : > { %394 = vmatmul.bf16.vlgmr.msra.gmra.mxu0 %v1507_v41  ;;  %v1343_v18 = vld [vmem:[%s2204_s1 + $0x70] sm:$0xf0]  ;;  %v1508_v20 = vld [vmem:[%s1759_s16 + $0xc] sm:$0xff]  ;;  %v1350_v22 = vor.u32 %v1437_v16, %v1349_v15  ;;  %v1341_v23 = vld [vmem:[%s2204_s1 + $0x60] sm:$0xf] }
  0x2e   : > { %413 = vmatmul.bf16.vlgmr.msra.gmra.mxu1 %v1507_v41  ;;  %432 = vmatmul.bf16.vlgmr.msra.gmra.mxu2 %v1507_v41  ;;  %v1436_v24 = vld [vmem:[%s2204_s1 + $0x6c] sm:$0xf0]  ;;  %v1435_v25 = vld [vmem:[%s2204_s1 + $0x6c] sm:$0xf]  ;;  %v1346_v26 = vor.u32 %v1434_v17, %v1343_v18  ;;  %v1351_v27 = vld [vmem:[%s2204_s1 + $0x78] sm:$0xf0] }
  0x2f   : > { %666 = vmatpush.bf16.msrb.mxu2 %v1414_v37  ;;  %647 = vmatpush.bf16.msrb.mxu1 %v1410_v42  ;;  %v1333_v28 = vld [vmem:[%s2204_s1 + $0x48] sm:$0xf]  ;;  %v1433_v29 = vld [vmem:[%s2204_s1 + $0x54] sm:$0xf0]  ;;  %v1430_v30 = vld [vmem:[%s2204_s1 + $0x44] sm:$0xf]  ;;  %v1342_v32 = vor.u32 %v1436_v24, %v1341_v23  ;;  %v1354_v33 = vor.u32 %v1435_v25, %v1351_v27 }
  0x30   : > { %451 = vmatmul.bf16.vlgmr.msra.gmra.mxu3 %v1507_v41  ;;  %628 = vmatpush.bf16.msrb.mxu0 %v1406_v47  ;;  %v1327_v31 = vld [vmem:[%s2204_s1 + $0x50] sm:$0xf0]  ;;  %v1334_v34 = vor.u32 %v1433_v29, %v1333_v28  ;;  %v1325_v35 = vld [vmem:[%s2204_s1 + $0x40] sm:$0xf]  ;;  %v1432_v36 = vld [vmem:[%s2204_s1 + $0x4c] sm:$0xf0] }
  0x31   : > { %685 = vmatpush.bf16.msrb.mxu3 %v1418_v48  ;;  %v1431_v37 = vld [vmem:[%s2204_s1 + $0x4c] sm:$0xf]  ;;  %v1330_v38 = vor.u32 %v1430_v30, %v1327_v31  ;;  %v1335_v39 = vld [vmem:[%s2204_s1 + $0x58] sm:$0xf0]  ;;  %v1317_v40 = vld [vmem:[%s2204_s1 + $0x28] sm:$0xf]  ;;  %v1326_v44 = vor.u32 %v1432_v36, %v1325_v35 }
  0x32   : > { %v1429_v41 = vld [vmem:[%s2204_s1 + $0x34] sm:$0xf0]  ;;  %v1426_v42 = vld [vmem:[%s2204_s1 + $0x24] sm:$0xf]  ;;  %v1311_v43 = vld [vmem:[%s2204_s1 + $0x30] sm:$0xf0]  ;;  %v1338_v45 = vor.u32 %v1431_v37, %v1335_v39 }
  0x33   : > { %667 = vmatpush.bf16.msrb.mxu2 %v1398_v49  ;;  %648 = vmatpush.bf16.msrb.mxu1 %v1394_v53  ;;  %v1318_v46 = vor.u32 %v1429_v41, %v1317_v40  ;;  %v1309_v47 = vld [vmem:[%s2204_s1 + $0x20] sm:$0xf]  ;;  %v1428_v48 = vld [vmem:[%s2204_s1 + $0x2c] sm:$0xf0]  ;;  %v1427_v49 = vld [vmem:[%s2204_s1 + $0x2c] sm:$0xf]  ;;  %v1314_v50 = vor.u32 %v1426_v42, %v1311_v43 }
  0x34   : > { %629 = vmatpush.bf16.msrb.mxu0 %v1390_v59  ;;  %v1319_v51 = vld [vmem:[%s2204_s1 + $0x38] sm:$0xf0]  ;;  %v1301_v52 = vld [vmem:[%s2204_s1 + $0x8] sm:$0xf]  ;;  %v1425_v53 = vld [vmem:[%s2204_s1 + $0x14] sm:$0xf0]  ;;  %v1310_v56 = vor.u32 %v1428_v48, %v1309_v47 }
  0x35   : > { %686 = vmatpush.bf16.msrb.mxu3 %v1402_v60  ;;  %v1422_v54 = vld [vmem:[%s2204_s1 + $0x4] sm:$0xf]  ;;  %v1295_v55 = vld [vmem:[%s2204_s1 + $0x10] sm:$0xf0]  ;;  %v1322_v57 = vor.u32 %v1427_v49, %v1319_v51  ;;  %v1302_v58 = vor.u32 %v1425_v53, %v1301_v52  ;;  %v1293_v59 = vld [vmem:[%s2204_s1] sm:$0xf] }
  0x36   : > { %v1424_v60 = vld [vmem:[%s2204_s1 + $0xc] sm:$0xf0]  ;;  %v1423_v62 = vld [vmem:[%s2204_s1 + $0xc] sm:$0xf]  ;;  %v1303_v63 = vld [vmem:[%s2204_s1 + $0x18] sm:$0xf0] }
  0x37   : > { %668 = vmatpush.bf16.msrb.mxu2 %v1382_v61  ;;  %649 = vmatpush.bf16.msrb.mxu1 %v1378_v1  ;;  %v1298_v61 = vor.u32 %v1422_v54, %v1295_v55  ;;  %v1294_v0 = vor.u32 %v1424_v60, %v1293_v59  ;;  %v1306_v1 = vor.u32 %v1423_v62, %v1303_v63  ;;  %v1487_v2 = vld [vmem:[%s1759_s16] sm:$0xff]   ;;  %v1494_v3 = vld [vmem:[%s1759_s16 + $0x8] sm:$0xff]   ;;  %s1421_s16 = sshll.u32 %s2207_s10, 5 }
  0x38   : > { %630 = vmatpush.bf16.msrb.mxu0 %v1374_v7  ;;  %s2174_s17 = scalar_lea.vmem %s2205_s2, %s1421_s16 }
  0x39   : > { %687 = vmatpush.bf16.msrb.mxu3 %v1386_v8 }
  0x3b   : > { %669 = vmatpush.bf16.msrb.mxu2 %v1366_v9  ;;  %650 = vmatpush.bf16.msrb.mxu1 %v1362_v13 }
  0x3c   : > { %631 = vmatpush.bf16.msrb.mxu0 %v1358_v19 }
  0x3d   : > { %688 = vmatpush.bf16.msrb.mxu3 %v1370_v21  ;;  %399 = vmatmul.bf16.gmra.mxu0 %v1508_v20 }
  0x3e   : > { %418 = vmatmul.bf16.gmra.mxu1 %v1508_v20  ;;  %437 = vmatmul.bf16.gmra.mxu2 %v1508_v20 }
  0x3f   : > { %670 = vmatpush.bf16.msrb.mxu2 %v1350_v22  ;;  %651 = vmatpush.bf16.msrb.mxu1 %v1346_v26 }
  0x40   : > { %456 = vmatmul.bf16.gmra.mxu3 %v1508_v20  ;;  %632 = vmatpush.bf16.msrb.mxu0 %v1342_v32 }
  0x41   : > { %689 = vmatpush.bf16.msrb.mxu3 %v1354_v33 }
  0x43   : > { %671 = vmatpush.bf16.msrb.mxu2 %v1334_v34  ;;  %652 = vmatpush.bf16.msrb.mxu1 %v1330_v38 }
  0x44   : > { %633 = vmatpush.bf16.msrb.mxu0 %v1326_v44 }
  0x45   : > { %690 = vmatpush.bf16.msrb.mxu3 %v1338_v45 }
  0x47   : > { %672 = vmatpush.bf16.msrb.mxu2 %v1318_v46  ;;  %653 = vmatpush.bf16.msrb.mxu1 %v1314_v50 }
  0x48   : > { %634 = vmatpush.bf16.msrb.mxu0 %v1310_v56 }
  0x49   : > { %691 = vmatpush.bf16.msrb.mxu3 %v1322_v57 }
  0x4b   : > { %673 = vmatpush.bf16.msrb.mxu2 %v1302_v58  ;;  %654 = vmatpush.bf16.msrb.mxu1 %v1298_v61 }
  0x4c   : > { %635 = vmatpush.bf16.msrb.mxu0 %v1294_v0 }
  0x4d   : > { %692 = vmatpush.bf16.msrb.mxu3 %v1306_v1 }
  0x4e   : > { %655 = vmatmul.bf16.vlgmr.msrb.gmra.mxu1 %v1487_v2  ;;  %674 = vmatmul.bf16.vlgmr.msrb.gmra.mxu2 %v1487_v2 }
  0x4f   : > { %636 = vmatmul.bf16.vlgmr.msrb.gmra.mxu0 %v1487_v2 }
  0x50   : > { %693 = vmatmul.bf16.vlgmr.msrb.gmra.mxu3 %v1487_v2 }
  0x5e   : > { %660 = vmatmul.bf16.gmra.mxu1 %v1494_v3  ;;  %679 = vmatmul.bf16.gmra.mxu2 %v1494_v3 }
  0x5f   : > { %641 = vmatmul.bf16.gmra.mxu0 %v1494_v3 }
  0x60   : > { %698 = vmatmul.bf16.gmra.mxu3 %v1494_v3 }
  0xaa   : > { %v395_v4 = vpop.f32.mrf.mxu0 }
  0xab   : > { %v414_v5 = vpop.f32.mrf.mxu1 }
  0xb1   : > { %v433_v6 = vpop.f32.mrf.mxu2 }
  0xb2   : > { %v397_v8 = vpop.f32.mrf.mxu0 }
  0xb3   : > { %v452_v7 = vpop.f32.mrf.mxu3  ;;  %v416_v9 = vpop.f32.mrf.mxu1 }
  0xb9   : > { %v435_v10 = vpop.f32.mrf.mxu2 }
  0xba   : > { %v400_v12 = vpop.f32.mrf.mxu0 }
  0xbb   : > { %v454_v11 = vpop.f32.mrf.mxu3  ;;  %v419_v13 = vpop.f32.mrf.mxu1 }
  0xc1   : > { %v1951_v14 = vpop.f32.mrf.mxu2 }
  0xc2   : > { %v1955_v16 = vpop.f32.mrf.mxu0 }
  0xc3   : > { %v1953_v15 = vpop.f32.mrf.mxu3  ;;  %v1957_v17 = vpop.f32.mrf.mxu1 }
  0xc9   : > { %v1959_v18 = vpop.f32.mrf.mxu2 }
  0xcb   : > { %v1961_v19 = vpop.f32.mrf.mxu3  ;;  %v656_v21 = vpop.f32.mrf.mxu1 }
  0xcc   : > { %v637_v20 = vpop.f32.mrf.mxu0  ;;  %v1965_v23 = vadd.f32 %v656_v21, %v414_v5 }
  0xcd   : > { %v1963_v22 = vadd.f32 %v637_v20, %v395_v4 }
  0xce   : > { %v736_v25 = vsel %vm704_vm0, %v1965_v23, 0.0 }
  0xcf   : > { %v705_v24 = vsel %vm704_vm0, %v1963_v22, 0.0  ;;  %v737_v27 = vrot.slane %v736_v25, 4 }
  0xd0   : > { %v706_v26 = vrot.slane %v705_v24, 4 }
  0xd1   : > { %v738_v29 = vadd.f32 %v737_v27, %v736_v25  ;;  %v675_v30 = vpop.f32.mrf.mxu2 }
  0xd2   : > { %v707_v28 = vadd.f32 %v706_v26, %v705_v24  ;;  %v1971_v32 = vadd.f32 %v675_v30, %v433_v6 }
  0xd3   : > { %v694_v31 = vpop.f32.mrf.mxu3  ;;  %v658_v35 = vpop.f32.mrf.mxu1  ;;  %v739_v41 = vrot.slane %v738_v29, 2 }
  0xd4   : > { %v1973_v33 = vadd.f32 %v694_v31, %v452_v7  ;;  %v639_v34 = vpop.f32.mrf.mxu0  ;;  %v1977_v37 = vadd.f32 %v658_v35, %v416_v9  ;;  %v708_v38 = vrot.slane %v707_v28, 2  ;;  %v768_v39 = vsel %vm704_vm0, %v1971_v32, 0.0 }
  0xd5   : > { %v1975_v36 = vadd.f32 %v639_v34, %v397_v8  ;;  %v769_v43 = vrot.slane %v768_v39, 4  ;;  %v740_v48 = vadd.f32 %v739_v41, %v738_v29 }
  0xd6   : > { %v800_v40 = vsel %vm704_vm0, %v1973_v33, 0.0  ;;  %v743_v45 = vsel %vm704_vm0, %v1977_v37, 0.0  ;;  %v709_v47 = vadd.f32 %v708_v38, %v707_v28 }
  0xd7   : > { %v712_v42 = vsel %vm704_vm0, %v1975_v36, 0.0  ;;  %v801_v46 = vrot.slane %v800_v40, 4  ;;  %v744_v50 = vrot.slane %v743_v45, 4  ;;  %v770_v53 = vadd.f32 %v769_v43, %v768_v39 }
  0xd8   : > { %v713_v44 = vrot.slane %v712_v42, 4  ;;  %v710_v61 = vrot.slane %v709_v47, 1  ;;  %v741_v0 = vrot.slane %v740_v48, 1 }
  0xd9   : > { %v677_v51 = vpop.f32.mrf.mxu2  ;;  %v802_v58 = vadd.f32 %v801_v46, %v800_v40  ;;  %v745_v2 = vadd.f32 %v744_v50, %v743_v45  ;;  %v771_v4 = vrot.slane %v770_v53, 2 }
  0xda   : > { %v714_v49 = vadd.f32 %v713_v44, %v712_v42  ;;  %v1987_v54 = vadd.f32 %v677_v51, %v435_v10 }
  0xdb   : > { %v696_v52 = vpop.f32.mrf.mxu3  ;;  %v661_v57 = vpop.f32.mrf.mxu1  ;;  %v803_v8 = vrot.slane %v802_v58, 2  ;;  %v746_v21 = vrot.slane %v745_v2, 2  ;;  %v2005_v26 = vadd.f32 %v771_v4, %v770_v53 }
  0xdc   : > { %v1989_v55 = vadd.f32 %v696_v52, %v454_v11  ;;  %v642_v56 = vpop.f32.mrf.mxu0  ;;  %v1993_v60 = vadd.f32 %v661_v57, %v419_v13  ;;  %v775_v62 = vsel %vm704_vm0, %v1987_v54, 0.0  ;;  %v715_v1 = vrot.slane %v714_v49, 2 }
  0xdd   : > { %v1991_v59 = vadd.f32 %v642_v56, %v400_v12  ;;  %v776_v3 = vrot.slane %v775_v62, 4  ;;  %v711_v12 = vadd.f32 %v710_v61, %v709_v47  ;;  %v2003_v13 = vadd.f32 %v741_v0, %v740_v48 }
  0xde   : > { %v807_v63 = vsel %vm704_vm0, %v1989_v55, 0.0  ;;  %v750_v7 = vsel %vm704_vm0, %v1993_v60, 0.0  ;;  %v716_v20 = vadd.f32 %v715_v1, %v714_v49  ;;  %v2007_v34 = vadd.f32 %v803_v8, %v802_v58 }
  0xdf   : > { %v808_v5 = vrot.slane %v807_v63, 4  ;;  %v719_v6 = vsel %vm704_vm0, %v1991_v59, 0.0  ;;  %v777_v9 = vadd.f32 %v776_v3, %v775_v62  ;;  %v751_v11 = vrot.slane %v750_v7, 4 }
  0xe0   : > { %v720_v10 = vrot.slane %v719_v6, 4  ;;  %v717_v44 = vrot.slane %v716_v20, 1  ;;  %v747_v45 = vadd.f32 %v746_v21, %v745_v2  ;;  %v773_v50 = vrot.slane %v2005_v26, 1 }
  0xe1   : > { %v680_v24 = vpop.f32.mrf.mxu2  ;;  %v809_v27 = vadd.f32 %v808_v5, %v807_v63  ;;  %v752_v29 = vadd.f32 %v751_v11, %v750_v7  ;;  %v778_v35 = vrot.slane %v777_v9, 2 }
  0xe2   : > { %v721_v28 = vadd.f32 %v720_v10, %v719_v6  ;;  %v2010_v38 = vadd.f32 %v680_v24, %v1951_v14  ;;  %v718_v58 = vadd.f32 %v717_v44, %v716_v20  ;;  %v748_v61 = vrot.slane %v747_v45, 1 }
  0xe3   : > { %v699_v25 = vpop.f32.mrf.mxu3  ;;  %v663_v31 = vpop.f32.mrf.mxu1  ;;  %v753_v41 = vrot.slane %v752_v29, 2  ;;  %v810_v47 = vrot.slane %v809_v27, 2  ;;  %v779_v52 = vadd.f32 %v778_v35, %v777_v9 }
  0xe4   : > { %v644_v30 = vpop.f32.mrf.mxu0  ;;  %v2013_v39 = vadd.f32 %v699_v25, %v1953_v15  ;;  %v722_v40 = vrot.slane %v721_v28, 2  ;;  %v2019_v43 = vadd.f32 %v663_v31, %v1957_v17  ;;  %v782_v46 = vsel %vm704_vm0, %v2010_v38, 0.0 }
  0xe5   : > { %v2016_v42 = vadd.f32 %v644_v30, %v1955_v16  ;;  %v783_v15 = vrot.slane %v782_v46, 4  ;;  %v805_v16 = vrot.slane %v2007_v34, 1  ;;  %v754_v53 = vadd.f32 %v753_v41, %v752_v29 }
  0xe6   : > { %v814_v14 = vsel %vm704_vm0, %v2013_v39, 0.0  ;;  %v723_v48 = vadd.f32 %v722_v40, %v721_v28  ;;  %v757_v51 = vsel %vm704_vm0, %v2019_v43, 0.0  ;;  %v811_v2 = vadd.f32 %v810_v47, %v809_v27 }
  0xe7   : > { %v815_v49 = vrot.slane %v814_v14, 4  ;;  %v726_v17 = vsel %vm704_vm0, %v2016_v42, 0.0  ;;  %v784_v56 = vadd.f32 %v783_v15, %v782_v46  ;;  %v758_v63 = vrot.slane %v757_v51, 4 }
  0xe8   : > { %v727_v62 = vrot.slane %v726_v17, 4  ;;  %v724_v3 = vrot.slane %v723_v48, 1  ;;  %v780_v10 = vrot.slane %v779_v52, 1  ;;  %v755_v11 = vrot.slane %v754_v53, 1 }
  0xe9   : > { %v816_v57 = vadd.f32 %v815_v49, %v814_v14  ;;  %v682_v0 = vpop.f32.mrf.mxu2  ;;  %v785_v4 = vrot.slane %v784_v56, 2  ;;  %v759_v7 = vadd.f32 %v758_v63, %v757_v51  ;;  %v733_v29 = vadd.f32 %v718_v58, %v711_v12 }
  0xea   : > { %v728_v6 = vadd.f32 %v727_v62, %v726_v17  ;;  %v2032_v8 = vadd.f32 %v682_v0, %v1959_v18  ;;  %v749_v30 = vadd.f32 %v748_v61, %v747_v45  ;;  %v812_v35 = vrot.slane %v811_v2, 1 }
  0xeb   : > { %v701_v1 = vpop.f32.mrf.mxu3  ;;  %v817_v5 = vrot.slane %v816_v57, 2  ;;  %v786_v20 = vadd.f32 %v785_v4, %v784_v56  ;;  %v760_v25 = vrot.slane %v759_v7, 2  ;;  %v725_v40 = vadd.f32 %v724_v3, %v723_v48 }
  0xec   : > { %v2035_v9 = vadd.f32 %v701_v1, %v1961_v19  ;;  %v729_v24 = vrot.slane %v728_v6, 2  ;;  %v789_v27 = vsel %vm704_vm0, %v2032_v8, 0.0  ;;  %v756_v44 = vadd.f32 %v755_v11, %v754_v53 }
  0xed   : > { %v818_v21 = vadd.f32 %v817_v5, %v816_v57  ;;  %v790_v31 = vrot.slane %v789_v27, 4  ;;  %v761_v41 = vadd.f32 %v760_v25, %v759_v7  ;;  %v787_v46 = vrot.slane %v786_v20, 1 }
  0xee   : > { %v821_v28 = vsel %vm704_vm0, %v2035_v9, 0.0  ;;  %v730_v19 = vadd.f32 %v729_v24, %v728_v6  ;;  %v781_v15 = vadd.f32 %v780_v10, %v779_v52  ;;  %v774_v56 = vadd.f32 %v773_v50, %v2005_v26 }
  0xef   : > { %v822_v18 = vrot.slane %v821_v28, 4  ;;  %v791_v14 = vadd.f32 %v790_v31, %v789_v27  ;;  %v819_v49 = vrot.slane %v818_v21, 1  ;;  %v762_v51 = vrot.slane %v761_v41, 1 }
  0xf0   : > { %v731_v17 = vrot.slane %v730_v19, 1  ;;  %v764_v57 = vadd.f32 %v749_v30, %v2003_v13  ;;  %v813_v58 = vadd.f32 %v812_v35, %v811_v2  ;;  %v734_v61 = vadd.f32 %v733_v29, %v725_v40 }
  0xf1   : > { %v823_v47 = vadd.f32 %v822_v18, %v821_v28  ;;  %v792_v12 = vrot.slane %v791_v14, 2  ;;  %v763_v48 = vadd.f32 %v762_v51, %v761_v41  ;;  %v788_v0 = vadd.f32 %v787_v46, %v786_v20 }
  0xf2   : > { %v732_v62 = vadd.f32 %v731_v17, %v730_v19  ;;  %v765_v63 = vadd.f32 %v764_v57, %v756_v44  ;;  %v806_v3 = vadd.f32 %v805_v16, %v2007_v34  ;;  %v796_v52 = vadd.f32 %v781_v15, %v774_v56 }
  0xf3   : > { %v824_v45 = vrot.slane %v823_v47, 2  ;;  %v793_v53 = vadd.f32 %v792_v12, %v791_v14  ;;  %v820_v4 = vadd.f32 %v819_v49, %v818_v21 }
  0xf4   : > { %v735_v5 = vadd.f32 %v734_v61, %v732_v62  ;;  %v766_v6 = vadd.f32 %v765_v63, %v763_v48  ;;  %v828_v50 = vadd.f32 %v813_v58, %v806_v3  ;;  %v797_v13 = vadd.f32 %v796_v52, %v788_v0 }
  0xf5   : > { %v825_v1 = vadd.f32 %v824_v45, %v823_v47  ;;  %v794_v7 = vrot.slane %v793_v53, 1 }
  0xf6   : > { %v829_v2 = vadd.f32 %v828_v50, %v820_v4  ;;  %v767_v24 = vadd.f32 %v766_v6, %v735_v5 }
  0xf7   : > { %v826_v26 = vrot.slane %v825_v1, 1  ;;  %v795_v10 = vadd.f32 %v794_v7, %v793_v53 }
  0xf9   : > { %v827_v11 = vadd.f32 %v826_v26, %v825_v1  ;;  %v798_v25 = vadd.f32 %v797_v13, %v795_v10 }
  0xfb   : > { %v799_v27 = vadd.f32 %v798_v25, %v767_v24  ;;  %v830_v28 = vadd.f32 %v829_v2, %v827_v11 }
  0xfd   : > { %v831_v20 = vadd.f32 %v830_v28, %v799_v27 }
  0xff   : > { %v2044_v29 = vmul.f32 0.015625, %v831_v20 }
 0x101   : > { %v2048_v34 = vsub.f32 %v1963_v22, %v2044_v29  ;;  %v2052_v16 = vsub.f32 %v1975_v36, %v2044_v29  ;;  %v2056_v21 = vsub.f32 %v1991_v59, %v2044_v29  ;;  %v2060_v30 = vsub.f32 %v2016_v42, %v2044_v29 }
 0x102   : > { %v2064_v31 = vsub.f32 %v1965_v23, %v2044_v29  ;;  %v2068_v22 = vsub.f32 %v1977_v37, %v2044_v29  ;;  %v2072_v36 = vsub.f32 %v1993_v60, %v2044_v29  ;;  %v2076_v59 = vsub.f32 %v2019_v43, %v2044_v29 }
 0x103   : > { %v837_v42 = vmul.f32 %v2048_v34, %v2048_v34  ;;  %v838_v18 = vmul.f32 %v2052_v16, %v2052_v16  ;;  %v839_v23 = vmul.f32 %v2056_v21, %v2056_v21  ;;  %v840_v37 = vmul.f32 %v2060_v30, %v2060_v30 }
 0x104   : > { %v876_v60 = vmul.f32 %v2064_v31, %v2064_v31  ;;  %v877_v35 = vmul.f32 %v2068_v22, %v2068_v22  ;;  %v878_v43 = vmul.f32 %v2072_v36, %v2072_v36  ;;  %v879_v40 = vmul.f32 %v2076_v59, %v2076_v59 }
 0x105   : > { %v841_v19 = vsel %vm704_vm0, %v837_v42, 0.0  ;;  %v848_v41 = vsel %vm704_vm0, %v838_v18, 0.0  ;;  %v855_v44 = vsel %vm704_vm0, %v839_v23, 0.0  ;;  %v862_v46 = vsel %vm704_vm0, %v840_v37, 0.0 }
 0x106   : > { %v842_v14 = vrot.slane %v841_v19, 4  ;;  %v849_v47 = vrot.slane %v848_v41, 4  ;;  %v856_v15 = vrot.slane %v855_v44, 4  ;;  %v863_v49 = vrot.slane %v862_v46, 4 }
 0x107   : > { %v880_v17 = vsel %vm704_vm0, %v876_v60, 0.0  ;;  %v887_v51 = vsel %vm704_vm0, %v877_v35, 0.0  ;;  %v894_v56 = vsel %vm704_vm0, %v878_v43, 0.0  ;;  %v901_v57 = vsel %vm704_vm0, %v879_v40, 0.0 }
 0x108   : > { %v843_v12 = vadd.f32 %v842_v14, %v841_v19  ;;  %v850_v45 = vadd.f32 %v849_v47, %v848_v41  ;;  %v857_v58 = vadd.f32 %v856_v15, %v855_v44  ;;  %v864_v61 = vadd.f32 %v863_v49, %v862_v46 }
 0x109   : > { %v881_v62 = vrot.slane %v880_v17, 4  ;;  %v888_v48 = vrot.slane %v887_v51, 4  ;;  %v895_v63 = vrot.slane %v894_v56, 4  ;;  %v902_v0 = vrot.slane %v901_v57, 4 }
 0x10a   : > { %v844_v53 = vrot.slane %v843_v12, 2  ;;  %v851_v1 = vrot.slane %v850_v45, 2  ;;  %v858_v3 = vrot.slane %v857_v58, 2  ;;  %v865_v52 = vrot.slane %v864_v61, 2 }
 0x10b   : > { %v882_v4 = vadd.f32 %v881_v62, %v880_v17  ;;  %v889_v5 = vadd.f32 %v888_v48, %v887_v51  ;;  %v896_v6 = vadd.f32 %v895_v63, %v894_v56  ;;  %v903_v7 = vadd.f32 %v902_v0, %v901_v57 }
 0x10c   : > { %v845_v26 = vadd.f32 %v844_v53, %v843_v12  ;;  %v852_v50 = vadd.f32 %v851_v1, %v850_v45  ;;  %v859_v13 = vadd.f32 %v858_v3, %v857_v58  ;;  %v866_v10 = vadd.f32 %v865_v52, %v864_v61 }
 0x10d   : > { %v883_v11 = vrot.slane %v882_v4, 2  ;;  %v890_v2 = vrot.slane %v889_v5, 2  ;;  %v897_v24 = vrot.slane %v896_v6, 2  ;;  %v904_v25 = vrot.slane %v903_v7, 2 }
 0x10e   : > { %v846_v27 = vrot.slane %v845_v26, 1  ;;  %v853_v28 = vrot.slane %v852_v50, 1  ;;  %v860_v20 = vrot.slane %v859_v13, 1  ;;  %v867_v42 = vrot.slane %v866_v10, 1 }
 0x10f   : > { %v884_v18 = vadd.f32 %v883_v11, %v882_v4  ;;  %v891_v23 = vadd.f32 %v890_v2, %v889_v5  ;;  %v898_v37 = vadd.f32 %v897_v24, %v896_v6  ;;  %v2102_v35 = vadd.f32 %v904_v25, %v903_v7 }
 0x110   : > { %v847_v60 = vadd.f32 %v846_v27, %v845_v26  ;;  %v854_v43 = vadd.f32 %v853_v28, %v852_v50  ;;  %v2106_v44 = vsub.f32 %v1971_v32, %v2044_v29  ;;  %v2110_v46 = vsub.f32 %v1987_v54, %v2044_v29 }
 0x111   : > { %v885_v40 = vrot.slane %v884_v18, 1  ;;  %v892_v19 = vrot.slane %v891_v23, 1  ;;  %v899_v41 = vrot.slane %v898_v37, 1  ;;  %v2114_v14 = vsub.f32 %v2010_v38, %v2044_v29 }
 0x112   : > { %v861_v47 = vadd.f32 %v860_v20, %v859_v13  ;;  %v868_v15 = vadd.f32 %v867_v42, %v866_v10  ;;  %v906_v51 = vrot.slane %v2102_v35, 1  ;;  %v2119_v56 = vsub.f32 %v2032_v8, %v2044_v29 }
 0x113   : > { %v886_v49 = vadd.f32 %v885_v40, %v884_v18  ;;  %v893_v17 = vadd.f32 %v892_v19, %v891_v23  ;;  %v916_v32 = vmul.f32 %v2106_v44, %v2106_v44  ;;  %v917_v54 = vmul.f32 %v2110_v46, %v2110_v46 }
 0x114   : > { %v869_v57 = vadd.f32 %v854_v43, %v847_v60  ;;  %v900_v12 = vadd.f32 %v899_v41, %v898_v37  ;;  %v918_v38 = vmul.f32 %v2114_v14, %v2114_v14  ;;  %v2129_v45 = vsub.f32 %v1973_v33, %v2044_v29 }
 0x115   : > { %v919_v58 = vmul.f32 %v2119_v56, %v2119_v56  ;;  %v920_v8 = vsel %vm704_vm0, %v916_v32, 0.0  ;;  %v927_v61 = vsel %vm704_vm0, %v917_v54, 0.0  ;;  %v2137_v62 = vsub.f32 %v1989_v55, %v2044_v29 }
 0x116   : > { %v908_v48 = vadd.f32 %v893_v17, %v886_v49  ;;  %v921_v63 = vrot.slane %v920_v8, 4  ;;  %v928_v0 = vrot.slane %v927_v61, 4  ;;  %v934_v53 = vsel %vm704_vm0, %v918_v38, 0.0 }
 0x117   : > { %v935_v1 = vrot.slane %v934_v53, 4  ;;  %v941_v33 = vsel %vm704_vm0, %v919_v58, 0.0  ;;  %v2143_v3 = vsub.f32 %v2013_v39, %v2044_v29  ;;  %v2147_v52 = vsub.f32 %v2035_v9, %v2044_v29 }
 0x118   : > { %v870_v4 = vadd.f32 %v869_v57, %v861_v47  ;;  %v922_v5 = vadd.f32 %v921_v63, %v920_v8  ;;  %v929_v55 = vadd.f32 %v928_v0, %v927_v61  ;;  %v942_v6 = vrot.slane %v941_v33, 4 }
 0x119   : > { %v936_v7 = vadd.f32 %v935_v1, %v934_v53  ;;  %v956_v26 = vmul.f32 %v2129_v45, %v2129_v45  ;;  %v957_v50 = vmul.f32 %v2137_v62, %v2137_v62  ;;  %v958_v13 = vmul.f32 %v2143_v3, %v2143_v3 }
 0x11a   : > { %v909_v39 = vadd.f32 %v908_v48, %v900_v12  ;;  %v923_v10 = vrot.slane %v922_v5, 2  ;;  %v930_v11 = vrot.slane %v929_v55, 2  ;;  %v943_v2 = vadd.f32 %v942_v6, %v941_v33 }
 0x11b   : > { %v937_v9 = vrot.slane %v936_v7, 2  ;;  %v959_v29 = vmul.f32 %v2147_v52, %v2147_v52  ;;  %v960_v24 = vsel %vm704_vm0, %v956_v26, 0.0  ;;  %v967_v25 = vsel %vm704_vm0, %v957_v50, 0.0 }
 0x11c   : > { %v924_v27 = vadd.f32 %v923_v10, %v922_v5  ;;  %v931_v28 = vadd.f32 %v930_v11, %v929_v55  ;;  %v944_v20 = vrot.slane %v943_v2, 2  ;;  %v961_v42 = vrot.slane %v960_v24, 4 }
 0x11d   : > { %v938_v18 = vadd.f32 %v937_v9, %v936_v7  ;;  %v968_v23 = vrot.slane %v967_v25, 4  ;;  %v974_v37 = vsel %vm704_vm0, %v958_v13, 0.0  ;;  %v981_v60 = vsel %vm704_vm0, %v959_v29, 0.0 }
 0x11e   : > { %v925_v43 = vrot.slane %v924_v27, 1  ;;  %v932_v40 = vrot.slane %v931_v28, 1  ;;  %v945_v19 = vadd.f32 %v944_v20, %v943_v2  ;;  %v962_v41 = vadd.f32 %v961_v42, %v960_v24 }
 0x11f   : > { %v939_v47 = vrot.slane %v938_v18, 1  ;;  %v969_v49 = vadd.f32 %v968_v23, %v967_v25  ;;  %v975_v17 = vrot.slane %v974_v37, 4  ;;  %v982_v32 = vrot.slane %v981_v60, 4 }
 0x120   : > { %v907_v54 = vadd.f32 %v906_v51, %v2102_v35  ;;  %v926_v57 = vadd.f32 %v925_v43, %v924_v27  ;;  %v933_v12 = vadd.f32 %v932_v40, %v931_v28  ;;  %v963_v38 = vrot.slane %v962_v41, 2 }
 0x121   : > { %v871_v58 = vadd.f32 %v870_v4, %v868_v15  ;;  %v970_v8 = vrot.slane %v969_v49, 2  ;;  %v976_v61 = vadd.f32 %v975_v17, %v974_v37  ;;  %v983_v48 = vadd.f32 %v982_v32, %v981_v60 }
 0x122   : > { %v910_v63 = vadd.f32 %v909_v39, %v907_v54  ;;  %v946_v0 = vrot.slane %v945_v19, 1  ;;  %v948_v53 = vadd.f32 %v933_v12, %v926_v57  ;;  %v964_v1 = vadd.f32 %v963_v38, %v962_v41 }
 0x123   : > { %v940_v33 = vadd.f32 %v939_v47, %v938_v18  ;;  %v971_v5 = vadd.f32 %v970_v8, %v969_v49  ;;  %v977_v55 = vrot.slane %v976_v61, 2  ;;  %v984_v6 = vrot.slane %v983_v48, 2 }
 0x124   : > { %v965_v7 = vrot.slane %v964_v1, 1  ;;  %v911_v51 = vadd.f32 %v910_v63, %v871_v58  ;;  %v947_v11 = vadd.f32 %v946_v0, %v945_v19 }
 0x125   : > { %v949_v26 = vadd.f32 %v948_v53, %v940_v33  ;;  %v972_v50 = vrot.slane %v971_v5, 1  ;;  %v978_v13 = vadd.f32 %v977_v55, %v976_v61  ;;  %v985_v35 = vadd.f32 %v984_v6, %v983_v48 }
 0x126   : > { %v966_v10 = vadd.f32 %v965_v7, %v964_v1 }
 0x127   : > { %v973_v15 = vadd.f32 %v972_v50, %v971_v5  ;;  %v979_v4 = vrot.slane %v978_v13, 1  ;;  %v986_v2 = vrot.slane %v985_v35, 1  ;;  %v950_v9 = vadd.f32 %v949_v26, %v947_v11 }
 0x129   : > { %v980_v39 = vadd.f32 %v979_v4, %v978_v13  ;;  %v988_v29 = vadd.f32 %v973_v15, %v966_v10  ;;  %v951_v24 = vadd.f32 %v950_v9, %v911_v51  ;;  %v987_v25 = vadd.f32 %v986_v2, %v985_v35 }
 0x12b   : > { %v989_v27 = vadd.f32 %v988_v29, %v980_v39 }
 0x12d   : > { %v990_v28 = vadd.f32 %v989_v27, %v987_v25 }
 0x12f   : > { %v991_v20 = vadd.f32 %v990_v28, %v951_v24 }
 0x131   : > { %v992_v42 = vmul.f32 0.015625, %v991_v20 }
 0x133   : > { %v993_v18 = vadd.f32 1e-05, %v992_v42 }
 0x135   : > { %1518 = vrsqrt.f32 %v993_v18  ;;  %vm1000_vm2 = vweird.f32 %v993_v18 }
 0x13b   : > { %v1519_v23 = vpop.eup %1518 }
 0x13c   : > { %v995_v37 = vmul.f32 %v1519_v23, %v993_v18  ;;  %vm1001_vm1 = vweird.f32 %v1519_v23 }
 0x13d   : > { %vm1002_vm3 = vmor %vm1000_vm2, %vm1001_vm1 }
 0x13e   : > { %v996_v60 = vmul.f32 %v1519_v23, %v995_v37 }
 0x140   : > { %v997_v43 = vmul.f32 0.5, %v996_v60 }
 0x142   : > { %v998_v40 = vsub.f32 1.5, %v997_v43 }
 0x144   : > { %v999_v19 = vmul.f32 %v1519_v23, %v998_v40 }
 0x146   : > { %v1003_v41 = vsel %vm1002_vm3, %v1519_v23, %v999_v19 }
 0x147   : > { %v1004_v47 = vmul.f32 %v1003_v41, %v2048_v34  ;;  %v1005_v49 = vmul.f32 %v1003_v41, %v2052_v16  ;;  %v1006_v17 = vmul.f32 %v1003_v41, %v2056_v21  ;;  %v1007_v32 = vmul.f32 %v1003_v41, %v2060_v30 }
 0x148   : > { %v1020_v54 = vmul.f32 %v1003_v41, %v2064_v31  ;;  %v1021_v57 = vmul.f32 %v1003_v41, %v2068_v22  ;;  %v1022_v12 = vmul.f32 %v1003_v41, %v2072_v36  ;;  %v1023_v38 = vmul.f32 %v1003_v41, %v2076_v59 }
 0x149   : > { %v1008_v58 = vmax.f32 %v1004_v47, 0.0  ;;  %v1009_v8 = vmax.f32 %v1005_v49, 0.0  ;;  %v1010_v61 = vmax.f32 %v1006_v17, 0.0  ;;  %v1011_v48 = vmax.f32 %v1007_v32, 0.0 }
 0x14a   : > { %v1024_v34 = vmax.f32 %v1020_v54, 0.0  ;;  %v1025_v16 = vmax.f32 %v1021_v57, 0.0  ;;  %v1026_v21 = vmax.f32 %v1022_v12, 0.0  ;;  %v1027_v59 = vmax.f32 %v1023_v38, 0.0 }
 0x14b   : > { %v1012_v30 = vpack.c.bf16 %v1008_v58, %v1008_v58  ;;  %v1013_v31 = vpack.c.bf16 %v1009_v8, %v1009_v8  ;;  %v1014_v22 = vpack.c.bf16 %v1010_v61, %v1010_v61  ;;  %v1015_v36 = vpack.c.bf16 %v1011_v48, %v1011_v48 }
 0x14c   : > { %v1028_v63 = vpack.c.bf16 %v1024_v34, %v1024_v34  ;;  %v1036_v0 = vmul.f32 %v1003_v41, %v2106_v44  ;;  %v1037_v53 = vmul.f32 %v1003_v41, %v2110_v46  ;;  %v1038_v1 = vmul.f32 %v1003_v41, %v2114_v14 }
 0x14d   : > { %1016 = vst [vmem:[%s2174_s17] sm:$0x3] %v1012_v30  ;;  %v1039_v33 = vmul.f32 %v1003_v41, %v2119_v56  ;;  %v1029_v5 = vpack.c.bf16 %v1025_v16, %v1025_v16  ;;  %v1030_v55 = vpack.c.bf16 %v1026_v21, %v1026_v21  ;;  %v1052_v6 = vmul.f32 %v1003_v41, %v2129_v45 }
 0x14e   : > { %1017 = vst [vmem:[%s2174_s17 + $0x8] sm:$0x3] %v1013_v31  ;;  %v1053_v7 = vmul.f32 %v1003_v41, %v2137_v62  ;;  %v1040_v26 = vmax.f32 %v1036_v0, 0.0  ;;  %v1041_v50 = vmax.f32 %v1037_v53, 0.0  ;;  %v1042_v44 = vmax.f32 %v1038_v1, 0.0 }
 0x14f   : > { %1018 = vst [vmem:[%s2174_s17 + $0x10] sm:$0x3] %v1014_v22  ;;  %v1054_v46 = vmul.f32 %v1003_v41, %v2143_v3  ;;  %v1031_v14 = vpack.c.bf16 %v1027_v59, %v1027_v59  ;;  %v1043_v56 = vmax.f32 %v1039_v33, 0.0  ;;  %v1055_v13 = vmul.f32 %v1003_v41, %v2147_v52 }
 0x150   : > { %1019 = vst [vmem:[%s2174_s17 + $0x18] sm:$0x3] %v1015_v36  ;;  %v1044_v45 = vpack.c.bf16 %v1040_v26, %v1040_v26  ;;  %v1056_v35 = vmax.f32 %v1052_v6, 0.0  ;;  %v1045_v62 = vpack.c.bf16 %v1041_v50, %v1041_v50  ;;  %v1057_v51 = vmax.f32 %v1053_v7, 0.0 }
 0x151   : > { %1032 = vst [vmem:[%s2174_s17 + $0x2] sm:$0x3] %v1028_v63  ;;  %v1046_v3 = vpack.c.bf16 %v1042_v44, %v1042_v44  ;;  %v1058_v10 = vmax.f32 %v1054_v46, 0.0  ;;  %v1047_v11 = vpack.c.bf16 %v1043_v56, %v1043_v56  ;;  %v1059_v15 = vmax.f32 %v1055_v13, 0.0 }
 0x152   : > { %1033 = vst [vmem:[%s2174_s17 + $0xa] sm:$0x3] %v1029_v5  ;;  %v1060_v52 = vpack.c.bf16 %v1056_v35, %v1056_v35  ;;  %v1061_v4 = vpack.c.bf16 %v1057_v51, %v1057_v51 }
 0x153   : > { %1034 = vst [vmem:[%s2174_s17 + $0x12] sm:$0x3] %v1030_v55  ;;  %v1062_v2 = vpack.c.bf16 %v1058_v10, %v1058_v10  ;;  %v1063_v9 = vpack.c.bf16 %v1059_v15, %v1059_v15 }
 0x154   : > { %1035 = vst [vmem:[%s2174_s17 + $0x1a] sm:$0x3] %v1031_v14 }
 0x155   : > { %1048 = vst [vmem:[%s2174_s17 + $0x4] sm:$0x3] %v1044_v45 }
 0x156   : > { %1049 = vst [vmem:[%s2174_s17 + $0xc] sm:$0x3] %v1045_v62 }
 0x157   : > { %1050 = vst [vmem:[%s2174_s17 + $0x14] sm:$0x3] %v1046_v3 }
 0x158   : > { %1051 = vst [vmem:[%s2174_s17 + $0x1c] sm:$0x3] %v1047_v11 }
 0x159   : > { %1064 = vst [vmem:[%s2174_s17 + $0x6] sm:$0x3] %v1060_v52 }
 0x15a   : > { %1065 = vst [vmem:[%s2174_s17 + $0xe] sm:$0x3] %v1061_v4 }
 0x15b   : > { %1066 = vst [vmem:[%s2174_s17 + $0x16] sm:$0x3] %v1062_v2 }
 0x15c   : > { %1067 = vst [vmem:[%s2174_s17 + $0x1e] sm:$0x3] %v1063_v9 }
 0x15d PF: > { %s12_s9 = sadd.s32 1, %s1526_s9  }
 0x15e   : > { %p9_p4 = scmp.ge.s32.totalorder %s12_s9, 4  }
 0x160   :  { %11 = sbr.rel (!%p9_p4) target bundleno = 1 (0x1), region = 59 }

// kernel: warp_res_generator_forward.25
= control target key start
LH: loop header
LB: loop body
LE: loop exit
PB: predicated region body
PF: predicated region fallthrough
CT: control target
= control target key end

     0   :  { %s1636_s9 = smov 0   ;;  %s2401_s0 = inlined_call_operand.vmem [shape: bf16[2,72,64], index: 0, kind: input, shape index: {}]   ;;  %s2402_s1 = inlined_call_operand.vmem [shape: bf16[2,64,512], index: 1, kind: input, shape index: {}]   ;;  %s2403_s2 = inlined_call_operand.vmem [shape: bf16[2,8,8,512], index: 2, kind: output, shape index: {}]  }
   0x1 LB: > { %s1336_s10 = sadd.s32 4294967295, %s1619_s9   ;;  %p1340_p0 = scmp.ge.s32.totalorder %s1619_s9, 1  ;;  %s1619_s9 = sphi %s1636_s9, %s12_s9  }
   0x2   : > { %p112_p1 = scmp.lt.s32.totalorder %s1619_s9, 3 }
   0x4   : > { %p113_p2 = pnand %p1340_p0, %p112_p1 }
   0x6   : > { %116 = sbr.rel (%p113_p2) target bundleno = 448 (0x1c0), region = 28 }
   0xb   : > { %v1410_v0 = vld [vmem:[%s2402_s1 + $0xe0] sm:$0xf]  ;;  %v1553_v1 = vld [vmem:[%s2402_s1 + $0xec] sm:$0xf0]  ;;  %v1551_v2 = vld [vmem:[%s2402_s1 + $0xe4] sm:$0xf] }
   0xc   : > { %v1411_v3 = vor.u32 %v1553_v1, %v1410_v0  ;;  %v1412_v4 = vld [vmem:[%s2402_s1 + $0xf0] sm:$0xf0]  ;;  %v1418_v5 = vld [vmem:[%s2402_s1 + $0xe8] sm:$0xf]  ;;  %v1554_v6 = vld [vmem:[%s2402_s1 + $0xf4] sm:$0xf0] }
   0xd   : > { %v1415_v7 = vor.u32 %v1551_v2, %v1412_v4  ;;  %v1419_v8 = vor.u32 %v1554_v6, %v1418_v5  ;;  %v1552_v9 = vld [vmem:[%s2402_s1 + $0xec] sm:$0xf]  ;;  %v1420_v10 = vld [vmem:[%s2402_s1 + $0xf8] sm:$0xf0]  ;;  %v1394_v11 = vld [vmem:[%s2402_s1 + $0xc0] sm:$0xf] }
   0xe   : > { %304 = vmatpush.bf16.msra.mxu0 %v1411_v3  ;;  %v1423_v12 = vor.u32 %v1552_v9, %v1420_v10  ;;  %v1549_v13 = vld [vmem:[%s2402_s1 + $0xcc] sm:$0xf0]  ;;  %v1547_v14 = vld [vmem:[%s2402_s1 + $0xc4] sm:$0xf]  ;;  %v1396_v15 = vld [vmem:[%s2402_s1 + $0xd0] sm:$0xf0] }
   0xf   : > { %333 = vmatpush.bf16.msra.mxu1 %v1415_v7  ;;  %362 = vmatpush.bf16.msra.mxu2 %v1419_v8  ;;  %v1395_v16 = vor.u32 %v1549_v13, %v1394_v11  ;;  %v1399_v17 = vor.u32 %v1547_v14, %v1396_v15  ;;  %v1402_v18 = vld [vmem:[%s2402_s1 + $0xc8] sm:$0xf]  ;;  %v1550_v19 = vld [vmem:[%s2402_s1 + $0xd4] sm:$0xf0]  ;;  %v1548_v20 = vld [vmem:[%s2402_s1 + $0xcc] sm:$0xf] }
  0x10   : > { %391 = vmatpush.bf16.msra.mxu3 %v1423_v12  ;;  %v1403_v21 = vor.u32 %v1550_v19, %v1402_v18  ;;  %v1404_v22 = vld [vmem:[%s2402_s1 + $0xd8] sm:$0xf0]  ;;  %v1378_v23 = vld [vmem:[%s2402_s1 + $0xa0] sm:$0xf]  ;;  %v1545_v24 = vld [vmem:[%s2402_s1 + $0xac] sm:$0xf0] }
  0x11   : > { %v1407_v25 = vor.u32 %v1548_v20, %v1404_v22  ;;  %v1543_v26 = vld [vmem:[%s2402_s1 + $0xa4] sm:$0xf]  ;;  %v1380_v27 = vld [vmem:[%s2402_s1 + $0xb0] sm:$0xf0]  ;;  %v1386_v28 = vld [vmem:[%s2402_s1 + $0xa8] sm:$0xf]  ;;  %v1379_v29 = vor.u32 %v1545_v24, %v1378_v23 }
  0x12   : > { %305 = vmatpush.bf16.msra.mxu0 %v1395_v16  ;;  %v1546_v30 = vld [vmem:[%s2402_s1 + $0xb4] sm:$0xf0]  ;;  %v1544_v31 = vld [vmem:[%s2402_s1 + $0xac] sm:$0xf]  ;;  %v1388_v32 = vld [vmem:[%s2402_s1 + $0xb8] sm:$0xf0]  ;;  %v1383_v33 = vor.u32 %v1543_v26, %v1380_v27 }
  0x13   : > { %334 = vmatpush.bf16.msra.mxu1 %v1399_v17  ;;  %363 = vmatpush.bf16.msra.mxu2 %v1403_v21  ;;  %v1387_v34 = vor.u32 %v1546_v30, %v1386_v28  ;;  %v1362_v35 = vld [vmem:[%s2402_s1 + $0x80] sm:$0xf]  ;;  %v1541_v36 = vld [vmem:[%s2402_s1 + $0x8c] sm:$0xf0]  ;;  %v1539_v37 = vld [vmem:[%s2402_s1 + $0x84] sm:$0xf]  ;;  %v1391_v38 = vor.u32 %v1544_v31, %v1388_v32 }
  0x14   : > { %392 = vmatpush.bf16.msra.mxu3 %v1407_v25  ;;  %v1364_v39 = vld [vmem:[%s2402_s1 + $0x90] sm:$0xf0]  ;;  %v1370_v40 = vld [vmem:[%s2402_s1 + $0x88] sm:$0xf]  ;;  %v1542_v41 = vld [vmem:[%s2402_s1 + $0x94] sm:$0xf0]  ;;  %v1363_v44 = vor.u32 %v1541_v36, %v1362_v35 }
  0x15   : > { %v1540_v42 = vld [vmem:[%s2402_s1 + $0x8c] sm:$0xf]  ;;  %v1372_v43 = vld [vmem:[%s2402_s1 + $0x98] sm:$0xf0]  ;;  %p134_p3 = scmp.lt.s32.totalorder %s1336_s10, 1  ;;  %v1367_v48 = vor.u32 %v1539_v37, %v1364_v39  ;;  %v1371_v49 = vor.u32 %v1542_v41, %v1370_v40  ;;  %vm287_vm0 = vcmask 523264  }
  0x16   : > { %306 = vmatpush.bf16.msra.mxu0 %v1379_v29  ;;  %v1498_v45 = vld [vmem:[%s2402_s1 + $0x68] sm:$0xf]  ;;  %v1538_v46 = vld [vmem:[%s2402_s1 + $0x74] sm:$0xf0]  ;;  %v1536_v47 = vld [vmem:[%s2402_s1 + $0x6c] sm:$0xf]  ;;  %v1375_v52 = vor.u32 %v1540_v42, %v1372_v43 }
  0x17   : > { %335 = vmatpush.bf16.msra.mxu1 %v1383_v33  ;;  %364 = vmatpush.bf16.msra.mxu2 %v1387_v34  ;;  %s2438_s10 = smov (!%p134_p3, %s1336_s10), 1  ;;  %v1500_v50 = vld [vmem:[%s2402_s1 + $0x78] sm:$0xf0]  ;;  %v1490_v51 = vld [vmem:[%s2402_s1 + $0x60] sm:$0xf]  ;;  %v1499_v53 = vor.u32 %v1538_v46, %v1498_v45 }
  0x18   : > { %393 = vmatpush.bf16.msra.mxu3 %v1391_v38  ;;  %v1537_v54 = vld [vmem:[%s2402_s1 + $0x6c] sm:$0xf0]  ;;  %v1535_v55 = vld [vmem:[%s2402_s1 + $0x64] sm:$0xf]  ;;  %v1492_v56 = vld [vmem:[%s2402_s1 + $0x70] sm:$0xf0]  ;;  %v1503_v57 = vor.u32 %v1536_v47, %v1500_v50 }
  0x19   : > { %s1602_s13 = smul.u32 36, %s2438_s10  ;;  %v1491_v58 = vor.u32 %v1537_v54, %v1490_v51  ;;  %v1482_v59 = vld [vmem:[%s2402_s1 + $0x48] sm:$0xf]  ;;  %v1534_v60 = vld [vmem:[%s2402_s1 + $0x54] sm:$0xf0]  ;;  %v1495_v2 = vor.u32 %v1535_v55, %v1492_v56 }
  0x1a   : > { %307 = vmatpush.bf16.msra.mxu0 %v1363_v44  ;;  %v1532_v61 = vld [vmem:[%s2402_s1 + $0x4c] sm:$0xf]  ;;  %v1484_v62 = vld [vmem:[%s2402_s1 + $0x58] sm:$0xf0]  ;;  %v1474_v63 = vld [vmem:[%s2402_s1 + $0x40] sm:$0xf]  ;;  %v1483_v3 = vor.u32 %v1534_v60, %v1482_v59 }
  0x1b   : > { %336 = vmatpush.bf16.msra.mxu1 %v1367_v48  ;;  %365 = vmatpush.bf16.msra.mxu2 %v1371_v49  ;;  %s1789_s26 = scalar_lea.vmem %s2401_s0, %s1602_s13  ;;  %v1533_v0 = vld [vmem:[%s2402_s1 + $0x4c] sm:$0xf0]  ;;  %v1487_v4 = vor.u32 %v1532_v61, %v1484_v62  ;;  %v1531_v6 = vld [vmem:[%s2402_s1 + $0x44] sm:$0xf]  ;;  %v1476_v7 = vld [vmem:[%s2402_s1 + $0x50] sm:$0xf0] }
  0x1c   : > { %394 = vmatpush.bf16.msra.mxu3 %v1375_v52  ;;  %v1596_v1 = vld [vmem:[%s1789_s26 + $0x4] sm:$0xff]   ;;  %v1475_v5 = vor.u32 %v1533_v0, %v1474_v63  ;;  %v1530_v9 = vld [vmem:[%s2402_s1 + $0x34] sm:$0xf0]  ;;  %v1528_v10 = vld [vmem:[%s2402_s1 + $0x2c] sm:$0xf]  ;;  %v1479_v11 = vor.u32 %v1531_v6, %v1476_v7 }
  0x1d   : > { %1424 = vmatmul.msk.bf16.vlgmr.msra.gmra.mxu0 %vm287_vm0, %v1596_v1  ;;  %v1466_v8 = vld [vmem:[%s2402_s1 + $0x28] sm:$0xf]  ;;  %v1468_v13 = vld [vmem:[%s2402_s1 + $0x38] sm:$0xf0]  ;;  %v1458_v14 = vld [vmem:[%s2402_s1 + $0x20] sm:$0xf] }
  0x1e   : > { %518 = vmatpush.bf16.msrb.mxu0 %v1491_v58  ;;  %1428 = vmatmul.msk.bf16.vlgmr.msra.gmra.mxu1 %vm287_vm0, %v1596_v1  ;;  %v1467_v12 = vor.u32 %v1530_v9, %v1466_v8  ;;  %v1529_v15 = vld [vmem:[%s2402_s1 + $0x2c] sm:$0xf0]  ;;  %v1471_v16 = vor.u32 %v1528_v10, %v1468_v13  ;;  %v1527_v18 = vld [vmem:[%s2402_s1 + $0x24] sm:$0xf]  ;;  %v1460_v19 = vld [vmem:[%s2402_s1 + $0x30] sm:$0xf0] }
  0x1f   : > { %576 = vmatpush.bf16.msrb.mxu2 %v1499_v53  ;;  %1436 = vmatmul.msk.bf16.vlgmr.msra.gmra.mxu3 %vm287_vm0, %v1596_v1  ;;  %v1459_v17 = vor.u32 %v1529_v15, %v1458_v14  ;;  %v1463_v20 = vor.u32 %v1527_v18, %v1460_v19  ;;  %v1598_v21 = vld [vmem:[%s1789_s26 + $0xc] sm:$0xff]   ;;  %v1450_v22 = vld [vmem:[%s2402_s1 + $0x8] sm:$0xf]  ;;  %v1526_v23 = vld [vmem:[%s2402_s1 + $0x14] sm:$0xf0] }
  0x20   : > { %605 = vmatpush.bf16.msrb.mxu3 %v1503_v57  ;;  %1432 = vmatmul.msk.bf16.vlgmr.msra.gmra.mxu2 %vm287_vm0, %v1596_v1  ;;  %v1524_v24 = vld [vmem:[%s2402_s1 + $0xc] sm:$0xf]  ;;  %v1451_v25 = vor.u32 %v1526_v23, %v1450_v22  ;;  %v1452_v26 = vld [vmem:[%s2402_s1 + $0x18] sm:$0xf0]  ;;  %v1442_v27 = vld [vmem:[%s2402_s1] sm:$0xf] }
  0x21   : > { %547 = vmatpush.bf16.msrb.mxu1 %v1495_v2  ;;  %v1525_v28 = vld [vmem:[%s2402_s1 + $0xc] sm:$0xf0]  ;;  %v1455_v29 = vor.u32 %v1524_v24, %v1452_v26  ;;  %v1523_v31 = vld [vmem:[%s2402_s1 + $0x4] sm:$0xf]  ;;  %v1444_v32 = vld [vmem:[%s2402_s1 + $0x10] sm:$0xf0] }
  0x22   : > { %519 = vmatpush.bf16.msrb.mxu0 %v1475_v5  ;;  %v1443_v30 = vor.u32 %v1525_v28, %v1442_v27  ;;  %v1447_v33 = vor.u32 %v1523_v31, %v1444_v32  ;;  %v1600_v34 = vld [vmem:[%s1789_s26 + $0x14] sm:$0xff]   ;;  %v1601_v35 = vld [vmem:[%s1789_s26 + $0x1c] sm:$0xff]  ;;  %v1571_v37 = vld [vmem:[%s1789_s26 + $0x8] sm:$0xff]  }
  0x23   : > { %577 = vmatpush.bf16.msrb.mxu2 %v1483_v3  ;;  %v1556_v36 = vld [vmem:[%s1789_s26] sm:$0xff]   ;;  %v1572_v38 = vld [vmem:[%s1789_s26 + $0x10] sm:$0xff]   ;;  %v1573_v39 = vld [vmem:[%s1789_s26 + $0x18] sm:$0xff]   ;;  %s1522_s26 = sshll.u32 %s2438_s10, 7 }
  0x24   : > { %606 = vmatpush.bf16.msrb.mxu3 %v1487_v4  ;;  %s2316_s15 = scalar_lea.vmem %s2403_s2, %s1522_s26 }
  0x25   : > { %548 = vmatpush.bf16.msrb.mxu1 %v1479_v11 }
  0x26   : > { %520 = vmatpush.bf16.msrb.mxu0 %v1459_v17 }
  0x27   : > { %578 = vmatpush.bf16.msrb.mxu2 %v1467_v12 }
  0x28   : > { %607 = vmatpush.bf16.msrb.mxu3 %v1471_v16 }
  0x29   : > { %549 = vmatpush.bf16.msrb.mxu1 %v1463_v20 }
  0x2a   : > { %521 = vmatpush.bf16.msrb.mxu0 %v1443_v30 }
  0x2b   : > { %579 = vmatpush.bf16.msrb.mxu2 %v1451_v25 }
  0x2c   : > { %608 = vmatpush.bf16.msrb.mxu3 %v1455_v29 }
  0x2d   : > { %1425 = vmatmul.msk.bf16.gmra.mxu0 %vm287_vm0, %v1598_v21  ;;  %550 = vmatpush.bf16.msrb.mxu1 %v1447_v33 }
  0x2e   : > { %1429 = vmatmul.msk.bf16.gmra.mxu1 %vm287_vm0, %v1598_v21 }
  0x2f   : > { %1437 = vmatmul.msk.bf16.gmra.mxu3 %vm287_vm0, %v1598_v21 }
  0x30   : > { %1433 = vmatmul.msk.bf16.gmra.mxu2 %vm287_vm0, %v1598_v21 }
  0x3d   : > { %1426 = vmatmul.msk.bf16.gmra.mxu0 %vm287_vm0, %v1600_v34 }
  0x3e   : > { %1430 = vmatmul.msk.bf16.gmra.mxu1 %vm287_vm0, %v1600_v34 }
  0x3f   : > { %1438 = vmatmul.msk.bf16.gmra.mxu3 %vm287_vm0, %v1600_v34 }
  0x40   : > { %1434 = vmatmul.msk.bf16.gmra.mxu2 %vm287_vm0, %v1600_v34 }
  0x4d   : > { %1427 = vmatmul.msk.bf16.gmra.mxu0 %vm287_vm0, %v1601_v35 }
  0x4e   : > { %1431 = vmatmul.msk.bf16.gmra.mxu1 %vm287_vm0, %v1601_v35 }
  0x4f   : > { %1439 = vmatmul.msk.bf16.gmra.mxu3 %vm287_vm0, %v1601_v35 }
  0x50   : > { %1435 = vmatmul.msk.bf16.gmra.mxu2 %vm287_vm0, %v1601_v35 }
  0x5d   : > { %1504 = vmatmul.msk.bf16.vlgmr.msrb.gmra.mxu0 %vm287_vm0, %v1556_v36 }
  0x5e   : > { %1508 = vmatmul.msk.bf16.vlgmr.msrb.gmra.mxu1 %vm287_vm0, %v1556_v36 }
  0x5f   : > { %1516 = vmatmul.msk.bf16.vlgmr.msrb.gmra.mxu3 %vm287_vm0, %v1556_v36 }
  0x60   : > { %1512 = vmatmul.msk.bf16.vlgmr.msrb.gmra.mxu2 %vm287_vm0, %v1556_v36 }
  0x6d   : > { %1505 = vmatmul.msk.bf16.gmra.mxu0 %vm287_vm0, %v1571_v37 }
  0x6e   : > { %1509 = vmatmul.msk.bf16.gmra.mxu1 %vm287_vm0, %v1571_v37 }
  0x6f   : > { %1517 = vmatmul.msk.bf16.gmra.mxu3 %vm287_vm0, %v1571_v37 }
  0x70   : > { %1513 = vmatmul.msk.bf16.gmra.mxu2 %vm287_vm0, %v1571_v37 }
  0x7d   : > { %1506 = vmatmul.msk.bf16.gmra.mxu0 %vm287_vm0, %v1572_v38 }
  0x7e   : > { %1510 = vmatmul.msk.bf16.gmra.mxu1 %vm287_vm0, %v1572_v38 }
  0x7f   : > { %1518 = vmatmul.msk.bf16.gmra.mxu3 %vm287_vm0, %v1572_v38 }
  0x80   : > { %1514 = vmatmul.msk.bf16.gmra.mxu2 %vm287_vm0, %v1572_v38 }
  0x8d   : > { %1507 = vmatmul.msk.bf16.gmra.mxu0 %vm287_vm0, %v1573_v39 }
  0x8e   : > { %1511 = vmatmul.msk.bf16.gmra.mxu1 %vm287_vm0, %v1573_v39 }
  0x8f   : > { %1519 = vmatmul.msk.bf16.gmra.mxu3 %vm287_vm0, %v1573_v39 }
  0x90   : > { %1515 = vmatmul.msk.bf16.gmra.mxu2 %vm287_vm0, %v1573_v39 }
  0x9a   : > { %v309_v40 = vpop.f32.mrf.mxu0 }
  0x9b   : > { %v338_v41 = vpop.f32.mrf.mxu1 }
  0xa2   : > { %v396_v43 = vpop.f32.mrf.mxu3  ;;  %v311_v44 = vpop.f32.mrf.mxu0 }
  0xa3   : > { %v367_v42 = vpop.f32.mrf.mxu2  ;;  %v340_v45 = vpop.f32.mrf.mxu1 }
  0xaa   : > { %v1890_v47 = vpop.f32.mrf.mxu3  ;;  %v1892_v48 = vpop.f32.mrf.mxu0 }
  0xab   : > { %v1888_v46 = vpop.f32.mrf.mxu2  ;;  %v1894_v49 = vpop.f32.mrf.mxu1 }
  0xb2   : > { %v1898_v51 = vpop.f32.mrf.mxu3  ;;  %v1900_v52 = vpop.f32.mrf.mxu0 }
  0xb3   : > { %v1896_v50 = vpop.f32.mrf.mxu2  ;;  %v1902_v53 = vpop.f32.mrf.mxu1 }
  0xba   : > { %v1906_v55 = vpop.f32.mrf.mxu3  ;;  %v1908_v56 = vpop.f32.mrf.mxu0 }
  0xbb   : > { %v1904_v54 = vpop.f32.mrf.mxu2  ;;  %v1910_v57 = vpop.f32.mrf.mxu1 }
  0xc2   : > { %v1914_v59 = vpop.f32.mrf.mxu3  ;;  %v1916_v60 = vpop.f32.mrf.mxu0 }
  0xc3   : > { %v1912_v58 = vpop.f32.mrf.mxu2  ;;  %v1918_v61 = vpop.f32.mrf.mxu1 }
  0xca   : > { %v1922_v63 = vpop.f32.mrf.mxu3  ;;  %v1924_v0 = vpop.f32.mrf.mxu0 }
  0xcb   : > { %v1920_v62 = vpop.f32.mrf.mxu2  ;;  %v1926_v1 = vpop.f32.mrf.mxu1 }
  0xd2   : > { %v1930_v3 = vpop.f32.mrf.mxu3  ;;  %v1932_v4 = vpop.f32.mrf.mxu0 }
  0xd3   : > { %v1928_v2 = vpop.f32.mrf.mxu2  ;;  %v1934_v5 = vpop.f32.mrf.mxu1 }
  0xda   : > { %v1938_v7 = vpop.f32.mrf.mxu3  ;;  %v523_v8 = vpop.f32.mrf.mxu0 }
  0xdb   : > { %v1936_v6 = vpop.f32.mrf.mxu2  ;;  %v552_v9 = vpop.f32.mrf.mxu1  ;;  %v1940_v10 = vadd.f32 %v523_v8, %v309_v40 }
  0xdc   : > { %v1942_v11 = vadd.f32 %v552_v9, %v338_v41 }
  0xdd   : > { %v630_v12 = vrot.slane %v1940_v10, 4 }
  0xde   : > { %v685_v13 = vrot.slane %v1942_v11, 4 }
  0xdf   : > { %v631_v14 = vadd.f32 %v630_v12, %v1940_v10 }
  0xe0   : > { %v686_v15 = vadd.f32 %v685_v13, %v1942_v11 }
  0xe1   : > { %v632_v16 = vrot.slane %v631_v14, 2 }
  0xe2   : > { %v687_v17 = vrot.slane %v686_v15, 2  ;;  %v610_v19 = vpop.f32.mrf.mxu3  ;;  %v525_v22 = vpop.f32.mrf.mxu0 }
  0xe3   : > { %v581_v18 = vpop.f32.mrf.mxu2  ;;  %v1950_v21 = vadd.f32 %v610_v19, %v396_v43  ;;  %v554_v23 = vpop.f32.mrf.mxu1  ;;  %v1952_v24 = vadd.f32 %v525_v22, %v311_v44  ;;  %v633_v28 = vadd.f32 %v632_v16, %v631_v14 }
  0xe4   : > { %v1948_v20 = vadd.f32 %v581_v18, %v367_v42  ;;  %v1954_v25 = vadd.f32 %v554_v23, %v340_v45  ;;  %v688_v29 = vadd.f32 %v687_v17, %v686_v15 }
  0xe5   : > { %v797_v27 = vrot.slane %v1950_v21, 4  ;;  %v636_v30 = vrot.slane %v1952_v24, 4  ;;  %v634_v38 = vrot.slane %v633_v28, 1 }
  0xe6   : > { %v741_v26 = vrot.slane %v1948_v20, 4  ;;  %v691_v31 = vrot.slane %v1954_v25, 4  ;;  %v689_v39 = vrot.slane %v688_v29, 1 }
  0xe7   : > { %v798_v33 = vadd.f32 %v797_v27, %v1950_v21  ;;  %v637_v34 = vadd.f32 %v636_v30, %v1952_v24  ;;  %v635_v30 = vadd.f32 %v634_v38, %v633_v28 }
  0xe8   : > { %v742_v32 = vadd.f32 %v741_v26, %v1948_v20  ;;  %v692_v35 = vadd.f32 %v691_v31, %v1954_v25  ;;  %v690_v31 = vadd.f32 %v689_v39, %v688_v29 }
  0xe9   : > { %v799_v37 = vrot.slane %v798_v33, 2  ;;  %v638_v40 = vrot.slane %v637_v34, 2 }
  0xea   : > { %v743_v36 = vrot.slane %v742_v32, 2  ;;  %v693_v41 = vrot.slane %v692_v35, 2  ;;  %v612_v43 = vpop.f32.mrf.mxu3  ;;  %v528_v12 = vpop.f32.mrf.mxu0 }
  0xeb   : > { %v583_v42 = vpop.f32.mrf.mxu2  ;;  %v800_v45 = vadd.f32 %v799_v37, %v798_v33  ;;  %v1968_v9 = vadd.f32 %v612_v43, %v1890_v47  ;;  %v557_v13 = vpop.f32.mrf.mxu1  ;;  %v639_v14 = vadd.f32 %v638_v40, %v637_v34  ;;  %v1971_v16 = vadd.f32 %v528_v12, %v1892_v48 }
  0xec   : > { %v744_v44 = vadd.f32 %v743_v36, %v742_v32  ;;  %v1965_v8 = vadd.f32 %v583_v42, %v1888_v46  ;;  %v694_v15 = vadd.f32 %v693_v41, %v692_v35  ;;  %v1974_v17 = vadd.f32 %v557_v13, %v1894_v49 }
  0xed   : > { %v801_v19 = vrot.slane %v800_v45, 1  ;;  %v803_v46 = vrot.slane %v1968_v9, 4  ;;  %v640_v23 = vrot.slane %v639_v14, 1  ;;  %v642_v47 = vrot.slane %v1971_v16, 4 }
  0xee   : > { %v745_v18 = vrot.slane %v744_v44, 1  ;;  %v747_v22 = vrot.slane %v1965_v8, 4  ;;  %v695_v26 = vrot.slane %v694_v15, 1  ;;  %v697_v27 = vrot.slane %v1974_v17, 4 }
  0xef   : > { %v804_v32 = vadd.f32 %v803_v46, %v1968_v9  ;;  %v641_v49 = vadd.f32 %v640_v23, %v639_v14  ;;  %v643_v34 = vadd.f32 %v642_v47, %v1971_v16  ;;  %v802_v37 = vadd.f32 %v801_v19, %v800_v45 }
  0xf0   : > { %v748_v48 = vadd.f32 %v747_v22, %v1965_v8  ;;  %v696_v33 = vadd.f32 %v695_v26, %v694_v15  ;;  %v698_v35 = vadd.f32 %v697_v27, %v1974_v17  ;;  %v746_v36 = vadd.f32 %v745_v18, %v744_v44 }
  0xf1   : > { %v805_v41 = vrot.slane %v804_v32, 2  ;;  %v678_v42 = vadd.f32 %v641_v49, %v635_v30  ;;  %v644_v12 = vrot.slane %v643_v34, 2 }
  0xf2   : > { %v749_v40 = vrot.slane %v748_v48, 2  ;;  %v733_v43 = vadd.f32 %v696_v33, %v690_v31  ;;  %v699_v13 = vrot.slane %v698_v35, 2  ;;  %v615_v29 = vpop.f32.mrf.mxu3  ;;  %v530_v15 = vpop.f32.mrf.mxu0 }
  0xf3   : > { %v586_v28 = vpop.f32.mrf.mxu2  ;;  %v806_v39 = vadd.f32 %v805_v41, %v804_v32  ;;  %v1988_v14 = vadd.f32 %v615_v29, %v1898_v51  ;;  %v559_v46 = vpop.f32.mrf.mxu1  ;;  %v645_v44 = vadd.f32 %v644_v12, %v643_v34  ;;  %v1991_v18 = vadd.f32 %v530_v15, %v1900_v52 }
  0xf4   : > { %v750_v38 = vadd.f32 %v749_v40, %v748_v48  ;;  %v1985_v22 = vadd.f32 %v586_v28, %v1896_v50  ;;  %v700_v45 = vadd.f32 %v699_v13, %v698_v35  ;;  %v1994_v19 = vadd.f32 %v559_v46, %v1902_v53 }
  0xf5   : > { %v807_v26 = vrot.slane %v806_v39, 1  ;;  %v809_v50 = vrot.slane %v1988_v14, 4  ;;  %v646_v27 = vrot.slane %v645_v44, 1  ;;  %v648_v51 = vrot.slane %v1991_v18, 4 }
  0xf6   : > { %v751_v23 = vrot.slane %v750_v38, 1  ;;  %v753_v47 = vrot.slane %v1985_v22, 4  ;;  %v701_v30 = vrot.slane %v700_v45, 1  ;;  %v703_v31 = vrot.slane %v1994_v19, 4 }
  0xf7   : > { %v808_v32 = vadd.f32 %v807_v26, %v806_v39  ;;  %v810_v49 = vadd.f32 %v809_v50, %v1988_v14  ;;  %v647_v53 = vadd.f32 %v646_v27, %v645_v44  ;;  %v649_v34 = vadd.f32 %v648_v51, %v1991_v18 }
  0xf8   : > { %v752_v48 = vadd.f32 %v751_v23, %v750_v38  ;;  %v754_v52 = vadd.f32 %v753_v47, %v1985_v22  ;;  %v702_v33 = vadd.f32 %v701_v30, %v700_v45  ;;  %v704_v35 = vadd.f32 %v703_v31, %v1994_v19 }
  0xf9   : > { %v845_v41 = vadd.f32 %v808_v32, %v802_v37  ;;  %v811_v13 = vrot.slane %v810_v49, 2  ;;  %v679_v28 = vadd.f32 %v678_v42, %v647_v53  ;;  %v650_v15 = vrot.slane %v649_v34, 2 }
  0xfa   : > { %v789_v40 = vadd.f32 %v752_v48, %v746_v36  ;;  %v755_v12 = vrot.slane %v754_v52, 2  ;;  %v734_v29 = vadd.f32 %v733_v43, %v702_v33  ;;  %v705_v46 = vrot.slane %v704_v35, 2  ;;  %v617_v39 = vpop.f32.mrf.mxu3  ;;  %v533_v45 = vpop.f32.mrf.mxu0 }
  0xfb   : > { %v588_v38 = vpop.f32.mrf.mxu2  ;;  %v812_v26 = vadd.f32 %v811_v13, %v810_v49  ;;  %v2008_v44 = vadd.f32 %v617_v39, %v1906_v55  ;;  %v562_v50 = vpop.f32.mrf.mxu1  ;;  %v651_v36 = vadd.f32 %v650_v15, %v649_v34  ;;  %v2011_v27 = vadd.f32 %v533_v45, %v1908_v56 }
  0xfc   : > { %v756_v23 = vadd.f32 %v755_v12, %v754_v52  ;;  %v2005_v47 = vadd.f32 %v588_v38, %v1904_v54  ;;  %v706_v37 = vadd.f32 %v705_v46, %v704_v35  ;;  %v2014_v42 = vadd.f32 %v562_v50, %v1910_v57 }
  0xfd   : > { %v813_v30 = vrot.slane %v812_v26, 1  ;;  %v815_v54 = vrot.slane %v2008_v44, 4  ;;  %v652_v31 = vrot.slane %v651_v36, 1  ;;  %v654_v55 = vrot.slane %v2011_v27, 4 }
  0xfe   : > { %v757_v43 = vrot.slane %v756_v23, 1  ;;  %v759_v51 = vrot.slane %v2005_v47, 4  ;;  %v707_v48 = vrot.slane %v706_v37, 1  ;;  %v709_v32 = vrot.slane %v2014_v42, 4 }
  0xff   : > { %v814_v49 = vadd.f32 %v813_v30, %v812_v26  ;;  %v816_v53 = vadd.f32 %v815_v54, %v2008_v44  ;;  %v653_v57 = vadd.f32 %v652_v31, %v651_v36  ;;  %v655_v34 = vadd.f32 %v654_v55, %v2011_v27 }
 0x100   : > { %v758_v52 = vadd.f32 %v757_v43, %v756_v23  ;;  %v760_v56 = vadd.f32 %v759_v51, %v2005_v47  ;;  %v708_v33 = vadd.f32 %v707_v48, %v706_v37  ;;  %v710_v35 = vadd.f32 %v709_v32, %v2014_v42 }
 0x101   : > { %v846_v13 = vadd.f32 %v845_v41, %v814_v49  ;;  %v817_v46 = vrot.slane %v816_v53, 2  ;;  %v680_v38 = vadd.f32 %v679_v28, %v653_v57  ;;  %v656_v45 = vrot.slane %v655_v34, 2 }
 0x102   : > { %v790_v12 = vadd.f32 %v789_v40, %v758_v52  ;;  %v761_v15 = vrot.slane %v760_v56, 2  ;;  %v735_v39 = vadd.f32 %v734_v29, %v708_v33  ;;  %v711_v50 = vrot.slane %v710_v35, 2  ;;  %v620_v26 = vpop.f32.mrf.mxu3  ;;  %v535_v37 = vpop.f32.mrf.mxu0 }
 0x103   : > { %v591_v23 = vpop.f32.mrf.mxu2  ;;  %v818_v30 = vadd.f32 %v817_v46, %v816_v53  ;;  %v2028_v36 = vadd.f32 %v620_v26, %v1914_v59  ;;  %v564_v54 = vpop.f32.mrf.mxu1  ;;  %v657_v40 = vadd.f32 %v656_v45, %v655_v34  ;;  %v2031_v31 = vadd.f32 %v535_v37, %v1916_v60 }
 0x104   : > { %v762_v43 = vadd.f32 %v761_v15, %v760_v56  ;;  %v2025_v51 = vadd.f32 %v591_v23, %v1912_v58  ;;  %v712_v41 = vadd.f32 %v711_v50, %v710_v35  ;;  %v2034_v28 = vadd.f32 %v564_v54, %v1918_v61 }
 0x105   : > { %v819_v48 = vrot.slane %v818_v30, 1  ;;  %v821_v58 = vrot.slane %v2028_v36, 4  ;;  %v658_v32 = vrot.slane %v657_v40, 1  ;;  %v660_v59 = vrot.slane %v2031_v31, 4 }
 0x106   : > { %v763_v29 = vrot.slane %v762_v43, 1  ;;  %v765_v55 = vrot.slane %v2025_v51, 4  ;;  %v713_v52 = vrot.slane %v712_v41, 1  ;;  %v715_v49 = vrot.slane %v2034_v28, 4 }
 0x107   : > { %v820_v53 = vadd.f32 %v819_v48, %v818_v30  ;;  %v822_v57 = vadd.f32 %v821_v58, %v2028_v36  ;;  %v659_v61 = vadd.f32 %v658_v32, %v657_v40  ;;  %v661_v34 = vadd.f32 %v660_v59, %v2031_v31 }
 0x108   : > { %v764_v56 = vadd.f32 %v763_v29, %v762_v43  ;;  %v766_v60 = vadd.f32 %v765_v55, %v2025_v51  ;;  %v714_v33 = vadd.f32 %v713_v52, %v712_v41  ;;  %v716_v35 = vadd.f32 %v715_v49, %v2034_v28 }
 0x109   : > { %v847_v46 = vadd.f32 %v846_v13, %v820_v53  ;;  %v823_v50 = vrot.slane %v822_v57, 2  ;;  %v681_v23 = vadd.f32 %v680_v38, %v659_v61  ;;  %v662_v37 = vrot.slane %v661_v34, 2 }
 0x10a   : > { %v791_v15 = vadd.f32 %v790_v12, %v764_v56  ;;  %v767_v45 = vrot.slane %v766_v60, 2  ;;  %v736_v26 = vadd.f32 %v735_v39, %v714_v33  ;;  %v717_v54 = vrot.slane %v716_v35, 2  ;;  %v622_v30 = vpop.f32.mrf.mxu3  ;;  %v538_v41 = vpop.f32.mrf.mxu0 }
 0x10b   : > { %v593_v43 = vpop.f32.mrf.mxu2  ;;  %v824_v48 = vadd.f32 %v823_v50, %v822_v57  ;;  %v2048_v40 = vadd.f32 %v622_v30, %v1922_v63  ;;  %v567_v58 = vpop.f32.mrf.mxu1  ;;  %v663_v12 = vadd.f32 %v662_v37, %v661_v34  ;;  %v2051_v32 = vadd.f32 %v538_v41, %v1924_v0 }
 0x10c   : > { %v768_v29 = vadd.f32 %v767_v45, %v766_v60  ;;  %v2045_v55 = vadd.f32 %v593_v43, %v1920_v62  ;;  %v718_v13 = vadd.f32 %v717_v54, %v716_v35  ;;  %v2054_v38 = vadd.f32 %v567_v58, %v1926_v1 }
 0x10d   : > { %v825_v52 = vrot.slane %v824_v48, 1  ;;  %v827_v62 = vrot.slane %v2048_v40, 4  ;;  %v664_v49 = vrot.slane %v663_v12, 1  ;;  %v666_v63 = vrot.slane %v2051_v32, 4 }
 0x10e   : > { %v769_v39 = vrot.slane %v768_v29, 1  ;;  %v771_v59 = vrot.slane %v2045_v55, 4  ;;  %v719_v56 = vrot.slane %v718_v13, 1  ;;  %v721_v53 = vrot.slane %v2054_v38, 4 }
 0x10f   : > { %v826_v57 = vadd.f32 %v825_v52, %v824_v48  ;;  %v828_v61 = vadd.f32 %v827_v62, %v2048_v40  ;;  %v665_v1 = vadd.f32 %v664_v49, %v663_v12  ;;  %v667_v34 = vadd.f32 %v666_v63, %v2051_v32 }
 0x110   : > { %v770_v60 = vadd.f32 %v769_v39, %v768_v29  ;;  %v772_v0 = vadd.f32 %v771_v59, %v2045_v55  ;;  %v720_v33 = vadd.f32 %v719_v56, %v718_v13  ;;  %v722_v35 = vadd.f32 %v721_v53, %v2054_v38 }
 0x111   : > { %v848_v50 = vadd.f32 %v847_v46, %v826_v57  ;;  %v829_v54 = vrot.slane %v828_v61, 2  ;;  %v682_v43 = vadd.f32 %v681_v23, %v665_v1  ;;  %v668_v41 = vrot.slane %v667_v34, 2 }
 0x112   : > { %v792_v45 = vadd.f32 %v791_v15, %v770_v60  ;;  %v773_v37 = vrot.slane %v772_v0, 2  ;;  %v737_v30 = vadd.f32 %v736_v26, %v720_v33  ;;  %v723_v58 = vrot.slane %v722_v35, 2  ;;  %v625_v48 = vpop.f32.mrf.mxu3  ;;  %v540_v13 = vpop.f32.mrf.mxu0 }
 0x113   : > { %v596_v29 = vpop.f32.mrf.mxu2  ;;  %v830_v52 = vadd.f32 %v829_v54, %v828_v61  ;;  %v2068_v12 = vadd.f32 %v625_v48, %v1930_v3  ;;  %v569_v62 = vpop.f32.mrf.mxu1  ;;  %v669_v15 = vadd.f32 %v668_v41, %v667_v34  ;;  %v2071_v49 = vadd.f32 %v540_v13, %v1932_v4 }
 0x114   : > { %v774_v39 = vadd.f32 %v773_v37, %v772_v0  ;;  %v2065_v59 = vadd.f32 %v596_v29, %v1928_v2  ;;  %v724_v46 = vadd.f32 %v723_v58, %v722_v35  ;;  %v2074_v23 = vadd.f32 %v569_v62, %v1934_v5 }
 0x115   : > { %v831_v56 = vrot.slane %v830_v52, 1  ;;  %v833_v2 = vrot.slane %v2068_v12, 4  ;;  %v670_v53 = vrot.slane %v669_v15, 1  ;;  %v672_v3 = vrot.slane %v2071_v49, 4 }
 0x116   : > { %v775_v26 = vrot.slane %v774_v39, 1  ;;  %v777_v63 = vrot.slane %v2065_v59, 4  ;;  %v725_v60 = vrot.slane %v724_v46, 1  ;;  %v727_v57 = vrot.slane %v2074_v23, 4 }
 0x117   : > { %v832_v61 = vadd.f32 %v831_v56, %v830_v52  ;;  %v834_v1 = vadd.f32 %v833_v2, %v2068_v12  ;;  %v671_v5 = vadd.f32 %v670_v53, %v669_v15  ;;  %v673_v34 = vadd.f32 %v672_v3, %v2071_v49 }
 0x118   : > { %v776_v0 = vadd.f32 %v775_v26, %v774_v39  ;;  %v778_v4 = vadd.f32 %v777_v63, %v2065_v59  ;;  %v726_v33 = vadd.f32 %v725_v60, %v724_v46  ;;  %v728_v35 = vadd.f32 %v727_v57, %v2074_v23 }
 0x119   : > { %v849_v54 = vadd.f32 %v848_v50, %v832_v61  ;;  %v835_v58 = vrot.slane %v834_v1, 2  ;;  %v683_v29 = vadd.f32 %v682_v43, %v671_v5  ;;  %v674_v13 = vrot.slane %v673_v34, 2 }
 0x11a   : > { %v793_v37 = vadd.f32 %v792_v45, %v776_v0  ;;  %v779_v41 = vrot.slane %v778_v4, 2  ;;  %v738_v48 = vadd.f32 %v737_v30, %v726_v33  ;;  %v729_v62 = vrot.slane %v728_v35, 2  ;;  %v627_v52 = vpop.f32.mrf.mxu3 }
 0x11b   : > { %v598_v39 = vpop.f32.mrf.mxu2  ;;  %v836_v56 = vadd.f32 %v835_v58, %v834_v1  ;;  %v2088_v15 = vadd.f32 %v627_v52, %v1938_v7  ;;  %v675_v46 = vadd.f32 %v674_v13, %v673_v34 }
 0x11c   : > { %v780_v26 = vadd.f32 %v779_v41, %v778_v4  ;;  %v2085_v63 = vadd.f32 %v598_v39, %v1936_v6  ;;  %v730_v2 = vadd.f32 %v729_v62, %v728_v35 }
 0x11d   : > { %v837_v50 = vrot.slane %v836_v56, 1  ;;  %v839_v43 = vrot.slane %v2088_v15, 4  ;;  %v676_v30 = vrot.slane %v675_v46, 1 }
 0x11e   : > { %v781_v45 = vrot.slane %v780_v26, 1  ;;  %v783_v53 = vrot.slane %v2085_v63, 4  ;;  %v731_v60 = vrot.slane %v730_v2, 1 }
 0x11f   : > { %v838_v57 = vadd.f32 %v837_v50, %v836_v56  ;;  %v840_v6 = vadd.f32 %v839_v43, %v2088_v15  ;;  %v677_v61 = vadd.f32 %v676_v30, %v675_v46 }
 0x120   : > { %v782_v3 = vadd.f32 %v781_v45, %v780_v26  ;;  %v784_v0 = vadd.f32 %v783_v53, %v2085_v63  ;;  %v732_v4 = vadd.f32 %v731_v60, %v730_v2 }
 0x121   : > { %v850_v1 = vadd.f32 %v849_v54, %v838_v57  ;;  %v841_v33 = vrot.slane %v840_v6, 2  ;;  %v684_v34 = vadd.f32 %v683_v29, %v677_v61 }
 0x122   : > { %v794_v7 = vadd.f32 %v793_v37, %v782_v3  ;;  %v785_v5 = vrot.slane %v784_v0, 2  ;;  %v739_v35 = vadd.f32 %v738_v48, %v732_v4 }
 0x123   : > { %v842_v58 = vadd.f32 %v841_v33, %v840_v6 }
 0x124   : > { %v786_v41 = vadd.f32 %v785_v5, %v784_v0  ;;  %v740_v13 = vadd.f32 %v739_v35, %v684_v34 }
 0x125   : > { %v843_v39 = vrot.slane %v842_v58, 1 }
 0x126   : > { %v787_v62 = vrot.slane %v786_v41, 1 }
 0x127   : > { %v844_v26 = vadd.f32 %v843_v39, %v842_v58 }
 0x128   : > { %v788_v52 = vadd.f32 %v787_v62, %v786_v41 }
 0x129   : > { %v851_v45 = vadd.f32 %v850_v1, %v844_v26 }
 0x12a   : > { %v795_v56 = vadd.f32 %v794_v7, %v788_v52 }
 0x12c   : > { %v796_v50 = vadd.f32 %v795_v56, %v740_v13 }
 0x12e   : > { %v852_v53 = vadd.f32 %v851_v45, %v796_v50 }
 0x130   : > { %v2094_v43 = vmul.f32 0.00390625, %v852_v53 }
 0x132   : > { %v2098_v37 = vsub.f32 %v1940_v10, %v2094_v43  ;;  %v2102_v54 = vsub.f32 %v1952_v24, %v2094_v43  ;;  %v2106_v29 = vsub.f32 %v1971_v16, %v2094_v43  ;;  %v2110_v48 = vsub.f32 %v1991_v18, %v2094_v43 }
 0x133   : > { %v2114_v46 = vsub.f32 %v2011_v27, %v2094_v43  ;;  %v2118_v10 = vsub.f32 %v2031_v31, %v2094_v43  ;;  %v2122_v24 = vsub.f32 %v2051_v32, %v2094_v43  ;;  %v2126_v16 = vsub.f32 %v2071_v49, %v2094_v43 }
 0x134   : > { %2415 = vst [vmem:[#allocation2_spill] sm:$0xff] %v2110_v48  ;;  %v862_v18 = vmul.f32 %v2098_v37, %v2098_v37  ;;  %v863_v2 = vmul.f32 %v2102_v54, %v2102_v54  ;;  %v864_v27 = vmul.f32 %v2106_v29, %v2106_v29  ;;  %v865_v31 = vmul.f32 %v2110_v48, %v2110_v48 }
 0x135   : > { %2416 = vst [vmem:[#allocation3_spill] sm:$0xff] %v2114_v46  ;;  %v866_v32 = vmul.f32 %v2114_v46, %v2114_v46  ;;  %v867_v30 = vmul.f32 %v2118_v10, %v2118_v10  ;;  %v868_v49 = vmul.f32 %v2122_v24, %v2122_v24  ;;  %v869_v60 = vmul.f32 %v2126_v16, %v2126_v16 }
 0x136   : > { %2417 = vst [vmem:[#allocation4_spill] sm:$0xff] %v2118_v10  ;;  %v870_v3 = vrot.slane %v862_v18, 4  ;;  %v876_v57 = vrot.slane %v863_v2, 4  ;;  %v882_v0 = vrot.slane %v864_v27, 4  ;;  %v888_v6 = vrot.slane %v865_v31, 4 }
 0x137   : > { %2418 = vst [vmem:[#allocation5_spill] sm:$0xff] %v2122_v24  ;;  %v894_v61 = vrot.slane %v866_v32, 4  ;;  %v900_v4 = vrot.slane %v867_v30, 4  ;;  %v906_v7 = vrot.slane %v868_v49, 4  ;;  %v912_v1 = vrot.slane %v869_v60, 4 }
 0x138   : > { %2419 = vst [vmem:[#allocation6_spill] sm:$0xff] %v2126_v16  ;;  %v871_v5 = vadd.f32 %v870_v3, %v862_v18  ;;  %v877_v33 = vadd.f32 %v876_v57, %v863_v2  ;;  %v883_v34 = vadd.f32 %v882_v0, %v864_v27  ;;  %v889_v35 = vadd.f32 %v888_v6, %v865_v31 }
 0x139   : > { %v895_v41 = vadd.f32 %v894_v61, %v866_v32  ;;  %v901_v58 = vadd.f32 %v900_v4, %v867_v30  ;;  %v907_v13 = vadd.f32 %v906_v7, %v868_v49  ;;  %v913_v62 = vadd.f32 %v912_v1, %v869_v60 }
 0x13a   : > { %v872_v39 = vrot.slane %v871_v5, 2  ;;  %v878_v52 = vrot.slane %v877_v33, 2  ;;  %v884_v26 = vrot.slane %v883_v34, 2  ;;  %v890_v56 = vrot.slane %v889_v35, 2 }
 0x13b   : > { %v896_v45 = vrot.slane %v895_v41, 2  ;;  %v902_v50 = vrot.slane %v901_v58, 2  ;;  %v908_v53 = vrot.slane %v907_v13, 2  ;;  %v914_v16 = vrot.slane %v913_v62, 2 }
 0x13c   : > { %v873_v24 = vadd.f32 %v872_v39, %v871_v5  ;;  %v879_v10 = vadd.f32 %v878_v52, %v877_v33  ;;  %v885_v46 = vadd.f32 %v884_v26, %v883_v34  ;;  %v891_v48 = vadd.f32 %v890_v56, %v889_v35 }
 0x13d   : > { %v897_v18 = vadd.f32 %v896_v45, %v895_v41  ;;  %v903_v2 = vadd.f32 %v902_v50, %v901_v58  ;;  %v909_v27 = vadd.f32 %v908_v53, %v907_v13  ;;  %v915_v31 = vadd.f32 %v914_v16, %v913_v62 }
 0x13e   : > { %v874_v32 = vrot.slane %v873_v24, 1  ;;  %v880_v30 = vrot.slane %v879_v10, 1  ;;  %v886_v49 = vrot.slane %v885_v46, 1  ;;  %v892_v60 = vrot.slane %v891_v48, 1 }
 0x13f   : > { %v898_v3 = vrot.slane %v897_v18, 1  ;;  %v904_v57 = vrot.slane %v903_v2, 1  ;;  %v910_v0 = vrot.slane %v909_v27, 1  ;;  %v916_v6 = vrot.slane %v915_v31, 1 }
 0x140   : > { %v875_v61 = vadd.f32 %v874_v32, %v873_v24  ;;  %v881_v4 = vadd.f32 %v880_v30, %v879_v10  ;;  %v887_v7 = vadd.f32 %v886_v49, %v885_v46  ;;  %v893_v1 = vadd.f32 %v892_v60, %v891_v48 }
 0x141   : > { %v899_v5 = vadd.f32 %v898_v3, %v897_v18  ;;  %v905_v33 = vadd.f32 %v904_v57, %v903_v2  ;;  %v911_v34 = vadd.f32 %v910_v0, %v909_v27  ;;  %v917_v35 = vadd.f32 %v916_v6, %v915_v31 }
 0x142   : > { %v918_v41 = vadd.f32 %v881_v4, %v875_v61  ;;  %v2146_v16 = vsub.f32 %v1942_v11, %v2094_v43  ;;  %v2150_v58 = vsub.f32 %v1954_v25, %v2094_v43  ;;  %v2154_v13 = vsub.f32 %v1974_v17, %v2094_v43 }
 0x143   : > { %v2158_v48 = vsub.f32 %v1994_v19, %v2094_v43  ;;  %v2162_v46 = vsub.f32 %v2014_v42, %v2094_v43  ;;  %v2166_v11 = vsub.f32 %v2034_v28, %v2094_v43  ;;  %v2170_v25 = vsub.f32 %v2054_v38, %v2094_v43 }
 0x144   : > { %v919_v10 = vadd.f32 %v918_v41, %v887_v7  ;;  %v2174_v17 = vsub.f32 %v2074_v23, %v2094_v43  ;;  %v933_v19 = vmul.f32 %v2146_v16, %v2146_v16  ;;  %v934_v42 = vmul.f32 %v2150_v58, %v2150_v58 }
 0x145   : > { %2420 = vst [vmem:[#allocation7_spill] sm:$0xff] %v2170_v25  ;;  %v935_v24 = vmul.f32 %v2154_v13, %v2154_v13  ;;  %v936_v28 = vmul.f32 %v2158_v48, %v2158_v48  ;;  %v937_v38 = vmul.f32 %v2162_v46, %v2162_v46  ;;  %v938_v62 = vmul.f32 %v2166_v11, %v2166_v11 }
 0x146   : > { %2421 = vst [vmem:[#allocation8_spill] sm:$0xff] %v2174_v17  ;;  %v920_v23 = vadd.f32 %v919_v10, %v893_v1  ;;  %v939_v39 = vmul.f32 %v2170_v25, %v2170_v25  ;;  %v940_v52 = vmul.f32 %v2174_v17, %v2174_v17  ;;  %v941_v26 = vrot.slane %v933_v19, 4 }
 0x147   : > { %v947_v56 = vrot.slane %v934_v42, 4  ;;  %v953_v45 = vrot.slane %v935_v24, 4  ;;  %v959_v50 = vrot.slane %v936_v28, 4  ;;  %v965_v53 = vrot.slane %v937_v38, 4 }
 0x148   : > { %v921_v18 = vadd.f32 %v920_v23, %v899_v5  ;;  %v942_v2 = vadd.f32 %v941_v26, %v933_v19  ;;  %v971_v27 = vrot.slane %v938_v62, 4  ;;  %v977_v31 = vrot.slane %v939_v39, 4 }
 0x149   : > { %v948_v32 = vadd.f32 %v947_v56, %v934_v42  ;;  %v954_v30 = vadd.f32 %v953_v45, %v935_v24  ;;  %v960_v49 = vadd.f32 %v959_v50, %v936_v28  ;;  %v966_v60 = vadd.f32 %v965_v53, %v937_v38 }
 0x14a   : > { %v922_v3 = vadd.f32 %v921_v18, %v905_v33  ;;  %v943_v57 = vrot.slane %v942_v2, 2  ;;  %v972_v0 = vadd.f32 %v971_v27, %v938_v62  ;;  %v978_v6 = vadd.f32 %v977_v31, %v939_v39 }
 0x14b   : > { %v949_v61 = vrot.slane %v948_v32, 2  ;;  %v955_v4 = vrot.slane %v954_v30, 2  ;;  %v961_v7 = vrot.slane %v960_v49, 2  ;;  %v967_v1 = vrot.slane %v966_v60, 2 }
 0x14c   : > { %v923_v41 = vadd.f32 %v922_v3, %v911_v34  ;;  %v944_v10 = vadd.f32 %v943_v57, %v942_v2  ;;  %v973_v17 = vrot.slane %v972_v0, 2  ;;  %v979_v25 = vrot.slane %v978_v6, 2 }
 0x14d   : > { %v950_v5 = vadd.f32 %v949_v61, %v948_v32  ;;  %v956_v19 = vadd.f32 %v955_v4, %v954_v30  ;;  %v962_v23 = vadd.f32 %v961_v7, %v960_v49  ;;  %v968_v26 = vadd.f32 %v967_v1, %v966_v60 }
 0x14e   : > { %v2192_v42 = vadd.f32 %v923_v41, %v917_v35  ;;  %v945_v24 = vrot.slane %v944_v10, 1  ;;  %v974_v28 = vadd.f32 %v973_v17, %v972_v0  ;;  %v980_v33 = vadd.f32 %v979_v25, %v978_v6 }
 0x14f   : > { %v951_v38 = vrot.slane %v950_v5, 1  ;;  %v957_v62 = vrot.slane %v956_v19, 1  ;;  %v963_v39 = vrot.slane %v962_v23, 1  ;;  %v969_v56 = vrot.slane %v968_v26, 1 }
 0x150   : > { %v946_v45 = vadd.f32 %v945_v24, %v944_v10  ;;  %v983_v50 = vrot.slane %v940_v52, 4  ;;  %v975_v18 = vrot.slane %v974_v28, 1  ;;  %v981_v2 = vrot.slane %v980_v33, 1 }
 0x151   : > { %v952_v53 = vadd.f32 %v951_v38, %v950_v5  ;;  %v958_v34 = vadd.f32 %v957_v62, %v956_v19  ;;  %v964_v27 = vadd.f32 %v963_v39, %v962_v23  ;;  %v970_v31 = vadd.f32 %v969_v56, %v968_v26 }
 0x152   : > { %v984_v32 = vadd.f32 %v983_v50, %v940_v52  ;;  %v2196_v35 = vsub.f32 %v1948_v20, %v2094_v43  ;;  %v2200_v25 = vsub.f32 %v1965_v8, %v2094_v43  ;;  %v2204_v17 = vsub.f32 %v1985_v22, %v2094_v43 }
 0x153   : > { %v989_v30 = vadd.f32 %v952_v53, %v946_v45  ;;  %v2208_v49 = vsub.f32 %v2005_v47, %v2094_v43  ;;  %v2212_v52 = vsub.f32 %v2025_v51, %v2094_v43  ;;  %v2216_v20 = vsub.f32 %v2045_v55, %v2094_v43 }
 0x154   : > { %v985_v60 = vrot.slane %v984_v32, 2  ;;  %v2220_v8 = vsub.f32 %v2065_v59, %v2094_v43  ;;  %v2224_v22 = vsub.f32 %v2085_v63, %v2094_v43  ;;  %v1005_v47 = vmul.f32 %v2196_v35, %v2196_v35 }
 0x155   : > { %2422 = vst [vmem:[#allocation9_spill] sm:$0xff] %v2216_v20  ;;  %v990_v3 = vadd.f32 %v989_v30, %v958_v34  ;;  %v1006_v51 = vmul.f32 %v2200_v25, %v2200_v25  ;;  %v1007_v55 = vmul.f32 %v2204_v17, %v2204_v17  ;;  %v1008_v0 = vmul.f32 %v2208_v49, %v2208_v49 }
 0x156   : > { %2423 = vst [vmem:[#allocation10_spill] sm:$0xff] %v2220_v8  ;;  %v986_v57 = vadd.f32 %v985_v60, %v984_v32  ;;  %v1009_v59 = vmul.f32 %v2212_v52, %v2212_v52  ;;  %v976_v6 = vadd.f32 %v975_v18, %v974_v28  ;;  %v1010_v63 = vmul.f32 %v2216_v20, %v2216_v20 }
 0x157   : > { %v991_v61 = vadd.f32 %v990_v3, %v964_v27  ;;  %v1011_v4 = vmul.f32 %v2220_v8, %v2220_v8  ;;  %v1013_v1 = vrot.slane %v1005_v47, 4  ;;  %v1019_v41 = vrot.slane %v1006_v51, 4 }
 0x158   : > { %v987_v7 = vrot.slane %v986_v57, 1  ;;  %v1025_v10 = vrot.slane %v1007_v55, 4  ;;  %v1031_v19 = vrot.slane %v1008_v0, 4  ;;  %v1037_v23 = vrot.slane %v1009_v59, 4 }
 0x159   : > { %v992_v5 = vadd.f32 %v991_v61, %v970_v31  ;;  %v1043_v26 = vrot.slane %v1010_v63, 4  ;;  %v982_v24 = vadd.f32 %v981_v2, %v980_v33  ;;  %v1014_v38 = vadd.f32 %v1013_v1, %v1005_v47 }
 0x15a   : > { %v1020_v62 = vadd.f32 %v1019_v41, %v1006_v51  ;;  %v1026_v39 = vadd.f32 %v1025_v10, %v1007_v55  ;;  %v1032_v56 = vadd.f32 %v1031_v19, %v1008_v0  ;;  %v1038_v45 = vadd.f32 %v1037_v23, %v1009_v59 }
 0x15b   : > { %v993_v28 = vadd.f32 %v992_v5, %v976_v6  ;;  %v1044_v50 = vadd.f32 %v1043_v26, %v1010_v63  ;;  %v1015_v53 = vrot.slane %v1014_v38, 2  ;;  %v1049_v27 = vrot.slane %v1011_v4, 4 }
 0x15c   : > { %v1021_v34 = vrot.slane %v1020_v62, 2  ;;  %v1027_v18 = vrot.slane %v1026_v39, 2  ;;  %v988_v32 = vadd.f32 %v987_v7, %v986_v57  ;;  %v1033_v60 = vrot.slane %v1032_v56, 2 }
 0x15d   : > { %v994_v30 = vadd.f32 %v993_v28, %v982_v24  ;;  %v1016_v3 = vadd.f32 %v1015_v53, %v1014_v38  ;;  %v1039_v61 = vrot.slane %v1038_v45, 2  ;;  %v1045_v33 = vrot.slane %v1044_v50, 2 }
 0x15e   : > { %v1022_v31 = vadd.f32 %v1021_v34, %v1020_v62  ;;  %v1028_v20 = vadd.f32 %v1027_v18, %v1026_v39  ;;  %v1034_v51 = vadd.f32 %v1033_v60, %v1032_v56  ;;  %v1050_v55 = vadd.f32 %v1049_v27, %v1011_v4 }
 0x15f   : > { %v995_v8 = vadd.f32 %v994_v30, %v988_v32  ;;  %v1017_v2 = vrot.slane %v1016_v3, 1  ;;  %v1012_v59 = vmul.f32 %v2224_v22, %v2224_v22  ;;  %v1040_v63 = vadd.f32 %v1039_v61, %v1038_v45 }
 0x160   : > { %v1023_v47 = vrot.slane %v1022_v31, 1  ;;  %v1029_v7 = vrot.slane %v1028_v20, 1  ;;  %v1046_v1 = vadd.f32 %v1045_v33, %v1044_v50  ;;  %v1035_v41 = vrot.slane %v1034_v51, 1 }
 0x161   : > { %v2241_v0 = vadd.f32 %v995_v8, %v2192_v42  ;;  %v1018_v6 = vadd.f32 %v1017_v2, %v1016_v3  ;;  %v1051_v10 = vrot.slane %v1050_v55, 2  ;;  %v2247_v5 = vsub.f32 %v1950_v21, %v2094_v43 }
 0x162   : > { %v1024_v57 = vadd.f32 %v1023_v47, %v1022_v31  ;;  %v2251_v4 = vsub.f32 %v1968_v9, %v2094_v43  ;;  %v2255_v8 = vsub.f32 %v1988_v14, %v2094_v43  ;;  %v2259_v19 = vsub.f32 %v2008_v44, %v2094_v43 }
 0x163   : > { %v2263_v23 = vsub.f32 %v2028_v36, %v2094_v43  ;;  %v1041_v26 = vrot.slane %v1040_v63, 1  ;;  %v1055_v21 = vrot.slane %v1012_v59, 4  ;;  %v2267_v24 = vsub.f32 %v2048_v40, %v2094_v43 }
 0x164   : > { %v1061_v42 = vadd.f32 %v1024_v57, %v1018_v6  ;;  %v2271_v9 = vsub.f32 %v2068_v12, %v2094_v43  ;;  %v1030_v14 = vadd.f32 %v1029_v7, %v1028_v20  ;;  %v2275_v38 = vsub.f32 %v2088_v15, %v2094_v43 }
 0x165   : > { %v1077_v44 = vmul.f32 %v2247_v5, %v2247_v5  ;;  %v1078_v36 = vmul.f32 %v2251_v4, %v2251_v4  ;;  %v1047_v62 = vrot.slane %v1046_v1, 1  ;;  %v1079_v40 = vmul.f32 %v2255_v8, %v2255_v8 }
 0x166   : > { %2424 = vst [vmem:[#allocation11_spill] sm:$0xff] %v2271_v9  ;;  %v1080_v39 = vmul.f32 %v2259_v19, %v2259_v19  ;;  %v1081_v12 = vmul.f32 %v2263_v23, %v2263_v23  ;;  %v1036_v20 = vadd.f32 %v1035_v41, %v1034_v51  ;;  %v1052_v28 = vadd.f32 %v1051_v10, %v1050_v55 }
 0x167   : > { %2425 = vst [vmem:[#allocation12_spill] sm:$0xff] %v2275_v38  ;;  %v1062_v15 = vadd.f32 %v1061_v42, %v1030_v14  ;;  %v1082_v43 = vmul.f32 %v2267_v24, %v2267_v24  ;;  %v1056_v56 = vadd.f32 %v1055_v21, %v1012_v59  ;;  %v1085_v45 = vrot.slane %v1077_v44, 4 }
 0x168   : > { %v1091_v50 = vrot.slane %v1078_v36, 4  ;;  %v1097_v53 = vrot.slane %v1079_v40, 4  ;;  %v1083_v34 = vmul.f32 %v2271_v9, %v2271_v9  ;;  %v1103_v18 = vrot.slane %v1080_v39, 4 }
 0x169   : > { %v1109_v27 = vrot.slane %v1081_v12, 4  ;;  %v1115_v32 = vrot.slane %v1082_v43, 4  ;;  %v1042_v30 = vadd.f32 %v1041_v26, %v1040_v63  ;;  %v1086_v60 = vadd.f32 %v1085_v45, %v1077_v44 }
 0x16a   : > { %v1092_v3 = vadd.f32 %v1091_v50, %v1078_v36  ;;  %v1098_v31 = vadd.f32 %v1097_v53, %v1079_v40  ;;  %v1063_v61 = vadd.f32 %v1062_v15, %v1036_v20  ;;  %v1104_v33 = vadd.f32 %v1103_v18, %v1080_v39 }
 0x16b   : > { %v1110_v2 = vadd.f32 %v1109_v27, %v1081_v12  ;;  %v1116_v47 = vadd.f32 %v1115_v32, %v1082_v43  ;;  %v1057_v51 = vrot.slane %v1056_v56, 2  ;;  %v1087_v55 = vrot.slane %v1086_v60, 2 }
 0x16c   : > { %v1093_v59 = vrot.slane %v1092_v3, 2  ;;  %v1099_v6 = vrot.slane %v1098_v31, 2  ;;  %v1105_v57 = vrot.slane %v1104_v33, 2  ;;  %v1121_v10 = vrot.slane %v1083_v34, 4 }
 0x16d   : > { %v1111_v7 = vrot.slane %v1110_v2, 2  ;;  %v1117_v41 = vrot.slane %v1116_v47, 2  ;;  %v1084_v42 = vmul.f32 %v2275_v38, %v2275_v38  ;;  %v1088_v21 = vadd.f32 %v1087_v55, %v1086_v60 }
 0x16e   : > { %v1094_v63 = vadd.f32 %v1093_v59, %v1092_v3  ;;  %v1100_v26 = vadd.f32 %v1099_v6, %v1098_v31  ;;  %v1064_v14 = vadd.f32 %v1063_v61, %v1042_v30  ;;  %v1106_v44 = vadd.f32 %v1105_v57, %v1104_v33 }
 0x16f   : > { %v1112_v36 = vadd.f32 %v1111_v7, %v1110_v2  ;;  %v1122_v40 = vadd.f32 %v1121_v10, %v1083_v34  ;;  %v1048_v39 = vadd.f32 %v1047_v62, %v1046_v1  ;;  %v1089_v12 = vrot.slane %v1088_v21, 1 }
 0x170   : > { %v1095_v20 = vrot.slane %v1094_v63, 1  ;;  %v1101_v15 = vrot.slane %v1100_v26, 1  ;;  %v1053_v43 = vrot.slane %v1052_v28, 1  ;;  %v1058_v45 = vadd.f32 %v1057_v51, %v1056_v56 }
 0x171   : > { %v1118_v50 = vadd.f32 %v1117_v41, %v1116_v47  ;;  %v1123_v53 = vrot.slane %v1122_v40, 2  ;;  %v1090_v18 = vadd.f32 %v1089_v12, %v1088_v21  ;;  %v1107_v32 = vrot.slane %v1106_v44, 1 }
 0x172   : > { %v1096_v27 = vadd.f32 %v1095_v20, %v1094_v63  ;;  %v1127_v9 = vrot.slane %v1084_v42, 4  ;;  %v1065_v38 = vadd.f32 %v1064_v14, %v1048_v39  ;;  %v1113_v60 = vrot.slane %v1112_v36, 1 }
 0x173   : > { %v1102_v3 = vadd.f32 %v1101_v15, %v1100_v26  ;;  %v1124_v31 = vadd.f32 %v1123_v53, %v1122_v40  ;;  %v1054_v33 = vadd.f32 %v1053_v43, %v1052_v28  ;;  %v1059_v34 = vrot.slane %v1058_v45, 1 }
 0x174   : > { %v1128_v30 = vadd.f32 %v1127_v9, %v1084_v42  ;;  %v1133_v61 = vadd.f32 %v1096_v27, %v1090_v18  ;;  %v1108_v1 = vadd.f32 %v1107_v32, %v1106_v44  ;;  %v1119_v62 = vrot.slane %v1118_v50, 1  ;;  %v2426_v18 = vld [vmem:[#allocation2_spill] sm:$0xff]  ;;  %v2427_v32 = vld [vmem:[#allocation3_spill] sm:$0xff] }
 0x175   : > { %v1066_v59 = vadd.f32 %v1065_v38, %v1054_v33  ;;  %v1114_v56 = vadd.f32 %v1113_v60, %v1112_v36  ;;  %v1125_v47 = vrot.slane %v1124_v31, 1  ;;  %v1060_v57 = vadd.f32 %v1059_v34, %v1058_v45  ;;  %v2430_v33 = vld [vmem:[#allocation6_spill] sm:$0xff] }
 0x176   : > { %v1129_v2 = vrot.slane %v1128_v30, 2  ;;  %v1134_v55 = vadd.f32 %v1133_v61, %v1102_v3  ;;  %v1120_v7 = vadd.f32 %v1119_v62, %v1118_v50  ;;  %v2428_v3 = vld [vmem:[#allocation4_spill] sm:$0xff] }
 0x177   : > { %v1067_v21 = vadd.f32 %v1066_v59, %v1060_v57  ;;  %v1126_v63 = vadd.f32 %v1125_v47, %v1124_v31 }
 0x178   : > { %v1130_v51 = vadd.f32 %v1129_v2, %v1128_v30  ;;  %v1135_v6 = vadd.f32 %v1134_v55, %v1108_v1  ;;  %v2429_v30 = vld [vmem:[#allocation5_spill] sm:$0xff] }
 0x179   : > { %v1068_v9 = vadd.f32 %v1067_v21, %v2241_v0 }
 0x17a   : > { %v1131_v41 = vrot.slane %v1130_v51, 1  ;;  %v1136_v10 = vadd.f32 %v1135_v6, %v1114_v56 }
 0x17c   : > { %v1137_v26 = vadd.f32 %v1136_v10, %v1120_v7  ;;  %v1132_v28 = vadd.f32 %v1131_v41, %v1130_v51 }
 0x17e   : > { %v1138_v42 = vadd.f32 %v1137_v26, %v1126_v63 }
 0x180   : > { %v1139_v14 = vadd.f32 %v1138_v42, %v1132_v28  ;;  %v2431_v28 = vld [vmem:[#allocation7_spill] sm:$0xff]  ;;  %v2432_v42 = vld [vmem:[#allocation8_spill] sm:$0xff] }
 0x182   : > { %v1140_v44 = vadd.f32 %v1139_v14, %v1068_v9 }
 0x184   : > { %v1141_v40 = vmul.f32 0.00390625, %v1140_v44 }
 0x186   : > { %v1142_v38 = vadd.f32 1e-05, %v1141_v40 }
 0x188   : > { %1611 = vrsqrt.f32 %v1142_v38  ;;  %vm1149_vm2 = vweird.f32 %v1142_v38 }
 0x18e   : > { %v1612_v36 = vpop.eup %1611 }
 0x18f   : > { %v1144_v39 = vmul.f32 %v1612_v36, %v1142_v38  ;;  %vm1150_vm1 = vweird.f32 %v1612_v36 }
 0x190   : > { %vm1151_vm3 = vmor %vm1149_vm2, %vm1150_vm1 }
 0x191   : > { %v1145_v12 = vmul.f32 %v1612_v36, %v1144_v39 }
 0x193   : > { %v1146_v20 = vmul.f32 0.5, %v1145_v12 }
 0x195   : > { %v1147_v15 = vsub.f32 1.5, %v1146_v20 }
 0x197   : > { %v1148_v43 = vmul.f32 %v1612_v36, %v1147_v15 }
 0x199   : > { %v2294_v45 = vsel %vm1151_vm3, %v1612_v36, %v1148_v43 }
 0x19a   : > { %v1153_v0 = vmul.f32 %v2294_v45, %v2098_v37  ;;  %v1154_v50 = vmul.f32 %v2294_v45, %v2102_v54  ;;  %v1155_v53 = vmul.f32 %v2294_v45, %v2106_v29  ;;  %v1156_v27 = vmul.f32 %v2294_v45, %v2426_v18 }
 0x19b   : > { %v1157_v60 = vmul.f32 %v2294_v45, %v2427_v32  ;;  %v1158_v31 = vmul.f32 %v2294_v45, %v2428_v3  ;;  %v1159_v61 = vmul.f32 %v2294_v45, %v2429_v30  ;;  %v1160_v37 = vmul.f32 %v2294_v45, %v2430_v33  ;;  %v2434_v30 = vld [vmem:[#allocation10_spill] sm:$0xff] }
 0x19c   : > { %v1161_v34 = vmax.f32 %v1153_v0, 0.0  ;;  %v1162_v54 = vmax.f32 %v1154_v50, 0.0  ;;  %v1163_v1 = vmax.f32 %v1155_v53, 0.0  ;;  %v1164_v62 = vmax.f32 %v1156_v27, 0.0 }
 0x19d   : > { %v1165_v29 = vmax.f32 %v1157_v60, 0.0  ;;  %v1166_v2 = vmax.f32 %v1158_v31, 0.0  ;;  %v1167_v55 = vmax.f32 %v1159_v61, 0.0  ;;  %v1168_v51 = vmax.f32 %v1160_v37, 0.0 }
 0x19e   : > { %v1169_v59 = vpack.c.bf16 %v1161_v34, %v1161_v34  ;;  %v1170_v56 = vpack.c.bf16 %v1162_v54, %v1162_v54  ;;  %v1171_v47 = vpack.c.bf16 %v1163_v1, %v1163_v1  ;;  %v1172_v6 = vpack.c.bf16 %v1164_v62, %v1164_v62 }
 0x19f   : > { %v1173_v57 = vpack.c.bf16 %v1165_v29, %v1165_v29  ;;  %v1174_v7 = vpack.c.bf16 %v1166_v2, %v1166_v2  ;;  %v1185_v41 = vmul.f32 %v2294_v45, %v2146_v16  ;;  %v1186_v10 = vmul.f32 %v2294_v45, %v2150_v58 }
 0x1a0   : > { %1177 = vst [vmem:[%s2316_s15] sm:$0xf] %v1169_v59  ;;  %v1187_v21 = vmul.f32 %v2294_v45, %v2154_v13  ;;  %v1188_v63 = vmul.f32 %v2294_v45, %v2158_v48  ;;  %v1189_v26 = vmul.f32 %v2294_v45, %v2162_v46  ;;  %v1190_v9 = vmul.f32 %v2294_v45, %v2166_v11 }
 0x1a1   : > { %1178 = vst [vmem:[%s2316_s15 + $0x10] sm:$0xf] %v1170_v56  ;;  %v1191_v16 = vmul.f32 %v2294_v45, %v2431_v28  ;;  %v1192_v58 = vmul.f32 %v2294_v45, %v2432_v42  ;;  %v1175_v14 = vpack.c.bf16 %v1167_v55, %v1167_v55  ;;  %v1193_v13 = vmax.f32 %v1185_v41, 0.0 }
 0x1a2   : > { %1179 = vst [vmem:[%s2316_s15 + $0x20] sm:$0xf] %v1171_v47  ;;  %v1194_v44 = vmax.f32 %v1186_v10, 0.0  ;;  %v1195_v48 = vmax.f32 %v1187_v21, 0.0  ;;  %v1176_v40 = vpack.c.bf16 %v1168_v51, %v1168_v51  ;;  %v1196_v38 = vmax.f32 %v1188_v63, 0.0  ;;  %v2435_v10 = vld [vmem:[#allocation11_spill] sm:$0xff] }
 0x1a3   : > { %1180 = vst [vmem:[%s2316_s15 + $0x30] sm:$0xf] %v1172_v6  ;;  %v1197_v46 = vmax.f32 %v1189_v26, 0.0  ;;  %v1201_v11 = vpack.c.bf16 %v1193_v13, %v1193_v13  ;;  %v1198_v36 = vmax.f32 %v1190_v9, 0.0  ;;  %v1199_v39 = vmax.f32 %v1191_v16, 0.0  ;;  %v2436_v26 = vld [vmem:[#allocation12_spill] sm:$0xff] }
 0x1a4   : > { %1181 = vst [vmem:[%s2316_s15 + $0x40] sm:$0xf] %v1173_v57  ;;  %v1202_v12 = vpack.c.bf16 %v1194_v44, %v1194_v44  ;;  %v1203_v20 = vpack.c.bf16 %v1195_v48, %v1195_v48  ;;  %v1217_v15 = vmul.f32 %v2294_v45, %v2196_v35  ;;  %v1218_v43 = vmul.f32 %v2294_v45, %v2200_v25  ;;  %v2433_v25 = vld [vmem:[#allocation9_spill] sm:$0xff] }
 0x1a5   : > { %1182 = vst [vmem:[%s2316_s15 + $0x50] sm:$0xf] %v1174_v7  ;;  %v1219_v0 = vmul.f32 %v2294_v45, %v2204_v17  ;;  %v1200_v50 = vmax.f32 %v1192_v58, 0.0  ;;  %v1204_v53 = vpack.c.bf16 %v1196_v38, %v1196_v38  ;;  %v1220_v18 = vmul.f32 %v2294_v45, %v2208_v49 }
 0x1a6   : > { %1183 = vst [vmem:[%s2316_s15 + $0x60] sm:$0xf] %v1175_v14  ;;  %v1205_v27 = vpack.c.bf16 %v1197_v46, %v1197_v46  ;;  %v1221_v35 = vmul.f32 %v2294_v45, %v2212_v52  ;;  %v1225_v32 = vmax.f32 %v1217_v15, 0.0  ;;  %v1206_v60 = vpack.c.bf16 %v1198_v36, %v1198_v36 }
 0x1a7   : > { %1184 = vst [vmem:[%s2316_s15 + $0x70] sm:$0xf] %v1176_v40  ;;  %v1222_v17 = vmul.f32 %v2294_v45, %v2433_v25  ;;  %v1226_v3 = vmax.f32 %v1218_v43, 0.0  ;;  %v1207_v31 = vpack.c.bf16 %v1199_v39, %v1199_v39  ;;  %v1223_v49 = vmul.f32 %v2294_v45, %v2434_v30 }
 0x1a8   : > { %1209 = vst [vmem:[%s2316_s15 + $0x4] sm:$0xf] %v1201_v11  ;;  %v1227_v61 = vmax.f32 %v1219_v0, 0.0  ;;  %v1208_v33 = vpack.c.bf16 %v1200_v50, %v1200_v50  ;;  %v1224_v52 = vmul.f32 %v2294_v45, %v2224_v22  ;;  %v1228_v37 = vmax.f32 %v1220_v18, 0.0 }
 0x1a9   : > { %1210 = vst [vmem:[%s2316_s15 + $0x14] sm:$0xf] %v1202_v12  ;;  %v1229_v34 = vmax.f32 %v1221_v35, 0.0  ;;  %v1233_v54 = vpack.c.bf16 %v1225_v32, %v1225_v32  ;;  %v1249_v1 = vmul.f32 %v2294_v45, %v2247_v5  ;;  %v1230_v62 = vmax.f32 %v1222_v17, 0.0 }
 0x1aa   : > { %1211 = vst [vmem:[%s2316_s15 + $0x24] sm:$0xf] %v1203_v20  ;;  %v1234_v29 = vpack.c.bf16 %v1226_v3, %v1226_v3  ;;  %v1250_v2 = vmul.f32 %v2294_v45, %v2251_v4  ;;  %v1231_v55 = vmax.f32 %v1223_v49, 0.0  ;;  %v1235_v59 = vpack.c.bf16 %v1227_v61, %v1227_v61 }
 0x1ab   : > { %1212 = vst [vmem:[%s2316_s15 + $0x34] sm:$0xf] %v1204_v53  ;;  %v1251_v22 = vmul.f32 %v2294_v45, %v2255_v8  ;;  %v1232_v56 = vmax.f32 %v1224_v52, 0.0  ;;  %v1236_v47 = vpack.c.bf16 %v1228_v37, %v1228_v37  ;;  %v1252_v5 = vmul.f32 %v2294_v45, %v2259_v19 }
 0x1ac   : > { %1213 = vst [vmem:[%s2316_s15 + $0x44] sm:$0xf] %v1205_v27  ;;  %v1237_v51 = vpack.c.bf16 %v1229_v34, %v1229_v34  ;;  %v1253_v4 = vmul.f32 %v2294_v45, %v2263_v23  ;;  %v1257_v6 = vmax.f32 %v1249_v1, 0.0  ;;  %v1238_v57 = vpack.c.bf16 %v1230_v62, %v1230_v62 }
 0x1ad   : > { %1214 = vst [vmem:[%s2316_s15 + $0x54] sm:$0xf] %v1206_v60  ;;  %v1254_v8 = vmul.f32 %v2294_v45, %v2267_v24  ;;  %v1258_v7 = vmax.f32 %v1250_v2, 0.0  ;;  %v1239_v41 = vpack.c.bf16 %v1231_v55, %v1231_v55  ;;  %v1255_v19 = vmul.f32 %v2294_v45, %v2435_v10 }
 0x1ae   : > { %1215 = vst [vmem:[%s2316_s15 + $0x64] sm:$0xf] %v1207_v31  ;;  %v1259_v21 = vmax.f32 %v1251_v22, 0.0  ;;  %v1240_v63 = vpack.c.bf16 %v1232_v56, %v1232_v56  ;;  %v1256_v23 = vmul.f32 %v2294_v45, %v2436_v26  ;;  %v1260_v9 = vmax.f32 %v1252_v5, 0.0 }
 0x1af   : > { %1216 = vst [vmem:[%s2316_s15 + $0x74] sm:$0xf] %v1208_v33  ;;  %v1261_v28 = vmax.f32 %v1253_v4, 0.0  ;;  %v1265_v24 = vpack.c.bf16 %v1257_v6, %v1257_v6  ;;  %v1262_v16 = vmax.f32 %v1254_v8, 0.0  ;;  %v1266_v42 = vpack.c.bf16 %v1258_v7, %v1258_v7 }
 0x1b0   : > { %1241 = vst [vmem:[%s2316_s15 + $0x8] sm:$0xf] %v1233_v54  ;;  %v1263_v58 = vmax.f32 %v1255_v19, 0.0  ;;  %v1267_v14 = vpack.c.bf16 %v1259_v21, %v1259_v21  ;;  %v1264_v13 = vmax.f32 %v1256_v23, 0.0  ;;  %v1268_v45 = vpack.c.bf16 %v1260_v9, %v1260_v9 }
 0x1b1   : > { %1242 = vst [vmem:[%s2316_s15 + $0x18] sm:$0xf] %v1234_v29  ;;  %v1269_v44 = vpack.c.bf16 %v1261_v28, %v1261_v28  ;;  %v1270_v48 = vpack.c.bf16 %v1262_v16, %v1262_v16 }
 0x1b2   : > { %1243 = vst [vmem:[%s2316_s15 + $0x28] sm:$0xf] %v1235_v59  ;;  %v1271_v40 = vpack.c.bf16 %v1263_v58, %v1263_v58  ;;  %v1272_v38 = vpack.c.bf16 %v1264_v13, %v1264_v13 }
 0x1b3   : > { %1244 = vst [vmem:[%s2316_s15 + $0x38] sm:$0xf] %v1236_v47 }
 0x1b4   : > { %1245 = vst [vmem:[%s2316_s15 + $0x48] sm:$0xf] %v1237_v51 }
 0x1b5   : > { %1246 = vst [vmem:[%s2316_s15 + $0x58] sm:$0xf] %v1238_v57 }
 0x1b6   : > { %1247 = vst [vmem:[%s2316_s15 + $0x68] sm:$0xf] %v1239_v41 }
 0x1b7   : > { %1248 = vst [vmem:[%s2316_s15 + $0x78] sm:$0xf] %v1240_v63 }
 0x1b8   : > { %1273 = vst [vmem:[%s2316_s15 + $0xc] sm:$0xf] %v1265_v24 }
 0x1b9   : > { %1274 = vst [vmem:[%s2316_s15 + $0x1c] sm:$0xf] %v1266_v42 }
 0x1ba   : > { %1275 = vst [vmem:[%s2316_s15 + $0x2c] sm:$0xf] %v1267_v14 }
 0x1bb   : > { %1276 = vst [vmem:[%s2316_s15 + $0x3c] sm:$0xf] %v1268_v45 }
 0x1bc   : > { %1277 = vst [vmem:[%s2316_s15 + $0x4c] sm:$0xf] %v1269_v44 }
 0x1bd   : > { %1278 = vst [vmem:[%s2316_s15 + $0x5c] sm:$0xf] %v1270_v48 }
 0x1be   : > { %1279 = vst [vmem:[%s2316_s15 + $0x6c] sm:$0xf] %v1271_v40 }
 0x1bf   : > { %1280 = vst [vmem:[%s2316_s15 + $0x7c] sm:$0xf] %v1272_v38 }
 0x1c0 PF: > { %s12_s9 = sadd.s32 1, %s1619_s9  }
 0x1c1   : > { %p9_p4 = scmp.ge.s32.totalorder %s12_s9, 4  }
 0x1c3   :  { %11 = sbr.rel (!%p9_p4) target bundleno = 1 (0x1), region = 59 }

// kernel: warp_res_generator_forward.26
= control target key start
LH: loop header
LB: loop body
LE: loop exit
PB: predicated region body
PF: predicated region fallthrough
CT: control target
= control target key end

     0   :  { %s1557_s9 = smov 0   ;;  %s2087_s0 = inlined_call_operand.vmem [shape: bf16[2,288,48], index: 0, kind: input, shape index: {}]   ;;  %s2088_s1 = inlined_call_operand.vmem [shape: bf16[3,48,128], index: 1, kind: input, shape index: {}]   ;;  %s2089_s2 = inlined_call_operand.vmem [shape: bf16[2,16,16,128], index: 2, kind: output, shape index: {}]  }
   0x1 LB: > { %s1213_s10 = sadd.s32 4294967295, %s1540_s9   ;;  %p1217_p0 = scmp.ge.s32.totalorder %s1540_s9, 1  ;;  %s1540_s9 = sphi %s1557_s9, %s12_s9  }
   0x2   : > { %p112_p1 = scmp.lt.s32.totalorder %s1540_s9, 3 }
   0x4   : > { %p113_p2 = pnand %p1217_p0, %p112_p1 }
   0x6   : > { %116 = sbr.rel (%p113_p2) target bundleno = 487 (0x1e7), region = 28 }
   0xb   : > { %v1415_v0 = vld [vmem:[%s2088_s1 + $0x28] sm:$0xff]  ;;  %v1412_v1 = vld [vmem:[%s2088_s1 + $0x10] sm:$0xff]  ;;  %v1418_v2 = vld [vmem:[%s2088_s1 + $0x40] sm:$0xff]  ;;  %p134_p3 = scmp.lt.s32.totalorder %s1213_s10, 1  ;;  %vm292_vm0 = vcmask 392192  }
   0xc   : > { %346 = vmatpush.bf16.msra.mxu0 %v1415_v0  ;;  %1514 = vmatpush.bf16.msra.mxu3 %v1415_v0  ;;  %v1414_v3 = vld [vmem:[%s2088_s1 + $0x20] sm:$0xff]  ;;  %v1411_v4 = vld [vmem:[%s2088_s1 + $0x8] sm:$0xff]  ;;  %v1417_v5 = vld [vmem:[%s2088_s1 + $0x38] sm:$0xff] }
   0xd   : > { %s2130_s10 = smov (!%p134_p3, %s1213_s10), 1  ;;  %461 = vmatpush.bf16.msra.mxu1 %v1412_v1  ;;  %583 = vmatpush.bf16.msra.mxu2 %v1418_v2  ;;  %v1413_v6 = vld [vmem:[%s2088_s1 + $0x18] sm:$0xff]  ;;  %v1410_v7 = vld [vmem:[%s2088_s1] sm:$0xff]  ;;  %v1416_v8 = vld [vmem:[%s2088_s1 + $0x30] sm:$0xff] }
   0xe   : > { %s1523_s23 = smul.u32 144, %s2130_s10  ;;  %s1391_s5 = sshll.u32 %s2130_s10, 7 }
   0xf   : > { %s2066_s8 = scalar_lea.vmem %s2089_s2, %s1391_s5 }
  0x10   : > { %347 = vmatpush.bf16.msra.mxu0 %v1414_v3  ;;  %1515 = vmatpush.bf16.msra.mxu3 %v1414_v3  ;;  %s1592_s28 = scalar_lea.vmem %s2087_s0, %s1523_s23 }
  0x11   : > { %462 = vmatpush.bf16.msra.mxu1 %v1411_v4  ;;  %584 = vmatpush.bf16.msra.mxu2 %v1417_v5  ;;  %v1393_v9 = vld [vmem:[%s1592_s28 + $0x8] sm:$0xff]  ;;  %v1392_v11 = vld [vmem:[%s1592_s28] sm:$0xff]  ;;  %v1394_v12 = vld [vmem:[%s1592_s28 + $0x10] sm:$0xff] }
  0x12   : > { %v1602_v10 = vld [vmem:[%s1592_s28 + $0x68] sm:$0xff]  ;;  %v1406_v13 = vld [vmem:[%s1592_s28 + $0x70] sm:$0xff]  ;;  %v1395_v14 = vld [vmem:[%s1592_s28 + $0x18] sm:$0xff] }
  0x13   : > { %v1407_v15 = vld [vmem:[%s1592_s28 + $0x78] sm:$0xff]  ;;  %v1396_v16 = vld [vmem:[%s1592_s28 + $0x20] sm:$0xff]  ;;  %v1397_v18 = vld [vmem:[%s1592_s28 + $0x28] sm:$0xff] }
  0x14   : > { %348 = vmatpush.bf16.msra.mxu0 %v1413_v6  ;;  %1516 = vmatpush.bf16.msra.mxu3 %v1413_v6  ;;  %v1624_v17 = vld [vmem:[%s1592_s28 + $0x80] sm:$0xff]  ;;  %v1398_v20 = vld [vmem:[%s1592_s28 + $0x30] sm:$0xff]  ;;  %v1399_v21 = vld [vmem:[%s1592_s28 + $0x38] sm:$0xff] }
  0x15   : > { %463 = vmatpush.bf16.msra.mxu1 %v1410_v7  ;;  %585 = vmatpush.bf16.msra.mxu2 %v1416_v8  ;;  %v1633_v19 = vld [vmem:[%s1592_s28 + $0x60] sm:$0xff]  ;;  %v1401_v23 = vld [vmem:[%s1592_s28 + $0x48] sm:$0xff]  ;;  %v1402_v25 = vld [vmem:[%s1592_s28 + $0x50] sm:$0xff] }
  0x16   : > { %v1400_v22 = vld [vmem:[%s1592_s28 + $0x40] sm:$0xff]  ;;  %v1403_v38 = vld [vmem:[%s1592_s28 + $0x58] sm:$0xff] }
  0x17   : > { %1303 = vmatmul.msk.bf16.vlgmr.msra.gmra.mxu0 %vm292_vm0, %v1393_v9  ;;  %1315 = vmatmul.msk.bf16.vlgmr.msra.gmra.mxu3 %vm292_vm0, %v1602_v10 }
  0x18   : > { %1517 = vmatpush.bf16.msrb.mxu3 %v1412_v1  ;;  %1335 = vmatmul.msk.bf16.vlgmr.msra.gmra.mxu1 %vm292_vm0, %v1392_v11 }
  0x19   : > { %1373 = vmatmul.msk.bf16.vlgmr.msra.gmra.mxu2 %vm292_vm0, %v1394_v12 }
  0x1c   : > { %1518 = vmatpush.bf16.msrb.mxu3 %v1411_v4 }
  0x20   : > { %1519 = vmatpush.bf16.msrb.mxu3 %v1410_v7 }
  0x24   : > { %1520 = vmatpush.bf16.msra.mxu3 %v1418_v2 }
  0x27   : > { %1304 = vmatmul.msk.bf16.gmra.mxu0 %vm292_vm0, %v1394_v12  ;;  %1316 = vmatmul.msk.bf16.gmra.mxu3 %vm292_vm0, %v1406_v13 }
  0x28   : > { %1521 = vmatpush.bf16.msra.mxu3 %v1417_v5  ;;  %1336 = vmatmul.msk.bf16.gmra.mxu1 %vm292_vm0, %v1393_v9 }
  0x29   : > { %1374 = vmatmul.msk.bf16.gmra.mxu2 %vm292_vm0, %v1395_v14 }
  0x2c   : > { %1522 = vmatpush.bf16.msra.mxu3 %v1416_v8 }
  0x37   : > { %1305 = vmatmul.msk.bf16.gmra.mxu0 %vm292_vm0, %v1395_v14  ;;  %1317 = vmatmul.msk.bf16.gmra.mxu3 %vm292_vm0, %v1407_v15 }
  0x38   : > { %1337 = vmatmul.msk.bf16.gmra.mxu1 %vm292_vm0, %v1394_v12  ;;  %v1409_v12 = vld [vmem:[%s1592_s28 + $0x88] sm:$0xff] }
  0x39   : > { %1375 = vmatmul.msk.bf16.gmra.mxu2 %vm292_vm0, %v1396_v16 }
  0x47   : > { %1306 = vmatmul.msk.bf16.gmra.mxu0 %vm292_vm0, %v1396_v16  ;;  %1318 = vmatmul.msk.bf16.gmra.mxu3 %vm292_vm0, %v1624_v17 }
  0x48   : > { %1338 = vmatmul.msk.bf16.gmra.mxu1 %vm292_vm0, %v1395_v14 }
  0x49   : > { %1376 = vmatmul.msk.bf16.gmra.mxu2 %vm292_vm0, %v1397_v18 }
  0x57   : > { %1307 = vmatmul.msk.bf16.gmra.mxu0 %vm292_vm0, %v1397_v18  ;;  %1347 = vmatmul.msk.bf16.vlgmr.msrb.gmra.mxu3 %vm292_vm0, %v1633_v19 }
  0x58   : > { %1339 = vmatmul.msk.bf16.gmra.mxu1 %vm292_vm0, %v1396_v16 }
  0x59   : > { %1377 = vmatmul.msk.bf16.gmra.mxu2 %vm292_vm0, %v1398_v20 }
  0x67   : > { %1308 = vmatmul.msk.bf16.gmra.mxu0 %vm292_vm0, %v1398_v20  ;;  %1348 = vmatmul.msk.bf16.gmra.mxu3 %vm292_vm0, %v1602_v10 }
  0x68   : > { %1340 = vmatmul.msk.bf16.gmra.mxu1 %vm292_vm0, %v1397_v18 }
  0x69   : > { %1378 = vmatmul.msk.bf16.gmra.mxu2 %vm292_vm0, %v1399_v21 }
  0x77   : > { %1309 = vmatmul.msk.bf16.gmra.mxu0 %vm292_vm0, %v1399_v21  ;;  %1349 = vmatmul.msk.bf16.gmra.mxu3 %vm292_vm0, %v1406_v13 }
  0x78   : > { %1341 = vmatmul.msk.bf16.gmra.mxu1 %vm292_vm0, %v1398_v20 }
  0x79   : > { %1379 = vmatmul.msk.bf16.gmra.mxu2 %vm292_vm0, %v1400_v22 }
  0x87   : > { %1310 = vmatmul.msk.bf16.gmra.mxu0 %vm292_vm0, %v1400_v22  ;;  %1350 = vmatmul.msk.bf16.gmra.mxu3 %vm292_vm0, %v1407_v15 }
  0x88   : > { %1342 = vmatmul.msk.bf16.gmra.mxu1 %vm292_vm0, %v1399_v21 }
  0x89   : > { %1380 = vmatmul.msk.bf16.gmra.mxu2 %vm292_vm0, %v1401_v23 }
  0x94   : > { %v350_v24 = vpop.f32.mrf.mxu0 }
  0x95   : > { %v465_v26 = vpop.f32.mrf.mxu1 }
  0x96   : > { %v466_v27 = vadd.f32 %v465_v26, %v350_v24 }
  0x97   : > { %1311 = vmatmul.msk.bf16.gmra.mxu0 %vm292_vm0, %v1401_v23  ;;  %1385 = vmatmul.msk.bf16.vlgmr.msra.gmra.mxu3 %vm292_vm0, %v1406_v13 }
  0x98   : > { %1343 = vmatmul.msk.bf16.gmra.mxu1 %vm292_vm0, %v1400_v22 }
  0x99   : > { %1381 = vmatmul.msk.bf16.gmra.mxu2 %vm292_vm0, %v1402_v25 }
  0x9a   : > { %v1662_v28 = vpop.f32.mrf.mxu3 }
  0x9c   : > { %v587_v29 = vpop.f32.mrf.mxu2  ;;  %v352_v31 = vpop.f32.mrf.mxu0 }
  0x9d   : > { %v1664_v30 = vadd.f32 %v587_v29, %v466_v27  ;;  %v467_v32 = vpop.f32.mrf.mxu1 }
  0x9e   : > { %v468_v33 = vadd.f32 %v467_v32, %v352_v31 }
  0xa2   : > { %v1666_v34 = vpop.f32.mrf.mxu3 }
  0xa4   : > { %v589_v35 = vpop.f32.mrf.mxu2  ;;  %v355_v37 = vpop.f32.mrf.mxu0 }
  0xa5   : > { %v1668_v36 = vadd.f32 %v589_v35, %v468_v33  ;;  %v470_v39 = vpop.f32.mrf.mxu1 }
  0xa6   : > { %v471_v41 = vadd.f32 %v470_v39, %v355_v37 }
  0xa7   : > { %v699_v40 = vadd.f32 %v1668_v36, %v1664_v30  ;;  %1312 = vmatmul.msk.bf16.gmra.mxu0 %vm292_vm0, %v1402_v25  ;;  %1386 = vmatmul.msk.bf16.gmra.mxu3 %vm292_vm0, %v1407_v15 }
  0xa8   : > { %1344 = vmatmul.msk.bf16.gmra.mxu1 %vm292_vm0, %v1401_v23 }
  0xa9   : > { %1382 = vmatmul.msk.bf16.gmra.mxu2 %vm292_vm0, %v1403_v38  ;;  %v700_v47 = vrot.slane %v699_v40, 4 }
  0xaa   : > { %v1677_v42 = vpop.f32.mrf.mxu3 }
  0xab   : > { %v701_v49 = vadd.f32 %v700_v47, %v699_v40 }
  0xac   : > { %v592_v43 = vpop.f32.mrf.mxu2  ;;  %v357_v45 = vpop.f32.mrf.mxu0 }
  0xad   : > { %v1679_v44 = vadd.f32 %v592_v43, %v471_v41  ;;  %v472_v46 = vpop.f32.mrf.mxu1  ;;  %v702_v55 = vrot.slane %v701_v49, 2 }
  0xae   : > { %v473_v48 = vadd.f32 %v472_v46, %v357_v45 }
  0xaf   : > { %v703_v59 = vadd.f32 %v702_v55, %v701_v49 }
  0xb1   : > { %v704_v3 = vrot.slane %v703_v59, 1 }
  0xb2   : > { %v1681_v50 = vpop.f32.mrf.mxu3 }
  0xb3   : > { %v705_v7 = vadd.f32 %v704_v3, %v703_v59 }
  0xb4   : > { %v594_v51 = vpop.f32.mrf.mxu2  ;;  %v360_v53 = vpop.f32.mrf.mxu0 }
  0xb5   : > { %v1683_v52 = vadd.f32 %v594_v51, %v473_v48  ;;  %v475_v54 = vpop.f32.mrf.mxu1 }
  0xb6   : > { %v476_v57 = vadd.f32 %v475_v54, %v360_v53 }
  0xb7   : > { %v706_v56 = vadd.f32 %v1683_v52, %v1679_v44  ;;  %1313 = vmatmul.msk.bf16.gmra.mxu0 %vm292_vm0, %v1403_v38  ;;  %1387 = vmatmul.msk.bf16.gmra.mxu3 %vm292_vm0, %v1624_v17 }
  0xb8   : > { %1345 = vmatmul.msk.bf16.gmra.mxu1 %vm292_vm0, %v1402_v25 }
  0xb9   : > { %v707_v58 = vrot.slane %v706_v56, 4  ;;  %1383 = vmatmul.msk.bf16.gmra.mxu2 %vm292_vm0, %v1633_v19 }
  0xba   : > { %v1693_v61 = vpop.f32.mrf.mxu3 }
  0xbb   : > { %v708_v60 = vadd.f32 %v707_v58, %v706_v56 }
  0xbc   : > { %v597_v62 = vpop.f32.mrf.mxu2  ;;  %v362_v1 = vpop.f32.mrf.mxu0 }
  0xbd   : > { %v709_v63 = vrot.slane %v708_v60, 2  ;;  %v1695_v0 = vadd.f32 %v597_v62, %v476_v57  ;;  %v477_v2 = vpop.f32.mrf.mxu1 }
  0xbe   : > { %v478_v5 = vadd.f32 %v477_v2, %v362_v1 }
  0xbf   : > { %v710_v4 = vadd.f32 %v709_v63, %v708_v60 }
  0xc1   : > { %v711_v6 = vrot.slane %v710_v4, 1 }
  0xc2   : > { %v1697_v9 = vpop.f32.mrf.mxu3 }
  0xc3   : > { %v712_v8 = vadd.f32 %v711_v6, %v710_v4 }
  0xc4   : > { %v599_v11 = vpop.f32.mrf.mxu2  ;;  %v365_v15 = vpop.f32.mrf.mxu0 }
  0xc5   : > { %v811_v13 = vadd.f32 %v712_v8, %v705_v7  ;;  %v1700_v14 = vadd.f32 %v599_v11, %v478_v5  ;;  %v480_v16 = vpop.f32.mrf.mxu1 }
  0xc6   : > { %v481_v18 = vadd.f32 %v480_v16, %v365_v15 }
  0xc7   : > { %v713_v17 = vadd.f32 %v1700_v14, %v1695_v0  ;;  %1314 = vmatmul.msk.bf16.gmra.mxu0 %vm292_vm0, %v1633_v19  ;;  %1388 = vmatmul.msk.bf16.gmra.mxu3 %vm292_vm0, %v1409_v12 }
  0xc8   : > { %1346 = vmatmul.msk.bf16.gmra.mxu1 %vm292_vm0, %v1403_v38 }
  0xc9   : > { %v714_v20 = vrot.slane %v713_v17, 4  ;;  %1384 = vmatmul.msk.bf16.gmra.mxu2 %vm292_vm0, %v1602_v10 }
  0xca   : > { %v1710_v22 = vpop.f32.mrf.mxu3 }
  0xcb   : > { %v715_v21 = vadd.f32 %v714_v20, %v713_v17 }
  0xcc   : > { %v602_v23 = vpop.f32.mrf.mxu2  ;;  %v367_v26 = vpop.f32.mrf.mxu0 }
  0xcd   : > { %v716_v24 = vrot.slane %v715_v21, 2  ;;  %v1712_v25 = vadd.f32 %v602_v23, %v481_v18  ;;  %v482_v27 = vpop.f32.mrf.mxu1 }
  0xce   : > { %v483_v31 = vadd.f32 %v482_v27, %v367_v26 }
  0xcf   : > { %v717_v29 = vadd.f32 %v716_v24, %v715_v21 }
  0xd1   : > { %v718_v19 = vrot.slane %v717_v29, 1 }
  0xd2   : > { %v1714_v33 = vpop.f32.mrf.mxu3 }
  0xd3   : > { %v719_v32 = vadd.f32 %v718_v19, %v717_v29 }
  0xd4   : > { %v604_v35 = vpop.f32.mrf.mxu2  ;;  %v370_v10 = vpop.f32.mrf.mxu0 }
  0xd5   : > { %v812_v37 = vadd.f32 %v811_v13, %v719_v32  ;;  %v1716_v38 = vadd.f32 %v604_v35, %v483_v31  ;;  %v485_v39 = vpop.f32.mrf.mxu1 }
  0xd6   : > { %v486_v41 = vadd.f32 %v485_v39, %v370_v10 }
  0xd7   : > { %v720_v40 = vadd.f32 %v1716_v38, %v1712_v25 }
  0xd9   : > { %v721_v43 = vrot.slane %v720_v40, 4 }
  0xda   : > { %v525_v46 = vpop.f32.mrf.mxu3 }
  0xdb   : > { %v722_v45 = vadd.f32 %v721_v43, %v720_v40  ;;  %v1721_v47 = vadd.f32 %v525_v46, %v1662_v28 }
  0xdc   : > { %v607_v48 = vpop.f32.mrf.mxu2  ;;  %v372_v53 = vpop.f32.mrf.mxu0 }
  0xdd   : > { %v723_v49 = vrot.slane %v722_v45, 2  ;;  %v1723_v51 = vadd.f32 %v607_v48, %v486_v41  ;;  %v487_v54 = vpop.f32.mrf.mxu1 }
  0xde   : > { %v488_v56 = vadd.f32 %v487_v54, %v372_v53 }
  0xdf   : > { %v724_v55 = vadd.f32 %v723_v49, %v722_v45 }
  0xe1   : > { %v725_v57 = vrot.slane %v724_v55, 1 }
  0xe2   : > { %v527_v59 = vpop.f32.mrf.mxu3 }
  0xe3   : > { %v726_v58 = vadd.f32 %v725_v57, %v724_v55  ;;  %v1726_v60 = vadd.f32 %v527_v59, %v1666_v34 }
  0xe4   : > { %v609_v62 = vpop.f32.mrf.mxu2  ;;  %v375_v28 = vpop.f32.mrf.mxu0 }
  0xe5   : > { %v813_v63 = vadd.f32 %v812_v37, %v726_v58  ;;  %v1728_v1 = vadd.f32 %v609_v62, %v488_v56  ;;  %v490_v2 = vpop.f32.mrf.mxu1 }
  0xe6   : > { %v491_v4 = vadd.f32 %v490_v2, %v375_v28 }
  0xe7   : > { %v727_v3 = vadd.f32 %v1728_v1, %v1723_v51 }
  0xe9   : > { %v728_v5 = vrot.slane %v727_v3, 4 }
  0xea   : > { %v530_v7 = vpop.f32.mrf.mxu3 }
  0xeb   : > { %v729_v6 = vadd.f32 %v728_v5, %v727_v3  ;;  %v1733_v8 = vadd.f32 %v530_v7, %v1677_v42 }
  0xec   : > { %v612_v11 = vpop.f32.mrf.mxu2  ;;  %v377_v13 = vpop.f32.mrf.mxu0 }
  0xed   : > { %v730_v12 = vrot.slane %v729_v6, 2  ;;  %v1735_v34 = vadd.f32 %v612_v11, %v491_v4  ;;  %v492_v15 = vpop.f32.mrf.mxu1 }
  0xee   : > { %v493_v17 = vadd.f32 %v492_v15, %v377_v13 }
  0xef   : > { %v731_v16 = vadd.f32 %v730_v12, %v729_v6 }
  0xf1   : > { %v732_v18 = vrot.slane %v731_v16, 1 }
  0xf2   : > { %v532_v21 = vpop.f32.mrf.mxu3 }
  0xf3   : > { %v733_v20 = vadd.f32 %v732_v18, %v731_v16  ;;  %v1738_v23 = vadd.f32 %v532_v21, %v1681_v50 }
  0xf4   : > { %v614_v24 = vpop.f32.mrf.mxu2  ;;  %v380_v42 = vpop.f32.mrf.mxu0 }
  0xf5   : > { %v814_v26 = vadd.f32 %v813_v63, %v733_v20  ;;  %v1740_v27 = vadd.f32 %v614_v24, %v493_v17  ;;  %v495_v29 = vpop.f32.mrf.mxu1 }
  0xf6   : > { %v496_v19 = vadd.f32 %v495_v29, %v380_v42 }
  0xf7   : > { %v734_v31 = vadd.f32 %v1740_v27, %v1735_v34 }
  0xf9   : > { %v735_v32 = vrot.slane %v734_v31, 4 }
  0xfa   : > { %v535_v37 = vpop.f32.mrf.mxu3 }
  0xfb   : > { %v736_v35 = vadd.f32 %v735_v32, %v734_v31  ;;  %v1745_v10 = vadd.f32 %v535_v37, %v1693_v61 }
  0xfc   : > { %v617_v39 = vpop.f32.mrf.mxu2  ;;  %v382_v41 = vpop.f32.mrf.mxu0 }
  0xfd   : > { %v737_v40 = vrot.slane %v736_v35, 2  ;;  %v1747_v50 = vadd.f32 %v617_v39, %v496_v19  ;;  %v497_v43 = vpop.f32.mrf.mxu1 }
  0xfe   : > { %v498_v46 = vadd.f32 %v497_v43, %v382_v41 }
  0xff   : > { %v738_v45 = vadd.f32 %v737_v40, %v736_v35 }
 0x101   : > { %v739_v48 = vrot.slane %v738_v45, 1 }
 0x102   : > { %v537_v53 = vpop.f32.mrf.mxu3 }
 0x103   : > { %v740_v49 = vadd.f32 %v739_v48, %v738_v45  ;;  %v1750_v54 = vadd.f32 %v537_v53, %v1697_v9 }
 0x104   : > { %v619_v55 = vpop.f32.mrf.mxu2  ;;  %v385_v61 = vpop.f32.mrf.mxu0 }
 0x105   : > { %v815_v56 = vadd.f32 %v814_v26, %v740_v49  ;;  %v1752_v57 = vadd.f32 %v619_v55, %v498_v46  ;;  %v500_v58 = vpop.f32.mrf.mxu1 }
 0x106   : > { %v501_v62 = vadd.f32 %v500_v58, %v385_v61 }
 0x107   : > { %v741_v59 = vadd.f32 %v1752_v57, %v1747_v50 }
 0x109   : > { %v742_v63 = vrot.slane %v741_v59, 4 }
 0x10a   : > { %v540_v2 = vpop.f32.mrf.mxu3 }
 0x10b   : > { %v743_v28 = vadd.f32 %v742_v63, %v741_v59  ;;  %v1757_v3 = vadd.f32 %v540_v2, %v1710_v22 }
 0x10c   : > { %v622_v4 = vpop.f32.mrf.mxu2  ;;  %v387_v6 = vpop.f32.mrf.mxu0 }
 0x10d   : > { %v744_v5 = vrot.slane %v743_v28, 2  ;;  %v1759_v9 = vadd.f32 %v622_v4, %v501_v62  ;;  %v502_v7 = vpop.f32.mrf.mxu1 }
 0x10e   : > { %v503_v15 = vadd.f32 %v502_v7, %v387_v6 }
 0x10f   : > { %v745_v11 = vadd.f32 %v744_v5, %v743_v28 }
 0x111   : > { %v746_v12 = vrot.slane %v745_v11, 1 }
 0x112   : > { %v1761_v16 = vpop.f32.mrf.mxu3 }
 0x113   : > { %v747_v13 = vadd.f32 %v746_v12, %v745_v11 }
 0x114   : > { %v624_v17 = vpop.f32.mrf.mxu2  ;;  %v390_v21 = vpop.f32.mrf.mxu0 }
 0x115   : > { %v816_v18 = vadd.f32 %v815_v56, %v747_v13  ;;  %v1763_v20 = vadd.f32 %v624_v17, %v503_v15  ;;  %v505_v24 = vpop.f32.mrf.mxu1 }
 0x116   : > { %v506_v6 = vadd.f32 %v505_v24, %v390_v21 }
 0x117   : > { %v748_v22 = vadd.f32 %v1763_v20, %v1759_v9 }
 0x119   : > { %v749_v26 = vrot.slane %v748_v22, 4 }
 0x11a   : > { %v647_v29 = vpop.f32.mrf.mxu3 }
 0x11b   : > { %v750_v42 = vadd.f32 %v749_v26, %v748_v22  ;;  %v1768_v43 = vadd.f32 %v647_v29, %v1721_v47 }
 0x11c   : > { %v627_v31 = vpop.f32.mrf.mxu2  ;;  %v392_v32 = vpop.f32.mrf.mxu0 }
 0x11d   : > { %v751_v19 = vrot.slane %v750_v42, 2  ;;  %v507_v35 = vpop.f32.mrf.mxu1 }
 0x11e   : > { %v508_v7 = vadd.f32 %v507_v35, %v392_v32 }
 0x11f   : > { %v752_v37 = vadd.f32 %v751_v19, %v750_v42 }
 0x121   : > { %v753_v39 = vrot.slane %v752_v37, 1 }
 0x122   : > { %v649_v41 = vpop.f32.mrf.mxu3 }
 0x123   : > { %v754_v40 = vadd.f32 %v753_v39, %v752_v37  ;;  %v1771_v46 = vadd.f32 %v649_v41, %v1726_v60 }
 0x124   : > { %v629_v45 = vpop.f32.mrf.mxu2  ;;  %v395_v49 = vpop.f32.mrf.mxu0 }
 0x125   : > { %v1773_v48 = vadd.f32 %v816_v18, %v754_v40  ;;  %v783_v53 = vadd.f32 %v1771_v46, %v1768_v43  ;;  %v510_v55 = vpop.f32.mrf.mxu1  ;;  %v1785_v13 = vadd.f32 %v629_v45, %v508_v7  ;;  %v1787_v18 = vadd.f32 %v627_v31, %v506_v6 }
 0x126   : > { %v511_v17 = vadd.f32 %v510_v55, %v395_v49  ;;  %v543_v7 = vadd.f32 %v1761_v16, %v1714_v33 }
 0x127   : > { %v755_v26 = vadd.f32 %v1785_v13, %v1787_v18 }
 0x129   : > { %v756_v39 = vrot.slane %v755_v26, 4 }
 0x12a   : > { %v652_v56 = vpop.f32.mrf.mxu3 }
 0x12b   : > { %v1778_v63 = vadd.f32 %v652_v56, %v1733_v8  ;;  %v757_v55 = vadd.f32 %v756_v39, %v755_v26 }
 0x12c   : > { %v632_v61 = vpop.f32.mrf.mxu2  ;;  %v397_v58 = vpop.f32.mrf.mxu0 }
 0x12d   : > { %v512_v59 = vpop.f32.mrf.mxu1  ;;  %v1793_v42 = vadd.f32 %v632_v61, %v511_v17 }
 0x12e   : > { %v513_v8 = vadd.f32 %v512_v59, %v397_v58  ;;  %v758_v59 = vrot.slane %v757_v55, 2 }
 0x132   : > { %v654_v62 = vpop.f32.mrf.mxu3 }
 0x133   : > { %v1781_v28 = vadd.f32 %v654_v62, %v1738_v23 }
 0x134   : > { %v634_v47 = vpop.f32.mrf.mxu2  ;;  %v400_v60 = vpop.f32.mrf.mxu0 }
 0x135   : > { %v790_v2 = vadd.f32 %v1781_v28, %v1778_v63  ;;  %v515_v4 = vpop.f32.mrf.mxu1  ;;  %v1789_v22 = vadd.f32 %v634_v47, %v513_v8  ;;  %v784_v47 = vrot.slane %v783_v53, 4 }
 0x136   : > { %v516_v23 = vadd.f32 %v515_v4, %v400_v60 }
 0x137   : > { %v762_v31 = vadd.f32 %v1789_v22, %v1793_v42 }
 0x139   : > { %v763_v49 = vrot.slane %v762_v31, 4 }
 0x13a   : > { %v657_v5 = vpop.f32.mrf.mxu3 }
 0x13b   : > { %v1796_v24 = vadd.f32 %v657_v5, %v1745_v10  ;;  %v764_v58 = vadd.f32 %v763_v49, %v762_v31 }
 0x13c   : > { %v637_v11 = vpop.f32.mrf.mxu2  ;;  %v402_v12 = vpop.f32.mrf.mxu0 }
 0x13d   : > { %v517_v15 = vpop.f32.mrf.mxu1  ;;  %v1803_v35 = vadd.f32 %v637_v11, %v516_v23  ;;  %v765_v5 = vrot.slane %v764_v58, 2  ;;  %v759_v11 = vadd.f32 %v758_v59, %v757_v55  ;;  %v785_v23 = vadd.f32 %v784_v47, %v783_v53 }
 0x13e   : > { %v518_v29 = vadd.f32 %v517_v15, %v402_v12  ;;  %v791_v12 = vrot.slane %v790_v2, 4 }
 0x13f   : > { %v786_v49 = vrot.slane %v785_v23, 2 }
 0x140   : > { %v792_v16 = vadd.f32 %v791_v12, %v790_v2 }
 0x142   : > { %v659_v21 = vpop.f32.mrf.mxu3  ;;  %v793_v59 = vrot.slane %v792_v16, 2 }
 0x143   : > { %v1799_v32 = vadd.f32 %v659_v21, %v1750_v54 }
 0x144   : > { %v639_v19 = vpop.f32.mrf.mxu2  ;;  %v405_v41 = vpop.f32.mrf.mxu0 }
 0x145   : > { %v1805_v37 = vadd.f32 %v639_v19, %v518_v29  ;;  %v797_v40 = vadd.f32 %v1799_v32, %v1796_v24  ;;  %v520_v45 = vpop.f32.mrf.mxu1  ;;  %v766_v19 = vadd.f32 %v765_v5, %v764_v58 }
 0x146   : > { %v521_v6 = vadd.f32 %v520_v45, %v405_v41  ;;  %v760_v45 = vrot.slane %v759_v11, 1 }
 0x147   : > { %v769_v10 = vadd.f32 %v1805_v37, %v1803_v35  ;;  %v798_v31 = vrot.slane %v797_v40, 4  ;;  %v767_v55 = vrot.slane %v766_v19, 1 }
 0x148   : > { %v761_v58 = vadd.f32 %v760_v45, %v759_v11 }
 0x149   : > { %v770_v54 = vrot.slane %v769_v10, 4  ;;  %v768_v5 = vadd.f32 %v767_v55, %v766_v19 }
 0x14a   : > { %v662_v56 = vpop.f32.mrf.mxu3  ;;  %v818_v2 = vadd.f32 %v1773_v48, %v761_v58 }
 0x14b   : > { %v771_v62 = vadd.f32 %v770_v54, %v769_v10  ;;  %v1814_v26 = vadd.f32 %v662_v56, %v1757_v3  ;;  %v799_v54 = vadd.f32 %v798_v31, %v797_v40 }
 0x14c   : > { %v642_v61 = vpop.f32.mrf.mxu2  ;;  %v407_v60 = vpop.f32.mrf.mxu0 }
 0x14d   : > { %v522_v4 = vpop.f32.mrf.mxu1  ;;  %v772_v15 = vrot.slane %v771_v62, 2  ;;  %v1818_v39 = vadd.f32 %v642_v61, %v521_v6  ;;  %v800_v6 = vrot.slane %v799_v54, 2 }
 0x14e   : > { %v523_v17 = vadd.f32 %v522_v4, %v407_v60  ;;  %v787_v4 = vadd.f32 %v786_v49, %v785_v23 }
 0x14f   : > { %2103 = vst [vmem:[#allocation2_spill] sm:$0xff] %v1818_v39  ;;  %v773_v10 = vadd.f32 %v772_v15, %v771_v62  ;;  %v794_v62 = vadd.f32 %v793_v59, %v792_v16 }
 0x151   : > { %v774_v61 = vrot.slane %v773_v10, 1  ;;  %v795_v31 = vrot.slane %v794_v62, 1 }
 0x152   : > { %v664_v8 = vpop.f32.mrf.mxu3 }
 0x153   : > { %v1816_v21 = vadd.f32 %v664_v8, %v543_v7  ;;  %v775_v12 = vadd.f32 %v774_v61, %v773_v10  ;;  %v788_v8 = vrot.slane %v787_v4, 1  ;;  %v796_v19 = vadd.f32 %v795_v31, %v794_v62 }
 0x154   : > { %v644_v29 = vpop.f32.mrf.mxu2 }
 0x155   : > { %v1820_v41 = vadd.f32 %v644_v29, %v523_v17  ;;  %v804_v33 = vadd.f32 %v1816_v21, %v1814_v26  ;;  %v819_v29 = vadd.f32 %v818_v2, %v768_v5 }
 0x157   : > { %2104 = vst [vmem:[#allocation3_spill] sm:$0xff] %v1820_v41  ;;  %v776_v53 = vadd.f32 %v1820_v41, %v1818_v39  ;;  %v805_v3 = vrot.slane %v804_v33, 4  ;;  %v801_v41 = vadd.f32 %v800_v6, %v799_v54  ;;  %v820_v11 = vadd.f32 %v819_v29, %v775_v12 }
 0x159   : > { %v777_v56 = vrot.slane %v776_v53, 4  ;;  %v806_v60 = vadd.f32 %v805_v3, %v804_v33  ;;  %v802_v33 = vrot.slane %v801_v41, 1 }
 0x15b   : > { %v778_v47 = vadd.f32 %v777_v56, %v776_v53  ;;  %v807_v17 = vrot.slane %v806_v60, 2  ;;  %v789_v53 = vadd.f32 %v788_v8, %v787_v4  ;;  %v803_v55 = vadd.f32 %v802_v33, %v801_v41 }
 0x15d   : > { %v779_v7 = vrot.slane %v778_v47, 2  ;;  %v808_v39 = vadd.f32 %v807_v17, %v806_v60 }
 0x15f   : > { %v780_v15 = vadd.f32 %v779_v7, %v778_v47  ;;  %v809_v49 = vrot.slane %v808_v39, 1 }
 0x161   : > { %v781_v40 = vrot.slane %v780_v15, 1  ;;  %v810_v16 = vadd.f32 %v809_v49, %v808_v39 }
 0x163   : > { %v782_v45 = vadd.f32 %v781_v40, %v780_v15 }
 0x165   : > { %v821_v23 = vadd.f32 %v820_v11, %v782_v45 }
 0x167   : > { %v822_v3 = vadd.f32 %v821_v23, %v789_v53 }
 0x169   : > { %v823_v48 = vadd.f32 %v822_v3, %v796_v19 }
 0x16b   : > { %v824_v10 = vadd.f32 %v823_v48, %v803_v55 }
 0x16d   : > { %v825_v56 = vadd.f32 %v824_v10, %v810_v16 }
 0x16f   : > { %v826_v58 = vmul.f32 0.00390625, %v825_v56  ;;  %v2114_v56 = vld [vmem:[#allocation2_spill] sm:$0xff] }
 0x171   : > { %v1828_v59 = vsub.f32 %v1664_v30, %v826_v58  ;;  %v1831_v54 = vsub.f32 %v1668_v36, %v826_v58  ;;  %v1834_v61 = vsub.f32 %v1679_v44, %v826_v58  ;;  %v1837_v47 = vsub.f32 %v1683_v52, %v826_v58 }
 0x172   : > { %v1840_v60 = vsub.f32 %v1695_v0, %v826_v58  ;;  %v1843_v39 = vsub.f32 %v1700_v14, %v826_v58  ;;  %v1846_v41 = vsub.f32 %v1712_v25, %v826_v58  ;;  %v1849_v30 = vsub.f32 %v1716_v38, %v826_v58 }
 0x173   : > { %v1852_v36 = vsub.f32 %v1723_v51, %v826_v58  ;;  %v1855_v44 = vsub.f32 %v1728_v1, %v826_v58  ;;  %v1858_v52 = vsub.f32 %v1735_v34, %v826_v58  ;;  %v1861_v0 = vsub.f32 %v1740_v27, %v826_v58 }
 0x174   : > { %v1864_v14 = vsub.f32 %v1747_v50, %v826_v58  ;;  %v1867_v25 = vsub.f32 %v1752_v57, %v826_v58  ;;  %v1870_v38 = vsub.f32 %v1759_v9, %v826_v58  ;;  %v1873_v51 = vsub.f32 %v1768_v43, %v826_v58 }
 0x175   : > { %v1876_v1 = vsub.f32 %v1771_v46, %v826_v58  ;;  %v1879_v34 = vsub.f32 %v1778_v63, %v826_v58  ;;  %v1882_v27 = vsub.f32 %v1781_v28, %v826_v58  ;;  %v1885_v50 = vsub.f32 %v1796_v24, %v826_v58 }
 0x176   : > { %2105 = vst [vmem:[#allocation4_spill] sm:$0xff] %v1873_v51  ;;  %v1888_v57 = vsub.f32 %v1799_v32, %v826_v58  ;;  %v1891_v9 = vsub.f32 %v1814_v26, %v826_v58  ;;  %v1894_v43 = vsub.f32 %v1816_v21, %v826_v58  ;;  %v1897_v46 = vsub.f32 %v1763_v20, %v826_v58 }
 0x177   : > { %2106 = vst [vmem:[#allocation5_spill] sm:$0xff] %v1876_v1  ;;  %v859_v63 = vmul.f32 %v1828_v59, %v1828_v59  ;;  %v860_v28 = vmul.f32 %v1831_v54, %v1831_v54  ;;  %v861_v24 = vmul.f32 %v1834_v61, %v1834_v61  ;;  %v862_v32 = vmul.f32 %v1837_v47, %v1837_v47 }
 0x178   : > { %2107 = vst [vmem:[#allocation6_spill] sm:$0xff] %v1879_v34  ;;  %v871_v26 = vmul.f32 %v1864_v14, %v1864_v14  ;;  %v872_v21 = vmul.f32 %v1867_v25, %v1867_v25  ;;  %v873_v20 = vmul.f32 %v1870_v38, %v1870_v38  ;;  %v874_v4 = vmul.f32 %v1897_v46, %v1897_v46 }
 0x179   : > { %2108 = vst [vmem:[#allocation7_spill] sm:$0xff] %v1882_v27  ;;  %v863_v5 = vmul.f32 %v1840_v60, %v1840_v60  ;;  %v864_v6 = vmul.f32 %v1843_v39, %v1843_v39  ;;  %v891_v7 = vadd.f32 %v860_v28, %v859_v63  ;;  %v898_v2 = vadd.f32 %v862_v32, %v861_v24  ;;  %v2116_v63 = vld [vmem:[#allocation3_spill] sm:$0xff] }
 0x17a   : > { %2109 = vst [vmem:[#allocation8_spill] sm:$0xff] %v1885_v50  ;;  %v865_v62 = vmul.f32 %v1846_v41, %v1846_v41  ;;  %v866_v12 = vmul.f32 %v1849_v30, %v1849_v30  ;;  %v933_v15 = vadd.f32 %v872_v21, %v871_v26  ;;  %v1923_v17 = vadd.f32 %v874_v4, %v873_v20 }
 0x17b   : > { %2110 = vst [vmem:[#allocation9_spill] sm:$0xff] %v1888_v57  ;;  %v867_v8 = vmul.f32 %v1852_v36, %v1852_v36  ;;  %v868_v29 = vmul.f32 %v1855_v44, %v1855_v44  ;;  %v905_v40 = vadd.f32 %v864_v6, %v863_v5  ;;  %v892_v31 = vrot.slane %v891_v7, 4 }
 0x17c   : > { %2111 = vst [vmem:[#allocation10_spill] sm:$0xff] %v1891_v9  ;;  %v899_v11 = vrot.slane %v898_v2, 4  ;;  %v869_v45 = vmul.f32 %v1858_v52, %v1858_v52  ;;  %v870_v53 = vmul.f32 %v1861_v0, %v1861_v0  ;;  %v912_v33 = vadd.f32 %v866_v12, %v865_v62 }
 0x17d   : > { %2112 = vst [vmem:[#allocation11_spill] sm:$0xff] %v1894_v43  ;;  %v1934_v23 = vsub.f32 %v1787_v18, %v826_v58  ;;  %v1937_v19 = vsub.f32 %v1785_v13, %v826_v58  ;;  %v906_v3 = vrot.slane %v905_v40, 4  ;;  %v919_v49 = vadd.f32 %v868_v29, %v867_v8 }
 0x17e   : > { %v1940_v55 = vsub.f32 %v1793_v42, %v826_v58  ;;  %v1943_v48 = vsub.f32 %v1789_v22, %v826_v58  ;;  %v1946_v16 = vsub.f32 %v1803_v35, %v826_v58  ;;  %v1949_v10 = vsub.f32 %v1805_v37, %v826_v58 }
 0x17f   : > { %v1952_v18 = vsub.f32 %v2114_v56, %v826_v58  ;;  %v1955_v13 = vsub.f32 %v2116_v63, %v826_v58  ;;  %v893_v28 = vadd.f32 %v892_v31, %v891_v7  ;;  %v900_v24 = vadd.f32 %v899_v11, %v898_v2 }
 0x180   : > { %2113 = vst [vmem:[#allocation12_spill] sm:$0xff] %v1949_v10  ;;  %v883_v42 = vmul.f32 %v1873_v51, %v1873_v51  ;;  %v884_v22 = vmul.f32 %v1876_v1, %v1876_v1  ;;  %v913_v32 = vrot.slane %v912_v33, 4  ;;  %v926_v35 = vadd.f32 %v870_v53, %v869_v45 }
 0x181   : > { %2115 = vst [vmem:[#allocation2_spill] sm:$0xff] %v1952_v18  ;;  %v885_v37 = vmul.f32 %v1879_v34, %v1879_v34  ;;  %v886_v26 = vmul.f32 %v1882_v27, %v1882_v27  ;;  %v907_v21 = vadd.f32 %v906_v3, %v905_v40  ;;  %v920_v20 = vrot.slane %v919_v49, 4 }
 0x182   : > { %2117 = vst [vmem:[#allocation3_spill] sm:$0xff] %v1955_v13  ;;  %v887_v58 = vmul.f32 %v1885_v50, %v1885_v50  ;;  %v888_v4 = vmul.f32 %v1888_v57, %v1888_v57  ;;  %v889_v5 = vmul.f32 %v1891_v9, %v1891_v9  ;;  %v890_v6 = vmul.f32 %v1894_v43, %v1894_v43 }
 0x183   : > { %v875_v7 = vmul.f32 %v1934_v23, %v1934_v23  ;;  %v876_v2 = vmul.f32 %v1937_v19, %v1937_v19  ;;  %v894_v62 = vrot.slane %v893_v28, 2  ;;  %v901_v12 = vrot.slane %v900_v24, 2 }
 0x184   : > { %v877_v8 = vmul.f32 %v1940_v55, %v1940_v55  ;;  %v878_v29 = vmul.f32 %v1943_v48, %v1943_v48  ;;  %v914_v40 = vadd.f32 %v913_v32, %v912_v33  ;;  %v927_v31 = vrot.slane %v926_v35, 4 }
 0x185   : > { %v879_v11 = vmul.f32 %v1946_v16, %v1946_v16  ;;  %v908_v45 = vrot.slane %v907_v21, 2  ;;  %v921_v53 = vadd.f32 %v920_v20, %v919_v49  ;;  %v934_v3 = vrot.slane %v933_v15, 4 }
 0x186   : > { %v975_v56 = vadd.f32 %v884_v22, %v883_v42  ;;  %v1983_v63 = vadd.f32 %v886_v26, %v885_v37  ;;  %v1985_v43 = vadd.f32 %v888_v4, %v887_v58  ;;  %v1987_v9 = vadd.f32 %v890_v6, %v889_v5 }
 0x187   : > { %v880_v57 = vmul.f32 %v1949_v10, %v1949_v10  ;;  %v895_v50 = vadd.f32 %v894_v62, %v893_v28  ;;  %v902_v27 = vadd.f32 %v901_v12, %v900_v24  ;;  %v947_v33 = vadd.f32 %v876_v2, %v875_v7 }
 0x188   : > { %v915_v32 = vrot.slane %v914_v40, 2  ;;  %v928_v34 = vadd.f32 %v927_v31, %v926_v35  ;;  %v941_v1 = vrot.slane %v1923_v17, 4  ;;  %v881_v49 = vmul.f32 %v1952_v18, %v1952_v18 }
 0x189   : > { %v882_v42 = vmul.f32 %v1955_v13, %v1955_v13  ;;  %v954_v22 = vadd.f32 %v878_v29, %v877_v8  ;;  %v909_v37 = vadd.f32 %v908_v45, %v907_v21  ;;  %v922_v26 = vrot.slane %v921_v53, 2 }
 0x18a   : > { %v935_v20 = vadd.f32 %v934_v3, %v933_v15  ;;  %v896_v58 = vrot.slane %v895_v50, 1  ;;  %v903_v4 = vrot.slane %v902_v27, 1  ;;  %v948_v5 = vrot.slane %v947_v33, 4 }
 0x18b   : > { %v961_v28 = vadd.f32 %v880_v57, %v879_v11  ;;  %v916_v24 = vadd.f32 %v915_v32, %v914_v40  ;;  %v929_v6 = vrot.slane %v928_v34, 2  ;;  %v942_v35 = vadd.f32 %v941_v1, %v1923_v17 }
 0x18c   : > { %v955_v7 = vrot.slane %v954_v22, 4  ;;  %v968_v2 = vadd.f32 %v882_v42, %v881_v49  ;;  %v910_v62 = vrot.slane %v909_v37, 1  ;;  %v923_v12 = vadd.f32 %v922_v26, %v921_v53 }
 0x18d   : > { %v936_v31 = vrot.slane %v935_v20, 2  ;;  %v897_v51 = vadd.f32 %v896_v58, %v895_v50  ;;  %v904_v18 = vadd.f32 %v903_v4, %v902_v27  ;;  %v949_v13 = vadd.f32 %v948_v5, %v947_v33 }
 0x18e   : > { %v962_v8 = vrot.slane %v961_v28, 4  ;;  %v917_v21 = vrot.slane %v916_v24, 1  ;;  %v930_v29 = vadd.f32 %v929_v6, %v928_v34  ;;  %v943_v15 = vrot.slane %v942_v35, 2 }
 0x18f   : > { %v956_v45 = vadd.f32 %v955_v7, %v954_v22  ;;  %v969_v3 = vrot.slane %v968_v2, 4  ;;  %v911_v10 = vadd.f32 %v910_v62, %v909_v37  ;;  %v924_v57 = vrot.slane %v923_v12, 1 }
 0x190   : > { %v937_v40 = vadd.f32 %v936_v31, %v935_v20  ;;  %v950_v11 = vrot.slane %v949_v13, 2  ;;  %v963_v32 = vadd.f32 %v962_v8, %v961_v28  ;;  %v976_v1 = vrot.slane %v975_v56, 4 }
 0x191   : > { %v1003_v17 = vadd.f32 %v904_v18, %v897_v51  ;;  %v918_v49 = vadd.f32 %v917_v21, %v916_v24  ;;  %v931_v42 = vrot.slane %v930_v29, 1  ;;  %v944_v53 = vadd.f32 %v943_v15, %v942_v35 }
 0x192   : > { %v957_v26 = vrot.slane %v956_v45, 2  ;;  %v970_v50 = vadd.f32 %v969_v3, %v968_v2  ;;  %v983_v27 = vrot.slane %v1983_v63, 4  ;;  %v925_v58 = vadd.f32 %v924_v57, %v923_v12 }
 0x193   : > { %v1004_v33 = vadd.f32 %v1003_v17, %v911_v10  ;;  %v938_v34 = vrot.slane %v937_v40, 1  ;;  %v990_v22 = vrot.slane %v1985_v43, 4  ;;  %v951_v4 = vadd.f32 %v950_v11, %v949_v13 }
 0x194   : > { %v964_v37 = vrot.slane %v963_v32, 2  ;;  %v977_v5 = vadd.f32 %v976_v1, %v975_v56  ;;  %v932_v6 = vadd.f32 %v931_v42, %v930_v29  ;;  %v945_v28 = vrot.slane %v944_v53, 1 }
 0x195   : > { %v1005_v20 = vadd.f32 %v1004_v33, %v918_v49  ;;  %v997_v51 = vrot.slane %v1987_v9, 4  ;;  %v958_v18 = vadd.f32 %v957_v26, %v956_v45  ;;  %v971_v24 = vrot.slane %v970_v50, 2 }
 0x196   : > { %v984_v35 = vadd.f32 %v983_v27, %v1983_v63  ;;  %v939_v2 = vadd.f32 %v938_v34, %v937_v40  ;;  %v991_v10 = vadd.f32 %v990_v22, %v1985_v43  ;;  %v952_v62 = vrot.slane %v951_v4, 1 }
 0x197   : > { %v1006_v7 = vadd.f32 %v1005_v20, %v925_v58  ;;  %v965_v12 = vadd.f32 %v964_v37, %v963_v32  ;;  %v978_v31 = vrot.slane %v977_v5, 2  ;;  %v946_v13 = vadd.f32 %v945_v28, %v944_v53 }
 0x198   : > { %v998_v56 = vadd.f32 %v997_v51, %v1987_v9  ;;  %v959_v21 = vrot.slane %v958_v18, 1  ;;  %v972_v29 = vadd.f32 %v971_v24, %v970_v50  ;;  %v985_v15 = vrot.slane %v984_v35, 2 }
 0x199   : > { %v1007_v8 = vadd.f32 %v1006_v7, %v932_v6  ;;  %v992_v57 = vrot.slane %v991_v10, 2  ;;  %v953_v45 = vadd.f32 %v952_v62, %v951_v4  ;;  %v966_v11 = vrot.slane %v965_v12, 1 }
 0x19a   : > { %v979_v1 = vadd.f32 %v978_v31, %v977_v5  ;;  %v999_v17 = vrot.slane %v998_v56, 2  ;;  %v960_v40 = vadd.f32 %v959_v21, %v958_v18  ;;  %v973_v49 = vrot.slane %v972_v29, 1 }
 0x19b   : > { %v1008_v3 = vadd.f32 %v1007_v8, %v939_v2  ;;  %v986_v43 = vadd.f32 %v985_v15, %v984_v35  ;;  %v967_v32 = vadd.f32 %v966_v11, %v965_v12  ;;  %v993_v27 = vadd.f32 %v992_v57, %v991_v10 }
 0x19c   : > { %v980_v26 = vrot.slane %v979_v1, 1  ;;  %v974_v33 = vadd.f32 %v973_v49, %v972_v29  ;;  %v1000_v58 = vadd.f32 %v999_v17, %v998_v56  ;;  %v2118_v17 = vld [vmem:[#allocation12_spill] sm:$0xff]  ;;  %v2120_v49 = vld [vmem:[#allocation3_spill] sm:$0xff] }
 0x19d   : > { %v1009_v63 = vadd.f32 %v1008_v3, %v946_v13  ;;  %v987_v9 = vrot.slane %v986_v43, 1  ;;  %v994_v22 = vrot.slane %v993_v27, 1 }
 0x19e   : > { %v981_v34 = vadd.f32 %v980_v26, %v979_v1  ;;  %v1001_v20 = vrot.slane %v1000_v58, 1  ;;  %v2124_v26 = vld [vmem:[#allocation7_spill] sm:$0xff] }
 0x19f   : > { %v1010_v42 = vadd.f32 %v1009_v63, %v953_v45  ;;  %v988_v4 = vadd.f32 %v987_v9, %v986_v43  ;;  %v995_v6 = vadd.f32 %v994_v22, %v993_v27  ;;  %v2121_v43 = vld [vmem:[#allocation4_spill] sm:$0xff]  ;;  %v2128_v9 = vld [vmem:[#allocation11_spill] sm:$0xff] }
 0x1a0   : > { %v1002_v51 = vadd.f32 %v1001_v20, %v1000_v58  ;;  %v2125_v27 = vld [vmem:[#allocation8_spill] sm:$0xff] }
 0x1a1   : > { %v1011_v53 = vadd.f32 %v1010_v42, %v960_v40  ;;  %v2119_v40 = vld [vmem:[#allocation2_spill] sm:$0xff]  ;;  %v2122_v42 = vld [vmem:[#allocation5_spill] sm:$0xff] }
 0x1a3   : > { %v1012_v50 = vadd.f32 %v1011_v53, %v967_v32  ;;  %v2123_v32 = vld [vmem:[#allocation6_spill] sm:$0xff]  ;;  %v2126_v53 = vld [vmem:[#allocation9_spill] sm:$0xff] }
 0x1a5   : > { %v1013_v37 = vadd.f32 %v1012_v50, %v974_v33  ;;  %v2127_v33 = vld [vmem:[#allocation10_spill] sm:$0xff] }
 0x1a7   : > { %v1014_v5 = vadd.f32 %v1013_v37, %v981_v34 }
 0x1a9   : > { %v1015_v28 = vadd.f32 %v1014_v5, %v988_v4 }
 0x1ab   : > { %v1016_v18 = vadd.f32 %v1015_v28, %v995_v6 }
 0x1ad   : > { %v1017_v24 = vadd.f32 %v1016_v18, %v1002_v51 }
 0x1af   : > { %v1018_v35 = vmul.f32 0.00390625, %v1017_v24 }
 0x1b1   : > { %v1019_v7 = vadd.f32 1e-05, %v1018_v35 }
 0x1b3   : > { %1532 = vrsqrt.f32 %v1019_v7  ;;  %vm1026_vm2 = vweird.f32 %v1019_v7 }
 0x1b9   : > { %v1533_v2 = vpop.eup %1532 }
 0x1ba   : > { %v1021_v10 = vmul.f32 %v1533_v2, %v1019_v7  ;;  %vm1027_vm1 = vweird.f32 %v1533_v2 }
 0x1bb   : > { %vm1028_vm3 = vmor %vm1026_vm2, %vm1027_vm1 }
 0x1bc   : > { %v1022_v62 = vmul.f32 %v1533_v2, %v1021_v10 }
 0x1be   : > { %v1023_v12 = vmul.f32 0.5, %v1022_v62 }
 0x1c0   : > { %v1024_v31 = vsub.f32 1.5, %v1023_v12 }
 0x1c2   : > { %v1025_v8 = vmul.f32 %v1533_v2, %v1024_v31 }
 0x1c4   : > { %v1029_v13 = vsel %vm1028_vm3, %v1533_v2, %v1025_v8 }
 0x1c5   : > { %v2004_v56 = vmul.f32 %v1029_v13, %v1828_v59  ;;  %v2007_v21 = vmul.f32 %v1029_v13, %v1831_v54  ;;  %v2010_v29 = vmul.f32 %v1029_v13, %v1834_v61  ;;  %v2013_v15 = vmul.f32 %v1029_v13, %v1837_v47 }
 0x1c6   : > { %v2016_v3 = vmul.f32 %v1029_v13, %v1840_v60  ;;  %v2019_v57 = vmul.f32 %v1029_v13, %v1843_v39  ;;  %v2022_v45 = vmul.f32 %v1029_v13, %v1846_v41  ;;  %v2025_v59 = vmul.f32 %v1029_v13, %v1849_v30 }
 0x1c7   : > { %v2028_v54 = vmul.f32 %v1029_v13, %v1852_v36  ;;  %v1039_v61 = vmul.f32 %v1029_v13, %v1855_v44  ;;  %v1040_v47 = vmul.f32 %v1029_v13, %v1858_v52  ;;  %v1041_v11 = vmul.f32 %v1029_v13, %v1861_v0 }
 0x1c8   : > { %v1042_v60 = vmul.f32 %v1029_v13, %v1864_v14  ;;  %v1043_v39 = vmul.f32 %v1029_v13, %v1867_v25  ;;  %v1044_v1 = vmul.f32 %v1029_v13, %v1870_v38  ;;  %v1045_v41 = vmul.f32 %v1029_v13, %v1897_v46 }
 0x1c9   : > { %v1046_v30 = vmul.f32 %v1029_v13, %v1934_v23  ;;  %v1047_v63 = vmul.f32 %v1029_v13, %v1937_v19  ;;  %v1048_v36 = vmul.f32 %v1029_v13, %v1940_v55  ;;  %v1049_v44 = vmul.f32 %v1029_v13, %v1943_v48 }
 0x1ca   : > { %v1050_v52 = vmul.f32 %v1029_v13, %v1946_v16  ;;  %v1051_v0 = vmul.f32 %v1029_v13, %v2118_v17  ;;  %v1052_v14 = vmul.f32 %v1029_v13, %v2119_v40  ;;  %v1053_v25 = vmul.f32 %v1029_v13, %v2120_v49 }
 0x1cb   : > { %v1054_v38 = vmul.f32 %v1029_v13, %v2121_v43  ;;  %v1055_v46 = vmul.f32 %v1029_v13, %v2122_v42  ;;  %v1056_v23 = vmul.f32 %v1029_v13, %v2123_v32  ;;  %v1057_v19 = vmul.f32 %v1029_v13, %v2124_v26 }
 0x1cc   : > { %v1058_v55 = vmul.f32 %v1029_v13, %v2125_v27  ;;  %v1059_v48 = vmul.f32 %v1029_v13, %v2126_v53  ;;  %v1060_v16 = vmul.f32 %v1029_v13, %v2127_v33  ;;  %v1061_v58 = vmul.f32 %v1029_v13, %v2128_v9 }
 0x1cd   : > { %v1062_v50 = vmax.f32 %v2004_v56, 0.0  ;;  %v1063_v34 = vmax.f32 %v2007_v21, 0.0  ;;  %v1064_v22 = vmax.f32 %v2010_v29, 0.0  ;;  %v1065_v37 = vmax.f32 %v2013_v15, 0.0 }
 0x1ce   : > { %v1066_v4 = vmax.f32 %v2016_v3, 0.0  ;;  %v1067_v20 = vmax.f32 %v2019_v57, 0.0  ;;  %v1068_v5 = vmax.f32 %v2022_v45, 0.0  ;;  %v1069_v6 = vmax.f32 %v2025_v59, 0.0 }
 0x1cf   : > { %v1070_v28 = vmax.f32 %v2028_v54, 0.0  ;;  %v1071_v51 = vmax.f32 %v1039_v61, 0.0  ;;  %v1072_v18 = vmax.f32 %v1040_v47, 0.0  ;;  %v1073_v24 = vmax.f32 %v1041_v11, 0.0 }
 0x1d0   : > { %v1074_v35 = vmax.f32 %v1042_v60, 0.0  ;;  %v1075_v7 = vmax.f32 %v1043_v39, 0.0  ;;  %v1076_v2 = vmax.f32 %v1044_v1, 0.0  ;;  %v1077_v10 = vmax.f32 %v1045_v41, 0.0 }
 0x1d1   : > { %v1078_v62 = vmax.f32 %v1046_v30, 0.0  ;;  %v1079_v12 = vmax.f32 %v1047_v63, 0.0  ;;  %v1080_v31 = vmax.f32 %v1048_v36, 0.0  ;;  %v1081_v8 = vmax.f32 %v1049_v44, 0.0 }
 0x1d2   : > { %v1082_v13 = vmax.f32 %v1050_v52, 0.0  ;;  %v1083_v56 = vmax.f32 %v1051_v0, 0.0  ;;  %v1084_v21 = vmax.f32 %v1052_v14, 0.0  ;;  %v1085_v29 = vmax.f32 %v1053_v25, 0.0 }
 0x1d3   : > { %v1086_v15 = vmax.f32 %v1054_v38, 0.0  ;;  %v1087_v3 = vmax.f32 %v1055_v46, 0.0  ;;  %v1088_v57 = vmax.f32 %v1056_v23, 0.0  ;;  %v1089_v45 = vmax.f32 %v1057_v19, 0.0 }
 0x1d4   : > { %v1090_v59 = vmax.f32 %v1058_v55, 0.0  ;;  %v1091_v54 = vmax.f32 %v1059_v48, 0.0  ;;  %v1092_v61 = vmax.f32 %v1060_v16, 0.0  ;;  %v1093_v47 = vmax.f32 %v1061_v58, 0.0 }
 0x1d5   : > { %v1422_v11 = vpack.c.bf16 %v1063_v34, %v1062_v50  ;;  %v1427_v60 = vpack.c.bf16 %v1065_v37, %v1064_v22  ;;  %v1432_v39 = vpack.c.bf16 %v1067_v20, %v1066_v4  ;;  %v1437_v1 = vpack.c.bf16 %v1069_v6, %v1068_v5 }
 0x1d6   : > { %v1442_v41 = vpack.c.bf16 %v1071_v51, %v1070_v28  ;;  %v1447_v30 = vpack.c.bf16 %v1073_v24, %v1072_v18  ;;  %v1452_v63 = vpack.c.bf16 %v1075_v7, %v1074_v35  ;;  %v1457_v36 = vpack.c.bf16 %v1077_v10, %v1076_v2 }
 0x1d7   : > { %1423 = vst [vmem:[%s2066_s8] sm:$0xff] %v1422_v11   ;;  %v1462_v44 = vpack.c.bf16 %v1079_v12, %v1078_v62  ;;  %v1467_v52 = vpack.c.bf16 %v1081_v8, %v1080_v31  ;;  %v1472_v17 = vpack.c.bf16 %v1083_v56, %v1082_v13  ;;  %v1477_v0 = vpack.c.bf16 %v1085_v29, %v1084_v21 }
 0x1d8   : > { %1499 = vst [vmem:[%s2066_s8 + $0x8] sm:$0xff] %v1427_v60   ;;  %v1482_v40 = vpack.c.bf16 %v1087_v3, %v1086_v15  ;;  %v1487_v14 = vpack.c.bf16 %v1089_v45, %v1088_v57  ;;  %v1492_v49 = vpack.c.bf16 %v1091_v54, %v1090_v59  ;;  %v1497_v25 = vpack.c.bf16 %v1093_v47, %v1092_v61 }
 0x1d9   : > { %1500 = vst [vmem:[%s2066_s8 + $0x10] sm:$0xff] %v1432_v39  }
 0x1da   : > { %1501 = vst [vmem:[%s2066_s8 + $0x18] sm:$0xff] %v1437_v1  }
 0x1db   : > { %1502 = vst [vmem:[%s2066_s8 + $0x20] sm:$0xff] %v1442_v41  }
 0x1dc   : > { %1503 = vst [vmem:[%s2066_s8 + $0x28] sm:$0xff] %v1447_v30  }
 0x1dd   : > { %1504 = vst [vmem:[%s2066_s8 + $0x30] sm:$0xff] %v1452_v63  }
 0x1de   : > { %1505 = vst [vmem:[%s2066_s8 + $0x38] sm:$0xff] %v1457_v36  }
 0x1df   : > { %1506 = vst [vmem:[%s2066_s8 + $0x40] sm:$0xff] %v1462_v44  }
 0x1e0   : > { %1507 = vst [vmem:[%s2066_s8 + $0x48] sm:$0xff] %v1467_v52  }
 0x1e1   : > { %1508 = vst [vmem:[%s2066_s8 + $0x50] sm:$0xff] %v1472_v17  }
 0x1e2   : > { %1509 = vst [vmem:[%s2066_s8 + $0x58] sm:$0xff] %v1477_v0  }
 0x1e3   : > { %1510 = vst [vmem:[%s2066_s8 + $0x60] sm:$0xff] %v1482_v40  }
 0x1e4   : > { %1511 = vst [vmem:[%s2066_s8 + $0x68] sm:$0xff] %v1487_v14  }
 0x1e5   : > { %1512 = vst [vmem:[%s2066_s8 + $0x70] sm:$0xff] %v1492_v49  }
 0x1e6   : > { %1513 = vst [vmem:[%s2066_s8 + $0x78] sm:$0xff] %v1497_v25  }
 0x1e7 PF: > { %s12_s9 = sadd.s32 1, %s1540_s9  }
 0x1e8   : > { %p9_p4 = scmp.ge.s32.totalorder %s12_s9, 4  }
 0x1ea   :  { %11 = sbr.rel (!%p9_p4) target bundleno = 1 (0x1), region = 60 }

// kernel: warp_res_generator_forward.27
= control target key start
LH: loop header
LB: loop body
LE: loop exit
PB: predicated region body
PF: predicated region fallthrough
CT: control target
= control target key end

     0   :  { %s2049_s12 = smov 0   ;;  %s2649_s0 = inlined_call_operand.vmem [shape: bf16[2,352,56], index: 0, kind: input, shape index: {}]   ;;  %s2650_s1 = inlined_call_operand.vmem [shape: bf16[7,56,128], index: 1, kind: input, shape index: {}]   ;;  %s2651_s2 = inlined_call_operand.vmem [shape: f32[1,128], index: 2, kind: input, shape index: {}]   ;;  %s2652_s3 = inlined_call_operand.vmem [shape: f32[2,16,16,128], index: 3, kind: output, shape index: {}]  }
   0x1 LB: > { %s1555_s13 = sadd.s32 4294967295, %s2027_s12   ;;  %p1559_p0 = scmp.ge.s32.totalorder %s2027_s12, 1  ;;  %s2027_s12 = sphi %s2049_s12, %s13_s12  }
   0x2   : > { %p137_p1 = scmp.lt.s32.totalorder %s2027_s12, 3 }
   0x4   : > { %p138_p2 = pnand %p1559_p0, %p137_p1 }
   0x5   : > { %p161_p3 = scmp.lt.s32.totalorder (!%p138_p2), %s1555_s13, 1 }
   0x6   : > { %141 = sbr.rel (%p138_p2) target bundleno = 622 (0x26e), region = 32 }
   0xb   : > { %v1569_v0 = vld [vmem:[%s2650_s1 + $0x34] sm:$0xf]  ;;  %v222_v1 = vld [vmem:[%s2650_s1 + $0x18] sm:$0xf]  ;;  %v1700_v4 = vld [vmem:[%s2650_s1 + $0x50] sm:$0xf] }
   0xc   : > { %v324_v2 = vunpack.c.l.b16 %v1569_v0  ;;  %v492_v3 = vunpack.c.l.b16 %v222_v1  ;;  %vm381_vm0 = vcmask 1043456   ;;  %v621_v5 = vunpack.c.l.b16 %v1700_v4  ;;  %v1919_v12 = vld [vmem:[%s2650_s1 + $0x2c] sm:$0xff]  ;;  %s2654_s13 = smov (!%p161_p3, %s1555_s13), 1  ;;  %v1856_v13 = vld [vmem:[%s2650_s1 + $0xc0] sm:$0xf]  ;;  %v1918_v19 = vld [vmem:[%s2650_s1 + $0x24] sm:$0xff] }
   0xd   : > { %v1916_v14 = vld [vmem:[%s2650_s1 + $0x10] sm:$0xff]  ;;  %v1922_v15 = vld [vmem:[%s2650_s1 + $0x48] sm:$0xff]  ;;  %v1265_v16 = vunpack.c.l.b16 %v1856_v13  ;;  %v1817_v18 = vld [vmem:[%s2650_s1 + $0xa4] sm:$0xf]  ;;  %s1947_s7 = smul.u32 176, %s2654_s13  ;;  %vm332_vm1 = vcmask 457728  }
   0xe   : > { %v328_v6 = vpack.c.b16 %v324_v2, %v324_v2  ;;  %v496_v7 = vpack.c.b16 %v492_v3, %v492_v3  ;;  %v625_v8 = vpack.c.b16 %v621_v5, %v621_v5  ;;  %v1778_v17 = vld [vmem:[%s2650_s1 + $0x88] sm:$0xf]  ;;  %v1921_v21 = vld [vmem:[%s2650_s1 + $0x40] sm:$0xff]  ;;  %v1104_v23 = vunpack.c.l.b16 %v1817_v18  ;;  %v1920_v27 = vld [vmem:[%s2650_s1 + $0x38] sm:$0xff]  ;;  %s1891_s27 = sshll.u32 %s2654_s13, 8 }
   0xf   : > { %v1915_v20 = vld [vmem:[%s2650_s1 + $0x8] sm:$0xff]  ;;  %v943_v22 = vunpack.c.l.b16 %v1778_v17  ;;  %v1269_v24 = vpack.c.b16 %v1265_v16, %v1265_v16  ;;  %v1917_v25 = vld [vmem:[%s2650_s1 + $0x1c] sm:$0xff]  ;;  %s2105_s18 = scalar_lea.vmem %s2649_s0, %s1947_s7  ;;  %v1933_v48 = vld [vmem:[%s2650_s1 + $0xb0] sm:$0xff]  ;;  %s2498_s30 = scalar_lea.vmem %s2652_s3, %s1891_s27 }
  0x10   : > { %v383_v9 = vsel %vm381_vm0, %v328_v6, 0  ;;  %v504_v10 = vsel %vm381_vm0, %v496_v7, 0  ;;  %v633_v11 = vsel %vm381_vm0, %v625_v8, 0  ;;  %v1914_v26 = vld [vmem:[%s2650_s1] sm:$0xff]  ;;  %v1108_v29 = vpack.c.b16 %v1104_v23, %v1104_v23  ;;  %v1893_v30 = vld [vmem:[%s2105_s18 + $0x8] sm:$0xff]  ;;  %v1894_v34 = vld [vmem:[%s2105_s18 + $0x10] sm:$0xff] }
  0x11   : > { %389 = vmatpush.bf16.msra.mxu0 %v383_v9  ;;  %1935 = vmatpush.bf16.msra.mxu3 %v383_v9  ;;  %v947_v28 = vpack.c.b16 %v943_v22, %v943_v22  ;;  %v2115_v31 = vld [vmem:[%s2105_s18 + $0x68] sm:$0xff]  ;;  %v1277_v32 = vsel %vm381_vm0, %v1269_v24, 0  ;;  %v1892_v33 = vld [vmem:[%s2105_s18] sm:$0xff]  ;;  %v2128_v37 = vld [vmem:[%s2105_s18 + $0x70] sm:$0xff] }
  0x12   : > { %510 = vmatpush.bf16.msra.mxu1 %v504_v10  ;;  %639 = vmatpush.bf16.msra.mxu2 %v633_v11  ;;  %v1116_v36 = vsel %vm381_vm0, %v1108_v29, 0  ;;  %v2131_v38 = vld [vmem:[%s2105_s18 + $0x18] sm:$0xff]  ;;  %v1928_v40 = vld [vmem:[%s2650_s1 + $0x80] sm:$0xff]  ;;  %v2165_v45 = vld [vmem:[%s2105_s18 + $0x28] sm:$0xff] }
  0x13   : > { %v955_v35 = vsel %vm381_vm0, %v947_v28, 0  ;;  %v1934_v39 = vld [vmem:[%s2650_s1 + $0xb8] sm:$0xff]  ;;  %v2152_v43 = vld [vmem:[%s2105_s18 + $0x20] sm:$0xff]  ;;  %v2179_v47 = vld [vmem:[%s2105_s18 + $0x30] sm:$0xff] }
  0x14   : > { %v1931_v41 = vld [vmem:[%s2650_s1 + $0x9c] sm:$0xff]  ;;  %v1930_v50 = vld [vmem:[%s2650_s1 + $0x94] sm:$0xff]  ;;  %v1739_v53 = vld [vmem:[%s2650_s1 + $0x6c] sm:$0xf] }
  0x15   : > { %390 = vmatpush.bf16.msra.mxu0 %v1919_v12  ;;  %1936 = vmatpush.bf16.msra.mxu3 %v1919_v12  ;;  %v2149_v42 = vld [vmem:[%s2105_s18 + $0x78] sm:$0xff]  ;;  %v2162_v44 = vld [vmem:[%s2105_s18 + $0x80] sm:$0xff]  ;;  %v782_v54 = vunpack.c.l.b16 %v1739_v53  ;;  %v2225_v57 = vld [vmem:[%s2105_s18 + $0x48] sm:$0xff] }
  0x16   : > { %511 = vmatpush.bf16.msra.mxu1 %v1916_v14  ;;  %640 = vmatpush.bf16.msra.mxu2 %v1922_v15  ;;  %v2176_v46 = vld [vmem:[%s2105_s18 + $0x60] sm:$0xff]  ;;  %v1927_v49 = vld [vmem:[%s2650_s1 + $0x78] sm:$0xff]  ;;  %v1932_v59 = vld [vmem:[%s2650_s1 + $0xa8] sm:$0xff] }
  0x17   : > { %v2199_v51 = vld [vmem:[%s2105_s18 + $0x38] sm:$0xff]  ;;  %v2210_v52 = vld [vmem:[%s2105_s18 + $0x40] sm:$0xff]  ;;  %v786_v55 = vpack.c.b16 %v782_v54, %v782_v54  ;;  %v1926_v60 = vld [vmem:[%s2650_s1 + $0x70] sm:$0xff] }
  0x18   : > { %v1925_v58 = vld [vmem:[%s2650_s1 + $0x64] sm:$0xff]  ;;  %v1929_v61 = vld [vmem:[%s2650_s1 + $0x8c] sm:$0xff]  ;;  %v1924_v2 = vld [vmem:[%s2650_s1 + $0x5c] sm:$0xff] }
  0x19   : > { %391 = vmatpush.bf16.msra.mxu0 %v1918_v19  ;;  %1937 = vmatpush.bf16.msra.mxu3 %v1918_v19  ;;  %v794_v56 = vsel %vm381_vm0, %v786_v55, 0  ;;  %v2248_v63 = vld [vmem:[%s2105_s18 + $0x50] sm:$0xff]  ;;  %v2270_v13 = vld [vmem:[%s2105_s18 + $0x58] sm:$0xff] }
  0x1a   : > { %512 = vmatpush.bf16.msra.mxu1 %v1915_v20  ;;  %641 = vmatpush.bf16.msra.mxu2 %v1921_v21  ;;  %v1923_v16 = vld [vmem:[%s2650_s1 + $0x54] sm:$0xff] }
  0x1d   : > { %392 = vmatpush.bf16.msra.mxu0 %v1917_v25  ;;  %1938 = vmatpush.bf16.msra.mxu3 %v1917_v25 }
  0x1e   : > { %513 = vmatpush.bf16.msra.mxu1 %v1914_v26  ;;  %642 = vmatpush.bf16.msra.mxu2 %v1920_v27 }
  0x20   : > { %1646 = vmatmul.msk.bf16.vlgmr.msra.gmra.mxu0 %vm332_vm1, %v1893_v30  ;;  %1658 = vmatmul.msk.bf16.vlgmr.msra.gmra.mxu3 %vm332_vm1, %v2115_v31 }
  0x21   : > { %1939 = vmatpush.bf16.msrb.mxu3 %v504_v10  ;;  %1678 = vmatmul.msk.bf16.vlgmr.msra.gmra.mxu1 %vm332_vm1, %v1892_v33 }
  0x22   : > { %1283 = vmatpush.bf16.msrb.mxu2 %v1277_v32  ;;  %961 = vmatpush.bf16.msrb.mxu0 %v955_v35 }
  0x23   : > { %1717 = vmatmul.msk.bf16.vlgmr.msra.gmra.mxu2 %vm332_vm1, %v1894_v34  ;;  %1122 = vmatpush.bf16.msrb.mxu1 %v1116_v36 }
  0x25   : > { %1940 = vmatpush.bf16.msrb.mxu3 %v1916_v14 }
  0x26   : > { %1284 = vmatpush.bf16.msrb.mxu2 %v1934_v39  ;;  %962 = vmatpush.bf16.msrb.mxu0 %v1928_v40  ;;  %v2306_v40 = vld [vmem:[%s2105_s18 + $0x88] sm:$0xff] }
  0x27   : > { %1123 = vmatpush.bf16.msrb.mxu1 %v1931_v41 }
  0x29   : > { %1941 = vmatpush.bf16.msrb.mxu3 %v1915_v20 }
  0x2a   : > { %1285 = vmatpush.bf16.msrb.mxu2 %v1933_v48  ;;  %963 = vmatpush.bf16.msrb.mxu0 %v1927_v49 }
  0x2b   : > { %1124 = vmatpush.bf16.msrb.mxu1 %v1930_v50 }
  0x2d   : > { %1942 = vmatpush.bf16.msrb.mxu3 %v1914_v26 }
  0x2e   : > { %1286 = vmatpush.bf16.msrb.mxu2 %v1932_v59  ;;  %964 = vmatpush.bf16.msrb.mxu0 %v1926_v60 }
  0x2f   : > { %1125 = vmatpush.bf16.msrb.mxu1 %v1929_v61 }
  0x30   : > { %1647 = vmatmul.msk.bf16.gmra.mxu0 %vm332_vm1, %v1894_v34  ;;  %1659 = vmatmul.msk.bf16.gmra.mxu3 %vm332_vm1, %v2128_v37 }
  0x31   : > { %1943 = vmatpush.bf16.msra.mxu3 %v633_v11  ;;  %1679 = vmatmul.msk.bf16.gmra.mxu1 %vm332_vm1, %v1893_v30 }
  0x33   : > { %1718 = vmatmul.msk.bf16.gmra.mxu2 %vm332_vm1, %v2131_v38 }
  0x35   : > { %1944 = vmatpush.bf16.msra.mxu3 %v1922_v15 }
  0x39   : > { %1945 = vmatpush.bf16.msra.mxu3 %v1921_v21 }
  0x3d   : > { %1946 = vmatpush.bf16.msra.mxu3 %v1920_v27 }
  0x40   : > { %1648 = vmatmul.msk.bf16.gmra.mxu0 %vm332_vm1, %v2131_v38  ;;  %1660 = vmatmul.msk.bf16.gmra.mxu3 %vm332_vm1, %v2149_v42 }
  0x41   : > { %1680 = vmatmul.msk.bf16.gmra.mxu1 %vm332_vm1, %v1894_v34 }
  0x43   : > { %1719 = vmatmul.msk.bf16.gmra.mxu2 %vm332_vm1, %v2152_v43 }
  0x50   : > { %1649 = vmatmul.msk.bf16.gmra.mxu0 %vm332_vm1, %v2152_v43  ;;  %1661 = vmatmul.msk.bf16.gmra.mxu3 %vm332_vm1, %v2162_v44 }
  0x51   : > { %1681 = vmatmul.msk.bf16.gmra.mxu1 %vm332_vm1, %v2131_v38 }
  0x53   : > { %1720 = vmatmul.msk.bf16.gmra.mxu2 %vm332_vm1, %v2165_v45 }
  0x60   : > { %1650 = vmatmul.msk.bf16.gmra.mxu0 %vm332_vm1, %v2165_v45  ;;  %1690 = vmatmul.msk.bf16.vlgmr.msrb.gmra.mxu3 %vm332_vm1, %v2176_v46 }
  0x61   : > { %1682 = vmatmul.msk.bf16.gmra.mxu1 %vm332_vm1, %v2152_v43  ;;  %800 = vmatpush.bf16.msrb.mxu3 %v794_v56 }
  0x63   : > { %1721 = vmatmul.msk.bf16.gmra.mxu2 %vm332_vm1, %v2179_v47 }
  0x65   : > { %801 = vmatpush.bf16.msrb.mxu3 %v1925_v58 }
  0x69   : > { %802 = vmatpush.bf16.msrb.mxu3 %v1924_v2 }
  0x6d   : > { %803 = vmatpush.bf16.msrb.mxu3 %v1923_v16 }
  0x70   : > { %1651 = vmatmul.msk.bf16.gmra.mxu0 %vm332_vm1, %v2179_v47  ;;  %1691 = vmatmul.msk.bf16.gmra.mxu3 %vm332_vm1, %v2115_v31 }
  0x71   : > { %1683 = vmatmul.msk.bf16.gmra.mxu1 %vm332_vm1, %v2165_v45 }
  0x73   : > { %1722 = vmatmul.msk.bf16.gmra.mxu2 %vm332_vm1, %v2199_v51 }
  0x80   : > { %1652 = vmatmul.msk.bf16.gmra.mxu0 %vm332_vm1, %v2199_v51  ;;  %1692 = vmatmul.msk.bf16.gmra.mxu3 %vm332_vm1, %v2128_v37 }
  0x81   : > { %1684 = vmatmul.msk.bf16.gmra.mxu1 %vm332_vm1, %v2179_v47 }
  0x83   : > { %1723 = vmatmul.msk.bf16.gmra.mxu2 %vm332_vm1, %v2210_v52 }
  0x90   : > { %1653 = vmatmul.msk.bf16.gmra.mxu0 %vm332_vm1, %v2210_v52  ;;  %1693 = vmatmul.msk.bf16.gmra.mxu3 %vm332_vm1, %v2149_v42 }
  0x91   : > { %1685 = vmatmul.msk.bf16.gmra.mxu1 %vm332_vm1, %v2199_v51 }
  0x93   : > { %1724 = vmatmul.msk.bf16.gmra.mxu2 %vm332_vm1, %v2225_v57 }
  0x9d   : > { %v394_v62 = vpop.f32.mrf.mxu0 }
  0x9e   : > { %v515_v0 = vpop.f32.mrf.mxu1 }
  0x9f   : > { %v516_v1 = vadd.f32 %v515_v0, %v394_v62 }
  0xa0   : > { %1654 = vmatmul.msk.bf16.gmra.mxu0 %vm332_vm1, %v2225_v57  ;;  %1729 = vmatmul.msk.bf16.vlgmr.msra.gmra.mxu3 %vm332_vm1, %v2128_v37 }
  0xa1   : > { %1686 = vmatmul.msk.bf16.gmra.mxu1 %vm332_vm1, %v2210_v52 }
  0xa3   : > { %1725 = vmatmul.msk.bf16.gmra.mxu2 %vm332_vm1, %v2248_v63  ;;  %v2261_v3 = vpop.f32.mrf.mxu3 }
  0xa5   : > { %v396_v6 = vpop.f32.mrf.mxu0 }
  0xa6   : > { %v644_v4 = vpop.f32.mrf.mxu2  ;;  %v517_v7 = vpop.f32.mrf.mxu1 }
  0xa7   : > { %v2263_v5 = vadd.f32 %v644_v4, %v516_v1  ;;  %v518_v8 = vadd.f32 %v517_v7, %v396_v6 }
  0xab   : > { %v2265_v9 = vpop.f32.mrf.mxu3 }
  0xad   : > { %v399_v12 = vpop.f32.mrf.mxu0 }
  0xae   : > { %v646_v10 = vpop.f32.mrf.mxu2  ;;  %v520_v14 = vpop.f32.mrf.mxu1 }
  0xaf   : > { %v2267_v11 = vadd.f32 %v646_v10, %v518_v8  ;;  %v521_v15 = vadd.f32 %v520_v14, %v399_v12 }
  0xb0   : > { %1655 = vmatmul.msk.bf16.gmra.mxu0 %vm332_vm1, %v2248_v63  ;;  %1730 = vmatmul.msk.bf16.gmra.mxu3 %vm332_vm1, %v2149_v42 }
  0xb1   : > { %1687 = vmatmul.msk.bf16.gmra.mxu1 %vm332_vm1, %v2225_v57 }
  0xb3   : > { %1726 = vmatmul.msk.bf16.gmra.mxu2 %vm332_vm1, %v2270_v13  ;;  %v2283_v17 = vpop.f32.mrf.mxu3 }
  0xb5   : > { %v401_v20 = vpop.f32.mrf.mxu0 }
  0xb6   : > { %v649_v18 = vpop.f32.mrf.mxu2  ;;  %v522_v21 = vpop.f32.mrf.mxu1 }
  0xb7   : > { %v2285_v19 = vadd.f32 %v649_v18, %v521_v15  ;;  %v523_v22 = vadd.f32 %v522_v21, %v401_v20 }
  0xbb   : > { %v2287_v23 = vpop.f32.mrf.mxu3 }
  0xbd   : > { %v404_v26 = vpop.f32.mrf.mxu0 }
  0xbe   : > { %v651_v24 = vpop.f32.mrf.mxu2  ;;  %v525_v27 = vpop.f32.mrf.mxu1 }
  0xbf   : > { %v2289_v25 = vadd.f32 %v651_v24, %v523_v22  ;;  %v526_v28 = vadd.f32 %v525_v27, %v404_v26 }
  0xc0   : > { %1656 = vmatmul.msk.bf16.gmra.mxu0 %vm332_vm1, %v2270_v13  ;;  %1731 = vmatmul.msk.bf16.gmra.mxu3 %vm332_vm1, %v2162_v44 }
  0xc1   : > { %1688 = vmatmul.msk.bf16.gmra.mxu1 %vm332_vm1, %v2248_v63 }
  0xc3   : > { %1727 = vmatmul.msk.bf16.gmra.mxu2 %vm332_vm1, %v2176_v46  ;;  %v2299_v29 = vpop.f32.mrf.mxu3 }
  0xc5   : > { %v406_v33 = vpop.f32.mrf.mxu0 }
  0xc6   : > { %v654_v30 = vpop.f32.mrf.mxu2  ;;  %v527_v34 = vpop.f32.mrf.mxu1 }
  0xc7   : > { %v2301_v32 = vadd.f32 %v654_v30, %v526_v28  ;;  %v528_v35 = vadd.f32 %v527_v34, %v406_v33 }
  0xcb   : > { %v2303_v36 = vpop.f32.mrf.mxu3 }
  0xcd   : > { %v409_v48 = vpop.f32.mrf.mxu0 }
  0xce   : > { %v656_v39 = vpop.f32.mrf.mxu2  ;;  %v530_v49 = vpop.f32.mrf.mxu1 }
  0xcf   : > { %v2308_v41 = vadd.f32 %v656_v39, %v528_v35  ;;  %v531_v50 = vadd.f32 %v530_v49, %v409_v48 }
  0xd0   : > { %1657 = vmatmul.msk.bf16.gmra.mxu0 %vm332_vm1, %v2176_v46  ;;  %1732 = vmatmul.msk.bf16.gmra.mxu3 %vm332_vm1, %v2306_v40 }
  0xd1   : > { %1689 = vmatmul.msk.bf16.gmra.mxu1 %vm332_vm1, %v2270_v13 }
  0xd3   : > { %1728 = vmatmul.msk.bf16.gmra.mxu2 %vm332_vm1, %v2115_v31  ;;  %v2318_v53 = vpop.f32.mrf.mxu3 }
  0xd5   : > { %v411_v56 = vpop.f32.mrf.mxu0 }
  0xd6   : > { %v659_v54 = vpop.f32.mrf.mxu2  ;;  %v532_v58 = vpop.f32.mrf.mxu1 }
  0xd7   : > { %v2320_v55 = vadd.f32 %v659_v54, %v531_v50  ;;  %v533_v59 = vadd.f32 %v532_v58, %v411_v56 }
  0xdb   : > { %v2322_v60 = vpop.f32.mrf.mxu3 }
  0xdd   : > { %v414_v0 = vpop.f32.mrf.mxu0 }
  0xde   : > { %v661_v61 = vpop.f32.mrf.mxu2  ;;  %v535_v1 = vpop.f32.mrf.mxu1 }
  0xdf   : > { %v2324_v62 = vadd.f32 %v661_v61, %v533_v59  ;;  %v536_v2 = vadd.f32 %v535_v1, %v414_v0 }
  0xe0   : > { %1756 = vmatmul.msk.bf16.vlgmr.msrb.gmra.mxu3 %vm332_vm1, %v2131_v38  ;;  %1795 = vmatmul.msk.bf16.vlgmr.msrb.gmra.mxu0 %vm332_vm1, %v2152_v43 }
  0xe1   : > { %1834 = vmatmul.msk.bf16.vlgmr.msrb.gmra.mxu1 %vm332_vm1, %v2165_v45 }
  0xe3   : > { %1873 = vmatmul.msk.bf16.vlgmr.msrb.gmra.mxu2 %vm332_vm1, %v2179_v47  ;;  %v575_v4 = vpop.f32.mrf.mxu3 }
  0xe4   : > { %v2335_v6 = vadd.f32 %v575_v4, %v2261_v3 }
  0xe5   : > { %v416_v10 = vpop.f32.mrf.mxu0 }
  0xe6   : > { %v664_v7 = vpop.f32.mrf.mxu2  ;;  %v537_v12 = vpop.f32.mrf.mxu1 }
  0xe7   : > { %v2337_v8 = vadd.f32 %v664_v7, %v536_v2  ;;  %v538_v14 = vadd.f32 %v537_v12, %v416_v10 }
  0xeb   : > { %v577_v38 = vpop.f32.mrf.mxu3 }
  0xec   : > { %v2340_v15 = vadd.f32 %v577_v38, %v2265_v9 }
  0xed   : > { %v419_v20 = vpop.f32.mrf.mxu0 }
  0xee   : > { %v666_v16 = vpop.f32.mrf.mxu2  ;;  %v540_v21 = vpop.f32.mrf.mxu1 }
  0xef   : > { %v2342_v18 = vadd.f32 %v666_v16, %v538_v14  ;;  %v541_v22 = vadd.f32 %v540_v21, %v419_v20 }
  0xf0   : > { %1757 = vmatmul.msk.bf16.gmra.mxu3 %vm332_vm1, %v2152_v43  ;;  %1796 = vmatmul.msk.bf16.gmra.mxu0 %vm332_vm1, %v2165_v45 }
  0xf1   : > { %1835 = vmatmul.msk.bf16.gmra.mxu1 %vm332_vm1, %v2179_v47 }
  0xf3   : > { %1874 = vmatmul.msk.bf16.gmra.mxu2 %vm332_vm1, %v2199_v51  ;;  %v580_v3 = vpop.f32.mrf.mxu3 }
  0xf4   : > { %v2353_v9 = vadd.f32 %v580_v3, %v2283_v17 }
  0xf5   : > { %v421_v27 = vpop.f32.mrf.mxu0 }
  0xf6   : > { %v669_v24 = vpop.f32.mrf.mxu2  ;;  %v542_v28 = vpop.f32.mrf.mxu1 }
  0xf7   : > { %v2355_v26 = vadd.f32 %v669_v24, %v541_v22  ;;  %v543_v30 = vadd.f32 %v542_v28, %v421_v27 }
  0xfb   : > { %v582_v43 = vpop.f32.mrf.mxu3 }
  0xfc   : > { %v2358_v33 = vadd.f32 %v582_v43, %v2287_v23 }
  0xfd   : > { %v424_v39 = vpop.f32.mrf.mxu0 }
  0xfe   : > { %v671_v34 = vpop.f32.mrf.mxu2  ;;  %v545_v48 = vpop.f32.mrf.mxu1 }
  0xff   : > { %v2360_v35 = vadd.f32 %v671_v34, %v543_v30  ;;  %v546_v49 = vadd.f32 %v545_v48, %v424_v39 }
 0x100   : > { %1758 = vmatmul.msk.bf16.gmra.mxu3 %vm332_vm1, %v2165_v45  ;;  %1797 = vmatmul.msk.bf16.gmra.mxu0 %vm332_vm1, %v2179_v47 }
 0x101   : > { %1836 = vmatmul.msk.bf16.gmra.mxu1 %vm332_vm1, %v2199_v51 }
 0x103   : > { %1875 = vmatmul.msk.bf16.gmra.mxu2 %vm332_vm1, %v2210_v52  ;;  %v585_v17 = vpop.f32.mrf.mxu3 }
 0x104   : > { %v2371_v23 = vadd.f32 %v585_v17, %v2299_v29 }
 0x105   : > { %v426_v56 = vpop.f32.mrf.mxu0 }
 0x106   : > { %v674_v50 = vpop.f32.mrf.mxu2  ;;  %v547_v58 = vpop.f32.mrf.mxu1 }
 0x107   : > { %v2373_v54 = vadd.f32 %v674_v50, %v546_v49  ;;  %v548_v59 = vadd.f32 %v547_v58, %v426_v56 }
 0x10b   : > { %v587_v45 = vpop.f32.mrf.mxu3 }
 0x10c   : > { %v2376_v61 = vadd.f32 %v587_v45, %v2303_v36 }
 0x10d   : > { %v429_v2 = vpop.f32.mrf.mxu0 }
 0x10e   : > { %v676_v0 = vpop.f32.mrf.mxu2  ;;  %v550_v4 = vpop.f32.mrf.mxu1 }
 0x10f   : > { %v2378_v1 = vadd.f32 %v676_v0, %v548_v59  ;;  %v551_v7 = vadd.f32 %v550_v4, %v429_v2 }
 0x110   : > { %1759 = vmatmul.msk.bf16.gmra.mxu3 %vm332_vm1, %v2179_v47  ;;  %1798 = vmatmul.msk.bf16.gmra.mxu0 %vm332_vm1, %v2199_v51 }
 0x111   : > { %1837 = vmatmul.msk.bf16.gmra.mxu1 %vm332_vm1, %v2210_v52 }
 0x113   : > { %1876 = vmatmul.msk.bf16.gmra.mxu2 %vm332_vm1, %v2225_v57  ;;  %v590_v29 = vpop.f32.mrf.mxu3 }
 0x114   : > { %v2389_v36 = vadd.f32 %v590_v29, %v2318_v53 }
 0x115   : > { %v431_v14 = vpop.f32.mrf.mxu0 }
 0x116   : > { %v679_v10 = vpop.f32.mrf.mxu2  ;;  %v552_v38 = vpop.f32.mrf.mxu1 }
 0x117   : > { %v2391_v12 = vadd.f32 %v679_v10, %v551_v7  ;;  %v553_v16 = vadd.f32 %v552_v38, %v431_v14 }
 0x11b   : > { %v592_v47 = vpop.f32.mrf.mxu3 }
 0x11c   : > { %v2394_v20 = vadd.f32 %v592_v47, %v2322_v60 }
 0x11d   : > { %v434_v3 = vpop.f32.mrf.mxu0 }
 0x11e   : > { %v681_v21 = vpop.f32.mrf.mxu2  ;;  %v555_v24 = vpop.f32.mrf.mxu1 }
 0x11f   : > { %v2396_v22 = vadd.f32 %v681_v21, %v553_v16  ;;  %v556_v27 = vadd.f32 %v555_v24, %v434_v3 }
 0x120   : > { %1760 = vmatmul.msk.bf16.gmra.mxu3 %vm332_vm1, %v2199_v51  ;;  %1799 = vmatmul.msk.bf16.gmra.mxu0 %vm332_vm1, %v2210_v52 }
 0x121   : > { %1838 = vmatmul.msk.bf16.gmra.mxu1 %vm332_vm1, %v2225_v57 }
 0x123   : > { %1877 = vmatmul.msk.bf16.gmra.mxu2 %vm332_vm1, %v2248_v63  ;;  %v704_v53 = vpop.f32.mrf.mxu3 }
 0x124   : > { %v2407_v28 = vadd.f32 %v704_v53, %v2335_v6 }
 0x125   : > { %v436_v43 = vpop.f32.mrf.mxu0 }
 0x126   : > { %v684_v60 = vpop.f32.mrf.mxu2  ;;  %v557_v34 = vpop.f32.mrf.mxu1 }
 0x127   : > { %v2409_v30 = vadd.f32 %v684_v60, %v556_v27  ;;  %v558_v39 = vadd.f32 %v557_v34, %v436_v43 }
 0x12b   : > { %v706_v51 = vpop.f32.mrf.mxu3 }
 0x12c   : > { %v2412_v49 = vadd.f32 %v706_v51, %v2340_v15 }
 0x12d   : > { %v439_v50 = vpop.f32.mrf.mxu0 }
 0x12e   : > { %v686_v48 = vpop.f32.mrf.mxu2  ;;  %v560_v56 = vpop.f32.mrf.mxu1 }
 0x12f   : > { %v2414_v17 = vadd.f32 %v686_v48, %v558_v39  ;;  %v561_v58 = vadd.f32 %v560_v56, %v439_v50 }
 0x130   : > { %1761 = vmatmul.msk.bf16.gmra.mxu3 %vm332_vm1, %v2210_v52  ;;  %1800 = vmatmul.msk.bf16.gmra.mxu0 %vm332_vm1, %v2225_v57 }
 0x131   : > { %1839 = vmatmul.msk.bf16.gmra.mxu1 %vm332_vm1, %v2248_v63 }
 0x133   : > { %1878 = vmatmul.msk.bf16.gmra.mxu2 %vm332_vm1, %v2270_v13  ;;  %v709_v6 = vpop.f32.mrf.mxu3 }
 0x134   : > { %v2425_v59 = vadd.f32 %v709_v6, %v2353_v9 }
 0x135   : > { %v441_v0 = vpop.f32.mrf.mxu0 }
 0x136   : > { %v689_v15 = vpop.f32.mrf.mxu2  ;;  %v562_v2 = vpop.f32.mrf.mxu1 }
 0x137   : > { %v2427_v45 = vadd.f32 %v689_v15, %v561_v58  ;;  %v563_v4 = vadd.f32 %v562_v2, %v441_v0 }
 0x13b   : > { %v711_v52 = vpop.f32.mrf.mxu3 }
 0x13c   : > { %v2430_v29 = vadd.f32 %v711_v52, %v2358_v33 }
 0x13d   : > { %v444_v14 = vpop.f32.mrf.mxu0 }
 0x13e   : > { %v691_v7 = vpop.f32.mrf.mxu2  ;;  %v565_v38 = vpop.f32.mrf.mxu1 }
 0x13f   : > { %v2432_v10 = vadd.f32 %v691_v7, %v563_v4  ;;  %v566_v16 = vadd.f32 %v565_v38, %v444_v14 }
 0x140   : > { %1762 = vmatmul.msk.bf16.gmra.mxu3 %vm332_vm1, %v2225_v57  ;;  %1801 = vmatmul.msk.bf16.gmra.mxu0 %vm332_vm1, %v2248_v63 }
 0x141   : > { %1840 = vmatmul.msk.bf16.gmra.mxu1 %vm332_vm1, %v2270_v13 }
 0x143   : > { %1879 = vmatmul.msk.bf16.gmra.mxu2 %vm332_vm1, %v2176_v46  ;;  %v714_v9 = vpop.f32.mrf.mxu3 }
 0x144   : > { %v2443_v47 = vadd.f32 %v714_v9, %v2371_v23 }
 0x145   : > { %v446_v3 = vpop.f32.mrf.mxu0 }
 0x146   : > { %v694_v33 = vpop.f32.mrf.mxu2  ;;  %v567_v24 = vpop.f32.mrf.mxu1 }
 0x147   : > { %v2445_v21 = vadd.f32 %v694_v33, %v566_v16  ;;  %v568_v27 = vadd.f32 %v567_v24, %v446_v3 }
 0x14b   : > { %v716_v57 = vpop.f32.mrf.mxu3 }
 0x14c   : > { %v2448_v60 = vadd.f32 %v716_v57, %v2376_v61 }
 0x14d   : > { %v449_v34 = vpop.f32.mrf.mxu0 }
 0x14e   : > { %v696_v53 = vpop.f32.mrf.mxu2  ;;  %v570_v39 = vpop.f32.mrf.mxu1 }
 0x14f   : > { %v2450_v43 = vadd.f32 %v696_v53, %v568_v27  ;;  %v571_v51 = vadd.f32 %v570_v39, %v449_v34 }
 0x150   : > { %1763 = vmatmul.msk.bf16.gmra.mxu3 %vm332_vm1, %v2248_v63  ;;  %1802 = vmatmul.msk.bf16.gmra.mxu0 %vm332_vm1, %v2270_v13 }
 0x151   : > { %1841 = vmatmul.msk.bf16.gmra.mxu1 %vm332_vm1, %v2176_v46 }
 0x153   : > { %1880 = vmatmul.msk.bf16.gmra.mxu2 %vm332_vm1, %v2115_v31  ;;  %v719_v23 = vpop.f32.mrf.mxu3 }
 0x154   : > { %v2461_v48 = vadd.f32 %v719_v23, %v2389_v36 }
 0x155   : > { %v451_v56 = vpop.f32.mrf.mxu0 }
 0x156   : > { %v699_v61 = vpop.f32.mrf.mxu2  ;;  %v572_v58 = vpop.f32.mrf.mxu1 }
 0x157   : > { %v2463_v50 = vadd.f32 %v699_v61, %v571_v51  ;;  %v573_v6 = vadd.f32 %v572_v58, %v451_v56 }
 0x15b   : > { %v721_v63 = vpop.f32.mrf.mxu3 }
 0x15c   : > { %v2466_v0 = vadd.f32 %v721_v63, %v2394_v20 }
 0x15d   : > { %v966_v4 = vpop.f32.mrf.mxu0 }
 0x15e   : > { %v701_v15 = vpop.f32.mrf.mxu2  ;;  %v1127_v52 = vpop.f32.mrf.mxu1 }
 0x15f   : > { %v2468_v2 = vadd.f32 %v701_v15, %v573_v6 }
 0x160   : > { %1764 = vmatmul.msk.bf16.gmra.mxu3 %vm332_vm1, %v2270_v13  ;;  %1803 = vmatmul.msk.bf16.gmra.mxu0 %vm332_vm1, %v2176_v46  ;;  %v2482_v13 = vld [vmem:[%s2651_s2] ss:$0 sm:$0xff] }
 0x161   : > { %1842 = vmatmul.msk.bf16.gmra.mxu1 %vm332_vm1, %v2115_v31 }
 0x163   : > { %1881 = vmatmul.msk.bf16.gmra.mxu2 %vm332_vm1, %v2128_v37  ;;  %v805_v36 = vpop.f32.mrf.mxu3 }
 0x164   : > { %v885_v20 = vadd.f32 %v805_v36, %v2263_v5 }
 0x165   : > { %v968_v14 = vpop.f32.mrf.mxu0 }
 0x166   : > { %v1288_v7 = vpop.f32.mrf.mxu2  ;;  %v1046_v38 = vadd.f32 %v966_v4, %v885_v20  ;;  %v1129_v16 = vpop.f32.mrf.mxu1 }
 0x168   : > { %v1207_v9 = vadd.f32 %v1127_v52, %v1046_v38 }
 0x16a   : > { %v1368_v33 = vadd.f32 %v1288_v7, %v1207_v9 }
 0x16b   : > { %v807_v3 = vpop.f32.mrf.mxu3 }
 0x16c   : > { %v1404_v24 = vadd.f32 %v2482_v13, %v1368_v33  ;;  %v886_v27 = vadd.f32 %v807_v3, %v2267_v11 }
 0x16d   : > { %v971_v53 = vpop.f32.mrf.mxu0 }
 0x16e   : > { %v1290_v57 = vpop.f32.mrf.mxu2  ;;  %1957 = vtanh.f32 %v1404_v24  ;;  %v1047_v5 = vadd.f32 %v968_v14, %v886_v27  ;;  %v1132_v34 = vpop.f32.mrf.mxu1 }
 0x170   : > { %v1208_v39 = vadd.f32 %v1129_v16, %v1047_v5  ;;  %1765 = vmatmul.msk.bf16.gmra.mxu3 %vm332_vm1, %v2176_v46  ;;  %1804 = vmatmul.msk.bf16.gmra.mxu0 %vm332_vm1, %v2115_v31 }
 0x171   : > { %1843 = vmatmul.msk.bf16.gmra.mxu1 %vm332_vm1, %v2128_v37 }
 0x172   : > { %v1369_v11 = vadd.f32 %v1290_v57, %v1208_v39 }
 0x173   : > { %1882 = vmatmul.msk.bf16.gmra.mxu2 %vm332_vm1, %v2149_v42  ;;  %v810_v51 = vpop.f32.mrf.mxu3 }
 0x174   : > { %v1958_v23 = vpop.eup %1957  ;;  %v1405_v46 = vadd.f32 %v2482_v13, %v1369_v11  ;;  %v887_v61 = vadd.f32 %v810_v51, %v2285_v19 }
 0x175   : > { %1468 = vst [vmem:[%s2498_s30] sm:$0xff] %v1958_v23  ;;  %v973_v58 = vpop.f32.mrf.mxu0 }
 0x176   : > { %v1293_v56 = vpop.f32.mrf.mxu2  ;;  %1959 = vtanh.f32 %v1405_v46  ;;  %v1048_v6 = vadd.f32 %v971_v53, %v887_v61  ;;  %v1134_v63 = vpop.f32.mrf.mxu1 }
 0x178   : > { %v1209_v15 = vadd.f32 %v1132_v34, %v1048_v6 }
 0x17a   : > { %v1370_v4 = vadd.f32 %v1293_v56, %v1209_v15 }
 0x17b   : > { %v812_v52 = vpop.f32.mrf.mxu3 }
 0x17c   : > { %v1960_v36 = vpop.eup %1959  ;;  %v1406_v20 = vadd.f32 %v2482_v13, %v1370_v4  ;;  %v888_v7 = vadd.f32 %v812_v52, %v2289_v25 }
 0x17d   : > { %1469 = vst [vmem:[%s2498_s30 + $0x8] sm:$0xff] %v1960_v36  ;;  %v976_v38 = vpop.f32.mrf.mxu0 }
 0x17e   : > { %v1295_v14 = vpop.f32.mrf.mxu2  ;;  %1961 = vtanh.f32 %v1406_v20  ;;  %v1049_v19 = vadd.f32 %v973_v58, %v888_v7  ;;  %v1137_v16 = vpop.f32.mrf.mxu1 }
 0x180   : > { %v1210_v9 = vadd.f32 %v1134_v63, %v1049_v19  ;;  %1766 = vmatmul.msk.bf16.gmra.mxu3 %vm332_vm1, %v2115_v31  ;;  %1805 = vmatmul.msk.bf16.gmra.mxu0 %vm332_vm1, %v2128_v37 }
 0x181   : > { %1844 = vmatmul.msk.bf16.gmra.mxu1 %vm332_vm1, %v2149_v42 }
 0x182   : > { %v1371_v25 = vadd.f32 %v1295_v14, %v1210_v9 }
 0x183   : > { %1883 = vmatmul.msk.bf16.gmra.mxu2 %vm332_vm1, %v2162_v44  ;;  %v815_v33 = vpop.f32.mrf.mxu3 }
 0x184   : > { %v1962_v3 = vpop.eup %1961  ;;  %v1407_v24 = vadd.f32 %v2482_v13, %v1371_v25  ;;  %v889_v27 = vadd.f32 %v815_v33, %v2301_v32 }
 0x185   : > { %1470 = vst [vmem:[%s2498_s30 + $0x10] sm:$0xff] %v1962_v3  ;;  %v978_v31 = vpop.f32.mrf.mxu0 }
 0x186   : > { %v1298_v57 = vpop.f32.mrf.mxu2  ;;  %1963 = vtanh.f32 %v1407_v24  ;;  %v1050_v53 = vadd.f32 %v976_v38, %v889_v27  ;;  %v1139_v5 = vpop.f32.mrf.mxu1 }
 0x188   : > { %v1211_v34 = vadd.f32 %v1137_v16, %v1050_v53 }
 0x18a   : > { %v1372_v39 = vadd.f32 %v1298_v57, %v1211_v34 }
 0x18b   : > { %v817_v11 = vpop.f32.mrf.mxu3 }
 0x18c   : > { %v1964_v51 = vpop.eup %1963  ;;  %v1408_v23 = vadd.f32 %v2482_v13, %v1372_v39  ;;  %v890_v46 = vadd.f32 %v817_v11, %v2308_v41 }
 0x18d   : > { %1471 = vst [vmem:[%s2498_s30 + $0x18] sm:$0xff] %v1964_v51  ;;  %v981_v56 = vpop.f32.mrf.mxu0 }
 0x18e   : > { %v1300_v61 = vpop.f32.mrf.mxu2  ;;  %1965 = vtanh.f32 %v1408_v23  ;;  %v1051_v32 = vadd.f32 %v978_v31, %v890_v46  ;;  %v1142_v58 = vpop.f32.mrf.mxu1 }
 0x190   : > { %v1212_v6 = vadd.f32 %v1139_v5, %v1051_v32  ;;  %1767 = vmatmul.msk.bf16.gmra.mxu3 %vm332_vm1, %v2128_v37  ;;  %1806 = vmatmul.msk.bf16.gmra.mxu0 %vm332_vm1, %v2149_v42 }
 0x191   : > { %1845 = vmatmul.msk.bf16.gmra.mxu1 %vm332_vm1, %v2162_v44 }
 0x192   : > { %v1373_v41 = vadd.f32 %v1300_v61, %v1212_v6 }
 0x193   : > { %1884 = vmatmul.msk.bf16.gmra.mxu2 %vm332_vm1, %v2306_v40  ;;  %v820_v63 = vpop.f32.mrf.mxu3 }
 0x194   : > { %v1966_v15 = vpop.eup %1965  ;;  %v1409_v4 = vadd.f32 %v2482_v13, %v1373_v41  ;;  %v891_v52 = vadd.f32 %v820_v63, %v2320_v55  ;;  %v2535_v55 = vld [vmem:[%s2105_s18 + $0x90] sm:$0xff] }
 0x195   : > { %1472 = vst [vmem:[%s2498_s30 + $0x20] sm:$0xff] %v1966_v15  ;;  %v983_v37 = vpop.f32.mrf.mxu0 }
 0x196   : > { %v1303_v36 = vpop.f32.mrf.mxu2  ;;  %1967 = vtanh.f32 %v1409_v4  ;;  %v1052_v20 = vadd.f32 %v981_v56, %v891_v52  ;;  %v1144_v7 = vpop.f32.mrf.mxu1 }
 0x198   : > { %v1213_v14 = vadd.f32 %v1142_v58, %v1052_v20 }
 0x19a   : > { %v1374_v38 = vadd.f32 %v1303_v36, %v1213_v14 }
 0x19b   : > { %v822_v19 = vpop.f32.mrf.mxu3 }
 0x19c   : > { %v1968_v16 = vpop.eup %1967  ;;  %v1410_v9 = vadd.f32 %v2482_v13, %v1374_v38  ;;  %v892_v25 = vadd.f32 %v822_v19, %v2324_v62 }
 0x19d   : > { %1473 = vst [vmem:[%s2498_s30 + $0x28] sm:$0xff] %v1968_v16  ;;  %v986_v3 = vpop.f32.mrf.mxu0 }
 0x19e   : > { %v1305_v33 = vpop.f32.mrf.mxu2  ;;  %1969 = vtanh.f32 %v1410_v9  ;;  %v1053_v24 = vadd.f32 %v983_v37, %v892_v25  ;;  %v1147_v27 = vpop.f32.mrf.mxu1 }
 0x1a0   : > { %v1214_v57 = vadd.f32 %v1144_v7, %v1053_v24  ;;  %1768 = vmatmul.msk.bf16.gmra.mxu3 %vm332_vm1, %v2149_v42  ;;  %1807 = vmatmul.msk.bf16.gmra.mxu0 %vm332_vm1, %v2162_v44 }
 0x1a1   : > { %1846 = vmatmul.msk.bf16.gmra.mxu1 %vm332_vm1, %v2306_v40 }
 0x1a2   : > { %v1375_v62 = vadd.f32 %v1305_v33, %v1214_v57 }
 0x1a3   : > { %1885 = vmatmul.msk.bf16.gmra.mxu2 %vm332_vm1, %v2535_v55  ;;  %v825_v31 = vpop.f32.mrf.mxu3 }
 0x1a4   : > { %v1970_v53 = vpop.eup %1969  ;;  %v1411_v5 = vadd.f32 %v2482_v13, %v1375_v62  ;;  %v893_v34 = vadd.f32 %v825_v31, %v2337_v8  ;;  %v2552_v8 = vld [vmem:[%s2105_s18 + $0x98] sm:$0xff] }
 0x1a5   : > { %1474 = vst [vmem:[%s2498_s30 + $0x30] sm:$0xff] %v1970_v53  ;;  %v988_v42 = vpop.f32.mrf.mxu0 }
 0x1a6   : > { %v1308_v39 = vpop.f32.mrf.mxu2  ;;  %1971 = vtanh.f32 %v1411_v5  ;;  %v1054_v11 = vadd.f32 %v986_v3, %v893_v34  ;;  %v1149_v51 = vpop.f32.mrf.mxu1 }
 0x1a8   : > { %v1215_v23 = vadd.f32 %v1147_v27, %v1054_v11 }
 0x1aa   : > { %v1376_v46 = vadd.f32 %v1308_v39, %v1215_v23 }
 0x1ab   : > { %v827_v61 = vpop.f32.mrf.mxu3 }
 0x1ac   : > { %v1972_v56 = vpop.eup %1971  ;;  %v1412_v32 = vadd.f32 %v2482_v13, %v1376_v46  ;;  %v894_v58 = vadd.f32 %v827_v61, %v2342_v18 }
 0x1ad   : > { %1475 = vst [vmem:[%s2498_s30 + $0x38] sm:$0xff] %v1972_v56  ;;  %v991_v41 = vpop.f32.mrf.mxu0 }
 0x1ae   : > { %v1310_v6 = vpop.f32.mrf.mxu2  ;;  %1973 = vtanh.f32 %v1412_v32  ;;  %v1055_v63 = vadd.f32 %v988_v42, %v894_v58  ;;  %v1152_v15 = vpop.f32.mrf.mxu1 }
 0x1b0   : > { %v1216_v4 = vadd.f32 %v1149_v51, %v1055_v63  ;;  %1769 = vmatmul.msk.bf16.gmra.mxu3 %vm332_vm1, %v2162_v44  ;;  %1808 = vmatmul.msk.bf16.gmra.mxu0 %vm332_vm1, %v2306_v40 }
 0x1b1   : > { %1847 = vmatmul.msk.bf16.gmra.mxu1 %vm332_vm1, %v2535_v55 }
 0x1b2   : > { %v1377_v18 = vadd.f32 %v1310_v6, %v1216_v4 }
 0x1b3   : > { %1886 = vmatmul.msk.bf16.gmra.mxu2 %vm332_vm1, %v2552_v8  ;;  %v830_v52 = vpop.f32.mrf.mxu3 }
 0x1b4   : > { %v1974_v36 = vpop.eup %1973  ;;  %v1413_v37 = vadd.f32 %v2482_v13, %v1377_v18  ;;  %v895_v20 = vadd.f32 %v830_v52, %v2355_v26  ;;  %v1912_v26 = vld [vmem:[%s2105_s18 + $0xa0] sm:$0xff] }
 0x1b5   : > { %1476 = vst [vmem:[%s2498_s30 + $0x40] sm:$0xff] %v1974_v36  ;;  %v993_v44 = vpop.f32.mrf.mxu0 }
 0x1b6   : > { %v1313_v7 = vpop.f32.mrf.mxu2  ;;  %1975 = vtanh.f32 %v1413_v37  ;;  %v1056_v14 = vadd.f32 %v991_v41, %v895_v20  ;;  %v1154_v38 = vpop.f32.mrf.mxu1 }
 0x1b8   : > { %v1217_v19 = vadd.f32 %v1152_v15, %v1056_v14 }
 0x1ba   : > { %v1378_v16 = vadd.f32 %v1313_v7, %v1217_v19 }
 0x1bb   : > { %v832_v9 = vpop.f32.mrf.mxu3 }
 0x1bc   : > { %v1976_v25 = vpop.eup %1975  ;;  %v1414_v33 = vadd.f32 %v2482_v13, %v1378_v16  ;;  %v896_v3 = vadd.f32 %v832_v9, %v2360_v35 }
 0x1bd   : > { %1477 = vst [vmem:[%s2498_s30 + $0x48] sm:$0xff] %v1976_v25  ;;  %v996_v27 = vpop.f32.mrf.mxu0 }
 0x1be   : > { %v1315_v24 = vpop.f32.mrf.mxu2  ;;  %1977 = vtanh.f32 %v1414_v33  ;;  %v1057_v57 = vadd.f32 %v993_v44, %v896_v3  ;;  %v1157_v62 = vpop.f32.mrf.mxu1 }
 0x1c0   : > { %v1218_v31 = vadd.f32 %v1154_v38, %v1057_v57  ;;  %1770 = vmatmul.msk.bf16.gmra.mxu3 %vm332_vm1, %v2306_v40  ;;  %1809 = vmatmul.msk.bf16.gmra.mxu0 %vm332_vm1, %v2535_v55 }
 0x1c1   : > { %1848 = vmatmul.msk.bf16.gmra.mxu1 %vm332_vm1, %v2552_v8 }
 0x1c2   : > { %v1379_v35 = vadd.f32 %v1315_v24, %v1218_v31 }
 0x1c3   : > { %1887 = vmatmul.msk.bf16.gmra.mxu2 %vm332_vm1, %v1912_v26  ;;  %v835_v53 = vpop.f32.mrf.mxu3 }
 0x1c4   : > { %v1978_v5 = vpop.eup %1977  ;;  %v1415_v34 = vadd.f32 %v2482_v13, %v1379_v35  ;;  %v897_v39 = vadd.f32 %v835_v53, %v2373_v54  ;;  %v1913_v54 = vld [vmem:[%s2105_s18 + $0xa8] sm:$0xff] }
 0x1c5   : > { %1478 = vst [vmem:[%s2498_s30 + $0x50] sm:$0xff] %v1978_v5  ;;  %v998_v40 = vpop.f32.mrf.mxu0 }
 0x1c6   : > { %v1318_v42 = vpop.f32.mrf.mxu2  ;;  %1979 = vtanh.f32 %v1415_v34  ;;  %v1058_v11 = vadd.f32 %v996_v27, %v897_v39  ;;  %v1159_v51 = vpop.f32.mrf.mxu1 }
 0x1c8   : > { %v1219_v23 = vadd.f32 %v1157_v62, %v1058_v11 }
 0x1ca   : > { %v1380_v46 = vadd.f32 %v1318_v42, %v1219_v23 }
 0x1cb   : > { %v837_v61 = vpop.f32.mrf.mxu3 }
 0x1cc   : > { %v1980_v56 = vpop.eup %1979  ;;  %v1416_v32 = vadd.f32 %v2482_v13, %v1380_v46  ;;  %v898_v58 = vadd.f32 %v837_v61, %v2378_v1 }
 0x1cd   : > { %1479 = vst [vmem:[%s2498_s30 + $0x58] sm:$0xff] %v1980_v56  ;;  %v1001_v41 = vpop.f32.mrf.mxu0 }
 0x1ce   : > { %v1320_v6 = vpop.f32.mrf.mxu2  ;;  %1981 = vtanh.f32 %v1416_v32  ;;  %v1059_v63 = vadd.f32 %v998_v40, %v898_v58  ;;  %v1162_v15 = vpop.f32.mrf.mxu1 }
 0x1d0   : > { %v1220_v4 = vadd.f32 %v1159_v51, %v1059_v63  ;;  %1771 = vmatmul.msk.bf16.gmra.mxu3 %vm332_vm1, %v2535_v55  ;;  %1810 = vmatmul.msk.bf16.gmra.mxu0 %vm332_vm1, %v2552_v8 }
 0x1d1   : > { %1849 = vmatmul.msk.bf16.gmra.mxu1 %vm332_vm1, %v1912_v26 }
 0x1d2   : > { %v1381_v1 = vadd.f32 %v1320_v6, %v1220_v4 }
 0x1d3   : > { %1888 = vmatmul.msk.bf16.gmra.mxu2 %vm332_vm1, %v1913_v54  ;;  %v840_v18 = vpop.f32.mrf.mxu3 }
 0x1d4   : > { %v1982_v52 = vpop.eup %1981  ;;  %v1417_v36 = vadd.f32 %v2482_v13, %v1381_v1  ;;  %v899_v37 = vadd.f32 %v840_v18, %v2391_v12 }
 0x1d5   : > { %1480 = vst [vmem:[%s2498_s30 + $0x60] sm:$0xff] %v1982_v52  ;;  %v1003_v7 = vpop.f32.mrf.mxu0 }
 0x1d6   : > { %v1323_v20 = vpop.f32.mrf.mxu2  ;;  %1983 = vtanh.f32 %v1417_v36  ;;  %v1060_v55 = vadd.f32 %v1001_v41, %v899_v37  ;;  %v1164_v44 = vpop.f32.mrf.mxu1 }
 0x1d8   : > { %v1221_v14 = vadd.f32 %v1162_v15, %v1060_v55 }
 0x1da   : > { %v1382_v8 = vadd.f32 %v1323_v20, %v1221_v14 }
 0x1db   : > { %v842_v38 = vpop.f32.mrf.mxu3 }
 0x1dc   : > { %v1984_v19 = vpop.eup %1983  ;;  %v1418_v16 = vadd.f32 %v2482_v13, %v1382_v8  ;;  %v900_v9 = vadd.f32 %v842_v38, %v2396_v22 }
 0x1dd   : > { %1481 = vst [vmem:[%s2498_s30 + $0x68] sm:$0xff] %v1984_v19  ;;  %v1006_v33 = vpop.f32.mrf.mxu0 }
 0x1de   : > { %v1325_v25 = vpop.f32.mrf.mxu2  ;;  %1985 = vtanh.f32 %v1418_v16  ;;  %v1061_v12 = vadd.f32 %v1003_v7, %v900_v9  ;;  %v1167_v3 = vpop.f32.mrf.mxu1 }
 0x1e0   : > { %v1222_v24 = vadd.f32 %v1164_v44, %v1061_v12 }
 0x1e2   : > { %v1383_v27 = vadd.f32 %v1325_v25, %v1222_v24 }
 0x1e3   : > { %v845_v26 = vpop.f32.mrf.mxu3 }
 0x1e4   : > { %v1986_v57 = vpop.eup %1985  ;;  %v1419_v62 = vadd.f32 %v2482_v13, %v1383_v27  ;;  %v901_v31 = vadd.f32 %v845_v26, %v2409_v30 }
 0x1e5   : > { %1482 = vst [vmem:[%s2498_s30 + $0x70] sm:$0xff] %v1986_v57  ;;  %v1008_v53 = vpop.f32.mrf.mxu0 }
 0x1e6   : > { %v1328_v35 = vpop.f32.mrf.mxu2  ;;  %1987 = vtanh.f32 %v1419_v62  ;;  %v1062_v22 = vadd.f32 %v1006_v33, %v901_v31  ;;  %v1169_v5 = vpop.f32.mrf.mxu1 }
 0x1e8   : > { %v1223_v34 = vadd.f32 %v1167_v3, %v1062_v22 }
 0x1ea   : > { %v1384_v39 = vadd.f32 %v1328_v35, %v1223_v34 }
 0x1eb   : > { %v847_v42 = vpop.f32.mrf.mxu3 }
 0x1ec   : > { %v1988_v40 = vpop.eup %1987  ;;  %v1420_v11 = vadd.f32 %v2482_v13, %v1384_v39  ;;  %v902_v51 = vadd.f32 %v847_v42, %v2414_v17 }
 0x1ed   : > { %1483 = vst [vmem:[%s2498_s30 + $0x78] sm:$0xff] %v1988_v40  ;;  %v1011_v46 = vpop.f32.mrf.mxu0 }
 0x1ee   : > { %v1330_v23 = vpop.f32.mrf.mxu2  ;;  %1989 = vtanh.f32 %v1420_v11  ;;  %v1063_v30 = vadd.f32 %v1008_v53, %v902_v51  ;;  %v1172_v61 = vpop.f32.mrf.mxu1 }
 0x1f0   : > { %v1224_v56 = vadd.f32 %v1169_v5, %v1063_v30 }
 0x1f2   : > { %v1385_v32 = vadd.f32 %v1330_v23, %v1224_v56 }
 0x1f3   : > { %v850_v58 = vpop.f32.mrf.mxu3 }
 0x1f4   : > { %v1990_v6 = vpop.eup %1989  ;;  %v1421_v41 = vadd.f32 %v2482_v13, %v1385_v32  ;;  %v903_v54 = vadd.f32 %v850_v58, %v2427_v45 }
 0x1f5   : > { %1484 = vst [vmem:[%s2498_s30 + $0x80] sm:$0xff] %v1990_v6  ;;  %v1013_v15 = vpop.f32.mrf.mxu0 }
 0x1f6   : > { %v1333_v63 = vpop.f32.mrf.mxu2  ;;  %1991 = vtanh.f32 %v1421_v41  ;;  %v1064_v17 = vadd.f32 %v1011_v46, %v903_v54  ;;  %v1174_v4 = vpop.f32.mrf.mxu1 }
 0x1f8   : > { %v1225_v1 = vadd.f32 %v1172_v61, %v1064_v17 }
 0x1fa   : > { %v1386_v18 = vadd.f32 %v1333_v63, %v1225_v1 }
 0x1fb   : > { %v852_v52 = vpop.f32.mrf.mxu3 }
 0x1fc   : > { %v1992_v36 = vpop.eup %1991  ;;  %v1422_v37 = vadd.f32 %v2482_v13, %v1386_v18  ;;  %v904_v20 = vadd.f32 %v852_v52, %v2432_v10 }
 0x1fd   : > { %1485 = vst [vmem:[%s2498_s30 + $0x88] sm:$0xff] %v1992_v36  ;;  %v1016_v55 = vpop.f32.mrf.mxu0 }
 0x1fe   : > { %v1335_v7 = vpop.f32.mrf.mxu2  ;;  %1993 = vtanh.f32 %v1422_v37  ;;  %v1065_v45 = vadd.f32 %v1013_v15, %v904_v20  ;;  %v1177_v44 = vpop.f32.mrf.mxu1 }
 0x200   : > { %v1226_v14 = vadd.f32 %v1174_v4, %v1065_v45 }
 0x202   : > { %v1387_v8 = vadd.f32 %v1335_v7, %v1226_v14 }
 0x203   : > { %v855_v38 = vpop.f32.mrf.mxu3 }
 0x204   : > { %v1994_v19 = vpop.eup %1993  ;;  %v1423_v16 = vadd.f32 %v2482_v13, %v1387_v8  ;;  %v905_v9 = vadd.f32 %v855_v38, %v2445_v21 }
 0x205   : > { %1486 = vst [vmem:[%s2498_s30 + $0x90] sm:$0xff] %v1994_v19  ;;  %v1018_v33 = vpop.f32.mrf.mxu0 }
 0x206   : > { %v1338_v25 = vpop.f32.mrf.mxu2  ;;  %1995 = vtanh.f32 %v1423_v16  ;;  %v1066_v10 = vadd.f32 %v1016_v55, %v905_v9  ;;  %v1179_v12 = vpop.f32.mrf.mxu1 }
 0x208   : > { %v1227_v3 = vadd.f32 %v1177_v44, %v1066_v10 }
 0x20a   : > { %v1388_v24 = vadd.f32 %v1338_v25, %v1227_v3 }
 0x20b   : > { %v857_v27 = vpop.f32.mrf.mxu3 }
 0x20c   : > { %v1996_v26 = vpop.eup %1995  ;;  %v1424_v57 = vadd.f32 %v2482_v13, %v1388_v24  ;;  %v906_v62 = vadd.f32 %v857_v27, %v2450_v43 }
 0x20d   : > { %1487 = vst [vmem:[%s2498_s30 + $0x98] sm:$0xff] %v1996_v26  ;;  %v1021_v35 = vpop.f32.mrf.mxu0 }
 0x20e   : > { %v1340_v31 = vpop.f32.mrf.mxu2  ;;  %1997 = vtanh.f32 %v1424_v57  ;;  %v1067_v21 = vadd.f32 %v1018_v33, %v906_v62  ;;  %v1182_v53 = vpop.f32.mrf.mxu1 }
 0x210   : > { %v1228_v22 = vadd.f32 %v1179_v12, %v1067_v21 }
 0x212   : > { %v1389_v5 = vadd.f32 %v1340_v31, %v1228_v22 }
 0x213   : > { %v860_v34 = vpop.f32.mrf.mxu3 }
 0x214   : > { %v1998_v39 = vpop.eup %1997  ;;  %v1425_v42 = vadd.f32 %v2482_v13, %v1389_v5  ;;  %v907_v40 = vadd.f32 %v860_v34, %v2463_v50 }
 0x215   : > { %1488 = vst [vmem:[%s2498_s30 + $0xa0] sm:$0xff] %v1998_v39  ;;  %v1023_v51 = vpop.f32.mrf.mxu0 }
 0x216   : > { %v1343_v11 = vpop.f32.mrf.mxu2  ;;  %1999 = vtanh.f32 %v1425_v42  ;;  %v1068_v43 = vadd.f32 %v1021_v35, %v907_v40  ;;  %v1184_v23 = vpop.f32.mrf.mxu1 }
 0x218   : > { %v1229_v46 = vadd.f32 %v1182_v53, %v1068_v43 }
 0x21a   : > { %v1390_v30 = vadd.f32 %v1343_v11, %v1229_v46 }
 0x21b   : > { %v862_v61 = vpop.f32.mrf.mxu3 }
 0x21c   : > { %v2000_v56 = vpop.eup %1999  ;;  %v1426_v32 = vadd.f32 %v2482_v13, %v1390_v30  ;;  %v908_v58 = vadd.f32 %v862_v61, %v2468_v2 }
 0x21d   : > { %1489 = vst [vmem:[%s2498_s30 + $0xa8] sm:$0xff] %v2000_v56  ;;  %v1026_v41 = vpop.f32.mrf.mxu0 }
 0x21e   : > { %v1345_v6 = vpop.f32.mrf.mxu2  ;;  %2001 = vtanh.f32 %v1426_v32  ;;  %v1069_v50 = vadd.f32 %v1023_v51, %v908_v58  ;;  %v1187_v54 = vpop.f32.mrf.mxu1 }
 0x220   : > { %v1230_v63 = vadd.f32 %v1184_v23, %v1069_v50 }
 0x222   : > { %v1391_v15 = vadd.f32 %v1345_v6, %v1230_v63 }
 0x223   : > { %v865_v17 = vpop.f32.mrf.mxu3 }
 0x224   : > { %v2002_v4 = vpop.eup %2001  ;;  %v1427_v1 = vadd.f32 %v2482_v13, %v1391_v15  ;;  %v909_v18 = vadd.f32 %v865_v17, %v2407_v28 }
 0x225   : > { %1490 = vst [vmem:[%s2498_s30 + $0xb0] sm:$0xff] %v2002_v4  ;;  %v1028_v36 = vpop.f32.mrf.mxu0 }
 0x226   : > { %v1348_v52 = vpop.f32.mrf.mxu2  ;;  %2003 = vtanh.f32 %v1427_v1  ;;  %v1070_v2 = vadd.f32 %v1026_v41, %v909_v18  ;;  %v1189_v37 = vpop.f32.mrf.mxu1 }
 0x228   : > { %v1231_v20 = vadd.f32 %v1187_v54, %v1070_v2 }
 0x22a   : > { %v1392_v7 = vadd.f32 %v1348_v52, %v1231_v20 }
 0x22b   : > { %v867_v55 = vpop.f32.mrf.mxu3 }
 0x22c   : > { %v2004_v45 = vpop.eup %2003  ;;  %v1428_v44 = vadd.f32 %v2482_v13, %v1392_v7  ;;  %v910_v14 = vadd.f32 %v867_v55, %v2412_v49 }
 0x22d   : > { %1491 = vst [vmem:[%s2498_s30 + $0xb8] sm:$0xff] %v2004_v45  ;;  %v1031_v38 = vpop.f32.mrf.mxu0 }
 0x22e   : > { %v1350_v8 = vpop.f32.mrf.mxu2  ;;  %2005 = vtanh.f32 %v1428_v44  ;;  %v1071_v28 = vadd.f32 %v1028_v36, %v910_v14  ;;  %v1192_v19 = vpop.f32.mrf.mxu1 }
 0x230   : > { %v1232_v16 = vadd.f32 %v1189_v37, %v1071_v28 }
 0x232   : > { %v1393_v9 = vadd.f32 %v1350_v8, %v1232_v16 }
 0x233   : > { %v870_v25 = vpop.f32.mrf.mxu3 }
 0x234   : > { %v2006_v33 = vpop.eup %2005  ;;  %v1429_v10 = vadd.f32 %v2482_v13, %v1393_v9  ;;  %v911_v12 = vadd.f32 %v870_v25, %v2425_v59 }
 0x235   : > { %1492 = vst [vmem:[%s2498_s30 + $0xc0] sm:$0xff] %v2006_v33  ;;  %v1033_v24 = vpop.f32.mrf.mxu0 }
 0x236   : > { %v1353_v3 = vpop.f32.mrf.mxu2  ;;  %2007 = vtanh.f32 %v1429_v10  ;;  %v1072_v49 = vadd.f32 %v1031_v38, %v911_v12  ;;  %v1194_v27 = vpop.f32.mrf.mxu1 }
 0x238   : > { %v1233_v26 = vadd.f32 %v1192_v19, %v1072_v49 }
 0x23a   : > { %v1394_v57 = vadd.f32 %v1353_v3, %v1233_v26 }
 0x23b   : > { %v872_v62 = vpop.f32.mrf.mxu3 }
 0x23c   : > { %v2008_v31 = vpop.eup %2007  ;;  %v1430_v35 = vadd.f32 %v2482_v13, %v1394_v57  ;;  %v912_v21 = vadd.f32 %v872_v62, %v2430_v29 }
 0x23d   : > { %1493 = vst [vmem:[%s2498_s30 + $0xc8] sm:$0xff] %v2008_v31  ;;  %v1036_v59 = vpop.f32.mrf.mxu0 }
 0x23e   : > { %v1355_v53 = vpop.f32.mrf.mxu2  ;;  %2009 = vtanh.f32 %v1430_v35  ;;  %v1073_v22 = vadd.f32 %v1033_v24, %v912_v21  ;;  %v1197_v34 = vpop.f32.mrf.mxu1 }
 0x240   : > { %v1234_v5 = vadd.f32 %v1194_v27, %v1073_v22 }
 0x242   : > { %v1395_v39 = vadd.f32 %v1355_v53, %v1234_v5 }
 0x243   : > { %v875_v42 = vpop.f32.mrf.mxu3 }
 0x244   : > { %v2010_v40 = vpop.eup %2009  ;;  %v1431_v11 = vadd.f32 %v2482_v13, %v1395_v39  ;;  %v913_v51 = vadd.f32 %v875_v42, %v2443_v47 }
 0x245   : > { %1494 = vst [vmem:[%s2498_s30 + $0xd0] sm:$0xff] %v2010_v40  ;;  %v1038_v46 = vpop.f32.mrf.mxu0 }
 0x246   : > { %v1358_v43 = vpop.f32.mrf.mxu2  ;;  %2011 = vtanh.f32 %v1431_v11  ;;  %v1074_v23 = vadd.f32 %v1036_v59, %v913_v51  ;;  %v1199_v61 = vpop.f32.mrf.mxu1 }
 0x248   : > { %v1235_v29 = vadd.f32 %v1197_v34, %v1074_v23 }
 0x24a   : > { %v1396_v30 = vadd.f32 %v1358_v43, %v1235_v29 }
 0x24b   : > { %v877_v56 = vpop.f32.mrf.mxu3 }
 0x24c   : > { %v2012_v32 = vpop.eup %2011  ;;  %v1432_v58 = vadd.f32 %v2482_v13, %v1396_v30  ;;  %v914_v6 = vadd.f32 %v877_v56, %v2448_v60 }
 0x24d   : > { %1495 = vst [vmem:[%s2498_s30 + $0xd8] sm:$0xff] %v2012_v32  ;;  %v1041_v63 = vpop.f32.mrf.mxu0 }
 0x24e   : > { %v1360_v41 = vpop.f32.mrf.mxu2  ;;  %2013 = vtanh.f32 %v1432_v58  ;;  %v1075_v50 = vadd.f32 %v1038_v46, %v914_v6  ;;  %v1202_v18 = vpop.f32.mrf.mxu1 }
 0x250   : > { %v1236_v47 = vadd.f32 %v1199_v61, %v1075_v50 }
 0x252   : > { %v1397_v54 = vadd.f32 %v1360_v41, %v1236_v47 }
 0x253   : > { %v880_v15 = vpop.f32.mrf.mxu3 }
 0x254   : > { %v2014_v17 = vpop.eup %2013  ;;  %v1433_v4 = vadd.f32 %v2482_v13, %v1397_v54  ;;  %v915_v1 = vadd.f32 %v880_v15, %v2461_v48 }
 0x255   : > { %1496 = vst [vmem:[%s2498_s30 + $0xe0] sm:$0xff] %v2014_v17  ;;  %v1043_v45 = vpop.f32.mrf.mxu0 }
 0x256   : > { %2015 = vtanh.f32 %v1433_v4  ;;  %v1076_v52 = vadd.f32 %v1041_v63, %v915_v1  ;;  %v1363_v36 = vpop.f32.mrf.mxu2  ;;  %v1204_v48 = vpop.f32.mrf.mxu1 }
 0x258   : > { %v1237_v60 = vadd.f32 %v1202_v18, %v1076_v52 }
 0x25a   : > { %v1398_v2 = vadd.f32 %v1363_v36, %v1237_v60 }
 0x25b   : > { %v882_v37 = vpop.f32.mrf.mxu3 }
 0x25c   : > { %v2016_v20 = vpop.eup %2015  ;;  %v1434_v7 = vadd.f32 %v2482_v13, %v1398_v2  ;;  %v916_v55 = vadd.f32 %v882_v37, %v2466_v0 }
 0x25d   : > { %1497 = vst [vmem:[%s2498_s30 + $0xe8] sm:$0xff] %v2016_v20 }
 0x25e   : > { %2017 = vtanh.f32 %v1434_v7  ;;  %v1077_v44 = vadd.f32 %v1043_v45, %v916_v55  ;;  %v1365_v8 = vpop.f32.mrf.mxu2 }
 0x260   : > { %v1238_v14 = vadd.f32 %v1204_v48, %v1077_v44 }
 0x262   : > { %v1399_v38 = vadd.f32 %v1365_v8, %v1238_v14 }
 0x264   : > { %v2018_v28 = vpop.eup %2017  ;;  %v1435_v19 = vadd.f32 %v2482_v13, %v1399_v38 }
 0x265   : > { %1498 = vst [vmem:[%s2498_s30 + $0xf0] sm:$0xff] %v2018_v28 }
 0x266   : > { %2019 = vtanh.f32 %v1435_v19 }
 0x26c   : > { %v2020_v16 = vpop.eup %2019 }
 0x26d   : > { %1499 = vst [vmem:[%s2498_s30 + $0xf8] sm:$0xff] %v2020_v16 }
 0x26e PF: > { %s13_s12 = sadd.s32 1, %s2027_s12  }
 0x26f   : > { %p10_p4 = scmp.ge.s32.totalorder %s13_s12, 4  }
 0x271   :  { %12 = sbr.rel (!%p10_p4) target bundleno = 1 (0x1), region = 68 }

</bundles_post_ra>
